<compile_context>
chip_gen: v7x
topology: tpu7x:2x2x1
jax: 0.10.0
libtpu: 0.0.40
codegen_flags: <defaults>
</compile_context>

<pallas_src>
import jax
import jax.numpy as jnp
from jax.experimental import pallas as pl
from jax.experimental.pallas import tpu as pltpu


# --------------------------------------------------------------------------- #
# Kernel 1: depthwise conv (k x k, padding k//2) with BatchNorm folded in.
# Refs: xpad (Hp, Wp, C), w (K, K, C), b (1, C)  ->  out (H, W, C)
# --------------------------------------------------------------------------- #
def _dwconv_bn_kernel(xpad_ref, w_ref, b_ref, o_ref):
    H, W, C = o_ref.shape
    K = w_ref.shape[0]
    acc = jnp.zeros((H, W, C), jnp.float32)
    # Unrolled taps: each tap is a shifted (H, W, C) window times a per-channel
    # weight vector -> pure VPU multiply-add chain, channels on the lane axis.
    for kh in range(K):
        for kw in range(K):
            win = xpad_ref[kh:kh + H, kw:kw + W, :].astype(jnp.float32)
            wv = w_ref[kh, kw:kw + 1, :].astype(jnp.float32)          # (1, C)
            acc = acc + win * wv
    acc = acc + b_ref[...].astype(jnp.float32)                         # (1, C) bcast
    o_ref[...] = acc.astype(o_ref.dtype)


# --------------------------------------------------------------------------- #
# Kernel 2: channel MLP (Linear -> Hardswish -> Linear) + gamma scale + residual.
# Refs: t (R, C), x (R, C), w1 (C, CE), b1 (1, CE), w2 (CE, C), b2 (1, C),
#       gamma (1, C)  ->  out (R, C)
# --------------------------------------------------------------------------- #
def _mlp_residual_kernel(t_ref, x_ref, w1_ref, b1_ref, w2_ref, b2_ref, g_ref, o_ref):
    t = t_ref[...].astype(jnp.float32)
    h = jnp.dot(t, w1_ref[...].astype(jnp.float32),
                preferred_element_type=jnp.float32) + b1_ref[...].astype(jnp.float32)
    # Hardswish: x * relu6(x + 3) / 6
    h = h * jnp.clip(h + 3.0, 0.0, 6.0) * (1.0 / 6.0)
    y = jnp.dot(h, w2_ref[...].astype(jnp.float32),
                preferred_element_type=jnp.float32) + b2_ref[...].astype(jnp.float32)
    out = x_ref[...].astype(jnp.float32) + g_ref[...].astype(jnp.float32) * y
    o_ref[...] = out.astype(o_ref.dtype)


def _pick_row_block(rows: int, max_block: int = 1024) -> int:
    """Largest sublane-aligned divisor of `rows` that keeps >= 2 grid steps.

    max_block ~ 1024 rows keeps per-step VMEM (inputs + 4x expanded hidden +
    output, double-buffered) comfortably inside v7x's 64 MiB / default scoped
    limits for realistic channel counts; raise it (and vmem_limit_bytes) on
    v5e/v6e if desired.
    """
    upper = min(max_block, max(8, rows // 2))
    start = upper - (upper % 8)
    for cand in range(start, 7, -8):
        if rows % cand == 0:
            return cand
    return rows  # fallback: single block (always correct)


def decoder_block_forward(x: jax.Array, params: dict, *, eps: float = 1e-5,
                          max_row_block: int = 1024) -> jax.Array:
    """x: (N, C, H, W) with in_dim == hidden_dim == out_dim == C."""
    N, C, H, W = x.shape
    K = params["w_dw"].shape[-1]
    P = K // 2
    CE = params["w1"].shape[1]

    # ---- fold BatchNorm (eval mode) into the depthwise conv (wrapper-side) ----
    s = params["bn_w"] / jnp.sqrt(params["bn_var"] + eps)                   # (C,)
    w_eff = jnp.transpose(params["w_dw"][:, 0, :, :], (1, 2, 0)) * s        # (K, K, C)
    b_eff = ((params["b_dw"] - params["bn_mean"]) * s + params["bn_b"]).reshape(1, C)

    gamma = params["gamma"] if params["gamma"] is not None else jnp.ones((C,), jnp.float32)
    gamma = gamma.reshape(1, C)
    b1 = params["b1"].reshape(1, CE)
    b2 = params["b2"].reshape(1, C)

    # ---- layout plumbing: NCHW -> NHWC, zero-pad the halo once ----
    x_nhwc = jnp.transpose(x, (0, 2, 3, 1))                                  # (N, H, W, C)
    x_pad = jnp.pad(x_nhwc, ((0, 0), (P, P), (P, P), (0, 0)))
    Hp, Wp = H + 2 * P, W + 2 * P

    # ---- kernel 1: depthwise conv + BN, one image per (parallel) grid step ----
    t_nhwc = pl.pallas_call(
        _dwconv_bn_kernel,
        out_shape=jax.ShapeDtypeStruct((N, H, W, C), jnp.float32),
        grid=(N,),
        in_specs=[
            pl.BlockSpec((None, Hp, Wp, C), lambda n: (n, 0, 0, 0)),
            pl.BlockSpec((K, K, C), lambda n: (0, 0, 0)),   # resident weights
            pl.BlockSpec((1, C), lambda n: (0, 0)),          # resident bias
        ],
        out_specs=pl.BlockSpec((None, H, W, C), lambda n: (n, 0, 0, 0)),
        compiler_params=pltpu.CompilerParams(dimension_semantics=("parallel",)),
    )(x_pad, w_eff, b_eff)

    # ---- kernel 2: fused MLP + gamma + residual over large row tiles ----
    rows = N * H * W
    t2 = t_nhwc.reshape(rows, C)      # contiguous NHWC flatten (free)
    x2 = x_nhwc.reshape(rows, C)
    r_blk = _pick_row_block(rows, max_row_block)
    grid_r = rows // r_blk

    out2 = pl.pallas_call(
        _mlp_residual_kernel,
        out_shape=jax.ShapeDtypeStruct((rows, C), x.dtype),
        grid=(grid_r,),
        in_specs=[
            pl.BlockSpec((r_blk, C), lambda i: (i, 0)),
            pl.BlockSpec((r_blk, C), lambda i: (i, 0)),
            pl.BlockSpec((C, CE), lambda i: (0, 0)),
            pl.BlockSpec((1, CE), lambda i: (0, 0)),
            pl.BlockSpec((CE, C), lambda i: (0, 0)),
            pl.BlockSpec((1, C), lambda i: (0, 0)),
            pl.BlockSpec((1, C), lambda i: (0, 0)),
        ],
        out_specs=pl.BlockSpec((r_blk, C), lambda i: (i, 0)),
        compiler_params=pltpu.CompilerParams(dimension_semantics=("parallel",)),
    )(t2, x2, params["w1"], b1, params["w2"], b2, gamma)

    return jnp.transpose(out2.reshape(N, H, W, C), (0, 3, 1, 2))


# --------------------------------------------------------------------------- #
# Deterministic parameter init (mirrors the PyTorch module's parameter set).
# Linear weights are stored as (in_features, out_features) so y = x @ W + b.
# --------------------------------------------------------------------------- #
def init_decoder_block_params(key, in_dim: int, *, expan_ratio: int = 4,
                              kernel_size: int = 7, scale_init: float = 1e-6):
    C = in_dim
    ks = jax.random.split(key, 10)
    p = {
        "w_dw": 0.1 * jax.random.normal(ks[0], (C, 1, kernel_size, kernel_size), jnp.float32),
        "b_dw": 0.1 * jax.random.normal(ks[1], (C,), jnp.float32),
        "bn_w": 1.0 + 0.1 * jax.random.normal(ks[2], (C,), jnp.float32),
        "bn_b": 0.1 * jax.random.normal(ks[3], (C,), jnp.float32),
        "bn_mean": 0.1 * jax.random.normal(ks[4], (C,), jnp.float32),
        "bn_var": jnp.abs(1.0 + 0.1 * jax.random.normal(ks[5], (C,), jnp.float32)),
        "w1": 0.1 * jax.random.normal(ks[6], (C, C * expan_ratio), jnp.float32),
        "b1": 0.1 * jax.random.normal(ks[7], (C * expan_ratio,), jnp.float32),
        "w2": 0.1 * jax.random.normal(ks[8], (C * expan_ratio, C), jnp.float32),
        "b2": 0.1 * jax.random.normal(ks[9], (C,), jnp.float32),
        "gamma": scale_init * jnp.ones((C,), jnp.float32) if scale_init > 0 else None,
    }
    return p


# Pure-JAX reference (mirrors the PyTorch forward, eval mode).
def ref_decoder_block(x, p, eps: float = 1e-5):
    N, C, H, W = x.shape
    K = p["w_dw"].shape[-1]
    P = K // 2
    y = jax.lax.conv_general_dilated(
        x, p["w_dw"], window_strides=(1, 1), padding=((P, P), (P, P)),
        dimension_numbers=("NCHW", "OIHW", "NCHW"), feature_group_count=C)
    y = y + p["b_dw"].reshape(1, C, 1, 1)
    inv = 1.0 / jnp.sqrt(p["bn_var"] + eps)
    y = (y - p["bn_mean"].reshape(1, C, 1, 1)) * (p["bn_w"] * inv).reshape(1, C, 1, 1) \
        + p["bn_b"].reshape(1, C, 1, 1)
    t = jnp.transpose(y, (0, 2, 3, 1))                       # NHWC
    h = t @ p["w1"] + p["b1"]
    h = h * jnp.clip(h + 3.0, 0.0, 6.0) / 6.0                # Hardswish
    m = h @ p["w2"] + p["b2"]
    if p["gamma"] is not None:
        m = p["gamma"] * m
    return x + jnp.transpose(m, (0, 3, 1, 2))


if __name__ == "__main__":
    key = jax.random.PRNGKey(0)
    kx, kp = jax.random.split(key)

    N, C, H, W = 2, 4, 16, 16          # in_dim = hidden_dim = out_dim = 4
    x = jax.random.normal(kx, (N, C, H, W), dtype=jnp.float32)
    # scale_init=0.5 (instead of 1e-6) so the conv+MLP branch contributes
    # non-trivially and the numerical check is meaningful.
    params = init_decoder_block_params(kp, C, expan_ratio=4, kernel_size=7,
                                       scale_init=0.5)

    out = jax.block_until_ready(decoder_block_forward(x, params))
    ref = jax.block_until_ready(ref_decoder_block(x, params))

    assert out.shape == (N, C, H, W)
    max_err = float(jnp.max(jnp.abs(out - ref)))
    assert jnp.allclose(out, ref, atol=2e-3, rtol=2e-3), f"max abs err {max_err}"

    print("KERNEL_OK")
</pallas_src>

<mosaic_0001>
module attributes {stable_mosaic.version = 11 : i64} {
  func.func @_dwconv_bn_kernel(%arg0: i32, %arg1: memref<1x22x22x4xf32, #tpu.memory_space<vmem>>, %arg2: memref<7x7x4xf32, #tpu.memory_space<vmem>>, %arg3: memref<1x4xf32, #tpu.memory_space<vmem>>, %arg4: memref<1x16x16x4xf32, #tpu.memory_space<vmem>>) attributes {dimension_semantics = [#tpu.dimension_semantics<parallel>], iteration_bounds = array<i64: 2>, scalar_prefetch = 0 : i64, scratch_operands = 0 : i64, tpu.core_type = #tpu.core_type<tc>, window_params = [{transform_indices = @transform_0, window_bounds = array<i64: 1, 22, 22, 4>}, {pipeline_mode = #tpu.pipeline_mode<synchronous>, transform_indices = @transform_1, window_bounds = array<i64: 7, 7, 4>}, {pipeline_mode = #tpu.pipeline_mode<synchronous>, transform_indices = @transform_2, window_bounds = array<i64: 1, 4>}, {transform_indices = @transform_3, window_bounds = array<i64: 1, 16, 16, 4>}]} {
    %cst = arith.constant 0.000000e+00 : f32
    %0 = vector.broadcast %cst : f32 to vector<16x16x4xf32>
    %c0 = arith.constant 0 : index
    %c0_0 = arith.constant 0 : index
    %c0_1 = arith.constant 0 : index
    %c0_2 = arith.constant 0 : index
    %1 = vector.load %arg1[%c0, %c0_0, %c0_1, %c0_2] : memref<1x22x22x4xf32, #tpu.memory_space<vmem>>, vector<1x16x16x4xf32>
    %2 = vector.shape_cast %1 : vector<1x16x16x4xf32> to vector<16x16x4xf32>
    %c0_3 = arith.constant 0 : index
    %c0_4 = arith.constant 0 : index
    %c0_5 = arith.constant 0 : index
    %3 = vector.load %arg2[%c0_3, %c0_4, %c0_5] : memref<7x7x4xf32, #tpu.memory_space<vmem>>, vector<1x1x4xf32>
    %4 = vector.shape_cast %3 : vector<1x1x4xf32> to vector<1x4xf32>
    %5 = vector.shape_cast %4 : vector<1x4xf32> to vector<1x1x4xf32>
    %6 = vector.broadcast %5 : vector<1x1x4xf32> to vector<16x16x4xf32>
    %7 = arith.mulf %2, %6 : vector<16x16x4xf32>
    %8 = arith.addf %0, %7 : vector<16x16x4xf32>
    %c0_6 = arith.constant 0 : index
    %c0_7 = arith.constant 0 : index
    %c1 = arith.constant 1 : index
    %c0_8 = arith.constant 0 : index
    %9 = vector.load %arg1[%c0_6, %c0_7, %c1, %c0_8] : memref<1x22x22x4xf32, #tpu.memory_space<vmem>>, vector<1x16x16x4xf32>
    %10 = vector.shape_cast %9 : vector<1x16x16x4xf32> to vector<16x16x4xf32>
    %c0_9 = arith.constant 0 : index
    %c1_10 = arith.constant 1 : index
    %c0_11 = arith.constant 0 : index
    %11 = vector.load %arg2[%c0_9, %c1_10, %c0_11] : memref<7x7x4xf32, #tpu.memory_space<vmem>>, vector<1x1x4xf32>
    %12 = vector.shape_cast %11 : vector<1x1x4xf32> to vector<1x4xf32>
    %13 = vector.shape_cast %12 : vector<1x4xf32> to vector<1x1x4xf32>
    %14 = vector.broadcast %13 : vector<1x1x4xf32> to vector<16x16x4xf32>
    %15 = arith.mulf %10, %14 : vector<16x16x4xf32>
    %16 = arith.addf %8, %15 : vector<16x16x4xf32>
    %c0_12 = arith.constant 0 : index
    %c0_13 = arith.constant 0 : index
    %c2 = arith.constant 2 : index
    %c0_14 = arith.constant 0 : index
    %17 = vector.load %arg1[%c0_12, %c0_13, %c2, %c0_14] : memref<1x22x22x4xf32, #tpu.memory_space<vmem>>, vector<1x16x16x4xf32>
    %18 = vector.shape_cast %17 : vector<1x16x16x4xf32> to vector<16x16x4xf32>
    %c0_15 = arith.constant 0 : index
    %c2_16 = arith.constant 2 : index
    %c0_17 = arith.constant 0 : index
    %19 = vector.load %arg2[%c0_15, %c2_16, %c0_17] : memref<7x7x4xf32, #tpu.memory_space<vmem>>, vector<1x1x4xf32>
    %20 = vector.shape_cast %19 : vector<1x1x4xf32> to vector<1x4xf32>
    %21 = vector.shape_cast %20 : vector<1x4xf32> to vector<1x1x4xf32>
    %22 = vector.broadcast %21 : vector<1x1x4xf32> to vector<16x16x4xf32>
    %23 = arith.mulf %18, %22 : vector<16x16x4xf32>
    %24 = arith.addf %16, %23 : vector<16x16x4xf32>
    %c0_18 = arith.constant 0 : index
    %c0_19 = arith.constant 0 : index
    %c3 = arith.constant 3 : index
    %c0_20 = arith.constant 0 : index
    %25 = vector.load %arg1[%c0_18, %c0_19, %c3, %c0_20] : memref<1x22x22x4xf32, #tpu.memory_space<vmem>>, vector<1x16x16x4xf32>
    %26 = vector.shape_cast %25 : vector<1x16x16x4xf32> to vector<16x16x4xf32>
    %c0_21 = arith.constant 0 : index
    %c3_22 = arith.constant 3 : index
    %c0_23 = arith.constant 0 : index
    %27 = vector.load %arg2[%c0_21, %c3_22, %c0_23] : memref<7x7x4xf32, #tpu.memory_space<vmem>>, vector<1x1x4xf32>
    %28 = vector.shape_cast %27 : vector<1x1x4xf32> to vector<1x4xf32>
    %29 = vector.shape_cast %28 : vector<1x4xf32> to vector<1x1x4xf32>
    %30 = vector.broadcast %29 : vector<1x1x4xf32> to vector<16x16x4xf32>
    %31 = arith.mulf %26, %30 : vector<16x16x4xf32>
    %32 = arith.addf %24, %31 : vector<16x16x4xf32>
    %c0_24 = arith.constant 0 : index
    %c0_25 = arith.constant 0 : index
    %c4 = arith.constant 4 : index
    %c0_26 = arith.constant 0 : index
    %33 = vector.load %arg1[%c0_24, %c0_25, %c4, %c0_26] : memref<1x22x22x4xf32, #tpu.memory_space<vmem>>, vector<1x16x16x4xf32>
    %34 = vector.shape_cast %33 : vector<1x16x16x4xf32> to vector<16x16x4xf32>
    %c0_27 = arith.constant 0 : index
    %c4_28 = arith.constant 4 : index
    %c0_29 = arith.constant 0 : index
    %35 = vector.load %arg2[%c0_27, %c4_28, %c0_29] : memref<7x7x4xf32, #tpu.memory_space<vmem>>, vector<1x1x4xf32>
    %36 = vector.shape_cast %35 : vector<1x1x4xf32> to vector<1x4xf32>
    %37 = vector.shape_cast %36 : vector<1x4xf32> to vector<1x1x4xf32>
    %38 = vector.broadcast %37 : vector<1x1x4xf32> to vector<16x16x4xf32>
    %39 = arith.mulf %34, %38 : vector<16x16x4xf32>
    %40 = arith.addf %32, %39 : vector<16x16x4xf32>
    %c0_30 = arith.constant 0 : index
    %c0_31 = arith.constant 0 : index
    %c5 = arith.constant 5 : index
    %c0_32 = arith.constant 0 : index
    %41 = vector.load %arg1[%c0_30, %c0_31, %c5, %c0_32] : memref<1x22x22x4xf32, #tpu.memory_space<vmem>>, vector<1x16x16x4xf32>
    %42 = vector.shape_cast %41 : vector<1x16x16x4xf32> to vector<16x16x4xf32>
    %c0_33 = arith.constant 0 : index
    %c5_34 = arith.constant 5 : index
    %c0_35 = arith.constant 0 : index
    %43 = vector.load %arg2[%c0_33, %c5_34, %c0_35] : memref<7x7x4xf32, #tpu.memory_space<vmem>>, vector<1x1x4xf32>
    %44 = vector.shape_cast %43 : vector<1x1x4xf32> to vector<1x4xf32>
    %45 = vector.shape_cast %44 : vector<1x4xf32> to vector<1x1x4xf32>
    %46 = vector.broadcast %45 : vector<1x1x4xf32> to vector<16x16x4xf32>
    %47 = arith.mulf %42, %46 : vector<16x16x4xf32>
    %48 = arith.addf %40, %47 : vector<16x16x4xf32>
    %c0_36 = arith.constant 0 : index
    %c0_37 = arith.constant 0 : index
    %c6 = arith.constant 6 : index
    %c0_38 = arith.constant 0 : index
    %49 = vector.load %arg1[%c0_36, %c0_37, %c6, %c0_38] : memref<1x22x22x4xf32, #tpu.memory_space<vmem>>, vector<1x16x16x4xf32>
    %50 = vector.shape_cast %49 : vector<1x16x16x4xf32> to vector<16x16x4xf32>
    %c0_39 = arith.constant 0 : index
    %c6_40 = arith.constant 6 : index
    %c0_41 = arith.constant 0 : index
    %51 = vector.load %arg2[%c0_39, %c6_40, %c0_41] : memref<7x7x4xf32, #tpu.memory_space<vmem>>, vector<1x1x4xf32>
    %52 = vector.shape_cast %51 : vector<1x1x4xf32> to vector<1x4xf32>
    %53 = vector.shape_cast %52 : vector<1x4xf32> to vector<1x1x4xf32>
    %54 = vector.broadcast %53 : vector<1x1x4xf32> to vector<16x16x4xf32>
    %55 = arith.mulf %50, %54 : vector<16x16x4xf32>
    %56 = arith.addf %48, %55 : vector<16x16x4xf32>
    %c0_42 = arith.constant 0 : index
    %c1_43 = arith.constant 1 : index
    %c0_44 = arith.constant 0 : index
    %c0_45 = arith.constant 0 : index
    %57 = vector.load %arg1[%c0_42, %c1_43, %c0_44, %c0_45] : memref<1x22x22x4xf32, #tpu.memory_space<vmem>>, vector<1x16x16x4xf32>
    %58 = vector.shape_cast %57 : vector<1x16x16x4xf32> to vector<16x16x4xf32>
    %c1_46 = arith.constant 1 : index
    %c0_47 = arith.constant 0 : index
    %c0_48 = arith.constant 0 : index
    %59 = vector.load %arg2[%c1_46, %c0_47, %c0_48] : memref<7x7x4xf32, #tpu.memory_space<vmem>>, vector<1x1x4xf32>
    %60 = vector.shape_cast %59 : vector<1x1x4xf32> to vector<1x4xf32>
    %61 = vector.shape_cast %60 : vector<1x4xf32> to vector<1x1x4xf32>
    %62 = vector.broadcast %61 : vector<1x1x4xf32> to vector<16x16x4xf32>
    %63 = arith.mulf %58, %62 : vector<16x16x4xf32>
    %64 = arith.addf %56, %63 : vector<16x16x4xf32>
    %c0_49 = arith.constant 0 : index
    %c1_50 = arith.constant 1 : index
    %c1_51 = arith.constant 1 : index
    %c0_52 = arith.constant 0 : index
    %65 = vector.load %arg1[%c0_49, %c1_50, %c1_51, %c0_52] : memref<1x22x22x4xf32, #tpu.memory_space<vmem>>, vector<1x16x16x4xf32>
    %66 = vector.shape_cast %65 : vector<1x16x16x4xf32> to vector<16x16x4xf32>
    %c1_53 = arith.constant 1 : index
    %c1_54 = arith.constant 1 : index
    %c0_55 = arith.constant 0 : index
    %67 = vector.load %arg2[%c1_53, %c1_54, %c0_55] : memref<7x7x4xf32, #tpu.memory_space<vmem>>, vector<1x1x4xf32>
    %68 = vector.shape_cast %67 : vector<1x1x4xf32> to vector<1x4xf32>
    %69 = vector.shape_cast %68 : vector<1x4xf32> to vector<1x1x4xf32>
    %70 = vector.broadcast %69 : vector<1x1x4xf32> to vector<16x16x4xf32>
    %71 = arith.mulf %66, %70 : vector<16x16x4xf32>
    %72 = arith.addf %64, %71 : vector<16x16x4xf32>
    %c0_56 = arith.constant 0 : index
    %c1_57 = arith.constant 1 : index
    %c2_58 = arith.constant 2 : index
    %c0_59 = arith.constant 0 : index
    %73 = vector.load %arg1[%c0_56, %c1_57, %c2_58, %c0_59] : memref<1x22x22x4xf32, #tpu.memory_space<vmem>>, vector<1x16x16x4xf32>
    %74 = vector.shape_cast %73 : vector<1x16x16x4xf32> to vector<16x16x4xf32>
    %c1_60 = arith.constant 1 : index
    %c2_61 = arith.constant 2 : index
    %c0_62 = arith.constant 0 : index
    %75 = vector.load %arg2[%c1_60, %c2_61, %c0_62] : memref<7x7x4xf32, #tpu.memory_space<vmem>>, vector<1x1x4xf32>
    %76 = vector.shape_cast %75 : vector<1x1x4xf32> to vector<1x4xf32>
    %77 = vector.shape_cast %76 : vector<1x4xf32> to vector<1x1x4xf32>
    %78 = vector.broadcast %77 : vector<1x1x4xf32> to vector<16x16x4xf32>
    %79 = arith.mulf %74, %78 : vector<16x16x4xf32>
    %80 = arith.addf %72, %79 : vector<16x16x4xf32>
    %c0_63 = arith.constant 0 : index
    %c1_64 = arith.constant 1 : index
    %c3_65 = arith.constant 3 : index
    %c0_66 = arith.constant 0 : index
    %81 = vector.load %arg1[%c0_63, %c1_64, %c3_65, %c0_66] : memref<1x22x22x4xf32, #tpu.memory_space<vmem>>, vector<1x16x16x4xf32>
    %82 = vector.shape_cast %81 : vector<1x16x16x4xf32> to vector<16x16x4xf32>
    %c1_67 = arith.constant 1 : index
    %c3_68 = arith.constant 3 : index
    %c0_69 = arith.constant 0 : index
    %83 = vector.load %arg2[%c1_67, %c3_68, %c0_69] : memref<7x7x4xf32, #tpu.memory_space<vmem>>, vector<1x1x4xf32>
    %84 = vector.shape_cast %83 : vector<1x1x4xf32> to vector<1x4xf32>
    %85 = vector.shape_cast %84 : vector<1x4xf32> to vector<1x1x4xf32>
    %86 = vector.broadcast %85 : vector<1x1x4xf32> to vector<16x16x4xf32>
    %87 = arith.mulf %82, %86 : vector<16x16x4xf32>
    %88 = arith.addf %80, %87 : vector<16x16x4xf32>
    %c0_70 = arith.constant 0 : index
    %c1_71 = arith.constant 1 : index
    %c4_72 = arith.constant 4 : index
    %c0_73 = arith.constant 0 : index
    %89 = vector.load %arg1[%c0_70, %c1_71, %c4_72, %c0_73] : memref<1x22x22x4xf32, #tpu.memory_space<vmem>>, vector<1x16x16x4xf32>
    %90 = vector.shape_cast %89 : vector<1x16x16x4xf32> to vector<16x16x4xf32>
    %c1_74 = arith.constant 1 : index
    %c4_75 = arith.constant 4 : index
    %c0_76 = arith.constant 0 : index
    %91 = vector.load %arg2[%c1_74, %c4_75, %c0_76] : memref<7x7x4xf32, #tpu.memory_space<vmem>>, vector<1x1x4xf32>
    %92 = vector.shape_cast %91 : vector<1x1x4xf32> to vector<1x4xf32>
    %93 = vector.shape_cast %92 : vector<1x4xf32> to vector<1x1x4xf32>
    %94 = vector.broadcast %93 : vector<1x1x4xf32> to vector<16x16x4xf32>
    %95 = arith.mulf %90, %94 : vector<16x16x4xf32>
    %96 = arith.addf %88, %95 : vector<16x16x4xf32>
    %c0_77 = arith.constant 0 : index
    %c1_78 = arith.constant 1 : index
    %c5_79 = arith.constant 5 : index
    %c0_80 = arith.constant 0 : index
    %97 = vector.load %arg1[%c0_77, %c1_78, %c5_79, %c0_80] : memref<1x22x22x4xf32, #tpu.memory_space<vmem>>, vector<1x16x16x4xf32>
    %98 = vector.shape_cast %97 : vector<1x16x16x4xf32> to vector<16x16x4xf32>
    %c1_81 = arith.constant 1 : index
    %c5_82 = arith.constant 5 : index
    %c0_83 = arith.constant 0 : index
    %99 = vector.load %arg2[%c1_81, %c5_82, %c0_83] : memref<7x7x4xf32, #tpu.memory_space<vmem>>, vector<1x1x4xf32>
    %100 = vector.shape_cast %99 : vector<1x1x4xf32> to vector<1x4xf32>
    %101 = vector.shape_cast %100 : vector<1x4xf32> to vector<1x1x4xf32>
    %102 = vector.broadcast %101 : vector<1x1x4xf32> to vector<16x16x4xf32>
    %103 = arith.mulf %98, %102 : vector<16x16x4xf32>
    %104 = arith.addf %96, %103 : vector<16x16x4xf32>
    %c0_84 = arith.constant 0 : index
    %c1_85 = arith.constant 1 : index
    %c6_86 = arith.constant 6 : index
    %c0_87 = arith.constant 0 : index
    %105 = vector.load %arg1[%c0_84, %c1_85, %c6_86, %c0_87] : memref<1x22x22x4xf32, #tpu.memory_space<vmem>>, vector<1x16x16x4xf32>
    %106 = vector.shape_cast %105 : vector<1x16x16x4xf32> to vector<16x16x4xf32>
    %c1_88 = arith.constant 1 : index
    %c6_89 = arith.constant 6 : index
    %c0_90 = arith.constant 0 : index
    %107 = vector.load %arg2[%c1_88, %c6_89, %c0_90] : memref<7x7x4xf32, #tpu.memory_space<vmem>>, vector<1x1x4xf32>
    %108 = vector.shape_cast %107 : vector<1x1x4xf32> to vector<1x4xf32>
    %109 = vector.shape_cast %108 : vector<1x4xf32> to vector<1x1x4xf32>
    %110 = vector.broadcast %109 : vector<1x1x4xf32> to vector<16x16x4xf32>
    %111 = arith.mulf %106, %110 : vector<16x16x4xf32>
    %112 = arith.addf %104, %111 : vector<16x16x4xf32>
    %c0_91 = arith.constant 0 : index
    %c2_92 = arith.constant 2 : index
    %c0_93 = arith.constant 0 : index
    %c0_94 = arith.constant 0 : index
    %113 = vector.load %arg1[%c0_91, %c2_92, %c0_93, %c0_94] : memref<1x22x22x4xf32, #tpu.memory_space<vmem>>, vector<1x16x16x4xf32>
    %114 = vector.shape_cast %113 : vector<1x16x16x4xf32> to vector<16x16x4xf32>
    %c2_95 = arith.constant 2 : index
    %c0_96 = arith.constant 0 : index
    %c0_97 = arith.constant 0 : index
    %115 = vector.load %arg2[%c2_95, %c0_96, %c0_97] : memref<7x7x4xf32, #tpu.memory_space<vmem>>, vector<1x1x4xf32>
    %116 = vector.shape_cast %115 : vector<1x1x4xf32> to vector<1x4xf32>
    %117 = vector.shape_cast %116 : vector<1x4xf32> to vector<1x1x4xf32>
    %118 = vector.broadcast %117 : vector<1x1x4xf32> to vector<16x16x4xf32>
    %119 = arith.mulf %114, %118 : vector<16x16x4xf32>
    %120 = arith.addf %112, %119 : vector<16x16x4xf32>
    %c0_98 = arith.constant 0 : index
    %c2_99 = arith.constant 2 : index
    %c1_100 = arith.constant 1 : index
    %c0_101 = arith.constant 0 : index
    %121 = vector.load %arg1[%c0_98, %c2_99, %c1_100, %c0_101] : memref<1x22x22x4xf32, #tpu.memory_space<vmem>>, vector<1x16x16x4xf32>
    %122 = vector.shape_cast %121 : vector<1x16x16x4xf32> to vector<16x16x4xf32>
    %c2_102 = arith.constant 2 : index
    %c1_103 = arith.constant 1 : index
    %c0_104 = arith.constant 0 : index
    %123 = vector.load %arg2[%c2_102, %c1_103, %c0_104] : memref<7x7x4xf32, #tpu.memory_space<vmem>>, vector<1x1x4xf32>
    %124 = vector.shape_cast %123 : vector<1x1x4xf32> to vector<1x4xf32>
    %125 = vector.shape_cast %124 : vector<1x4xf32> to vector<1x1x4xf32>
    %126 = vector.broadcast %125 : vector<1x1x4xf32> to vector<16x16x4xf32>
    %127 = arith.mulf %122, %126 : vector<16x16x4xf32>
    %128 = arith.addf %120, %127 : vector<16x16x4xf32>
    %c0_105 = arith.constant 0 : index
    %c2_106 = arith.constant 2 : index
    %c2_107 = arith.constant 2 : index
    %c0_108 = arith.constant 0 : index
    %129 = vector.load %arg1[%c0_105, %c2_106, %c2_107, %c0_108] : memref<1x22x22x4xf32, #tpu.memory_space<vmem>>, vector<1x16x16x4xf32>
    %130 = vector.shape_cast %129 : vector<1x16x16x4xf32> to vector<16x16x4xf32>
    %c2_109 = arith.constant 2 : index
    %c2_110 = arith.constant 2 : index
    %c0_111 = arith.constant 0 : index
    %131 = vector.load %arg2[%c2_109, %c2_110, %c0_111] : memref<7x7x4xf32, #tpu.memory_space<vmem>>, vector<1x1x4xf32>
    %132 = vector.shape_cast %131 : vector<1x1x4xf32> to vector<1x4xf32>
    %133 = vector.shape_cast %132 : vector<1x4xf32> to vector<1x1x4xf32>
    %134 = vector.broadcast %133 : vector<1x1x4xf32> to vector<16x16x4xf32>
    %135 = arith.mulf %130, %134 : vector<16x16x4xf32>
    %136 = arith.addf %128, %135 : vector<16x16x4xf32>
    %c0_112 = arith.constant 0 : index
    %c2_113 = arith.constant 2 : index
    %c3_114 = arith.constant 3 : index
    %c0_115 = arith.constant 0 : index
    %137 = vector.load %arg1[%c0_112, %c2_113, %c3_114, %c0_115] : memref<1x22x22x4xf32, #tpu.memory_space<vmem>>, vector<1x16x16x4xf32>
    %138 = vector.shape_cast %137 : vector<1x16x16x4xf32> to vector<16x16x4xf32>
    %c2_116 = arith.constant 2 : index
    %c3_117 = arith.constant 3 : index
    %c0_118 = arith.constant 0 : index
    %139 = vector.load %arg2[%c2_116, %c3_117, %c0_118] : memref<7x7x4xf32, #tpu.memory_space<vmem>>, vector<1x1x4xf32>
    %140 = vector.shape_cast %139 : vector<1x1x4xf32> to vector<1x4xf32>
    %141 = vector.shape_cast %140 : vector<1x4xf32> to vector<1x1x4xf32>
    %142 = vector.broadcast %141 : vector<1x1x4xf32> to vector<16x16x4xf32>
    %143 = arith.mulf %138, %142 : vector<16x16x4xf32>
    %144 = arith.addf %136, %143 : vector<16x16x4xf32>
    %c0_119 = arith.constant 0 : index
    %c2_120 = arith.constant 2 : index
    %c4_121 = arith.constant 4 : index
    %c0_122 = arith.constant 0 : index
    %145 = vector.load %arg1[%c0_119, %c2_120, %c4_121, %c0_122] : memref<1x22x22x4xf32, #tpu.memory_space<vmem>>, vector<1x16x16x4xf32>
    %146 = vector.shape_cast %145 : vector<1x16x16x4xf32> to vector<16x16x4xf32>
    %c2_123 = arith.constant 2 : index
    %c4_124 = arith.constant 4 : index
    %c0_125 = arith.constant 0 : index
    %147 = vector.load %arg2[%c2_123, %c4_124, %c0_125] : memref<7x7x4xf32, #tpu.memory_space<vmem>>, vector<1x1x4xf32>
    %148 = vector.shape_cast %147 : vector<1x1x4xf32> to vector<1x4xf32>
    %149 = vector.shape_cast %148 : vector<1x4xf32> to vector<1x1x4xf32>
    %150 = vector.broadcast %149 : vector<1x1x4xf32> to vector<16x16x4xf32>
    %151 = arith.mulf %146, %150 : vector<16x16x4xf32>
    %152 = arith.addf %144, %151 : vector<16x16x4xf32>
    %c0_126 = arith.constant 0 : index
    %c2_127 = arith.constant 2 : index
    %c5_128 = arith.constant 5 : index
    %c0_129 = arith.constant 0 : index
    %153 = vector.load %arg1[%c0_126, %c2_127, %c5_128, %c0_129] : memref<1x22x22x4xf32, #tpu.memory_space<vmem>>, vector<1x16x16x4xf32>
    %154 = vector.shape_cast %153 : vector<1x16x16x4xf32> to vector<16x16x4xf32>
    %c2_130 = arith.constant 2 : index
    %c5_131 = arith.constant 5 : index
    %c0_132 = arith.constant 0 : index
    %155 = vector.load %arg2[%c2_130, %c5_131, %c0_132] : memref<7x7x4xf32, #tpu.memory_space<vmem>>, vector<1x1x4xf32>
    %156 = vector.shape_cast %155 : vector<1x1x4xf32> to vector<1x4xf32>
    %157 = vector.shape_cast %156 : vector<1x4xf32> to vector<1x1x4xf32>
    %158 = vector.broadcast %157 : vector<1x1x4xf32> to vector<16x16x4xf32>
    %159 = arith.mulf %154, %158 : vector<16x16x4xf32>
    %160 = arith.addf %152, %159 : vector<16x16x4xf32>
    %c0_133 = arith.constant 0 : index
    %c2_134 = arith.constant 2 : index
    %c6_135 = arith.constant 6 : index
    %c0_136 = arith.constant 0 : index
    %161 = vector.load %arg1[%c0_133, %c2_134, %c6_135, %c0_136] : memref<1x22x22x4xf32, #tpu.memory_space<vmem>>, vector<1x16x16x4xf32>
    %162 = vector.shape_cast %161 : vector<1x16x16x4xf32> to vector<16x16x4xf32>
    %c2_137 = arith.constant 2 : index
    %c6_138 = arith.constant 6 : index
    %c0_139 = arith.constant 0 : index
    %163 = vector.load %arg2[%c2_137, %c6_138, %c0_139] : memref<7x7x4xf32, #tpu.memory_space<vmem>>, vector<1x1x4xf32>
    %164 = vector.shape_cast %163 : vector<1x1x4xf32> to vector<1x4xf32>
    %165 = vector.shape_cast %164 : vector<1x4xf32> to vector<1x1x4xf32>
    %166 = vector.broadcast %165 : vector<1x1x4xf32> to vector<16x16x4xf32>
    %167 = arith.mulf %162, %166 : vector<16x16x4xf32>
    %168 = arith.addf %160, %167 : vector<16x16x4xf32>
    %c0_140 = arith.constant 0 : index
    %c3_141 = arith.constant 3 : index
    %c0_142 = arith.constant 0 : index
    %c0_143 = arith.constant 0 : index
    %169 = vector.load %arg1[%c0_140, %c3_141, %c0_142, %c0_143] : memref<1x22x22x4xf32, #tpu.memory_space<vmem>>, vector<1x16x16x4xf32>
    %170 = vector.shape_cast %169 : vector<1x16x16x4xf32> to vector<16x16x4xf32>
    %c3_144 = arith.constant 3 : index
    %c0_145 = arith.constant 0 : index
    %c0_146 = arith.constant 0 : index
    %171 = vector.load %arg2[%c3_144, %c0_145, %c0_146] : memref<7x7x4xf32, #tpu.memory_space<vmem>>, vector<1x1x4xf32>
    %172 = vector.shape_cast %171 : vector<1x1x4xf32> to vector<1x4xf32>
    %173 = vector.shape_cast %172 : vector<1x4xf32> to vector<1x1x4xf32>
    %174 = vector.broadcast %173 : vector<1x1x4xf32> to vector<16x16x4xf32>
    %175 = arith.mulf %170, %174 : vector<16x16x4xf32>
    %176 = arith.addf %168, %175 : vector<16x16x4xf32>
    %c0_147 = arith.constant 0 : index
    %c3_148 = arith.constant 3 : index
    %c1_149 = arith.constant 1 : index
    %c0_150 = arith.constant 0 : index
    %177 = vector.load %arg1[%c0_147, %c3_148, %c1_149, %c0_150] : memref<1x22x22x4xf32, #tpu.memory_space<vmem>>, vector<1x16x16x4xf32>
    %178 = vector.shape_cast %177 : vector<1x16x16x4xf32> to vector<16x16x4xf32>
    %c3_151 = arith.constant 3 : index
    %c1_152 = arith.constant 1 : index
    %c0_153 = arith.constant 0 : index
    %179 = vector.load %arg2[%c3_151, %c1_152, %c0_153] : memref<7x7x4xf32, #tpu.memory_space<vmem>>, vector<1x1x4xf32>
    %180 = vector.shape_cast %179 : vector<1x1x4xf32> to vector<1x4xf32>
    %181 = vector.shape_cast %180 : vector<1x4xf32> to vector<1x1x4xf32>
    %182 = vector.broadcast %181 : vector<1x1x4xf32> to vector<16x16x4xf32>
    %183 = arith.mulf %178, %182 : vector<16x16x4xf32>
    %184 = arith.addf %176, %183 : vector<16x16x4xf32>
    %c0_154 = arith.constant 0 : index
    %c3_155 = arith.constant 3 : index
    %c2_156 = arith.constant 2 : index
    %c0_157 = arith.constant 0 : index
    %185 = vector.load %arg1[%c0_154, %c3_155, %c2_156, %c0_157] : memref<1x22x22x4xf32, #tpu.memory_space<vmem>>, vector<1x16x16x4xf32>
    %186 = vector.shape_cast %185 : vector<1x16x16x4xf32> to vector<16x16x4xf32>
    %c3_158 = arith.constant 3 : index
    %c2_159 = arith.constant 2 : index
    %c0_160 = arith.constant 0 : index
    %187 = vector.load %arg2[%c3_158, %c2_159, %c0_160] : memref<7x7x4xf32, #tpu.memory_space<vmem>>, vector<1x1x4xf32>
    %188 = vector.shape_cast %187 : vector<1x1x4xf32> to vector<1x4xf32>
    %189 = vector.shape_cast %188 : vector<1x4xf32> to vector<1x1x4xf32>
    %190 = vector.broadcast %189 : vector<1x1x4xf32> to vector<16x16x4xf32>
    %191 = arith.mulf %186, %190 : vector<16x16x4xf32>
    %192 = arith.addf %184, %191 : vector<16x16x4xf32>
    %c0_161 = arith.constant 0 : index
    %c3_162 = arith.constant 3 : index
    %c3_163 = arith.constant 3 : index
    %c0_164 = arith.constant 0 : index
    %193 = vector.load %arg1[%c0_161, %c3_162, %c3_163, %c0_164] : memref<1x22x22x4xf32, #tpu.memory_space<vmem>>, vector<1x16x16x4xf32>
    %194 = vector.shape_cast %193 : vector<1x16x16x4xf32> to vector<16x16x4xf32>
    %c3_165 = arith.constant 3 : index
    %c3_166 = arith.constant 3 : index
    %c0_167 = arith.constant 0 : index
    %195 = vector.load %arg2[%c3_165, %c3_166, %c0_167] : memref<7x7x4xf32, #tpu.memory_space<vmem>>, vector<1x1x4xf32>
    %196 = vector.shape_cast %195 : vector<1x1x4xf32> to vector<1x4xf32>
    %197 = vector.shape_cast %196 : vector<1x4xf32> to vector<1x1x4xf32>
    %198 = vector.broadcast %197 : vector<1x1x4xf32> to vector<16x16x4xf32>
    %199 = arith.mulf %194, %198 : vector<16x16x4xf32>
    %200 = arith.addf %192, %199 : vector<16x16x4xf32>
    %c0_168 = arith.constant 0 : index
    %c3_169 = arith.constant 3 : index
    %c4_170 = arith.constant 4 : index
    %c0_171 = arith.constant 0 : index
    %201 = vector.load %arg1[%c0_168, %c3_169, %c4_170, %c0_171] : memref<1x22x22x4xf32, #tpu.memory_space<vmem>>, vector<1x16x16x4xf32>
    %202 = vector.shape_cast %201 : vector<1x16x16x4xf32> to vector<16x16x4xf32>
    %c3_172 = arith.constant 3 : index
    %c4_173 = arith.constant 4 : index
    %c0_174 = arith.constant 0 : index
    %203 = vector.load %arg2[%c3_172, %c4_173, %c0_174] : memref<7x7x4xf32, #tpu.memory_space<vmem>>, vector<1x1x4xf32>
    %204 = vector.shape_cast %203 : vector<1x1x4xf32> to vector<1x4xf32>
    %205 = vector.shape_cast %204 : vector<1x4xf32> to vector<1x1x4xf32>
    %206 = vector.broadcast %205 : vector<1x1x4xf32> to vector<16x16x4xf32>
    %207 = arith.mulf %202, %206 : vector<16x16x4xf32>
    %208 = arith.addf %200, %207 : vector<16x16x4xf32>
    %c0_175 = arith.constant 0 : index
    %c3_176 = arith.constant 3 : index
    %c5_177 = arith.constant 5 : index
    %c0_178 = arith.constant 0 : index
    %209 = vector.load %arg1[%c0_175, %c3_176, %c5_177, %c0_178] : memref<1x22x22x4xf32, #tpu.memory_space<vmem>>, vector<1x16x16x4xf32>
    %210 = vector.shape_cast %209 : vector<1x16x16x4xf32> to vector<16x16x4xf32>
    %c3_179 = arith.constant 3 : index
    %c5_180 = arith.constant 5 : index
    %c0_181 = arith.constant 0 : index
    %211 = vector.load %arg2[%c3_179, %c5_180, %c0_181] : memref<7x7x4xf32, #tpu.memory_space<vmem>>, vector<1x1x4xf32>
    %212 = vector.shape_cast %211 : vector<1x1x4xf32> to vector<1x4xf32>
    %213 = vector.shape_cast %212 : vector<1x4xf32> to vector<1x1x4xf32>
    %214 = vector.broadcast %213 : vector<1x1x4xf32> to vector<16x16x4xf32>
    %215 = arith.mulf %210, %214 : vector<16x16x4xf32>
    %216 = arith.addf %208, %215 : vector<16x16x4xf32>
    %c0_182 = arith.constant 0 : index
    %c3_183 = arith.constant 3 : index
    %c6_184 = arith.constant 6 : index
    %c0_185 = arith.constant 0 : index
    %217 = vector.load %arg1[%c0_182, %c3_183, %c6_184, %c0_185] : memref<1x22x22x4xf32, #tpu.memory_space<vmem>>, vector<1x16x16x4xf32>
    %218 = vector.shape_cast %217 : vector<1x16x16x4xf32> to vector<16x16x4xf32>
    %c3_186 = arith.constant 3 : index
    %c6_187 = arith.constant 6 : index
    %c0_188 = arith.constant 0 : index
    %219 = vector.load %arg2[%c3_186, %c6_187, %c0_188] : memref<7x7x4xf32, #tpu.memory_space<vmem>>, vector<1x1x4xf32>
    %220 = vector.shape_cast %219 : vector<1x1x4xf32> to vector<1x4xf32>
    %221 = vector.shape_cast %220 : vector<1x4xf32> to vector<1x1x4xf32>
    %222 = vector.broadcast %221 : vector<1x1x4xf32> to vector<16x16x4xf32>
    %223 = arith.mulf %218, %222 : vector<16x16x4xf32>
    %224 = arith.addf %216, %223 : vector<16x16x4xf32>
    %c0_189 = arith.constant 0 : index
    %c4_190 = arith.constant 4 : index
    %c0_191 = arith.constant 0 : index
    %c0_192 = arith.constant 0 : index
    %225 = vector.load %arg1[%c0_189, %c4_190, %c0_191, %c0_192] : memref<1x22x22x4xf32, #tpu.memory_space<vmem>>, vector<1x16x16x4xf32>
    %226 = vector.shape_cast %225 : vector<1x16x16x4xf32> to vector<16x16x4xf32>
    %c4_193 = arith.constant 4 : index
    %c0_194 = arith.constant 0 : index
    %c0_195 = arith.constant 0 : index
    %227 = vector.load %arg2[%c4_193, %c0_194, %c0_195] : memref<7x7x4xf32, #tpu.memory_space<vmem>>, vector<1x1x4xf32>
    %228 = vector.shape_cast %227 : vector<1x1x4xf32> to vector<1x4xf32>
    %229 = vector.shape_cast %228 : vector<1x4xf32> to vector<1x1x4xf32>
    %230 = vector.broadcast %229 : vector<1x1x4xf32> to vector<16x16x4xf32>
    %231 = arith.mulf %226, %230 : vector<16x16x4xf32>
    %232 = arith.addf %224, %231 : vector<16x16x4xf32>
    %c0_196 = arith.constant 0 : index
    %c4_197 = arith.constant 4 : index
    %c1_198 = arith.constant 1 : index
    %c0_199 = arith.constant 0 : index
    %233 = vector.load %arg1[%c0_196, %c4_197, %c1_198, %c0_199] : memref<1x22x22x4xf32, #tpu.memory_space<vmem>>, vector<1x16x16x4xf32>
    %234 = vector.shape_cast %233 : vector<1x16x16x4xf32> to vector<16x16x4xf32>
    %c4_200 = arith.constant 4 : index
    %c1_201 = arith.constant 1 : index
    %c0_202 = arith.constant 0 : index
    %235 = vector.load %arg2[%c4_200, %c1_201, %c0_202] : memref<7x7x4xf32, #tpu.memory_space<vmem>>, vector<1x1x4xf32>
    %236 = vector.shape_cast %235 : vector<1x1x4xf32> to vector<1x4xf32>
    %237 = vector.shape_cast %236 : vector<1x4xf32> to vector<1x1x4xf32>
    %238 = vector.broadcast %237 : vector<1x1x4xf32> to vector<16x16x4xf32>
    %239 = arith.mulf %234, %238 : vector<16x16x4xf32>
    %240 = arith.addf %232, %239 : vector<16x16x4xf32>
    %c0_203 = arith.constant 0 : index
    %c4_204 = arith.constant 4 : index
    %c2_205 = arith.constant 2 : index
    %c0_206 = arith.constant 0 : index
    %241 = vector.load %arg1[%c0_203, %c4_204, %c2_205, %c0_206] : memref<1x22x22x4xf32, #tpu.memory_space<vmem>>, vector<1x16x16x4xf32>
    %242 = vector.shape_cast %241 : vector<1x16x16x4xf32> to vector<16x16x4xf32>
    %c4_207 = arith.constant 4 : index
    %c2_208 = arith.constant 2 : index
    %c0_209 = arith.constant 0 : index
    %243 = vector.load %arg2[%c4_207, %c2_208, %c0_209] : memref<7x7x4xf32, #tpu.memory_space<vmem>>, vector<1x1x4xf32>
    %244 = vector.shape_cast %243 : vector<1x1x4xf32> to vector<1x4xf32>
    %245 = vector.shape_cast %244 : vector<1x4xf32> to vector<1x1x4xf32>
    %246 = vector.broadcast %245 : vector<1x1x4xf32> to vector<16x16x4xf32>
    %247 = arith.mulf %242, %246 : vector<16x16x4xf32>
    %248 = arith.addf %240, %247 : vector<16x16x4xf32>
    %c0_210 = arith.constant 0 : index
    %c4_211 = arith.constant 4 : index
    %c3_212 = arith.constant 3 : index
    %c0_213 = arith.constant 0 : index
    %249 = vector.load %arg1[%c0_210, %c4_211, %c3_212, %c0_213] : memref<1x22x22x4xf32, #tpu.memory_space<vmem>>, vector<1x16x16x4xf32>
    %250 = vector.shape_cast %249 : vector<1x16x16x4xf32> to vector<16x16x4xf32>
    %c4_214 = arith.constant 4 : index
    %c3_215 = arith.constant 3 : index
    %c0_216 = arith.constant 0 : index
    %251 = vector.load %arg2[%c4_214, %c3_215, %c0_216] : memref<7x7x4xf32, #tpu.memory_space<vmem>>, vector<1x1x4xf32>
    %252 = vector.shape_cast %251 : vector<1x1x4xf32> to vector<1x4xf32>
    %253 = vector.shape_cast %252 : vector<1x4xf32> to vector<1x1x4xf32>
    %254 = vector.broadcast %253 : vector<1x1x4xf32> to vector<16x16x4xf32>
    %255 = arith.mulf %250, %254 : vector<16x16x4xf32>
    %256 = arith.addf %248, %255 : vector<16x16x4xf32>
    %c0_217 = arith.constant 0 : index
    %c4_218 = arith.constant 4 : index
    %c4_219 = arith.constant 4 : index
    %c0_220 = arith.constant 0 : index
    %257 = vector.load %arg1[%c0_217, %c4_218, %c4_219, %c0_220] : memref<1x22x22x4xf32, #tpu.memory_space<vmem>>, vector<1x16x16x4xf32>
    %258 = vector.shape_cast %257 : vector<1x16x16x4xf32> to vector<16x16x4xf32>
    %c4_221 = arith.constant 4 : index
    %c4_222 = arith.constant 4 : index
    %c0_223 = arith.constant 0 : index
    %259 = vector.load %arg2[%c4_221, %c4_222, %c0_223] : memref<7x7x4xf32, #tpu.memory_space<vmem>>, vector<1x1x4xf32>
    %260 = vector.shape_cast %259 : vector<1x1x4xf32> to vector<1x4xf32>
    %261 = vector.shape_cast %260 : vector<1x4xf32> to vector<1x1x4xf32>
    %262 = vector.broadcast %261 : vector<1x1x4xf32> to vector<16x16x4xf32>
    %263 = arith.mulf %258, %262 : vector<16x16x4xf32>
    %264 = arith.addf %256, %263 : vector<16x16x4xf32>
    %c0_224 = arith.constant 0 : index
    %c4_225 = arith.constant 4 : index
    %c5_226 = arith.constant 5 : index
    %c0_227 = arith.constant 0 : index
    %265 = vector.load %arg1[%c0_224, %c4_225, %c5_226, %c0_227] : memref<1x22x22x4xf32, #tpu.memory_space<vmem>>, vector<1x16x16x4xf32>
    %266 = vector.shape_cast %265 : vector<1x16x16x4xf32> to vector<16x16x4xf32>
    %c4_228 = arith.constant 4 : index
    %c5_229 = arith.constant 5 : index
    %c0_230 = arith.constant 0 : index
    %267 = vector.load %arg2[%c4_228, %c5_229, %c0_230] : memref<7x7x4xf32, #tpu.memory_space<vmem>>, vector<1x1x4xf32>
    %268 = vector.shape_cast %267 : vector<1x1x4xf32> to vector<1x4xf32>
    %269 = vector.shape_cast %268 : vector<1x4xf32> to vector<1x1x4xf32>
    %270 = vector.broadcast %269 : vector<1x1x4xf32> to vector<16x16x4xf32>
    %271 = arith.mulf %266, %270 : vector<16x16x4xf32>
    %272 = arith.addf %264, %271 : vector<16x16x4xf32>
    %c0_231 = arith.constant 0 : index
    %c4_232 = arith.constant 4 : index
    %c6_233 = arith.constant 6 : index
    %c0_234 = arith.constant 0 : index
    %273 = vector.load %arg1[%c0_231, %c4_232, %c6_233, %c0_234] : memref<1x22x22x4xf32, #tpu.memory_space<vmem>>, vector<1x16x16x4xf32>
    %274 = vector.shape_cast %273 : vector<1x16x16x4xf32> to vector<16x16x4xf32>
    %c4_235 = arith.constant 4 : index
    %c6_236 = arith.constant 6 : index
    %c0_237 = arith.constant 0 : index
    %275 = vector.load %arg2[%c4_235, %c6_236, %c0_237] : memref<7x7x4xf32, #tpu.memory_space<vmem>>, vector<1x1x4xf32>
    %276 = vector.shape_cast %275 : vector<1x1x4xf32> to vector<1x4xf32>
    %277 = vector.shape_cast %276 : vector<1x4xf32> to vector<1x1x4xf32>
    %278 = vector.broadcast %277 : vector<1x1x4xf32> to vector<16x16x4xf32>
    %279 = arith.mulf %274, %278 : vector<16x16x4xf32>
    %280 = arith.addf %272, %279 : vector<16x16x4xf32>
    %c0_238 = arith.constant 0 : index
    %c5_239 = arith.constant 5 : index
    %c0_240 = arith.constant 0 : index
    %c0_241 = arith.constant 0 : index
    %281 = vector.load %arg1[%c0_238, %c5_239, %c0_240, %c0_241] : memref<1x22x22x4xf32, #tpu.memory_space<vmem>>, vector<1x16x16x4xf32>
    %282 = vector.shape_cast %281 : vector<1x16x16x4xf32> to vector<16x16x4xf32>
    %c5_242 = arith.constant 5 : index
    %c0_243 = arith.constant 0 : index
    %c0_244 = arith.constant 0 : index
    %283 = vector.load %arg2[%c5_242, %c0_243, %c0_244] : memref<7x7x4xf32, #tpu.memory_space<vmem>>, vector<1x1x4xf32>
    %284 = vector.shape_cast %283 : vector<1x1x4xf32> to vector<1x4xf32>
    %285 = vector.shape_cast %284 : vector<1x4xf32> to vector<1x1x4xf32>
    %286 = vector.broadcast %285 : vector<1x1x4xf32> to vector<16x16x4xf32>
    %287 = arith.mulf %282, %286 : vector<16x16x4xf32>
    %288 = arith.addf %280, %287 : vector<16x16x4xf32>
    %c0_245 = arith.constant 0 : index
    %c5_246 = arith.constant 5 : index
    %c1_247 = arith.constant 1 : index
    %c0_248 = arith.constant 0 : index
    %289 = vector.load %arg1[%c0_245, %c5_246, %c1_247, %c0_248] : memref<1x22x22x4xf32, #tpu.memory_space<vmem>>, vector<1x16x16x4xf32>
    %290 = vector.shape_cast %289 : vector<1x16x16x4xf32> to vector<16x16x4xf32>
    %c5_249 = arith.constant 5 : index
    %c1_250 = arith.constant 1 : index
    %c0_251 = arith.constant 0 : index
    %291 = vector.load %arg2[%c5_249, %c1_250, %c0_251] : memref<7x7x4xf32, #tpu.memory_space<vmem>>, vector<1x1x4xf32>
    %292 = vector.shape_cast %291 : vector<1x1x4xf32> to vector<1x4xf32>
    %293 = vector.shape_cast %292 : vector<1x4xf32> to vector<1x1x4xf32>
    %294 = vector.broadcast %293 : vector<1x1x4xf32> to vector<16x16x4xf32>
    %295 = arith.mulf %290, %294 : vector<16x16x4xf32>
    %296 = arith.addf %288, %295 : vector<16x16x4xf32>
    %c0_252 = arith.constant 0 : index
    %c5_253 = arith.constant 5 : index
    %c2_254 = arith.constant 2 : index
    %c0_255 = arith.constant 0 : index
    %297 = vector.load %arg1[%c0_252, %c5_253, %c2_254, %c0_255] : memref<1x22x22x4xf32, #tpu.memory_space<vmem>>, vector<1x16x16x4xf32>
    %298 = vector.shape_cast %297 : vector<1x16x16x4xf32> to vector<16x16x4xf32>
    %c5_256 = arith.constant 5 : index
    %c2_257 = arith.constant 2 : index
    %c0_258 = arith.constant 0 : index
    %299 = vector.load %arg2[%c5_256, %c2_257, %c0_258] : memref<7x7x4xf32, #tpu.memory_space<vmem>>, vector<1x1x4xf32>
    %300 = vector.shape_cast %299 : vector<1x1x4xf32> to vector<1x4xf32>
    %301 = vector.shape_cast %300 : vector<1x4xf32> to vector<1x1x4xf32>
    %302 = vector.broadcast %301 : vector<1x1x4xf32> to vector<16x16x4xf32>
    %303 = arith.mulf %298, %302 : vector<16x16x4xf32>
    %304 = arith.addf %296, %303 : vector<16x16x4xf32>
    %c0_259 = arith.constant 0 : index
    %c5_260 = arith.constant 5 : index
    %c3_261 = arith.constant 3 : index
    %c0_262 = arith.constant 0 : index
    %305 = vector.load %arg1[%c0_259, %c5_260, %c3_261, %c0_262] : memref<1x22x22x4xf32, #tpu.memory_space<vmem>>, vector<1x16x16x4xf32>
    %306 = vector.shape_cast %305 : vector<1x16x16x4xf32> to vector<16x16x4xf32>
    %c5_263 = arith.constant 5 : index
    %c3_264 = arith.constant 3 : index
    %c0_265 = arith.constant 0 : index
    %307 = vector.load %arg2[%c5_263, %c3_264, %c0_265] : memref<7x7x4xf32, #tpu.memory_space<vmem>>, vector<1x1x4xf32>
    %308 = vector.shape_cast %307 : vector<1x1x4xf32> to vector<1x4xf32>
    %309 = vector.shape_cast %308 : vector<1x4xf32> to vector<1x1x4xf32>
    %310 = vector.broadcast %309 : vector<1x1x4xf32> to vector<16x16x4xf32>
    %311 = arith.mulf %306, %310 : vector<16x16x4xf32>
    %312 = arith.addf %304, %311 : vector<16x16x4xf32>
    %c0_266 = arith.constant 0 : index
    %c5_267 = arith.constant 5 : index
    %c4_268 = arith.constant 4 : index
    %c0_269 = arith.constant 0 : index
    %313 = vector.load %arg1[%c0_266, %c5_267, %c4_268, %c0_269] : memref<1x22x22x4xf32, #tpu.memory_space<vmem>>, vector<1x16x16x4xf32>
    %314 = vector.shape_cast %313 : vector<1x16x16x4xf32> to vector<16x16x4xf32>
    %c5_270 = arith.constant 5 : index
    %c4_271 = arith.constant 4 : index
    %c0_272 = arith.constant 0 : index
    %315 = vector.load %arg2[%c5_270, %c4_271, %c0_272] : memref<7x7x4xf32, #tpu.memory_space<vmem>>, vector<1x1x4xf32>
    %316 = vector.shape_cast %315 : vector<1x1x4xf32> to vector<1x4xf32>
    %317 = vector.shape_cast %316 : vector<1x4xf32> to vector<1x1x4xf32>
    %318 = vector.broadcast %317 : vector<1x1x4xf32> to vector<16x16x4xf32>
    %319 = arith.mulf %314, %318 : vector<16x16x4xf32>
    %320 = arith.addf %312, %319 : vector<16x16x4xf32>
    %c0_273 = arith.constant 0 : index
    %c5_274 = arith.constant 5 : index
    %c5_275 = arith.constant 5 : index
    %c0_276 = arith.constant 0 : index
    %321 = vector.load %arg1[%c0_273, %c5_274, %c5_275, %c0_276] : memref<1x22x22x4xf32, #tpu.memory_space<vmem>>, vector<1x16x16x4xf32>
    %322 = vector.shape_cast %321 : vector<1x16x16x4xf32> to vector<16x16x4xf32>
    %c5_277 = arith.constant 5 : index
    %c5_278 = arith.constant 5 : index
    %c0_279 = arith.constant 0 : index
    %323 = vector.load %arg2[%c5_277, %c5_278, %c0_279] : memref<7x7x4xf32, #tpu.memory_space<vmem>>, vector<1x1x4xf32>
    %324 = vector.shape_cast %323 : vector<1x1x4xf32> to vector<1x4xf32>
    %325 = vector.shape_cast %324 : vector<1x4xf32> to vector<1x1x4xf32>
    %326 = vector.broadcast %325 : vector<1x1x4xf32> to vector<16x16x4xf32>
    %327 = arith.mulf %322, %326 : vector<16x16x4xf32>
    %328 = arith.addf %320, %327 : vector<16x16x4xf32>
    %c0_280 = arith.constant 0 : index
    %c5_281 = arith.constant 5 : index
    %c6_282 = arith.constant 6 : index
    %c0_283 = arith.constant 0 : index
    %329 = vector.load %arg1[%c0_280, %c5_281, %c6_282, %c0_283] : memref<1x22x22x4xf32, #tpu.memory_space<vmem>>, vector<1x16x16x4xf32>
    %330 = vector.shape_cast %329 : vector<1x16x16x4xf32> to vector<16x16x4xf32>
    %c5_284 = arith.constant 5 : index
    %c6_285 = arith.constant 6 : index
    %c0_286 = arith.constant 0 : index
    %331 = vector.load %arg2[%c5_284, %c6_285, %c0_286] : memref<7x7x4xf32, #tpu.memory_space<vmem>>, vector<1x1x4xf32>
    %332 = vector.shape_cast %331 : vector<1x1x4xf32> to vector<1x4xf32>
    %333 = vector.shape_cast %332 : vector<1x4xf32> to vector<1x1x4xf32>
    %334 = vector.broadcast %333 : vector<1x1x4xf32> to vector<16x16x4xf32>
    %335 = arith.mulf %330, %334 : vector<16x16x4xf32>
    %336 = arith.addf %328, %335 : vector<16x16x4xf32>
    %c0_287 = arith.constant 0 : index
    %c6_288 = arith.constant 6 : index
    %c0_289 = arith.constant 0 : index
    %c0_290 = arith.constant 0 : index
    %337 = vector.load %arg1[%c0_287, %c6_288, %c0_289, %c0_290] : memref<1x22x22x4xf32, #tpu.memory_space<vmem>>, vector<1x16x16x4xf32>
    %338 = vector.shape_cast %337 : vector<1x16x16x4xf32> to vector<16x16x4xf32>
    %c6_291 = arith.constant 6 : index
    %c0_292 = arith.constant 0 : index
    %c0_293 = arith.constant 0 : index
    %339 = vector.load %arg2[%c6_291, %c0_292, %c0_293] : memref<7x7x4xf32, #tpu.memory_space<vmem>>, vector<1x1x4xf32>
    %340 = vector.shape_cast %339 : vector<1x1x4xf32> to vector<1x4xf32>
    %341 = vector.shape_cast %340 : vector<1x4xf32> to vector<1x1x4xf32>
    %342 = vector.broadcast %341 : vector<1x1x4xf32> to vector<16x16x4xf32>
    %343 = arith.mulf %338, %342 : vector<16x16x4xf32>
    %344 = arith.addf %336, %343 : vector<16x16x4xf32>
    %c0_294 = arith.constant 0 : index
    %c6_295 = arith.constant 6 : index
    %c1_296 = arith.constant 1 : index
    %c0_297 = arith.constant 0 : index
    %345 = vector.load %arg1[%c0_294, %c6_295, %c1_296, %c0_297] : memref<1x22x22x4xf32, #tpu.memory_space<vmem>>, vector<1x16x16x4xf32>
    %346 = vector.shape_cast %345 : vector<1x16x16x4xf32> to vector<16x16x4xf32>
    %c6_298 = arith.constant 6 : index
    %c1_299 = arith.constant 1 : index
    %c0_300 = arith.constant 0 : index
    %347 = vector.load %arg2[%c6_298, %c1_299, %c0_300] : memref<7x7x4xf32, #tpu.memory_space<vmem>>, vector<1x1x4xf32>
    %348 = vector.shape_cast %347 : vector<1x1x4xf32> to vector<1x4xf32>
    %349 = vector.shape_cast %348 : vector<1x4xf32> to vector<1x1x4xf32>
    %350 = vector.broadcast %349 : vector<1x1x4xf32> to vector<16x16x4xf32>
    %351 = arith.mulf %346, %350 : vector<16x16x4xf32>
    %352 = arith.addf %344, %351 : vector<16x16x4xf32>
    %c0_301 = arith.constant 0 : index
    %c6_302 = arith.constant 6 : index
    %c2_303 = arith.constant 2 : index
    %c0_304 = arith.constant 0 : index
    %353 = vector.load %arg1[%c0_301, %c6_302, %c2_303, %c0_304] : memref<1x22x22x4xf32, #tpu.memory_space<vmem>>, vector<1x16x16x4xf32>
    %354 = vector.shape_cast %353 : vector<1x16x16x4xf32> to vector<16x16x4xf32>
    %c6_305 = arith.constant 6 : index
    %c2_306 = arith.constant 2 : index
    %c0_307 = arith.constant 0 : index
    %355 = vector.load %arg2[%c6_305, %c2_306, %c0_307] : memref<7x7x4xf32, #tpu.memory_space<vmem>>, vector<1x1x4xf32>
    %356 = vector.shape_cast %355 : vector<1x1x4xf32> to vector<1x4xf32>
    %357 = vector.shape_cast %356 : vector<1x4xf32> to vector<1x1x4xf32>
    %358 = vector.broadcast %357 : vector<1x1x4xf32> to vector<16x16x4xf32>
    %359 = arith.mulf %354, %358 : vector<16x16x4xf32>
    %360 = arith.addf %352, %359 : vector<16x16x4xf32>
    %c0_308 = arith.constant 0 : index
    %c6_309 = arith.constant 6 : index
    %c3_310 = arith.constant 3 : index
    %c0_311 = arith.constant 0 : index
    %361 = vector.load %arg1[%c0_308, %c6_309, %c3_310, %c0_311] : memref<1x22x22x4xf32, #tpu.memory_space<vmem>>, vector<1x16x16x4xf32>
    %362 = vector.shape_cast %361 : vector<1x16x16x4xf32> to vector<16x16x4xf32>
    %c6_312 = arith.constant 6 : index
    %c3_313 = arith.constant 3 : index
    %c0_314 = arith.constant 0 : index
    %363 = vector.load %arg2[%c6_312, %c3_313, %c0_314] : memref<7x7x4xf32, #tpu.memory_space<vmem>>, vector<1x1x4xf32>
    %364 = vector.shape_cast %363 : vector<1x1x4xf32> to vector<1x4xf32>
    %365 = vector.shape_cast %364 : vector<1x4xf32> to vector<1x1x4xf32>
    %366 = vector.broadcast %365 : vector<1x1x4xf32> to vector<16x16x4xf32>
    %367 = arith.mulf %362, %366 : vector<16x16x4xf32>
    %368 = arith.addf %360, %367 : vector<16x16x4xf32>
    %c0_315 = arith.constant 0 : index
    %c6_316 = arith.constant 6 : index
    %c4_317 = arith.constant 4 : index
    %c0_318 = arith.constant 0 : index
    %369 = vector.load %arg1[%c0_315, %c6_316, %c4_317, %c0_318] : memref<1x22x22x4xf32, #tpu.memory_space<vmem>>, vector<1x16x16x4xf32>
    %370 = vector.shape_cast %369 : vector<1x16x16x4xf32> to vector<16x16x4xf32>
    %c6_319 = arith.constant 6 : index
    %c4_320 = arith.constant 4 : index
    %c0_321 = arith.constant 0 : index
    %371 = vector.load %arg2[%c6_319, %c4_320, %c0_321] : memref<7x7x4xf32, #tpu.memory_space<vmem>>, vector<1x1x4xf32>
    %372 = vector.shape_cast %371 : vector<1x1x4xf32> to vector<1x4xf32>
    %373 = vector.shape_cast %372 : vector<1x4xf32> to vector<1x1x4xf32>
    %374 = vector.broadcast %373 : vector<1x1x4xf32> to vector<16x16x4xf32>
    %375 = arith.mulf %370, %374 : vector<16x16x4xf32>
    %376 = arith.addf %368, %375 : vector<16x16x4xf32>
    %c0_322 = arith.constant 0 : index
    %c6_323 = arith.constant 6 : index
    %c5_324 = arith.constant 5 : index
    %c0_325 = arith.constant 0 : index
    %377 = vector.load %arg1[%c0_322, %c6_323, %c5_324, %c0_325] : memref<1x22x22x4xf32, #tpu.memory_space<vmem>>, vector<1x16x16x4xf32>
    %378 = vector.shape_cast %377 : vector<1x16x16x4xf32> to vector<16x16x4xf32>
    %c6_326 = arith.constant 6 : index
    %c5_327 = arith.constant 5 : index
    %c0_328 = arith.constant 0 : index
    %379 = vector.load %arg2[%c6_326, %c5_327, %c0_328] : memref<7x7x4xf32, #tpu.memory_space<vmem>>, vector<1x1x4xf32>
    %380 = vector.shape_cast %379 : vector<1x1x4xf32> to vector<1x4xf32>
    %381 = vector.shape_cast %380 : vector<1x4xf32> to vector<1x1x4xf32>
    %382 = vector.broadcast %381 : vector<1x1x4xf32> to vector<16x16x4xf32>
    %383 = arith.mulf %378, %382 : vector<16x16x4xf32>
    %384 = arith.addf %376, %383 : vector<16x16x4xf32>
    %c0_329 = arith.constant 0 : index
    %c6_330 = arith.constant 6 : index
    %c6_331 = arith.constant 6 : index
    %c0_332 = arith.constant 0 : index
    %385 = vector.load %arg1[%c0_329, %c6_330, %c6_331, %c0_332] : memref<1x22x22x4xf32, #tpu.memory_space<vmem>>, vector<1x16x16x4xf32>
    %386 = vector.shape_cast %385 : vector<1x16x16x4xf32> to vector<16x16x4xf32>
    %c6_333 = arith.constant 6 : index
    %c6_334 = arith.constant 6 : index
    %c0_335 = arith.constant 0 : index
    %387 = vector.load %arg2[%c6_333, %c6_334, %c0_335] : memref<7x7x4xf32, #tpu.memory_space<vmem>>, vector<1x1x4xf32>
    %388 = vector.shape_cast %387 : vector<1x1x4xf32> to vector<1x4xf32>
    %389 = vector.shape_cast %388 : vector<1x4xf32> to vector<1x1x4xf32>
    %390 = vector.broadcast %389 : vector<1x1x4xf32> to vector<16x16x4xf32>
    %391 = arith.mulf %386, %390 : vector<16x16x4xf32>
    %392 = arith.addf %384, %391 : vector<16x16x4xf32>
    %c0_336 = arith.constant 0 : index
    %c0_337 = arith.constant 0 : index
    %393 = vector.load %arg3[%c0_336, %c0_337] : memref<1x4xf32, #tpu.memory_space<vmem>>, vector<1x4xf32>
    %394 = vector.shape_cast %393 : vector<1x4xf32> to vector<1x1x4xf32>
    %395 = vector.broadcast %394 : vector<1x1x4xf32> to vector<16x16x4xf32>
    %396 = arith.addf %392, %395 : vector<16x16x4xf32>
    %c0_338 = arith.constant 0 : index
    %c0_339 = arith.constant 0 : index
    %c0_340 = arith.constant 0 : index
    %c0_341 = arith.constant 0 : index
    %397 = vector.load %arg4[%c0_338, %c0_339, %c0_340, %c0_341] : memref<1x16x16x4xf32, #tpu.memory_space<vmem>>, vector<1x16x16x4xf32>
    %398 = vector.shape_cast %397 : vector<1x16x16x4xf32> to vector<16x16x4xf32>
    %399 = vector.shape_cast %396 : vector<16x16x4xf32> to vector<1x16x16x4xf32>
    tpu.vector_store %arg4[%c0_338, %c0_339, %c0_340, %c0_341], %399 {strides = array<i32>} : memref<1x16x16x4xf32, #tpu.memory_space<vmem>>, vector<1x16x16x4xf32>,
    return
  }
  func.func @transform_0(%arg0: i32) -> (i32, i32, i32, i32) {
    %c0_i32 = arith.constant 0 : i32
    %c0_i32_0 = arith.constant 0 : i32
    %c0_i32_1 = arith.constant 0 : i32
    %c0_i32_2 = arith.constant 0 : i32
    return %arg0, %c0_i32, %c0_i32_0, %c0_i32_1 : i32, i32, i32, i32
  }
  func.func @transform_1(%arg0: i32) -> (i32, i32, i32) {
    %c0_i32 = arith.constant 0 : i32
    %c0_i32_0 = arith.constant 0 : i32
    %c0_i32_1 = arith.constant 0 : i32
    %c0_i32_2 = arith.constant 0 : i32
    return %c0_i32, %c0_i32_0, %c0_i32_1 : i32, i32, i32
  }
  func.func @transform_2(%arg0: i32) -> (i32, i32) {
    %c0_i32 = arith.constant 0 : i32
    %c0_i32_0 = arith.constant 0 : i32
    %c0_i32_1 = arith.constant 0 : i32
    return %c0_i32, %c0_i32_0 : i32, i32
  }
  func.func @transform_3(%arg0: i32) -> (i32, i32, i32, i32) {
    %c0_i32 = arith.constant 0 : i32
    %c0_i32_0 = arith.constant 0 : i32
    %c0_i32_1 = arith.constant 0 : i32
    %c0_i32_2 = arith.constant 0 : i32
    return %arg0, %c0_i32, %c0_i32_0, %c0_i32_1 : i32, i32, i32, i32
  }
}

</mosaic_0001>

<bundles_post_ra>
// kernel: tpu_custom_call.1
= control target key start
LH: loop header
LB: loop body
LE: loop exit
PB: predicated region body
PF: predicated region fallthrough
CT: control target
= control target key end

     0   :  { %s6743_s12 = smov 0   ;;  %s13464_s0 = inlined_call_operand.vmem [shape: f32[2,22,22,4], index: 0, kind: input, shape index: {}]   ;;  %s13465_s1 = inlined_call_operand.vmem [shape: f32[7,7,4], index: 1, kind: input, shape index: {}]   ;;  %s13466_s2 = inlined_call_operand.vmem [shape: f32[1,4], index: 2, kind: input, shape index: {}]   ;;  %s13467_s3 = inlined_call_operand.vmem [shape: f32[2,16,16,4], index: 3, kind: output, shape index: {}]  }
   0x1 LB: > { %s5259_s13 = sadd.s32 4294967295, %s6721_s12   ;;  %p5263_p0 = scmp.ge.s32.totalorder %s6721_s12, 1  ;;  %s6721_s12 = sphi %s6743_s12, %s13_s12  }
   0x2   : > { %p137_p1 = scmp.lt.s32.totalorder %s6721_s12, 3 }
   0x4   : > { %p138_p2 = pnand %p5263_p0, %p137_p1 }
   0x6   : > { %141 = sbr.rel (%p138_p2) target bundleno = 978 (0x3d2), region = 32 }
   0xd   : > { %p161_p3 = scmp.lt.s32.totalorder %s5259_s13, 1  ;;  %v6762_v0 = vld [vmem:[%s13465_s1] ss:$0 sm:$0xff]  ;;  %v6824_v34 = vld [vmem:[%s13465_s1 + $0x1] ss:$0 sm:$0xff]  ;;  %vm5171_vm0 = vcmask 31744  }
   0xf   : > { %s15065_s13 = smov (!%p161_p3, %s5259_s13), 1 }
  0x10   : > { %s6706_s14 = smul.u32 528, %s15065_s13  ;;  %s6705_s21 = sshll.u32 %s15065_s13, 8 }
  0x11   : > { %s13395_s24 = scalar_lea.vmem %s13467_s3, %s6705_s21 }
  0x12   : > { %s6757_s17 = scalar_lea.vmem %s13464_s0, %s6706_s14 }
  0x13   : > { %v171_v1 = vld [vmem:[%s6757_s17] sm:$0xff]  ;;  %v172_v2 = vld [vmem:[%s6757_s17 + $0x8] sm:$0xff]  ;;  %v173_v3 = vld [vmem:[%s6757_s17 + $0x18] sm:$0xff] }
  0x14   : > { %v174_v4 = vld [vmem:[%s6757_s17 + $0x20] sm:$0xff]  ;;  %v175_v5 = vld [vmem:[%s6757_s17 + $0x30] sm:$0xff]  ;;  %v176_v6 = vld [vmem:[%s6757_s17 + $0x38] sm:$0xff]  ;;  %v6780_v16 = vmul.f32 %v6762_v0, %v171_v1  ;;  %v6783_v17 = vmul.f32 %v6762_v0, %v172_v2  ;;  %v6786_v18 = vmul.f32 %v6762_v0, %v173_v3 }
  0x15   : > { %v177_v7 = vld [vmem:[%s6757_s17 + $0x48] sm:$0xff]  ;;  %v178_v8 = vld [vmem:[%s6757_s17 + $0x50] sm:$0xff]  ;;  %v179_v9 = vld [vmem:[%s6757_s17 + $0x60] sm:$0xff]  ;;  %v6789_v19 = vmul.f32 %v6762_v0, %v174_v4  ;;  %v6795_v23 = vmul.f32 %v6762_v0, %v175_v5  ;;  %v6798_v24 = vmul.f32 %v6762_v0, %v176_v6 }
  0x16   : > { %v180_v10 = vld [vmem:[%s6757_s17 + $0x68] sm:$0xff]  ;;  %v181_v11 = vld [vmem:[%s6757_s17 + $0x78] sm:$0xff]  ;;  %v182_v12 = vld [vmem:[%s6757_s17 + $0x80] sm:$0xff]  ;;  %v6801_v25 = vmul.f32 %v6762_v0, %v177_v7  ;;  %v6804_v26 = vmul.f32 %v6762_v0, %v178_v8  ;;  %v6810_v30 = vmul.f32 %v6762_v0, %v179_v9 }
  0x17   : > { %v183_v13 = vld [vmem:[%s6757_s17 + $0x90] sm:$0xff]  ;;  %v184_v14 = vld [vmem:[%s6757_s17 + $0x98] sm:$0xff]  ;;  %v185_v15 = vld [vmem:[%s6757_s17 + $0xa8] sm:$0xff]  ;;  %v6813_v31 = vmul.f32 %v6762_v0, %v180_v10  ;;  %v6816_v32 = vmul.f32 %v6762_v0, %v181_v11  ;;  %v6819_v33 = vmul.f32 %v6762_v0, %v182_v12 }
  0x18   : > { %v186_v20 = vld [vmem:[%s6757_s17 + $0xb0] sm:$0xff]  ;;  %v187_v21 = vld [vmem:[%s6757_s17 + $0xc0] sm:$0xff]  ;;  %v188_v22 = vld [vmem:[%s6757_s17 + $0xc8] sm:$0xff]  ;;  %v6830_v38 = vmul.f32 %v6762_v0, %v183_v13  ;;  %v6833_v39 = vmul.f32 %v6762_v0, %v184_v14  ;;  %v6836_v40 = vmul.f32 %v6762_v0, %v185_v15 }
  0x19   : > { %v189_v27 = vld [vmem:[%s6757_s17 + $0xd8] sm:$0xff]  ;;  %v190_v28 = vld [vmem:[%s6757_s17 + $0xe0] sm:$0xff]  ;;  %v191_v29 = vld [vmem:[%s6757_s17 + $0xf0] sm:$0xff]  ;;  %v6839_v41 = vmul.f32 %v6762_v0, %v186_v20  ;;  %v6845_v45 = vmul.f32 %v6762_v0, %v187_v21  ;;  %v6848_v46 = vmul.f32 %v6762_v0, %v188_v22 }
  0x1a   : > { %v192_v35 = vld [vmem:[%s6757_s17 + $0xf8] sm:$0xff]  ;;  %v193_v36 = vld [vmem:[%s6757_s17 + $0x108] sm:$0xff]  ;;  %v194_v37 = vld [vmem:[%s6757_s17 + $0x110] sm:$0xff]  ;;  %v6851_v47 = vmul.f32 %v6762_v0, %v189_v27  ;;  %v6854_v48 = vmul.f32 %v6762_v0, %v190_v28  ;;  %v6860_v52 = vmul.f32 %v6762_v0, %v191_v29 }
  0x1b   : > { %v195_v42 = vld [vmem:[%s6757_s17 + $0x120] sm:$0xff]  ;;  %v196_v43 = vld [vmem:[%s6757_s17 + $0x128] sm:$0xff]  ;;  %v197_v44 = vld [vmem:[%s6757_s17 + $0x138] sm:$0xff]  ;;  %v6863_v53 = vmul.f32 %v6762_v0, %v192_v35  ;;  %v6866_v54 = vmul.f32 %v6762_v0, %v193_v36  ;;  %v6869_v55 = vmul.f32 %v6762_v0, %v194_v37 }
  0x1c   : > { %v198_v49 = vld [vmem:[%s6757_s17 + $0x140] sm:$0xff]  ;;  %v199_v50 = vld [vmem:[%s6757_s17 + $0x150] sm:$0xff]  ;;  %v200_v51 = vld [vmem:[%s6757_s17 + $0x158] sm:$0xff]  ;;  %v6874_v58 = vmul.f32 %v6762_v0, %v195_v42  ;;  %v6877_v59 = vmul.f32 %v6762_v0, %v196_v43  ;;  %v6880_v60 = vmul.f32 %v6762_v0, %v197_v44 }
  0x1d   : > { %v201_v56 = vld [vmem:[%s6757_s17 + $0x168] sm:$0xff]  ;;  %v202_v57 = vld [vmem:[%s6757_s17 + $0x170] sm:$0xff]  ;;  %v6883_v61 = vmul.f32 %v6762_v0, %v198_v49  ;;  %v6887_v63 = vmul.f32 %v6762_v0, %v199_v50  ;;  %v6890_v1 = vmul.f32 %v6762_v0, %v200_v51  ;;  %v274_v4 = vld [vmem:[%s6757_s17 + $0x19] sm:$0xff] }
  0x1e   : > { %v272_v62 = vld [vmem:[%s6757_s17 + $0x1] sm:$0xff]  ;;  %v6893_v2 = vmul.f32 %v6762_v0, %v201_v56  ;;  %v273_v3 = vld [vmem:[%s6757_s17 + $0x9] sm:$0xff]  ;;  %v6900_v7 = vmul.f32 %v6762_v0, %v202_v57  ;;  %v276_v8 = vld [vmem:[%s6757_s17 + $0x31] sm:$0xff]  ;;  %v311_v12 = vmul.f32 %v6824_v34, %v274_v4 }
  0x1f   : > { %v275_v5 = vld [vmem:[%s6757_s17 + $0x21] sm:$0xff]  ;;  %v309_v6 = vmul.f32 %v6824_v34, %v272_v62  ;;  %v277_v9 = vld [vmem:[%s6757_s17 + $0x39] sm:$0xff]  ;;  %v278_v10 = vld [vmem:[%s6757_s17 + $0x49] sm:$0xff]  ;;  %v310_v11 = vmul.f32 %v6824_v34, %v273_v3  ;;  %v313_v21 = vmul.f32 %v6824_v34, %v276_v8 }
  0x20   : > { %v312_v13 = vmul.f32 %v6824_v34, %v275_v5  ;;  %v279_v14 = vld [vmem:[%s6757_s17 + $0x51] sm:$0xff]  ;;  %v280_v15 = vld [vmem:[%s6757_s17 + $0x61] sm:$0xff]  ;;  %v281_v20 = vld [vmem:[%s6757_s17 + $0x69] sm:$0xff]  ;;  %v314_v0 = vmul.f32 %v6824_v34, %v277_v9  ;;  %v315_v22 = vmul.f32 %v6824_v34, %v278_v10  ;;  %v6933_v57 = vadd.f32 %v311_v12, %v6786_v18 }
  0x21   : > { %v6915_v27 = vadd.f32 %v309_v6, %v6780_v16  ;;  %v282_v28 = vld [vmem:[%s6757_s17 + $0x79] sm:$0xff]  ;;  %v283_v29 = vld [vmem:[%s6757_s17 + $0x81] sm:$0xff]  ;;  %v284_v35 = vld [vmem:[%s6757_s17 + $0x91] sm:$0xff]  ;;  %v316_v36 = vmul.f32 %v6824_v34, %v279_v14  ;;  %v317_v37 = vmul.f32 %v6824_v34, %v280_v15  ;;  %v318_v42 = vmul.f32 %v6824_v34, %v281_v20 }
  0x22   : > { %v6924_v43 = vadd.f32 %v310_v11, %v6783_v17  ;;  %v285_v44 = vld [vmem:[%s6757_s17 + $0x99] sm:$0xff]  ;;  %v286_v16 = vld [vmem:[%s6757_s17 + $0xa9] sm:$0xff]  ;;  %v287_v49 = vld [vmem:[%s6757_s17 + $0xb1] sm:$0xff]  ;;  %v319_v50 = vmul.f32 %v6824_v34, %v282_v28  ;;  %v320_v51 = vmul.f32 %v6824_v34, %v283_v29  ;;  %v321_v56 = vmul.f32 %v6824_v34, %v284_v35 }
  0x23   : > { %v288_v62 = vld [vmem:[%s6757_s17 + $0xc1] sm:$0xff]  ;;  %v289_v17 = vld [vmem:[%s6757_s17 + $0xc9] sm:$0xff]  ;;  %v290_v3 = vld [vmem:[%s6757_s17 + $0xd9] sm:$0xff]  ;;  %v322_v4 = vmul.f32 %v6824_v34, %v285_v44  ;;  %v323_v5 = vmul.f32 %v6824_v34, %v286_v16  ;;  %v324_v6 = vmul.f32 %v6824_v34, %v287_v49  ;;  %v6942_v8 = vadd.f32 %v312_v13, %v6789_v19 }
  0x24   : > { %v291_v9 = vld [vmem:[%s6757_s17 + $0xe1] sm:$0xff]  ;;  %v292_v18 = vld [vmem:[%s6757_s17 + $0xf1] sm:$0xff]  ;;  %v293_v10 = vld [vmem:[%s6757_s17 + $0xf9] sm:$0xff]  ;;  %v325_v11 = vmul.f32 %v6824_v34, %v288_v62  ;;  %v326_v12 = vmul.f32 %v6824_v34, %v289_v17  ;;  %v327_v14 = vmul.f32 %v6824_v34, %v290_v3  ;;  %v6951_v15 = vadd.f32 %v313_v21, %v6795_v23 }
  0x25   : > { %v294_v20 = vld [vmem:[%s6757_s17 + $0x109] sm:$0xff]  ;;  %v295_v19 = vld [vmem:[%s6757_s17 + $0x111] sm:$0xff]  ;;  %v296_v13 = vld [vmem:[%s6757_s17 + $0x121] sm:$0xff]  ;;  %v328_v28 = vmul.f32 %v6824_v34, %v291_v9  ;;  %v329_v29 = vmul.f32 %v6824_v34, %v292_v18  ;;  %v330_v35 = vmul.f32 %v6824_v34, %v293_v10  ;;  %v6960_v44 = vadd.f32 %v314_v0, %v6798_v24 }
  0x26   : > { %13468 = vst [vmem:[#allocation2_spill] sm:$0xff] %v6951_v15  ;;  %v297_v16 = vld [vmem:[%s6757_s17 + $0x129] sm:$0xff]  ;;  %v298_v49 = vld [vmem:[%s6757_s17 + $0x139] sm:$0xff]  ;;  %v299_v62 = vld [vmem:[%s6757_s17 + $0x141] sm:$0xff]  ;;  %v331_v23 = vmul.f32 %v6824_v34, %v294_v20  ;;  %v332_v21 = vmul.f32 %v6824_v34, %v295_v19  ;;  %v333_v17 = vmul.f32 %v6824_v34, %v296_v13  ;;  %v6969_v3 = vadd.f32 %v315_v22, %v6801_v25 }
  0x27   : > { %v300_v9 = vld [vmem:[%s6757_s17 + $0x151] sm:$0xff]  ;;  %v301_v18 = vld [vmem:[%s6757_s17 + $0x159] sm:$0xff]  ;;  %v302_v15 = vld [vmem:[%s6757_s17 + $0x169] sm:$0xff]  ;;  %v334_v10 = vmul.f32 %v6824_v34, %v297_v16  ;;  %v335_v24 = vmul.f32 %v6824_v34, %v298_v49  ;;  %v336_v0 = vmul.f32 %v6824_v34, %v299_v62  ;;  %v6978_v20 = vadd.f32 %v316_v36, %v6804_v26 }
  0x28   : > { %v303_v19 = vld [vmem:[%s6757_s17 + $0x171] sm:$0xff]  ;;  %v337_v25 = vmul.f32 %v6824_v34, %v300_v9  ;;  %v338_v22 = vmul.f32 %v6824_v34, %v301_v18  ;;  %v339_v13 = vmul.f32 %v6824_v34, %v302_v15  ;;  %v6985_v16 = vadd.f32 %v317_v37, %v6810_v30 }
  0x29   : > { %v340_v49 = vmul.f32 %v6824_v34, %v303_v19  ;;  %v6989_v62 = vadd.f32 %v318_v42, %v6813_v31  ;;  %v6992_v26 = vadd.f32 %v319_v50, %v6816_v32  ;;  %v6995_v36 = vadd.f32 %v320_v51, %v6819_v33  ;;  %v373_v32 = vld [vmem:[%s6757_s17 + $0x2] sm:$0xff]  ;;  %v374_v37 = vld [vmem:[%s6757_s17 + $0xa] sm:$0xff]  ;;  %v375_v42 = vld [vmem:[%s6757_s17 + $0x1a] sm:$0xff] }
  0x2a   : > { %v6998_v9 = vadd.f32 %v321_v56, %v6830_v38  ;;  %v7001_v30 = vadd.f32 %v322_v4, %v6833_v39  ;;  %v7004_v34 = vadd.f32 %v323_v5, %v6836_v40  ;;  %v7007_v31 = vadd.f32 %v324_v6, %v6839_v41  ;;  %v376_v33 = vld [vmem:[%s6757_s17 + $0x22] sm:$0xff]  ;;  %v377_v51 = vld [vmem:[%s6757_s17 + $0x32] sm:$0xff]  ;;  %v378_v56 = vld [vmem:[%s6757_s17 + $0x3a] sm:$0xff] }
  0x2b   : > { %v7016_v38 = vld [vmem:[%s13465_s1 + $0x2] ss:$0 sm:$0xff]  ;;  %v7019_v39 = vadd.f32 %v325_v11, %v6845_v45  ;;  %v7022_v40 = vadd.f32 %v326_v12, %v6848_v46  ;;  %v7025_v41 = vadd.f32 %v327_v14, %v6851_v47  ;;  %v7028_v50 = vadd.f32 %v328_v28, %v6854_v48  ;;  %v379_v4 = vld [vmem:[%s6757_s17 + $0x4a] sm:$0xff]  ;;  %v380_v5 = vld [vmem:[%s6757_s17 + $0x52] sm:$0xff] }
  0x2c   : > { %v7035_v6 = vadd.f32 %v329_v29, %v6860_v52  ;;  %v7038_v45 = vadd.f32 %v330_v35, %v6863_v53  ;;  %v7041_v46 = vadd.f32 %v331_v23, %v6866_v54  ;;  %v7044_v47 = vadd.f32 %v332_v21, %v6869_v55  ;;  %v381_v48 = vld [vmem:[%s6757_s17 + $0x62] sm:$0xff]  ;;  %v382_v11 = vld [vmem:[%s6757_s17 + $0x6a] sm:$0xff]  ;;  %v383_v12 = vld [vmem:[%s6757_s17 + $0x7a] sm:$0xff] }
  0x2d   : > { %v7050_v52 = vadd.f32 %v333_v17, %v6874_v58  ;;  %v7053_v53 = vadd.f32 %v334_v10, %v6877_v59  ;;  %v7056_v54 = vadd.f32 %v335_v24, %v6880_v60  ;;  %v7059_v55 = vadd.f32 %v336_v0, %v6883_v61  ;;  %v384_v14 = vld [vmem:[%s6757_s17 + $0x82] sm:$0xff]  ;;  %v385_v15 = vld [vmem:[%s6757_s17 + $0x92] sm:$0xff]  ;;  %v386_v28 = vld [vmem:[%s6757_s17 + $0x9a] sm:$0xff] }
  0x2e   : > { %13469 = vst [vmem:[#allocation3_spill] sm:$0xff] %v7041_v46  ;;  %13470 = vst [vmem:[#allocation4_spill] sm:$0xff] %v7044_v47  ;;  %v7065_v29 = vadd.f32 %v337_v25, %v6887_v63  ;;  %v7068_v58 = vadd.f32 %v338_v22, %v6890_v1  ;;  %v7071_v59 = vadd.f32 %v339_v13, %v6893_v2  ;;  %v387_v61 = vld [vmem:[%s6757_s17 + $0xaa] sm:$0xff]  ;;  %v388_v35 = vld [vmem:[%s6757_s17 + $0xb2] sm:$0xff] }
  0x2f   : > { %13471 = vst [vmem:[#allocation5_spill] sm:$0xff] %v7050_v52  ;;  %13472 = vst [vmem:[#allocation6_spill] sm:$0xff] %v7053_v53  ;;  %v7074_v60 = vadd.f32 %v340_v49, %v6900_v7  ;;  %v389_v23 = vld [vmem:[%s6757_s17 + $0xc2] sm:$0xff]  ;;  %v390_v21 = vld [vmem:[%s6757_s17 + $0xca] sm:$0xff]  ;;  %v410_v18 = vmul.f32 %v7016_v38, %v373_v32  ;;  %v411_v1 = vmul.f32 %v7016_v38, %v374_v37 }
  0x30   : > { %13473 = vst [vmem:[#allocation7_spill] sm:$0xff] %v7056_v54  ;;  %13474 = vst [vmem:[#allocation8_spill] sm:$0xff] %v7059_v55  ;;  %v391_v17 = vld [vmem:[%s6757_s17 + $0xda] sm:$0xff]  ;;  %v392_v63 = vld [vmem:[%s6757_s17 + $0xe2] sm:$0xff]  ;;  %v412_v10 = vmul.f32 %v7016_v38, %v375_v42  ;;  %v413_v2 = vmul.f32 %v7016_v38, %v376_v33  ;;  %v414_v19 = vmul.f32 %v7016_v38, %v377_v51 }
  0x31   : > { %13475 = vst [vmem:[#allocation9_spill] sm:$0xff] %v7065_v29  ;;  %13476 = vst [vmem:[#allocation10_spill] sm:$0xff] %v7068_v58  ;;  %v393_v7 = vld [vmem:[%s6757_s17 + $0xf2] sm:$0xff]  ;;  %v394_v24 = vld [vmem:[%s6757_s17 + $0xfa] sm:$0xff]  ;;  %v415_v25 = vmul.f32 %v7016_v38, %v378_v56  ;;  %v416_v22 = vmul.f32 %v7016_v38, %v379_v4  ;;  %v417_v13 = vmul.f32 %v7016_v38, %v380_v5 }
  0x32   : > { %13477 = vst [vmem:[#allocation11_spill] sm:$0xff] %v7071_v59  ;;  %13478 = vst [vmem:[#allocation12_spill] sm:$0xff] %v7074_v60  ;;  %v395_v0 = vld [vmem:[%s6757_s17 + $0x10a] sm:$0xff]  ;;  %v396_v49 = vld [vmem:[%s6757_s17 + $0x112] sm:$0xff]  ;;  %v418_v42 = vmul.f32 %v7016_v38, %v381_v48  ;;  %v419_v33 = vmul.f32 %v7016_v38, %v382_v11  ;;  %v420_v60 = vmul.f32 %v7016_v38, %v383_v12 }
  0x33   : > { %v397_v32 = vld [vmem:[%s6757_s17 + $0x122] sm:$0xff]  ;;  %v398_v37 = vld [vmem:[%s6757_s17 + $0x12a] sm:$0xff]  ;;  %v421_v51 = vmul.f32 %v7016_v38, %v384_v14  ;;  %v399_v59 = vld [vmem:[%s6757_s17 + $0x13a] sm:$0xff]  ;;  %v422_v4 = vmul.f32 %v7016_v38, %v385_v15  ;;  %v423_v5 = vmul.f32 %v7016_v38, %v386_v28  ;;  %v424_v29 = vmul.f32 %v7016_v38, %v387_v61 }
  0x34   : > { %v400_v56 = vld [vmem:[%s6757_s17 + $0x142] sm:$0xff]  ;;  %v401_v58 = vld [vmem:[%s6757_s17 + $0x152] sm:$0xff]  ;;  %v425_v55 = vmul.f32 %v7016_v38, %v388_v35  ;;  %v402_v54 = vld [vmem:[%s6757_s17 + $0x15a] sm:$0xff]  ;;  %v426_v11 = vmul.f32 %v7016_v38, %v389_v23  ;;  %v427_v12 = vmul.f32 %v7016_v38, %v390_v21  ;;  %v428_v14 = vmul.f32 %v7016_v38, %v391_v17 }
  0x35   : > { %v403_v53 = vld [vmem:[%s6757_s17 + $0x16a] sm:$0xff]  ;;  %v404_v48 = vld [vmem:[%s6757_s17 + $0x172] sm:$0xff]  ;;  %v429_v52 = vmul.f32 %v7016_v38, %v392_v63  ;;  %v430_v47 = vmul.f32 %v7016_v38, %v393_v7  ;;  %v431_v15 = vmul.f32 %v7016_v38, %v394_v24  ;;  %v432_v28 = vmul.f32 %v7016_v38, %v395_v0 }
  0x36   : > { %v433_v61 = vmul.f32 %v7016_v38, %v396_v49  ;;  %v434_v35 = vmul.f32 %v7016_v38, %v397_v32  ;;  %v435_v46 = vmul.f32 %v7016_v38, %v398_v37  ;;  %v436_v23 = vmul.f32 %v7016_v38, %v399_v59  ;;  %v484_v32 = vld [vmem:[%s6757_s17 + $0x7b] sm:$0xff] }
  0x37   : > { %v437_v21 = vmul.f32 %v7016_v38, %v400_v56  ;;  %v438_v17 = vmul.f32 %v7016_v38, %v401_v58  ;;  %v439_v63 = vmul.f32 %v7016_v38, %v402_v54  ;;  %v440_v7 = vmul.f32 %v7016_v38, %v403_v53  ;;  %v13479_v54 = vld [vmem:[#allocation2_spill] sm:$0xff]  ;;  %v13485_v37 = vld [vmem:[#allocation5_spill] sm:$0xff] }
  0x38   : > { %v441_v24 = vmul.f32 %v7016_v38, %v404_v48  ;;  %v7127_v0 = vadd.f32 %v410_v18, %v6915_v27  ;;  %v7130_v49 = vadd.f32 %v411_v1, %v6924_v43  ;;  %v7133_v59 = vadd.f32 %v412_v10, %v6933_v57  ;;  %v476_v1 = vld [vmem:[%s6757_s17 + $0x1b] sm:$0xff] }
  0x39   : > { %v7136_v58 = vadd.f32 %v413_v2, %v6942_v8  ;;  %v7139_v53 = vadd.f32 %v414_v19, %v13479_v54  ;;  %v7142_v38 = vadd.f32 %v415_v25, %v6960_v44  ;;  %v7145_v27 = vadd.f32 %v416_v22, %v6969_v3  ;;  %v479_v10 = vld [vmem:[%s6757_s17 + $0x3b] sm:$0xff]  ;;  %v480_v2 = vld [vmem:[%s6757_s17 + $0x4b] sm:$0xff]  ;;  %v481_v19 = vld [vmem:[%s6757_s17 + $0x53] sm:$0xff] }
  0x3a   : > { %v7148_v43 = vadd.f32 %v417_v13, %v6978_v20  ;;  %v7151_v57 = vadd.f32 %v418_v42, %v6985_v16  ;;  %v7154_v18 = vadd.f32 %v419_v33, %v6989_v62  ;;  %v7157_v8 = vadd.f32 %v420_v60, %v6992_v26  ;;  %v474_v26 = vld [vmem:[%s6757_s17 + $0x3] sm:$0xff]  ;;  %v475_v60 = vld [vmem:[%s6757_s17 + $0xb] sm:$0xff]  ;;  %v487_v48 = vld [vmem:[%s6757_s17 + $0x9b] sm:$0xff] }
  0x3b   : > { %v7160_v44 = vadd.f32 %v421_v51, %v6995_v36  ;;  %v7163_v3 = vadd.f32 %v422_v4, %v6998_v9  ;;  %v7166_v20 = vadd.f32 %v423_v5, %v7001_v30  ;;  %v7169_v16 = vadd.f32 %v424_v29, %v7004_v34  ;;  %v477_v36 = vld [vmem:[%s6757_s17 + $0x23] sm:$0xff]  ;;  %v478_v29 = vld [vmem:[%s6757_s17 + $0x33] sm:$0xff]  ;;  %v483_v13 = vld [vmem:[%s6757_s17 + $0x6b] sm:$0xff] }
  0x3c   : > { %v7172_v62 = vadd.f32 %v425_v55, %v7007_v31  ;;  %v7181_v9 = vld [vmem:[%s13465_s1 + $0x3] ss:$0 sm:$0xff]  ;;  %v7184_v30 = vadd.f32 %v426_v11, %v7019_v39  ;;  %v7187_v34 = vadd.f32 %v427_v12, %v7022_v40  ;;  %v7190_v31 = vadd.f32 %v428_v14, %v7025_v41  ;;  %v13481_v40 = vld [vmem:[#allocation3_spill] sm:$0xff]  ;;  %v13483_v41 = vld [vmem:[#allocation4_spill] sm:$0xff] }
  0x3d   : > { %v7193_v55 = vadd.f32 %v429_v52, %v7028_v50  ;;  %v7200_v25 = vadd.f32 %v430_v47, %v7035_v6  ;;  %v7203_v39 = vadd.f32 %v431_v15, %v7038_v45  ;;  %v7206_v22 = vadd.f32 %v432_v28, %v13481_v40  ;;  %v482_v52 = vld [vmem:[%s6757_s17 + $0x63] sm:$0xff]  ;;  %v13491_v51 = vld [vmem:[#allocation8_spill] sm:$0xff]  ;;  %v13493_v11 = vld [vmem:[#allocation9_spill] sm:$0xff] }
  0x3e   : > { %v7209_v50 = vadd.f32 %v433_v61, %v13483_v41  ;;  %v7215_v6 = vadd.f32 %v434_v35, %v13485_v37  ;;  %v13487_v47 = vld [vmem:[#allocation6_spill] sm:$0xff]  ;;  %v13489_v42 = vld [vmem:[#allocation7_spill] sm:$0xff]  ;;  %v7224_v56 = vadd.f32 %v437_v21, %v13491_v51  ;;  %v486_v5 = vld [vmem:[%s6757_s17 + $0x93] sm:$0xff]  ;;  %v7230_v12 = vadd.f32 %v438_v17, %v13493_v11 }
  0x3f   : > { %13480 = vst [vmem:[#allocation2_spill] sm:$0xff] %v7203_v39  ;;  %13482 = vst [vmem:[#allocation3_spill] sm:$0xff] %v7206_v22  ;;  %v7218_v45 = vadd.f32 %v435_v46, %v13487_v47  ;;  %v7221_v33 = vadd.f32 %v436_v23, %v13489_v42  ;;  %v485_v4 = vld [vmem:[%s6757_s17 + $0x83] sm:$0xff]  ;;  %v13499_v61 = vld [vmem:[#allocation12_spill] sm:$0xff]  ;;  %v511_v37 = vmul.f32 %v7181_v9, %v474_v26 }
  0x40   : > { %13484 = vst [vmem:[#allocation4_spill] sm:$0xff] %v7209_v50  ;;  %13486 = vst [vmem:[#allocation5_spill] sm:$0xff] %v7215_v6  ;;  %v13495_v14 = vld [vmem:[#allocation10_spill] sm:$0xff]  ;;  %v13497_v46 = vld [vmem:[#allocation11_spill] sm:$0xff]  ;;  %v7239_v35 = vadd.f32 %v441_v24, %v13499_v61  ;;  %v513_v47 = vmul.f32 %v7181_v9, %v476_v1  ;;  %v515_v11 = vmul.f32 %v7181_v9, %v478_v29 }
  0x41   : > { %13488 = vst [vmem:[#allocation6_spill] sm:$0xff] %v7218_v45  ;;  %13490 = vst [vmem:[#allocation7_spill] sm:$0xff] %v7221_v33  ;;  %v7233_v15 = vadd.f32 %v439_v63, %v13495_v14  ;;  %v7236_v28 = vadd.f32 %v440_v7, %v13497_v46  ;;  %v488_v23 = vld [vmem:[%s6757_s17 + $0xab] sm:$0xff]  ;;  %v489_v21 = vld [vmem:[%s6757_s17 + $0xb3] sm:$0xff]  ;;  %v512_v63 = vmul.f32 %v7181_v9, %v475_v60 }
  0x42   : > { %13492 = vst [vmem:[#allocation8_spill] sm:$0xff] %v7224_v56  ;;  %13494 = vst [vmem:[#allocation9_spill] sm:$0xff] %v7230_v12  ;;  %v490_v54 = vld [vmem:[%s6757_s17 + $0xc3] sm:$0xff]  ;;  %v491_v40 = vld [vmem:[%s6757_s17 + $0xcb] sm:$0xff]  ;;  %v514_v7 = vmul.f32 %v7181_v9, %v477_v36  ;;  %v516_v14 = vmul.f32 %v7181_v9, %v479_v10  ;;  %v517_v46 = vmul.f32 %v7181_v9, %v480_v2 }
  0x43   : > { %13496 = vst [vmem:[#allocation10_spill] sm:$0xff] %v7233_v15  ;;  %13498 = vst [vmem:[#allocation11_spill] sm:$0xff] %v7236_v28  ;;  %v492_v41 = vld [vmem:[%s6757_s17 + $0xdb] sm:$0xff]  ;;  %v493_v17 = vld [vmem:[%s6757_s17 + $0xe3] sm:$0xff]  ;;  %v518_v26 = vmul.f32 %v7181_v9, %v481_v19  ;;  %v519_v36 = vmul.f32 %v7181_v9, %v482_v52  ;;  %v521_v28 = vmul.f32 %v7181_v9, %v484_v32 }
  0x44   : > { %13500 = vst [vmem:[#allocation12_spill] sm:$0xff] %v7239_v35  ;;  %v494_v24 = vld [vmem:[%s6757_s17 + $0xf3] sm:$0xff]  ;;  %v495_v42 = vld [vmem:[%s6757_s17 + $0xfb] sm:$0xff]  ;;  %v496_v51 = vld [vmem:[%s6757_s17 + $0x10b] sm:$0xff]  ;;  %v520_v35 = vmul.f32 %v7181_v9, %v483_v13  ;;  %v522_v29 = vmul.f32 %v7181_v9, %v485_v4  ;;  %v523_v2 = vmul.f32 %v7181_v9, %v486_v5  ;;  %v524_v19 = vmul.f32 %v7181_v9, %v487_v48 }
  0x45   : > { %v497_v60 = vld [vmem:[%s6757_s17 + $0x113] sm:$0xff]  ;;  %v498_v1 = vld [vmem:[%s6757_s17 + $0x123] sm:$0xff]  ;;  %v499_v61 = vld [vmem:[%s6757_s17 + $0x12b] sm:$0xff]  ;;  %v525_v56 = vmul.f32 %v7181_v9, %v488_v23  ;;  %v526_v33 = vmul.f32 %v7181_v9, %v489_v21  ;;  %v527_v13 = vmul.f32 %v7181_v9, %v490_v54  ;;  %v528_v32 = vmul.f32 %v7181_v9, %v491_v40 }
  0x46   : > { %v500_v15 = vld [vmem:[%s6757_s17 + $0x13b] sm:$0xff]  ;;  %v501_v10 = vld [vmem:[%s6757_s17 + $0x143] sm:$0xff]  ;;  %v502_v12 = vld [vmem:[%s6757_s17 + $0x153] sm:$0xff]  ;;  %v529_v4 = vmul.f32 %v7181_v9, %v492_v41  ;;  %v530_v50 = vmul.f32 %v7181_v9, %v493_v17  ;;  %v531_v22 = vmul.f32 %v7181_v9, %v494_v24  ;;  %v532_v5 = vmul.f32 %v7181_v9, %v495_v42 }
  0x47   : > { %v503_v45 = vld [vmem:[%s6757_s17 + $0x15b] sm:$0xff]  ;;  %v504_v6 = vld [vmem:[%s6757_s17 + $0x16b] sm:$0xff]  ;;  %v505_v52 = vld [vmem:[%s6757_s17 + $0x173] sm:$0xff]  ;;  %v533_v48 = vmul.f32 %v7181_v9, %v496_v51  ;;  %v534_v23 = vmul.f32 %v7181_v9, %v497_v60  ;;  %v535_v21 = vmul.f32 %v7181_v9, %v498_v1  ;;  %v536_v39 = vmul.f32 %v7181_v9, %v499_v61 }
  0x48   : > { %v537_v54 = vmul.f32 %v7181_v9, %v500_v15  ;;  %v538_v40 = vmul.f32 %v7181_v9, %v501_v10  ;;  %v539_v41 = vmul.f32 %v7181_v9, %v502_v12  ;;  %v540_v17 = vmul.f32 %v7181_v9, %v503_v45  ;;  %v13511_v61 = vld [vmem:[#allocation7_spill] sm:$0xff] }
  0x49   : > { %v541_v24 = vmul.f32 %v7181_v9, %v504_v6  ;;  %v542_v42 = vmul.f32 %v7181_v9, %v505_v52  ;;  %v7292_v51 = vadd.f32 %v511_v37, %v7127_v0  ;;  %v7295_v60 = vadd.f32 %v512_v63, %v7130_v49  ;;  %v581_v37 = vld [vmem:[%s6757_s17 + $0x4c] sm:$0xff]  ;;  %v582_v63 = vld [vmem:[%s6757_s17 + $0x54] sm:$0xff]  ;;  %v588_v52 = vld [vmem:[%s6757_s17 + $0x9c] sm:$0xff] }
  0x4a   : > { %v7298_v15 = vadd.f32 %v513_v47, %v7133_v59  ;;  %v7301_v12 = vadd.f32 %v514_v7, %v7136_v58  ;;  %v7304_v6 = vadd.f32 %v515_v11, %v7139_v53  ;;  %v7307_v9 = vadd.f32 %v516_v14, %v7142_v38  ;;  %v584_v14 = vld [vmem:[%s6757_s17 + $0x6c] sm:$0xff] }
  0x4b   : > { %v7310_v0 = vadd.f32 %v517_v46, %v7145_v27  ;;  %v7313_v49 = vadd.f32 %v518_v26, %v7148_v43  ;;  %v7316_v59 = vadd.f32 %v519_v36, %v7151_v57  ;;  %v7319_v45 = vadd.f32 %v520_v35, %v7154_v18  ;;  %v575_v18 = vld [vmem:[%s6757_s17 + $0x4] sm:$0xff]  ;;  %v580_v35 = vld [vmem:[%s6757_s17 + $0x3c] sm:$0xff] }
  0x4c   : > { %v7322_v58 = vadd.f32 %v521_v28, %v7157_v8  ;;  %v7325_v53 = vadd.f32 %v522_v29, %v7160_v44  ;;  %v7328_v38 = vadd.f32 %v523_v2, %v7163_v3  ;;  %v7331_v27 = vadd.f32 %v524_v19, %v7166_v20  ;;  %v576_v8 = vld [vmem:[%s6757_s17 + $0xc] sm:$0xff]  ;;  %v577_v28 = vld [vmem:[%s6757_s17 + $0x1c] sm:$0xff]  ;;  %v578_v44 = vld [vmem:[%s6757_s17 + $0x24] sm:$0xff] }
  0x4d   : > { %v7334_v43 = vadd.f32 %v525_v56, %v7169_v16  ;;  %v7337_v57 = vadd.f32 %v526_v33, %v7172_v62  ;;  %v7346_v3 = vld [vmem:[%s13465_s1 + $0x4] ss:$0 sm:$0xff]  ;;  %v7349_v20 = vadd.f32 %v527_v13, %v7184_v30  ;;  %v7352_v16 = vadd.f32 %v528_v32, %v7187_v34  ;;  %v579_v56 = vld [vmem:[%s6757_s17 + $0x34] sm:$0xff]  ;;  %v13503_v34 = vld [vmem:[#allocation3_spill] sm:$0xff] }
  0x4e   : > { %v7355_v62 = vadd.f32 %v529_v4, %v7190_v31  ;;  %v7358_v33 = vadd.f32 %v530_v50, %v7193_v55  ;;  %v7365_v47 = vadd.f32 %v531_v22, %v7200_v25  ;;  %v13501_v30 = vld [vmem:[#allocation2_spill] sm:$0xff]  ;;  %v7371_v11 = vadd.f32 %v533_v48, %v13503_v34  ;;  %v13505_v31 = vld [vmem:[#allocation4_spill] sm:$0xff]  ;;  %v13507_v26 = vld [vmem:[#allocation5_spill] sm:$0xff] }
  0x4f   : > { %v7368_v7 = vadd.f32 %v532_v5, %v13501_v30  ;;  %v7374_v55 = vadd.f32 %v534_v23, %v13505_v31  ;;  %v583_v50 = vld [vmem:[%s6757_s17 + $0x64] sm:$0xff]  ;;  %v585_v46 = vld [vmem:[%s6757_s17 + $0x7c] sm:$0xff]  ;;  %v7380_v25 = vadd.f32 %v535_v21, %v13507_v26  ;;  %v7386_v36 = vadd.f32 %v537_v54, %v13511_v61  ;;  %v13513_v29 = vld [vmem:[#allocation8_spill] sm:$0xff] }
  0x50   : > { %13504 = vst [vmem:[#allocation3_spill] sm:$0xff] %v7371_v11  ;;  %v13509_v22 = vld [vmem:[#allocation6_spill] sm:$0xff]  ;;  %v7389_v10 = vadd.f32 %v538_v40, %v13513_v29  ;;  %v587_v19 = vld [vmem:[%s6757_s17 + $0x94] sm:$0xff]  ;;  %v589_v54 = vld [vmem:[%s6757_s17 + $0xac] sm:$0xff]  ;;  %v612_v26 = vmul.f32 %v7346_v3, %v575_v18  ;;  %v619_v18 = vmul.f32 %v7346_v3, %v582_v63  ;;  %v625_v63 = vmul.f32 %v7346_v3, %v588_v52 }
  0x51   : > { %13502 = vst [vmem:[#allocation2_spill] sm:$0xff] %v7368_v7  ;;  %13506 = vst [vmem:[#allocation4_spill] sm:$0xff] %v7374_v55  ;;  %v7383_v1 = vadd.f32 %v536_v39, %v13509_v22  ;;  %v586_v2 = vld [vmem:[%s6757_s17 + $0x84] sm:$0xff]  ;;  %v13515_v13 = vld [vmem:[#allocation9_spill] sm:$0xff]  ;;  %v614_v22 = vmul.f32 %v7346_v3, %v577_v28 }
  0x52   : > { %13508 = vst [vmem:[#allocation5_spill] sm:$0xff] %v7380_v25  ;;  %13512 = vst [vmem:[#allocation7_spill] sm:$0xff] %v7386_v36  ;;  %v7395_v32 = vadd.f32 %v539_v41, %v13515_v13  ;;  %v13517_v4 = vld [vmem:[#allocation10_spill] sm:$0xff]  ;;  %v13519_v39 = vld [vmem:[#allocation11_spill] sm:$0xff]  ;;  %v616_v13 = vmul.f32 %v7346_v3, %v579_v56  ;;  %v623_v56 = vmul.f32 %v7346_v3, %v586_v2 }
  0x53   : > { %13510 = vst [vmem:[#allocation6_spill] sm:$0xff] %v7383_v1  ;;  %13514 = vst [vmem:[#allocation8_spill] sm:$0xff] %v7389_v10  ;;  %v7398_v5 = vadd.f32 %v540_v17, %v13517_v4  ;;  %v7401_v48 = vadd.f32 %v541_v24, %v13519_v39  ;;  %v13521_v23 = vld [vmem:[#allocation12_spill] sm:$0xff]  ;;  %v591_v30 = vld [vmem:[%s6757_s17 + $0xc4] sm:$0xff]  ;;  %v613_v17 = vmul.f32 %v7346_v3, %v576_v8 }
  0x54   : > { %13516 = vst [vmem:[#allocation9_spill] sm:$0xff] %v7395_v32  ;;  %v7404_v21 = vadd.f32 %v542_v42, %v13521_v23  ;;  %v590_v40 = vld [vmem:[%s6757_s17 + $0xb4] sm:$0xff]  ;;  %v592_v34 = vld [vmem:[%s6757_s17 + $0xcc] sm:$0xff]  ;;  %v593_v31 = vld [vmem:[%s6757_s17 + $0xdc] sm:$0xff]  ;;  %v615_v24 = vmul.f32 %v7346_v3, %v578_v44  ;;  %v617_v4 = vmul.f32 %v7346_v3, %v580_v35  ;;  %v618_v39 = vmul.f32 %v7346_v3, %v581_v37 }
  0x55   : > { %13518 = vst [vmem:[#allocation10_spill] sm:$0xff] %v7398_v5  ;;  %13520 = vst [vmem:[#allocation11_spill] sm:$0xff] %v7401_v48  ;;  %v594_v41 = vld [vmem:[%s6757_s17 + $0xe4] sm:$0xff]  ;;  %v595_v42 = vld [vmem:[%s6757_s17 + $0xf4] sm:$0xff]  ;;  %v620_v44 = vmul.f32 %v7346_v3, %v583_v50  ;;  %v622_v48 = vmul.f32 %v7346_v3, %v585_v46  ;;  %v624_v37 = vmul.f32 %v7346_v3, %v587_v19 }
  0x56   : > { %13522 = vst [vmem:[#allocation12_spill] sm:$0xff] %v7404_v21  ;;  %v596_v61 = vld [vmem:[%s6757_s17 + $0xfc] sm:$0xff]  ;;  %v597_v29 = vld [vmem:[%s6757_s17 + $0x10c] sm:$0xff]  ;;  %v598_v8 = vld [vmem:[%s6757_s17 + $0x114] sm:$0xff]  ;;  %v621_v21 = vmul.f32 %v7346_v3, %v584_v14  ;;  %v626_v10 = vmul.f32 %v7346_v3, %v589_v54  ;;  %v627_v36 = vmul.f32 %v7346_v3, %v590_v40  ;;  %v628_v14 = vmul.f32 %v7346_v3, %v591_v30 }
  0x57   : > { %v599_v28 = vld [vmem:[%s6757_s17 + $0x124] sm:$0xff]  ;;  %v600_v23 = vld [vmem:[%s6757_s17 + $0x12c] sm:$0xff]  ;;  %v601_v5 = vld [vmem:[%s6757_s17 + $0x13c] sm:$0xff]  ;;  %v629_v46 = vmul.f32 %v7346_v3, %v592_v34  ;;  %v630_v2 = vmul.f32 %v7346_v3, %v593_v31  ;;  %v631_v55 = vmul.f32 %v7346_v3, %v594_v41  ;;  %v632_v11 = vmul.f32 %v7346_v3, %v595_v42 }
  0x58   : > { %v602_v35 = vld [vmem:[%s6757_s17 + $0x144] sm:$0xff]  ;;  %v603_v32 = vld [vmem:[%s6757_s17 + $0x154] sm:$0xff]  ;;  %v604_v1 = vld [vmem:[%s6757_s17 + $0x15c] sm:$0xff]  ;;  %v633_v19 = vmul.f32 %v7346_v3, %v596_v61  ;;  %v634_v52 = vmul.f32 %v7346_v3, %v597_v29  ;;  %v635_v54 = vmul.f32 %v7346_v3, %v598_v8  ;;  %v636_v40 = vmul.f32 %v7346_v3, %v599_v28 }
  0x59   : > { %v605_v25 = vld [vmem:[%s6757_s17 + $0x16c] sm:$0xff]  ;;  %v606_v50 = vld [vmem:[%s6757_s17 + $0x174] sm:$0xff]  ;;  %v637_v7 = vmul.f32 %v7346_v3, %v600_v23  ;;  %v638_v30 = vmul.f32 %v7346_v3, %v601_v5  ;;  %v639_v34 = vmul.f32 %v7346_v3, %v602_v35  ;;  %v640_v31 = vmul.f32 %v7346_v3, %v603_v32 }
  0x5a   : > { %v641_v41 = vmul.f32 %v7346_v3, %v604_v1  ;;  %v642_v42 = vmul.f32 %v7346_v3, %v605_v25  ;;  %v643_v61 = vmul.f32 %v7346_v3, %v606_v50  ;;  %v7457_v29 = vadd.f32 %v612_v26, %v7292_v51  ;;  %v682_v26 = vld [vmem:[%s6757_s17 + $0x4d] sm:$0xff]  ;;  %v689_v50 = vld [vmem:[%s6757_s17 + $0x9d] sm:$0xff] }
  0x5b   : > { %v7460_v8 = vadd.f32 %v613_v17, %v7295_v60  ;;  %v7463_v5 = vadd.f32 %v614_v22, %v7298_v15  ;;  %v7466_v32 = vadd.f32 %v615_v24, %v7301_v12  ;;  %v7469_v25 = vadd.f32 %v616_v13, %v7304_v6  ;;  %v683_v17 = vld [vmem:[%s6757_s17 + $0x55] sm:$0xff]  ;;  %v13533_v23 = vld [vmem:[#allocation7_spill] sm:$0xff] }
  0x5c   : > { %v7472_v3 = vadd.f32 %v617_v4, %v7307_v9  ;;  %v7475_v51 = vadd.f32 %v618_v39, %v7310_v0  ;;  %v7478_v60 = vadd.f32 %v619_v18, %v7313_v49  ;;  %v7481_v15 = vadd.f32 %v620_v44, %v7316_v59  ;;  %v685_v4 = vld [vmem:[%s6757_s17 + $0x6d] sm:$0xff]  ;;  %v686_v39 = vld [vmem:[%s6757_s17 + $0x7d] sm:$0xff] }
  0x5d   : > { %v7484_v1 = vadd.f32 %v621_v21, %v7319_v45  ;;  %v7487_v12 = vadd.f32 %v622_v48, %v7322_v58  ;;  %v7490_v6 = vadd.f32 %v623_v56, %v7325_v53  ;;  %v7493_v9 = vadd.f32 %v624_v37, %v7328_v38  ;;  %v676_v45 = vld [vmem:[%s6757_s17 + $0x5] sm:$0xff]  ;;  %v677_v58 = vld [vmem:[%s6757_s17 + $0xd] sm:$0xff]  ;;  %v678_v48 = vld [vmem:[%s6757_s17 + $0x1d] sm:$0xff] }
  0x5e   : > { %v7496_v0 = vadd.f32 %v625_v63, %v7331_v27  ;;  %v7499_v49 = vadd.f32 %v626_v10, %v7334_v43  ;;  %v7502_v59 = vadd.f32 %v627_v36, %v7337_v57  ;;  %v679_v53 = vld [vmem:[%s6757_s17 + $0x25] sm:$0xff]  ;;  %v7514_v27 = vadd.f32 %v628_v14, %v7349_v20  ;;  %v680_v10 = vld [vmem:[%s6757_s17 + $0x35] sm:$0xff]  ;;  %v681_v21 = vld [vmem:[%s6757_s17 + $0x3d] sm:$0xff] }
  0x5f   : > { %v7511_v38 = vld [vmem:[%s13465_s1 + $0x5] ss:$0 sm:$0xff]  ;;  %v7517_v43 = vadd.f32 %v629_v46, %v7352_v16  ;;  %v7520_v57 = vadd.f32 %v630_v2, %v7355_v62  ;;  %v7523_v36 = vadd.f32 %v631_v55, %v7358_v33  ;;  %v7530_v22 = vadd.f32 %v632_v11, %v7365_v47  ;;  %v13525_v16 = vld [vmem:[#allocation3_spill] sm:$0xff]  ;;  %v13527_v62 = vld [vmem:[#allocation4_spill] sm:$0xff] }
  0x60   : > { %v13523_v20 = vld [vmem:[#allocation2_spill] sm:$0xff]  ;;  %v7536_v13 = vadd.f32 %v634_v52, %v13525_v16  ;;  %v7539_v33 = vadd.f32 %v635_v54, %v13527_v62  ;;  %v13529_v18 = vld [vmem:[#allocation5_spill] sm:$0xff]  ;;  %v7551_v44 = vadd.f32 %v638_v30, %v13533_v23  ;;  %v13535_v56 = vld [vmem:[#allocation8_spill] sm:$0xff] }
  0x61   : > { %v7533_v24 = vadd.f32 %v633_v19, %v13523_v20  ;;  %v684_v55 = vld [vmem:[%s6757_s17 + $0x65] sm:$0xff]  ;;  %v7545_v47 = vadd.f32 %v636_v40, %v13529_v18  ;;  %v7554_v35 = vadd.f32 %v639_v34, %v13535_v56  ;;  %v688_v63 = vld [vmem:[%s6757_s17 + $0x95] sm:$0xff]  ;;  %v690_v30 = vld [vmem:[%s6757_s17 + $0xad] sm:$0xff]  ;;  %v713_v18 = vmul.f32 %v7511_v38, %v676_v45 }
  0x62   : > { %13526 = vst [vmem:[#allocation3_spill] sm:$0xff] %v7536_v13  ;;  %13528 = vst [vmem:[#allocation4_spill] sm:$0xff] %v7539_v33  ;;  %v13531_v11 = vld [vmem:[#allocation6_spill] sm:$0xff]  ;;  %v13537_v14 = vld [vmem:[#allocation9_spill] sm:$0xff]  ;;  %v720_v45 = vmul.f32 %v7511_v38, %v683_v17  ;;  %v726_v17 = vmul.f32 %v7511_v38, %v689_v50 }
  0x63   : > { %13524 = vst [vmem:[#allocation2_spill] sm:$0xff] %v7533_v24  ;;  %13530 = vst [vmem:[#allocation5_spill] sm:$0xff] %v7545_v47  ;;  %v7548_v28 = vadd.f32 %v637_v7, %v13531_v11  ;;  %v687_v37 = vld [vmem:[%s6757_s17 + $0x85] sm:$0xff]  ;;  %v7560_v46 = vadd.f32 %v640_v31, %v13537_v14  ;;  %v13543_v54 = vld [vmem:[#allocation12_spill] sm:$0xff]  ;;  %v715_v11 = vmul.f32 %v7511_v38, %v678_v48 }
  0x64   : > { %13534 = vst [vmem:[#allocation7_spill] sm:$0xff] %v7551_v44  ;;  %13536 = vst [vmem:[#allocation8_spill] sm:$0xff] %v7554_v35  ;;  %v13539_v2 = vld [vmem:[#allocation10_spill] sm:$0xff]  ;;  %v13541_v7 = vld [vmem:[#allocation11_spill] sm:$0xff]  ;;  %v7569_v40 = vadd.f32 %v643_v61, %v13543_v54  ;;  %v717_v14 = vmul.f32 %v7511_v38, %v680_v10  ;;  %v724_v10 = vmul.f32 %v7511_v38, %v687_v37 }
  0x65   : > { %13532 = vst [vmem:[#allocation6_spill] sm:$0xff] %v7548_v28  ;;  %13538 = vst [vmem:[#allocation9_spill] sm:$0xff] %v7560_v46  ;;  %v7563_v19 = vadd.f32 %v641_v41, %v13539_v2  ;;  %v7566_v52 = vadd.f32 %v642_v42, %v13541_v7  ;;  %v691_v34 = vld [vmem:[%s6757_s17 + $0xb5] sm:$0xff]  ;;  %v692_v20 = vld [vmem:[%s6757_s17 + $0xc5] sm:$0xff]  ;;  %v714_v41 = vmul.f32 %v7511_v38, %v677_v58 }
  0x66   : > { %13544 = vst [vmem:[#allocation12_spill] sm:$0xff] %v7569_v40  ;;  %v693_v16 = vld [vmem:[%s6757_s17 + $0xcd] sm:$0xff]  ;;  %v694_v62 = vld [vmem:[%s6757_s17 + $0xdd] sm:$0xff]  ;;  %v695_v31 = vld [vmem:[%s6757_s17 + $0xe5] sm:$0xff]  ;;  %v716_v42 = vmul.f32 %v7511_v38, %v679_v53  ;;  %v718_v2 = vmul.f32 %v7511_v38, %v681_v21  ;;  %v719_v7 = vmul.f32 %v7511_v38, %v682_v26  ;;  %v721_v53 = vmul.f32 %v7511_v38, %v684_v55 }
  0x67   : > { %13540 = vst [vmem:[#allocation10_spill] sm:$0xff] %v7563_v19  ;;  %13542 = vst [vmem:[#allocation11_spill] sm:$0xff] %v7566_v52  ;;  %v696_v61 = vld [vmem:[%s6757_s17 + $0xf5] sm:$0xff]  ;;  %v697_v23 = vld [vmem:[%s6757_s17 + $0xfd] sm:$0xff]  ;;  %v722_v40 = vmul.f32 %v7511_v38, %v685_v4  ;;  %v723_v52 = vmul.f32 %v7511_v38, %v686_v39  ;;  %v725_v26 = vmul.f32 %v7511_v38, %v688_v63 }
  0x68   : > { %v698_v56 = vld [vmem:[%s6757_s17 + $0x10d] sm:$0xff]  ;;  %v699_v58 = vld [vmem:[%s6757_s17 + $0x115] sm:$0xff]  ;;  %v700_v48 = vld [vmem:[%s6757_s17 + $0x125] sm:$0xff]  ;;  %v727_v35 = vmul.f32 %v7511_v38, %v690_v30  ;;  %v728_v44 = vmul.f32 %v7511_v38, %v691_v34  ;;  %v729_v4 = vmul.f32 %v7511_v38, %v692_v20  ;;  %v730_v39 = vmul.f32 %v7511_v38, %v693_v16 }
  0x69   : > { %v701_v54 = vld [vmem:[%s6757_s17 + $0x12d] sm:$0xff]  ;;  %v702_v19 = vld [vmem:[%s6757_s17 + $0x13d] sm:$0xff]  ;;  %v703_v21 = vld [vmem:[%s6757_s17 + $0x145] sm:$0xff]  ;;  %v731_v37 = vmul.f32 %v7511_v38, %v694_v62  ;;  %v732_v33 = vmul.f32 %v7511_v38, %v695_v31  ;;  %v733_v13 = vmul.f32 %v7511_v38, %v696_v61  ;;  %v734_v63 = vmul.f32 %v7511_v38, %v697_v23 }
  0x6a   : > { %v704_v46 = vld [vmem:[%s6757_s17 + $0x155] sm:$0xff]  ;;  %v705_v28 = vld [vmem:[%s6757_s17 + $0x15d] sm:$0xff]  ;;  %v706_v47 = vld [vmem:[%s6757_s17 + $0x16d] sm:$0xff]  ;;  %v735_v50 = vmul.f32 %v7511_v38, %v698_v56  ;;  %v736_v30 = vmul.f32 %v7511_v38, %v699_v58  ;;  %v737_v34 = vmul.f32 %v7511_v38, %v700_v48  ;;  %v738_v24 = vmul.f32 %v7511_v38, %v701_v54 }
  0x6b   : > { %v707_v55 = vld [vmem:[%s6757_s17 + $0x175] sm:$0xff]  ;;  %v739_v20 = vmul.f32 %v7511_v38, %v702_v19  ;;  %v740_v16 = vmul.f32 %v7511_v38, %v703_v21  ;;  %v741_v62 = vmul.f32 %v7511_v38, %v704_v46  ;;  %v742_v31 = vmul.f32 %v7511_v38, %v705_v28  ;;  %v13555_v54 = vld [vmem:[#allocation7_spill] sm:$0xff] }
  0x6c   : > { %v743_v61 = vmul.f32 %v7511_v38, %v706_v47  ;;  %v744_v23 = vmul.f32 %v7511_v38, %v707_v55  ;;  %v7622_v56 = vadd.f32 %v713_v18, %v7457_v29  ;;  %v7625_v58 = vadd.f32 %v714_v41, %v7460_v8  ;;  %v783_v18 = vld [vmem:[%s6757_s17 + $0x4e] sm:$0xff]  ;;  %v784_v41 = vld [vmem:[%s6757_s17 + $0x56] sm:$0xff]  ;;  %v790_v55 = vld [vmem:[%s6757_s17 + $0x9e] sm:$0xff] }
  0x6d   : > { %v7628_v19 = vadd.f32 %v715_v11, %v7463_v5  ;;  %v7631_v46 = vadd.f32 %v716_v42, %v7466_v32  ;;  %v7634_v47 = vadd.f32 %v717_v14, %v7469_v25  ;;  %v7637_v38 = vadd.f32 %v718_v2, %v7472_v3  ;;  %v786_v2 = vld [vmem:[%s6757_s17 + $0x6e] sm:$0xff] }
  0x6e   : > { %v7640_v29 = vadd.f32 %v719_v7, %v7475_v51  ;;  %v7643_v8 = vadd.f32 %v720_v45, %v7478_v60  ;;  %v7646_v5 = vadd.f32 %v721_v53, %v7481_v15  ;;  %v7649_v28 = vadd.f32 %v722_v40, %v7484_v1  ;;  %v777_v1 = vld [vmem:[%s6757_s17 + $0x6] sm:$0xff]  ;;  %v782_v40 = vld [vmem:[%s6757_s17 + $0x3e] sm:$0xff] }
  0x6f   : > { %v7652_v32 = vadd.f32 %v723_v52, %v7487_v12  ;;  %v7655_v25 = vadd.f32 %v724_v10, %v7490_v6  ;;  %v7658_v3 = vadd.f32 %v725_v26, %v7493_v9  ;;  %v7661_v51 = vadd.f32 %v726_v17, %v7496_v0  ;;  %v778_v12 = vld [vmem:[%s6757_s17 + $0xe] sm:$0xff]  ;;  %v779_v52 = vld [vmem:[%s6757_s17 + $0x1e] sm:$0xff]  ;;  %v780_v6 = vld [vmem:[%s6757_s17 + $0x26] sm:$0xff] }
  0x70   : > { %v7664_v60 = vadd.f32 %v727_v35, %v7499_v49  ;;  %v7667_v15 = vadd.f32 %v728_v44, %v7502_v59  ;;  %v7676_v9 = vld [vmem:[%s13465_s1 + $0x6] ss:$0 sm:$0xff]  ;;  %v7679_v0 = vadd.f32 %v729_v4, %v7514_v27  ;;  %v7682_v49 = vadd.f32 %v730_v39, %v7517_v43  ;;  %v781_v35 = vld [vmem:[%s6757_s17 + $0x36] sm:$0xff]  ;;  %v13547_v43 = vld [vmem:[#allocation3_spill] sm:$0xff] }
  0x71   : > { %v7685_v59 = vadd.f32 %v731_v37, %v7520_v57  ;;  %v7688_v44 = vadd.f32 %v732_v33, %v7523_v36  ;;  %v7695_v11 = vadd.f32 %v733_v13, %v7530_v22  ;;  %v13545_v27 = vld [vmem:[#allocation2_spill] sm:$0xff]  ;;  %v7701_v14 = vadd.f32 %v735_v50, %v13547_v43  ;;  %v13549_v57 = vld [vmem:[#allocation4_spill] sm:$0xff]  ;;  %v13551_v45 = vld [vmem:[#allocation5_spill] sm:$0xff] }
  0x72   : > { %v7698_v42 = vadd.f32 %v734_v63, %v13545_v27  ;;  %v7704_v36 = vadd.f32 %v736_v30, %v13549_v57  ;;  %v785_v33 = vld [vmem:[%s6757_s17 + $0x66] sm:$0xff]  ;;  %v787_v7 = vld [vmem:[%s6757_s17 + $0x7e] sm:$0xff]  ;;  %v7710_v22 = vadd.f32 %v737_v34, %v13551_v45  ;;  %v7716_v53 = vadd.f32 %v739_v20, %v13555_v54  ;;  %v13557_v10 = vld [vmem:[#allocation8_spill] sm:$0xff] }
  0x73   : > { %13548 = vst [vmem:[#allocation3_spill] sm:$0xff] %v7701_v14  ;;  %v13553_v13 = vld [vmem:[#allocation6_spill] sm:$0xff]  ;;  %v7719_v21 = vadd.f32 %v740_v16, %v13557_v10  ;;  %v789_v17 = vld [vmem:[%s6757_s17 + $0x96] sm:$0xff]  ;;  %v791_v20 = vld [vmem:[%s6757_s17 + $0xae] sm:$0xff]  ;;  %v814_v45 = vmul.f32 %v7676_v9, %v777_v1  ;;  %v821_v1 = vmul.f32 %v7676_v9, %v784_v41  ;;  %v827_v41 = vmul.f32 %v7676_v9, %v790_v55 }
  0x74   : > { %13546 = vst [vmem:[#allocation2_spill] sm:$0xff] %v7698_v42  ;;  %13550 = vst [vmem:[#allocation4_spill] sm:$0xff] %v7704_v36  ;;  %v7713_v48 = vadd.f32 %v738_v24, %v13553_v13  ;;  %v788_v26 = vld [vmem:[%s6757_s17 + $0x86] sm:$0xff]  ;;  %v13559_v4 = vld [vmem:[#allocation9_spill] sm:$0xff]  ;;  %v816_v13 = vmul.f32 %v7676_v9, %v779_v52 }
  0x75   : > { %13552 = vst [vmem:[#allocation5_spill] sm:$0xff] %v7710_v22  ;;  %13556 = vst [vmem:[#allocation7_spill] sm:$0xff] %v7716_v53  ;;  %v7725_v39 = vadd.f32 %v741_v62, %v13559_v4  ;;  %v13561_v37 = vld [vmem:[#allocation10_spill] sm:$0xff]  ;;  %v13563_v24 = vld [vmem:[#allocation11_spill] sm:$0xff]  ;;  %v818_v4 = vmul.f32 %v7676_v9, %v781_v35  ;;  %v825_v35 = vmul.f32 %v7676_v9, %v788_v26 }
  0x76   : > { %13554 = vst [vmem:[#allocation6_spill] sm:$0xff] %v7713_v48  ;;  %13558 = vst [vmem:[#allocation8_spill] sm:$0xff] %v7719_v21  ;;  %v7728_v63 = vadd.f32 %v742_v31, %v13561_v37  ;;  %v7731_v50 = vadd.f32 %v743_v61, %v13563_v24  ;;  %v13565_v30 = vld [vmem:[#allocation12_spill] sm:$0xff]  ;;  %v793_v27 = vld [vmem:[%s6757_s17 + $0xc6] sm:$0xff]  ;;  %v815_v31 = vmul.f32 %v7676_v9, %v778_v12 }
  0x77   : > { %13560 = vst [vmem:[#allocation9_spill] sm:$0xff] %v7725_v39  ;;  %v7734_v34 = vadd.f32 %v744_v23, %v13565_v30  ;;  %v792_v16 = vld [vmem:[%s6757_s17 + $0xb6] sm:$0xff]  ;;  %v794_v43 = vld [vmem:[%s6757_s17 + $0xce] sm:$0xff]  ;;  %v795_v57 = vld [vmem:[%s6757_s17 + $0xde] sm:$0xff]  ;;  %v817_v61 = vmul.f32 %v7676_v9, %v780_v6  ;;  %v819_v37 = vmul.f32 %v7676_v9, %v782_v40  ;;  %v820_v24 = vmul.f32 %v7676_v9, %v783_v18 }
  0x78   : > { %13562 = vst [vmem:[#allocation10_spill] sm:$0xff] %v7728_v63  ;;  %13564 = vst [vmem:[#allocation11_spill] sm:$0xff] %v7731_v50  ;;  %v796_v62 = vld [vmem:[%s6757_s17 + $0xe6] sm:$0xff]  ;;  %v797_v23 = vld [vmem:[%s6757_s17 + $0xf6] sm:$0xff]  ;;  %v822_v6 = vmul.f32 %v7676_v9, %v785_v33  ;;  %v824_v50 = vmul.f32 %v7676_v9, %v787_v7  ;;  %v826_v18 = vmul.f32 %v7676_v9, %v789_v17 }
  0x79   : > { %13566 = vst [vmem:[#allocation12_spill] sm:$0xff] %v7734_v34  ;;  %v798_v54 = vld [vmem:[%s6757_s17 + $0xfe] sm:$0xff]  ;;  %v799_v10 = vld [vmem:[%s6757_s17 + $0x10e] sm:$0xff]  ;;  %v800_v12 = vld [vmem:[%s6757_s17 + $0x116] sm:$0xff]  ;;  %v823_v34 = vmul.f32 %v7676_v9, %v786_v2  ;;  %v828_v21 = vmul.f32 %v7676_v9, %v791_v20  ;;  %v829_v53 = vmul.f32 %v7676_v9, %v792_v16  ;;  %v830_v2 = vmul.f32 %v7676_v9, %v793_v27 }
  0x7a   : > { %v801_v52 = vld [vmem:[%s6757_s17 + $0x126] sm:$0xff]  ;;  %v802_v30 = vld [vmem:[%s6757_s17 + $0x12e] sm:$0xff]  ;;  %v803_v63 = vld [vmem:[%s6757_s17 + $0x13e] sm:$0xff]  ;;  %v831_v7 = vmul.f32 %v7676_v9, %v794_v43  ;;  %v832_v26 = vmul.f32 %v7676_v9, %v795_v57  ;;  %v833_v36 = vmul.f32 %v7676_v9, %v796_v62  ;;  %v834_v14 = vmul.f32 %v7676_v9, %v797_v23 }
  0x7b   : > { %v804_v40 = vld [vmem:[%s6757_s17 + $0x146] sm:$0xff]  ;;  %v805_v39 = vld [vmem:[%s6757_s17 + $0x156] sm:$0xff]  ;;  %v806_v48 = vld [vmem:[%s6757_s17 + $0x15e] sm:$0xff]  ;;  %v835_v17 = vmul.f32 %v7676_v9, %v798_v54  ;;  %v836_v55 = vmul.f32 %v7676_v9, %v799_v10  ;;  %v837_v20 = vmul.f32 %v7676_v9, %v800_v12  ;;  %v838_v16 = vmul.f32 %v7676_v9, %v801_v52 }
  0x7c   : > { %v807_v22 = vld [vmem:[%s6757_s17 + $0x16e] sm:$0xff]  ;;  %v808_v33 = vld [vmem:[%s6757_s17 + $0x176] sm:$0xff]  ;;  %v839_v42 = vmul.f32 %v7676_v9, %v802_v30  ;;  %v840_v27 = vmul.f32 %v7676_v9, %v803_v63  ;;  %v841_v43 = vmul.f32 %v7676_v9, %v804_v40  ;;  %v842_v57 = vmul.f32 %v7676_v9, %v805_v39 }
  0x7d   : > { %v843_v62 = vmul.f32 %v7676_v9, %v806_v48  ;;  %v844_v23 = vmul.f32 %v7676_v9, %v807_v22  ;;  %v845_v54 = vmul.f32 %v7676_v9, %v808_v33  ;;  %v7787_v10 = vadd.f32 %v814_v45, %v7622_v56  ;;  %v5280_v45 = vld [vmem:[%s6757_s17 + $0x60] sm:$0xff]  ;;  %v13577_v30 = vld [vmem:[#allocation7_spill] sm:$0xff]  ;;  %v5287_v33 = vld [vmem:[%s6757_s17 + $0xb0] sm:$0xff] }
  0x7e   : > { %v7790_v12 = vadd.f32 %v815_v31, %v7625_v58  ;;  %v7793_v63 = vadd.f32 %v816_v13, %v7628_v19  ;;  %v7796_v39 = vadd.f32 %v817_v61, %v7631_v46  ;;  %v7799_v22 = vadd.f32 %v818_v4, %v7634_v47  ;;  %v5281_v31 = vld [vmem:[%s6757_s17 + $0x68] sm:$0xff] }
  0x7f   : > { %v7802_v9 = vadd.f32 %v819_v37, %v7637_v38  ;;  %v7805_v56 = vadd.f32 %v820_v24, %v7640_v29  ;;  %v7808_v58 = vadd.f32 %v821_v1, %v7643_v8  ;;  %v7811_v19 = vadd.f32 %v822_v6, %v7646_v5  ;;  %v5283_v37 = vld [vmem:[%s6757_s17 + $0x80] sm:$0xff]  ;;  %v5284_v24 = vld [vmem:[%s6757_s17 + $0x90] sm:$0xff]  ;;  %v13573_v1 = vld [vmem:[#allocation5_spill] sm:$0xff] }
  0x80   : > { %v7814_v48 = vadd.f32 %v823_v34, %v7649_v28  ;;  %v7817_v46 = vadd.f32 %v824_v50, %v7652_v32  ;;  %v7820_v47 = vadd.f32 %v825_v35, %v7655_v25  ;;  %v7823_v38 = vadd.f32 %v826_v18, %v7658_v3  ;;  %v5274_v28 = vld [vmem:[%s6757_s17 + $0x18] sm:$0xff]  ;;  %v5275_v32 = vld [vmem:[%s6757_s17 + $0x20] sm:$0xff]  ;;  %v5276_v50 = vld [vmem:[%s6757_s17 + $0x30] sm:$0xff] }
  0x81   : > { %v7826_v29 = vadd.f32 %v827_v41, %v7661_v51  ;;  %v7829_v8 = vadd.f32 %v828_v21, %v7664_v60  ;;  %v7832_v5 = vadd.f32 %v829_v53, %v7667_v15  ;;  %v5277_v25 = vld [vmem:[%s6757_s17 + $0x38] sm:$0xff]  ;;  %v7841_v3 = vld [vmem:[%s13465_s1 + $0x8] ss:$0 sm:$0xff]  ;;  %v7844_v51 = vadd.f32 %v830_v2, %v7679_v0  ;;  %v5279_v34 = vld [vmem:[%s6757_s17 + $0x50] sm:$0xff] }
  0x82   : > { %v7847_v60 = vadd.f32 %v831_v7, %v7682_v49  ;;  %v7850_v15 = vadd.f32 %v832_v26, %v7685_v59  ;;  %v7853_v53 = vadd.f32 %v833_v36, %v7688_v44  ;;  %v5278_v21 = vld [vmem:[%s6757_s17 + $0x48] sm:$0xff]  ;;  %v7860_v13 = vadd.f32 %v834_v14, %v7695_v11  ;;  %v13567_v0 = vld [vmem:[#allocation2_spill] sm:$0xff]  ;;  %v13571_v59 = vld [vmem:[#allocation4_spill] sm:$0xff] }
  0x83   : > { %v7863_v61 = vadd.f32 %v835_v17, %v13567_v0  ;;  %v13569_v49 = vld [vmem:[#allocation3_spill] sm:$0xff]  ;;  %v7869_v44 = vadd.f32 %v837_v20, %v13571_v59  ;;  %v5282_v36 = vld [vmem:[%s6757_s17 + $0x78] sm:$0xff]  ;;  %v7875_v11 = vadd.f32 %v838_v16, %v13573_v1  ;;  %v13575_v14 = vld [vmem:[#allocation6_spill] sm:$0xff]  ;;  %v7881_v6 = vadd.f32 %v840_v27, %v13577_v30 }
  0x84   : > { %v7866_v4 = vadd.f32 %v836_v55, %v13569_v49  ;;  %v7878_v52 = vadd.f32 %v839_v42, %v13575_v14  ;;  %v13579_v35 = vld [vmem:[#allocation8_spill] sm:$0xff]  ;;  %v5285_v18 = vld [vmem:[%s6757_s17 + $0x98] sm:$0xff]  ;;  %v5286_v41 = vld [vmem:[%s6757_s17 + $0xa8] sm:$0xff]  ;;  %v917_v1 = vmul.f32 %v7841_v3, %v5274_v28  ;;  %v919_v14 = vmul.f32 %v7841_v3, %v5276_v50 }
  0x85   : > { %13568 = vst [vmem:[#allocation2_spill] sm:$0xff] %v7863_v61  ;;  %13572 = vst [vmem:[#allocation4_spill] sm:$0xff] %v7869_v44  ;;  %v7884_v40 = vadd.f32 %v841_v43, %v13579_v35  ;;  %v13581_v2 = vld [vmem:[#allocation9_spill] sm:$0xff]  ;;  %v13583_v26 = vld [vmem:[#allocation10_spill] sm:$0xff]  ;;  %v924_v28 = vmul.f32 %v7841_v3, %v5281_v31  ;;  %v930_v31 = vmul.f32 %v7841_v3, %v5287_v33 }
  0x86   : > { %13570 = vst [vmem:[#allocation3_spill] sm:$0xff] %v7866_v4  ;;  %13574 = vst [vmem:[#allocation5_spill] sm:$0xff] %v7875_v11  ;;  %v7890_v7 = vadd.f32 %v842_v57, %v13581_v2  ;;  %v7893_v17 = vadd.f32 %v843_v62, %v13583_v26  ;;  %v13585_v42 = vld [vmem:[#allocation11_spill] sm:$0xff]  ;;  %v13587_v20 = vld [vmem:[#allocation12_spill] sm:$0xff]  ;;  %v918_v62 = vmul.f32 %v7841_v3, %v5275_v32 }
  0x87   : > { %13576 = vst [vmem:[#allocation6_spill] sm:$0xff] %v7878_v52  ;;  %13578 = vst [vmem:[#allocation7_spill] sm:$0xff] %v7881_v6  ;;  %v7896_v55 = vadd.f32 %v844_v23, %v13585_v42  ;;  %v7899_v16 = vadd.f32 %v845_v54, %v13587_v20  ;;  %v5288_v27 = vld [vmem:[%s6757_s17 + $0xc0] sm:$0xff]  ;;  %v5289_v43 = vld [vmem:[%s6757_s17 + $0xc8] sm:$0xff]  ;;  %v920_v23 = vmul.f32 %v7841_v3, %v5277_v25 }
  0x88   : > { %13580 = vst [vmem:[#allocation8_spill] sm:$0xff] %v7884_v40  ;;  %13582 = vst [vmem:[#allocation9_spill] sm:$0xff] %v7890_v7  ;;  %v5290_v0 = vld [vmem:[%s6757_s17 + $0xd8] sm:$0xff]  ;;  %v5291_v49 = vld [vmem:[%s6757_s17 + $0xe0] sm:$0xff]  ;;  %v921_v2 = vmul.f32 %v7841_v3, %v5278_v21  ;;  %v922_v26 = vmul.f32 %v7841_v3, %v5279_v34  ;;  %v923_v42 = vmul.f32 %v7841_v3, %v5280_v45 }
  0x89   : > { %13584 = vst [vmem:[#allocation10_spill] sm:$0xff] %v7893_v17  ;;  %13586 = vst [vmem:[#allocation11_spill] sm:$0xff] %v7896_v55  ;;  %v5292_v59 = vld [vmem:[%s6757_s17 + $0xf0] sm:$0xff]  ;;  %v5293_v57 = vld [vmem:[%s6757_s17 + $0xf8] sm:$0xff]  ;;  %v925_v25 = vmul.f32 %v7841_v3, %v5282_v36  ;;  %v927_v55 = vmul.f32 %v7841_v3, %v5284_v24  ;;  %v928_v21 = vmul.f32 %v7841_v3, %v5285_v18 }
  0x8a   : > { %13588 = vst [vmem:[#allocation12_spill] sm:$0xff] %v7899_v16  ;;  %v5294_v54 = vld [vmem:[%s6757_s17 + $0x108] sm:$0xff]  ;;  %v5295_v30 = vld [vmem:[%s6757_s17 + $0x110] sm:$0xff]  ;;  %v5296_v35 = vld [vmem:[%s6757_s17 + $0x120] sm:$0xff]  ;;  %v926_v16 = vmul.f32 %v7841_v3, %v5283_v37  ;;  %v929_v45 = vmul.f32 %v7841_v3, %v5286_v41  ;;  %v931_v40 = vmul.f32 %v7841_v3, %v5288_v27  ;;  %v932_v6 = vmul.f32 %v7841_v3, %v5289_v43 }
  0x8b   : > { %v5297_v32 = vld [vmem:[%s6757_s17 + $0x128] sm:$0xff]  ;;  %v5298_v50 = vld [vmem:[%s6757_s17 + $0x138] sm:$0xff]  ;;  %v5299_v20 = vld [vmem:[%s6757_s17 + $0x140] sm:$0xff]  ;;  %v933_v37 = vmul.f32 %v7841_v3, %v5290_v0  ;;  %v934_v24 = vmul.f32 %v7841_v3, %v5291_v49  ;;  %v935_v18 = vmul.f32 %v7841_v3, %v5292_v59  ;;  %v936_v44 = vmul.f32 %v7841_v3, %v5293_v57 }
  0x8c   : > { %v5300_v17 = vld [vmem:[%s6757_s17 + $0x150] sm:$0xff]  ;;  %v5301_v34 = vld [vmem:[%s6757_s17 + $0x158] sm:$0xff]  ;;  %v5302_v7 = vld [vmem:[%s6757_s17 + $0x168] sm:$0xff]  ;;  %v937_v4 = vmul.f32 %v7841_v3, %v5294_v54  ;;  %v938_v41 = vmul.f32 %v7841_v3, %v5295_v30  ;;  %v939_v33 = vmul.f32 %v7841_v3, %v5296_v35  ;;  %v940_v27 = vmul.f32 %v7841_v3, %v5297_v32 }
  0x8d   : > { %v5303_v52 = vld [vmem:[%s6757_s17 + $0x170] sm:$0xff]  ;;  %v5304_v11 = vld [vmem:[%s6757_s17 + $0x180] sm:$0xff]  ;;  %v5305_v36 = vld [vmem:[%s6757_s17 + $0x188] sm:$0xff]  ;;  %v941_v43 = vmul.f32 %v7841_v3, %v5298_v50  ;;  %v942_v61 = vmul.f32 %v7841_v3, %v5299_v20  ;;  %v943_v0 = vmul.f32 %v7841_v3, %v5300_v17  ;;  %v944_v49 = vmul.f32 %v7841_v3, %v5301_v34 }
  0x8e   : > { %v945_v59 = vmul.f32 %v7841_v3, %v5302_v7  ;;  %v946_v57 = vmul.f32 %v7841_v3, %v5303_v52  ;;  %v947_v54 = vmul.f32 %v7841_v3, %v5304_v11  ;;  %v948_v30 = vmul.f32 %v7841_v3, %v5305_v36  ;;  %v13599_v20 = vld [vmem:[#allocation7_spill] sm:$0xff]  ;;  %v5321_v36 = vld [vmem:[%s6757_s17 + $0xb1] sm:$0xff] }
  0x8f   : > { %v7952_v35 = vadd.f32 %v917_v1, %v7787_v10  ;;  %v7955_v32 = vadd.f32 %v918_v62, %v7790_v12  ;;  %v7958_v17 = vadd.f32 %v919_v14, %v7793_v63  ;;  %v7961_v7 = vadd.f32 %v920_v23, %v7796_v39  ;;  %v5314_v1 = vld [vmem:[%s6757_s17 + $0x61] sm:$0xff]  ;;  %v5315_v62 = vld [vmem:[%s6757_s17 + $0x69] sm:$0xff] }
  0x90   : > { %v7964_v11 = vadd.f32 %v921_v2, %v7799_v22  ;;  %v7967_v3 = vadd.f32 %v922_v26, %v7802_v9  ;;  %v7970_v10 = vadd.f32 %v923_v42, %v7805_v56  ;;  %v7973_v12 = vadd.f32 %v924_v28, %v7808_v58  ;;  %v5317_v26 = vld [vmem:[%s6757_s17 + $0x81] sm:$0xff]  ;;  %v5318_v42 = vld [vmem:[%s6757_s17 + $0x91] sm:$0xff] }
  0x91   : > { %v7976_v63 = vadd.f32 %v925_v25, %v7811_v19  ;;  %v7979_v52 = vadd.f32 %v926_v16, %v7814_v48  ;;  %v7982_v39 = vadd.f32 %v927_v55, %v7817_v46  ;;  %v7985_v22 = vadd.f32 %v928_v21, %v7820_v47  ;;  %v5308_v48 = vld [vmem:[%s6757_s17 + $0x19] sm:$0xff]  ;;  %v5309_v46 = vld [vmem:[%s6757_s17 + $0x21] sm:$0xff]  ;;  %v5310_v55 = vld [vmem:[%s6757_s17 + $0x31] sm:$0xff] }
  0x92   : > { %v7988_v9 = vadd.f32 %v929_v45, %v7823_v38  ;;  %v7991_v56 = vadd.f32 %v930_v31, %v7826_v29  ;;  %v7994_v58 = vadd.f32 %v931_v40, %v7829_v8  ;;  %v7997_v19 = vadd.f32 %v932_v6, %v7832_v5  ;;  %v5311_v47 = vld [vmem:[%s6757_s17 + $0x39] sm:$0xff]  ;;  %v8006_v38 = vld [vmem:[%s13465_s1 + $0x9] ss:$0 sm:$0xff]  ;;  %v5313_v16 = vld [vmem:[%s6757_s17 + $0x51] sm:$0xff] }
  0x93   : > { %v8009_v29 = vadd.f32 %v933_v37, %v7844_v51  ;;  %v8012_v8 = vadd.f32 %v934_v24, %v7847_v60  ;;  %v8015_v5 = vadd.f32 %v935_v18, %v7850_v15  ;;  %v8018_v6 = vadd.f32 %v936_v44, %v7853_v53  ;;  %v5312_v40 = vld [vmem:[%s6757_s17 + $0x49] sm:$0xff]  ;;  %v13589_v51 = vld [vmem:[#allocation2_spill] sm:$0xff]  ;;  %v13595_v28 = vld [vmem:[#allocation5_spill] sm:$0xff] }
  0x94   : > { %v8025_v14 = vadd.f32 %v937_v4, %v7860_v13  ;;  %v8028_v23 = vadd.f32 %v938_v41, %v13589_v51  ;;  %v13591_v60 = vld [vmem:[#allocation3_spill] sm:$0xff]  ;;  %v13593_v15 = vld [vmem:[#allocation4_spill] sm:$0xff]  ;;  %v5316_v44 = vld [vmem:[%s6757_s17 + $0x79] sm:$0xff]  ;;  %v8040_v13 = vadd.f32 %v941_v43, %v13595_v28  ;;  %v8046_v25 = vadd.f32 %v943_v0, %v13599_v20 }
  0x95   : > { %v8031_v2 = vadd.f32 %v939_v33, %v13591_v60  ;;  %v8034_v53 = vadd.f32 %v940_v27, %v13593_v15  ;;  %v13597_v4 = vld [vmem:[#allocation6_spill] sm:$0xff]  ;;  %v13601_v21 = vld [vmem:[#allocation8_spill] sm:$0xff]  ;;  %v13603_v37 = vld [vmem:[#allocation9_spill] sm:$0xff]  ;;  %v1018_v28 = vmul.f32 %v8006_v38, %v5308_v48  ;;  %v1025_v48 = vmul.f32 %v8006_v38, %v5315_v62 }
  0x96   : > { %13590 = vst [vmem:[#allocation2_spill] sm:$0xff] %v8028_v23  ;;  %13596 = vst [vmem:[#allocation5_spill] sm:$0xff] %v8040_v13  ;;  %v8043_v50 = vadd.f32 %v942_v61, %v13597_v4  ;;  %v8049_v34 = vadd.f32 %v944_v49, %v13601_v21  ;;  %v5319_v45 = vld [vmem:[%s6757_s17 + $0x99] sm:$0xff]  ;;  %v5320_v31 = vld [vmem:[%s6757_s17 + $0xa9] sm:$0xff]  ;;  %v8055_v24 = vadd.f32 %v945_v59, %v13603_v37 }
  0x97   : > { %13592 = vst [vmem:[#allocation3_spill] sm:$0xff] %v8031_v2  ;;  %13594 = vst [vmem:[#allocation4_spill] sm:$0xff] %v8034_v53  ;;  %v13605_v18 = vld [vmem:[#allocation10_spill] sm:$0xff]  ;;  %v13607_v61 = vld [vmem:[#allocation11_spill] sm:$0xff]  ;;  %v1020_v4 = vmul.f32 %v8006_v38, %v5310_v55  ;;  %v1022_v37 = vmul.f32 %v8006_v38, %v5312_v40  ;;  %v1029_v40 = vmul.f32 %v8006_v38, %v5319_v45 }
  0x98   : > { %13598 = vst [vmem:[#allocation6_spill] sm:$0xff] %v8043_v50  ;;  %13600 = vst [vmem:[#allocation7_spill] sm:$0xff] %v8046_v25  ;;  %v8058_v41 = vadd.f32 %v946_v57, %v13605_v18  ;;  %v8061_v33 = vadd.f32 %v947_v54, %v13607_v61  ;;  %v13609_v27 = vld [vmem:[#allocation12_spill] sm:$0xff]  ;;  %v5322_v0 = vld [vmem:[%s6757_s17 + $0xc1] sm:$0xff]  ;;  %v1019_v57 = vmul.f32 %v8006_v38, %v5309_v46 }
  0x99   : > { %13602 = vst [vmem:[#allocation8_spill] sm:$0xff] %v8049_v34  ;;  %13604 = vst [vmem:[#allocation9_spill] sm:$0xff] %v8055_v24  ;;  %v8064_v43 = vadd.f32 %v948_v30, %v13609_v27  ;;  %v5323_v49 = vld [vmem:[%s6757_s17 + $0xc9] sm:$0xff]  ;;  %v5324_v51 = vld [vmem:[%s6757_s17 + $0xd9] sm:$0xff]  ;;  %v1021_v54 = vmul.f32 %v8006_v38, %v5311_v47  ;;  %v1023_v18 = vmul.f32 %v8006_v38, %v5313_v16 }
  0x9a   : > { %13606 = vst [vmem:[#allocation10_spill] sm:$0xff] %v8058_v41  ;;  %13608 = vst [vmem:[#allocation11_spill] sm:$0xff] %v8061_v33  ;;  %v5325_v60 = vld [vmem:[%s6757_s17 + $0xe1] sm:$0xff]  ;;  %v5326_v15 = vld [vmem:[%s6757_s17 + $0xf1] sm:$0xff]  ;;  %v1024_v61 = vmul.f32 %v8006_v38, %v5314_v1  ;;  %v1026_v47 = vmul.f32 %v8006_v38, %v5316_v44  ;;  %v1028_v33 = vmul.f32 %v8006_v38, %v5318_v42 }
  0x9b   : > { %13610 = vst [vmem:[#allocation12_spill] sm:$0xff] %v8064_v43  ;;  %v5327_v59 = vld [vmem:[%s6757_s17 + $0xf9] sm:$0xff]  ;;  %v5328_v30 = vld [vmem:[%s6757_s17 + $0x109] sm:$0xff]  ;;  %v5329_v20 = vld [vmem:[%s6757_s17 + $0x111] sm:$0xff]  ;;  %v1027_v43 = vmul.f32 %v8006_v38, %v5317_v26  ;;  %v1030_v1 = vmul.f32 %v8006_v38, %v5320_v31  ;;  %v1031_v62 = vmul.f32 %v8006_v38, %v5321_v36  ;;  %v1032_v34 = vmul.f32 %v8006_v38, %v5322_v0 }
  0x9c   : > { %v5330_v21 = vld [vmem:[%s6757_s17 + $0x121] sm:$0xff]  ;;  %v5331_v46 = vld [vmem:[%s6757_s17 + $0x129] sm:$0xff]  ;;  %v5332_v55 = vld [vmem:[%s6757_s17 + $0x139] sm:$0xff]  ;;  %v1033_v25 = vmul.f32 %v8006_v38, %v5323_v49  ;;  %v1034_v26 = vmul.f32 %v8006_v38, %v5324_v51  ;;  %v1035_v42 = vmul.f32 %v8006_v38, %v5325_v60  ;;  %v1036_v45 = vmul.f32 %v8006_v38, %v5326_v15 }
  0x9d   : > { %v5333_v27 = vld [vmem:[%s6757_s17 + $0x141] sm:$0xff]  ;;  %v5334_v41 = vld [vmem:[%s6757_s17 + $0x151] sm:$0xff]  ;;  %v5335_v16 = vld [vmem:[%s6757_s17 + $0x159] sm:$0xff]  ;;  %v1037_v53 = vmul.f32 %v8006_v38, %v5327_v59  ;;  %v1038_v2 = vmul.f32 %v8006_v38, %v5328_v30  ;;  %v1039_v31 = vmul.f32 %v8006_v38, %v5329_v20  ;;  %v1040_v36 = vmul.f32 %v8006_v38, %v5330_v21 }
  0x9e   : > { %v5336_v24 = vld [vmem:[%s6757_s17 + $0x169] sm:$0xff]  ;;  %v5337_v50 = vld [vmem:[%s6757_s17 + $0x171] sm:$0xff]  ;;  %v5338_v13 = vld [vmem:[%s6757_s17 + $0x181] sm:$0xff]  ;;  %v1041_v0 = vmul.f32 %v8006_v38, %v5331_v46  ;;  %v1042_v49 = vmul.f32 %v8006_v38, %v5332_v55  ;;  %v1043_v23 = vmul.f32 %v8006_v38, %v5333_v27  ;;  %v1044_v51 = vmul.f32 %v8006_v38, %v5334_v41 }
  0x9f   : > { %v5339_v44 = vld [vmem:[%s6757_s17 + $0x189] sm:$0xff]  ;;  %v1045_v60 = vmul.f32 %v8006_v38, %v5335_v16  ;;  %v1046_v15 = vmul.f32 %v8006_v38, %v5336_v24  ;;  %v1047_v59 = vmul.f32 %v8006_v38, %v5337_v50  ;;  %v1048_v30 = vmul.f32 %v8006_v38, %v5338_v13  ;;  %v5342_v50 = vld [vmem:[%s6757_s17 + $0x1a] sm:$0xff] }
  0xa0   : > { %v1049_v20 = vmul.f32 %v8006_v38, %v5339_v44  ;;  %v8117_v21 = vadd.f32 %v1018_v28, %v7952_v35  ;;  %v8120_v46 = vadd.f32 %v1019_v57, %v7955_v32  ;;  %v8123_v41 = vadd.f32 %v1020_v4, %v7958_v17  ;;  %v5349_v28 = vld [vmem:[%s6757_s17 + $0x6a] sm:$0xff]  ;;  %v5355_v44 = vld [vmem:[%s6757_s17 + $0xb2] sm:$0xff] }
  0xa1   : > { %v8126_v24 = vadd.f32 %v1021_v54, %v7961_v7  ;;  %v8129_v13 = vadd.f32 %v1022_v37, %v7964_v11  ;;  %v8132_v38 = vadd.f32 %v1023_v18, %v7967_v3  ;;  %v8135_v35 = vadd.f32 %v1024_v61, %v7970_v10  ;;  %v5352_v18 = vld [vmem:[%s6757_s17 + $0x92] sm:$0xff]  ;;  %v13628_v27 = vld [vmem:[#allocation7_spill] sm:$0xff] }
  0xa2   : > { %v8138_v32 = vadd.f32 %v1025_v48, %v7973_v12  ;;  %v8141_v17 = vadd.f32 %v1026_v47, %v7976_v63  ;;  %v8144_v7 = vadd.f32 %v1027_v43, %v7979_v52  ;;  %v8147_v11 = vadd.f32 %v1028_v33, %v7982_v39  ;;  %v5343_v39 = vld [vmem:[%s6757_s17 + $0x22] sm:$0xff]  ;;  %v5344_v33 = vld [vmem:[%s6757_s17 + $0x32] sm:$0xff] }
  0xa3   : > { %v8150_v3 = vadd.f32 %v1029_v40, %v7985_v22  ;;  %v8153_v10 = vadd.f32 %v1030_v1, %v7988_v9  ;;  %v8156_v12 = vadd.f32 %v1031_v62, %v7991_v56  ;;  %v8159_v63 = vadd.f32 %v1032_v34, %v7994_v58  ;;  %v5345_v22 = vld [vmem:[%s6757_s17 + $0x3a] sm:$0xff]  ;;  %v5348_v34 = vld [vmem:[%s6757_s17 + $0x62] sm:$0xff]  ;;  %v13630_v40 = vld [vmem:[#allocation8_spill] sm:$0xff] }
  0xa4   : > { %v8162_v52 = vadd.f32 %v1033_v25, %v7997_v19  ;;  %v8169_v43 = vadd.f32 %v1034_v26, %v8009_v29  ;;  %v8172_v9 = vadd.f32 %v1035_v42, %v8012_v8  ;;  %v8175_v56 = vadd.f32 %v1036_v45, %v8015_v5  ;;  %v5346_v19 = vld [vmem:[%s6757_s17 + $0x4a] sm:$0xff]  ;;  %v5347_v25 = vld [vmem:[%s6757_s17 + $0x52] sm:$0xff]  ;;  %v13618_v29 = vld [vmem:[#allocation2_spill] sm:$0xff] }
  0xa5   : > { %13611 = vst [vmem:[#allocation13_spill] sm:$0xff] %v8159_v63  ;;  %v8178_v58 = vadd.f32 %v1037_v53, %v8018_v6  ;;  %v8185_v57 = vadd.f32 %v1038_v2, %v8025_v14  ;;  %v8188_v4 = vadd.f32 %v1039_v31, %v13618_v29  ;;  %v13620_v8 = vld [vmem:[#allocation3_spill] sm:$0xff]  ;;  %v13622_v5 = vld [vmem:[#allocation4_spill] sm:$0xff]  ;;  %v5350_v6 = vld [vmem:[%s6757_s17 + $0x7a] sm:$0xff]  ;;  %v8209_v47 = vadd.f32 %v1044_v51, %v13628_v27 }
  0xa6   : > { %13612 = vst [vmem:[#allocation14_spill] sm:$0xff] %v8162_v52  ;;  %13613 = vst [vmem:[#allocation15_spill] sm:$0xff] %v8169_v43  ;;  %v8191_v54 = vadd.f32 %v1040_v36, %v13620_v8  ;;  %v8194_v37 = vadd.f32 %v1041_v0, %v13622_v5  ;;  %v5351_v53 = vld [vmem:[%s6757_s17 + $0x82] sm:$0xff]  ;;  %v5375_v14 = vld [vmem:[%s13465_s1 + $0xa] ss:$0 sm:$0xff]  ;;  %v8212_v16 = vadd.f32 %v1045_v60, %v13630_v40 }
  0xa7   : > { %13614 = vst [vmem:[#allocation16_spill] sm:$0xff] %v8172_v9  ;;  %13615 = vst [vmem:[#allocation17_spill] sm:$0xff] %v8175_v56  ;;  %v13624_v2 = vld [vmem:[#allocation5_spill] sm:$0xff]  ;;  %v13626_v48 = vld [vmem:[#allocation6_spill] sm:$0xff]  ;;  %v1121_v27 = vmul.f32 %v5375_v14, %v5344_v33  ;;  %v1129_v33 = vmul.f32 %v5375_v14, %v5352_v18 }
  0xa8   : > { %13616 = vst [vmem:[#allocation18_spill] sm:$0xff] %v8178_v58  ;;  %13617 = vst [vmem:[#allocation19_spill] sm:$0xff] %v8185_v57  ;;  %v8203_v61 = vadd.f32 %v1042_v49, %v13624_v2  ;;  %v8206_v55 = vadd.f32 %v1043_v23, %v13626_v48  ;;  %v5353_v1 = vld [vmem:[%s6757_s17 + $0x9a] sm:$0xff]  ;;  %v5354_v62 = vld [vmem:[%s6757_s17 + $0xaa] sm:$0xff]  ;;  %v1119_v2 = vmul.f32 %v5375_v14, %v5342_v50 }
  0xa9   : > { %13619 = vst [vmem:[#allocation2_spill] sm:$0xff] %v8188_v4  ;;  %13621 = vst [vmem:[#allocation3_spill] sm:$0xff] %v8191_v54  ;;  %v13632_v26 = vld [vmem:[#allocation9_spill] sm:$0xff]  ;;  %v13634_v45 = vld [vmem:[#allocation10_spill] sm:$0xff]  ;;  %v1120_v48 = vmul.f32 %v5375_v14, %v5343_v39  ;;  %v1127_v50 = vmul.f32 %v5375_v14, %v5350_v6  ;;  %v1128_v39 = vmul.f32 %v5375_v14, %v5351_v53 }
  0xaa   : > { %13623 = vst [vmem:[#allocation4_spill] sm:$0xff] %v8194_v37  ;;  %13625 = vst [vmem:[#allocation5_spill] sm:$0xff] %v8203_v61  ;;  %v8218_v42 = vadd.f32 %v1046_v15, %v13632_v26  ;;  %v8221_v31 = vadd.f32 %v1047_v59, %v13634_v45  ;;  %v13636_v23 = vld [vmem:[#allocation11_spill] sm:$0xff]  ;;  %v13638_v0 = vld [vmem:[#allocation12_spill] sm:$0xff]  ;;  %v1122_v59 = vmul.f32 %v5375_v14, %v5345_v22 }
  0xab   : > { %13627 = vst [vmem:[#allocation6_spill] sm:$0xff] %v8206_v55  ;;  %13629 = vst [vmem:[#allocation7_spill] sm:$0xff] %v8209_v47  ;;  %v8224_v36 = vadd.f32 %v1048_v30, %v13636_v23  ;;  %v8227_v49 = vadd.f32 %v1049_v20, %v13638_v0  ;;  %v5356_v51 = vld [vmem:[%s6757_s17 + $0xc2] sm:$0xff]  ;;  %v5357_v60 = vld [vmem:[%s6757_s17 + $0xca] sm:$0xff]  ;;  %v1123_v26 = vmul.f32 %v5375_v14, %v5346_v19 }
  0xac   : > { %13631 = vst [vmem:[#allocation8_spill] sm:$0xff] %v8212_v16  ;;  %13633 = vst [vmem:[#allocation9_spill] sm:$0xff] %v8218_v42  ;;  %v5358_v29 = vld [vmem:[%s6757_s17 + $0xda] sm:$0xff]  ;;  %v5359_v8 = vld [vmem:[%s6757_s17 + $0xe2] sm:$0xff]  ;;  %v1124_v45 = vmul.f32 %v5375_v14, %v5347_v25  ;;  %v1125_v23 = vmul.f32 %v5375_v14, %v5348_v34  ;;  %v1126_v0 = vmul.f32 %v5375_v14, %v5349_v28 }
  0xad   : > { %13635 = vst [vmem:[#allocation10_spill] sm:$0xff] %v8221_v31  ;;  %13637 = vst [vmem:[#allocation11_spill] sm:$0xff] %v8224_v36  ;;  %v5360_v5 = vld [vmem:[%s6757_s17 + $0xf2] sm:$0xff]  ;;  %v5361_v15 = vld [vmem:[%s6757_s17 + $0xfa] sm:$0xff]  ;;  %v1130_v42 = vmul.f32 %v5375_v14, %v5353_v1  ;;  %v1131_v55 = vmul.f32 %v5375_v14, %v5354_v62  ;;  %v1132_v61 = vmul.f32 %v5375_v14, %v5355_v44 }
  0xae   : > { %13639 = vst [vmem:[#allocation12_spill] sm:$0xff] %v8227_v49  ;;  %v5362_v30 = vld [vmem:[%s6757_s17 + $0x10a] sm:$0xff]  ;;  %v5363_v40 = vld [vmem:[%s6757_s17 + $0x112] sm:$0xff]  ;;  %v5364_v20 = vld [vmem:[%s6757_s17 + $0x122] sm:$0xff]  ;;  %v1133_v37 = vmul.f32 %v5375_v14, %v5356_v51  ;;  %v1134_v19 = vmul.f32 %v5375_v14, %v5357_v60  ;;  %v1135_v28 = vmul.f32 %v5375_v14, %v5358_v29  ;;  %v1136_v4 = vmul.f32 %v5375_v14, %v5359_v8 }
  0xaf   : > { %v5365_v49 = vld [vmem:[%s6757_s17 + $0x12a] sm:$0xff]  ;;  %v5366_v36 = vld [vmem:[%s6757_s17 + $0x13a] sm:$0xff]  ;;  %v5367_v31 = vld [vmem:[%s6757_s17 + $0x142] sm:$0xff]  ;;  %v1137_v57 = vmul.f32 %v5375_v14, %v5360_v5  ;;  %v1138_v58 = vmul.f32 %v5375_v14, %v5361_v15  ;;  %v1139_v56 = vmul.f32 %v5375_v14, %v5362_v30  ;;  %v1140_v9 = vmul.f32 %v5375_v14, %v5363_v40 }
  0xb0   : > { %v5368_v22 = vld [vmem:[%s6757_s17 + $0x152] sm:$0xff]  ;;  %v5369_v16 = vld [vmem:[%s6757_s17 + $0x15a] sm:$0xff]  ;;  %v5370_v47 = vld [vmem:[%s6757_s17 + $0x16a] sm:$0xff]  ;;  %v1141_v6 = vmul.f32 %v5375_v14, %v5364_v20  ;;  %v1142_v53 = vmul.f32 %v5375_v14, %v5365_v49  ;;  %v1143_v18 = vmul.f32 %v5375_v14, %v5366_v36  ;;  %v1144_v1 = vmul.f32 %v5375_v14, %v5367_v31 }
  0xb1   : > { %v5371_v25 = vld [vmem:[%s6757_s17 + $0x172] sm:$0xff]  ;;  %v5372_v34 = vld [vmem:[%s6757_s17 + $0x182] sm:$0xff]  ;;  %v5373_v54 = vld [vmem:[%s6757_s17 + $0x18a] sm:$0xff]  ;;  %v1145_v43 = vmul.f32 %v5375_v14, %v5368_v22  ;;  %v1146_v52 = vmul.f32 %v5375_v14, %v5369_v16  ;;  %v1147_v63 = vmul.f32 %v5375_v14, %v5370_v47  ;;  %v8248_v60 = vadd.f32 %v1119_v2, %v8117_v21 }
  0xb2   : > { %v1148_v62 = vmul.f32 %v5375_v14, %v5371_v25  ;;  %v1149_v44 = vmul.f32 %v5375_v14, %v5372_v34  ;;  %v1150_v51 = vmul.f32 %v5375_v14, %v5373_v54  ;;  %v8251_v29 = vadd.f32 %v1120_v48, %v8120_v46  ;;  %v5376_v36 = vld [vmem:[%s6757_s17 + $0x1b] sm:$0xff]  ;;  %v5378_v49 = vld [vmem:[%s6757_s17 + $0x33] sm:$0xff]  ;;  %v5380_v2 = vld [vmem:[%s6757_s17 + $0x4b] sm:$0xff] }
  0xb3   : > { %v8254_v8 = vadd.f32 %v1121_v27, %v8123_v41  ;;  %v8257_v31 = vadd.f32 %v1122_v59, %v8126_v24  ;;  %v8260_v47 = vadd.f32 %v1123_v26, %v8129_v13  ;;  %v8263_v54 = vadd.f32 %v1124_v45, %v8132_v38  ;;  %v5381_v48 = vld [vmem:[%s6757_s17 + $0x53] sm:$0xff]  ;;  %v5382_v27 = vld [vmem:[%s6757_s17 + $0x63] sm:$0xff]  ;;  %v5383_v59 = vld [vmem:[%s6757_s17 + $0x6b] sm:$0xff] }
  0xb4   : > { %v8266_v21 = vadd.f32 %v1125_v23, %v8135_v35  ;;  %v8269_v46 = vadd.f32 %v1126_v0, %v8138_v32  ;;  %v8272_v41 = vadd.f32 %v1127_v50, %v8141_v17  ;;  %v8275_v24 = vadd.f32 %v1128_v39, %v8144_v7  ;;  %v13640_v17 = vld [vmem:[#allocation13_spill] sm:$0xff]  ;;  %v13642_v7 = vld [vmem:[#allocation14_spill] sm:$0xff]  ;;  %v13652_v30 = vld [vmem:[#allocation19_spill] sm:$0xff] }
  0xb5   : > { %v8278_v13 = vadd.f32 %v1129_v33, %v8147_v11  ;;  %v8281_v38 = vadd.f32 %v1130_v42, %v8150_v3  ;;  %v8284_v35 = vadd.f32 %v1131_v55, %v8153_v10  ;;  %v8287_v32 = vadd.f32 %v1132_v61, %v8156_v12  ;;  %v5377_v11 = vld [vmem:[%s6757_s17 + $0x23] sm:$0xff]  ;;  %v5379_v3 = vld [vmem:[%s6757_s17 + $0x3b] sm:$0xff]  ;;  %v13646_v10 = vld [vmem:[#allocation16_spill] sm:$0xff] }
  0xb6   : > { %v8290_v14 = vadd.f32 %v1133_v37, %v13640_v17  ;;  %v8293_v16 = vadd.f32 %v1134_v19, %v13642_v7  ;;  %v13644_v42 = vld [vmem:[#allocation15_spill] sm:$0xff]  ;;  %v8303_v55 = vadd.f32 %v1136_v4, %v13646_v10  ;;  %v13648_v12 = vld [vmem:[#allocation17_spill] sm:$0xff]  ;;  %v13650_v37 = vld [vmem:[#allocation18_spill] sm:$0xff]  ;;  %v8316_v40 = vadd.f32 %v1139_v56, %v13652_v30 }
  0xb7   : > { %v8300_v5 = vadd.f32 %v1135_v28, %v13644_v42  ;;  %v8306_v61 = vadd.f32 %v1137_v57, %v13648_v12  ;;  %v8309_v15 = vadd.f32 %v1138_v58, %v13650_v37  ;;  %v13654_v20 = vld [vmem:[#allocation2_spill] sm:$0xff]  ;;  %v13656_v4 = vld [vmem:[#allocation3_spill] sm:$0xff]  ;;  %v13658_v57 = vld [vmem:[#allocation4_spill] sm:$0xff] }
  0xb8   : > { %13641 = vst [vmem:[#allocation13_spill] sm:$0xff] %v8290_v14  ;;  %13643 = vst [vmem:[#allocation14_spill] sm:$0xff] %v8293_v16  ;;  %v8319_v26 = vadd.f32 %v1140_v9, %v13654_v20  ;;  %v8322_v45 = vadd.f32 %v1141_v6, %v13656_v4  ;;  %v8325_v23 = vadd.f32 %v1142_v53, %v13658_v57  ;;  %v5384_v58 = vld [vmem:[%s6757_s17 + $0x7b] sm:$0xff]  ;;  %v5385_v0 = vld [vmem:[%s6757_s17 + $0x83] sm:$0xff] }
  0xb9   : > { %13645 = vst [vmem:[#allocation15_spill] sm:$0xff] %v8300_v5  ;;  %13647 = vst [vmem:[#allocation16_spill] sm:$0xff] %v8303_v55  ;;  %v5386_v50 = vld [vmem:[%s6757_s17 + $0x93] sm:$0xff]  ;;  %v5409_v56 = vld [vmem:[%s13465_s1 + $0xb] ss:$0 sm:$0xff] }
  0xba   : > { %13649 = vst [vmem:[#allocation17_spill] sm:$0xff] %v8306_v61  ;;  %13651 = vst [vmem:[#allocation18_spill] sm:$0xff] %v8309_v15  ;;  %v13660_v39 = vld [vmem:[#allocation5_spill] sm:$0xff]  ;;  %v13662_v33 = vld [vmem:[#allocation6_spill] sm:$0xff] }
  0xbb   : > { %13653 = vst [vmem:[#allocation19_spill] sm:$0xff] %v8316_v40  ;;  %13655 = vst [vmem:[#allocation2_spill] sm:$0xff] %v8319_v26  ;;  %v8334_v9 = vadd.f32 %v1143_v18, %v13660_v39  ;;  %v8337_v22 = vadd.f32 %v1144_v1, %v13662_v33  ;;  %v13664_v19 = vld [vmem:[#allocation7_spill] sm:$0xff]  ;;  %v13666_v34 = vld [vmem:[#allocation8_spill] sm:$0xff]  ;;  %v1220_v39 = vmul.f32 %v5409_v56, %v5376_v36 }
  0xbc   : > { %13657 = vst [vmem:[#allocation3_spill] sm:$0xff] %v8322_v45  ;;  %13659 = vst [vmem:[#allocation4_spill] sm:$0xff] %v8325_v23  ;;  %v8340_v25 = vadd.f32 %v1145_v43, %v13664_v19  ;;  %v8343_v28 = vadd.f32 %v1146_v52, %v13666_v34  ;;  %v5387_v6 = vld [vmem:[%s6757_s17 + $0x9b] sm:$0xff]  ;;  %v5388_v53 = vld [vmem:[%s6757_s17 + $0xab] sm:$0xff]  ;;  %v1221_v33 = vmul.f32 %v5409_v56, %v5377_v11 }
  0xbd   : > { %13661 = vst [vmem:[#allocation5_spill] sm:$0xff] %v8334_v9  ;;  %13663 = vst [vmem:[#allocation6_spill] sm:$0xff] %v8337_v22  ;;  %v5389_v17 = vld [vmem:[%s6757_s17 + $0xb3] sm:$0xff]  ;;  %v13670_v18 = vld [vmem:[#allocation10_spill] sm:$0xff]  ;;  %v1222_v19 = vmul.f32 %v5409_v56, %v5378_v49  ;;  %v1228_v36 = vmul.f32 %v5409_v56, %v5384_v58  ;;  %v1229_v11 = vmul.f32 %v5409_v56, %v5385_v0 }
  0xbe   : > { %13665 = vst [vmem:[#allocation7_spill] sm:$0xff] %v8340_v25  ;;  %13667 = vst [vmem:[#allocation8_spill] sm:$0xff] %v8343_v28  ;;  %v13668_v7 = vld [vmem:[#allocation9_spill] sm:$0xff]  ;;  %v8352_v10 = vadd.f32 %v1148_v62, %v13670_v18  ;;  %v13672_v1 = vld [vmem:[#allocation11_spill] sm:$0xff]  ;;  %v1223_v62 = vmul.f32 %v5409_v56, %v5379_v3  ;;  %v1225_v18 = vmul.f32 %v5409_v56, %v5381_v48 }
  0xbf   : > { %v8349_v42 = vadd.f32 %v1147_v63, %v13668_v7  ;;  %v8355_v12 = vadd.f32 %v1149_v44, %v13672_v1  ;;  %v13674_v43 = vld [vmem:[#allocation12_spill] sm:$0xff]  ;;  %v5390_v52 = vld [vmem:[%s6757_s17 + $0xc3] sm:$0xff]  ;;  %v5392_v20 = vld [vmem:[%s6757_s17 + $0xdb] sm:$0xff]  ;;  %v1224_v7 = vmul.f32 %v5409_v56, %v5380_v2  ;;  %v1226_v1 = vmul.f32 %v5409_v56, %v5382_v27 }
  0xc0   : > { %13671 = vst [vmem:[#allocation10_spill] sm:$0xff] %v8352_v10  ;;  %v8358_v37 = vadd.f32 %v1150_v51, %v13674_v43  ;;  %v5391_v30 = vld [vmem:[%s6757_s17 + $0xcb] sm:$0xff]  ;;  %v5393_v4 = vld [vmem:[%s6757_s17 + $0xe3] sm:$0xff]  ;;  %v5394_v57 = vld [vmem:[%s6757_s17 + $0xf3] sm:$0xff]  ;;  %v1227_v43 = vmul.f32 %v5409_v56, %v5383_v59  ;;  %v1230_v49 = vmul.f32 %v5409_v56, %v5386_v50  ;;  %v1232_v22 = vmul.f32 %v5409_v56, %v5388_v53 }
  0xc1   : > { %13669 = vst [vmem:[#allocation9_spill] sm:$0xff] %v8349_v42  ;;  %13673 = vst [vmem:[#allocation11_spill] sm:$0xff] %v8355_v12  ;;  %v5395_v63 = vld [vmem:[%s6757_s17 + $0xfb] sm:$0xff]  ;;  %v5396_v44 = vld [vmem:[%s6757_s17 + $0x10b] sm:$0xff]  ;;  %v1231_v42 = vmul.f32 %v5409_v56, %v5387_v6  ;;  %v1233_v9 = vmul.f32 %v5409_v56, %v5389_v17  ;;  %v1234_v23 = vmul.f32 %v5409_v56, %v5390_v52 }
  0xc2   : > { %13675 = vst [vmem:[#allocation12_spill] sm:$0xff] %v8358_v37  ;;  %v5397_v34 = vld [vmem:[%s6757_s17 + $0x113] sm:$0xff]  ;;  %v5398_v51 = vld [vmem:[%s6757_s17 + $0x123] sm:$0xff]  ;;  %v5399_v37 = vld [vmem:[%s6757_s17 + $0x12b] sm:$0xff]  ;;  %v1235_v2 = vmul.f32 %v5409_v56, %v5391_v30  ;;  %v1236_v59 = vmul.f32 %v5409_v56, %v5392_v20  ;;  %v1237_v26 = vmul.f32 %v5409_v56, %v5393_v4  ;;  %v1238_v40 = vmul.f32 %v5409_v56, %v5394_v57 }
  0xc3   : > { %v5400_v12 = vld [vmem:[%s6757_s17 + $0x13b] sm:$0xff]  ;;  %v5401_v10 = vld [vmem:[%s6757_s17 + $0x143] sm:$0xff]  ;;  %v5402_v3 = vld [vmem:[%s6757_s17 + $0x153] sm:$0xff]  ;;  %v1239_v15 = vmul.f32 %v5409_v56, %v5395_v63  ;;  %v1240_v61 = vmul.f32 %v5409_v56, %v5396_v44  ;;  %v1241_v55 = vmul.f32 %v5409_v56, %v5397_v34  ;;  %v1242_v58 = vmul.f32 %v5409_v56, %v5398_v51 }
  0xc4   : > { %v5403_v28 = vld [vmem:[%s6757_s17 + $0x15b] sm:$0xff]  ;;  %v5404_v25 = vld [vmem:[%s6757_s17 + $0x16b] sm:$0xff]  ;;  %v5405_v48 = vld [vmem:[%s6757_s17 + $0x173] sm:$0xff]  ;;  %v1243_v0 = vmul.f32 %v5409_v56, %v5399_v37  ;;  %v1244_v50 = vmul.f32 %v5409_v56, %v5400_v12  ;;  %v1245_v6 = vmul.f32 %v5409_v56, %v5401_v10  ;;  %v1246_v5 = vmul.f32 %v5409_v56, %v5402_v3 }
  0xc5   : > { %v5406_v27 = vld [vmem:[%s6757_s17 + $0x183] sm:$0xff]  ;;  %v5407_v45 = vld [vmem:[%s6757_s17 + $0x18b] sm:$0xff]  ;;  %v1247_v16 = vmul.f32 %v5409_v56, %v5403_v28  ;;  %v1248_v14 = vmul.f32 %v5409_v56, %v5404_v25  ;;  %v1249_v53 = vmul.f32 %v5409_v56, %v5405_v48  ;;  %v8379_v30 = vadd.f32 %v1220_v39, %v8248_v60  ;;  %v5412_v37 = vld [vmem:[%s6757_s17 + $0x34] sm:$0xff] }
  0xc6   : > { %v1250_v17 = vmul.f32 %v5409_v56, %v5406_v27  ;;  %v1251_v52 = vmul.f32 %v5409_v56, %v5407_v45  ;;  %v8382_v20 = vadd.f32 %v1221_v33, %v8251_v29  ;;  %v8385_v4 = vadd.f32 %v1222_v19, %v8254_v8  ;;  %v5410_v12 = vld [vmem:[%s6757_s17 + $0x1c] sm:$0xff]  ;;  %v5414_v39 = vld [vmem:[%s6757_s17 + $0x4c] sm:$0xff]  ;;  %v5415_v33 = vld [vmem:[%s6757_s17 + $0x54] sm:$0xff] }
  0xc7   : > { %v8388_v10 = vadd.f32 %v1223_v62, %v8257_v31  ;;  %v8391_v25 = vadd.f32 %v1224_v7, %v8260_v47  ;;  %v8394_v45 = vadd.f32 %v1225_v18, %v8263_v54  ;;  %v8397_v60 = vadd.f32 %v1226_v1, %v8266_v21  ;;  %v5416_v19 = vld [vmem:[%s6757_s17 + $0x64] sm:$0xff]  ;;  %v5417_v62 = vld [vmem:[%s6757_s17 + $0x6c] sm:$0xff] }
  0xc8   : > { %v8400_v29 = vadd.f32 %v1227_v43, %v8269_v46  ;;  %v8403_v8 = vadd.f32 %v1228_v36, %v8272_v41  ;;  %v8406_v31 = vadd.f32 %v1229_v11, %v8275_v24  ;;  %v8409_v47 = vadd.f32 %v1230_v49, %v8278_v13  ;;  %v13676_v41 = vld [vmem:[#allocation13_spill] sm:$0xff]  ;;  %v13678_v24 = vld [vmem:[#allocation14_spill] sm:$0xff]  ;;  %v13688_v44 = vld [vmem:[#allocation19_spill] sm:$0xff] }
  0xc9   : > { %v8412_v54 = vadd.f32 %v1231_v42, %v8281_v38  ;;  %v8415_v21 = vadd.f32 %v1232_v22, %v8284_v35  ;;  %v8418_v46 = vadd.f32 %v1233_v9, %v8287_v32  ;;  %v8421_v56 = vadd.f32 %v1234_v23, %v13676_v41  ;;  %v5411_v13 = vld [vmem:[%s6757_s17 + $0x24] sm:$0xff]  ;;  %v5413_v38 = vld [vmem:[%s6757_s17 + $0x3c] sm:$0xff]  ;;  %v13682_v35 = vld [vmem:[#allocation16_spill] sm:$0xff] }
  0xca   : > { %v8424_v28 = vadd.f32 %v1235_v2, %v13678_v24  ;;  %v13680_v42 = vld [vmem:[#allocation15_spill] sm:$0xff]  ;;  %v8434_v22 = vadd.f32 %v1237_v26, %v13682_v35  ;;  %v13684_v32 = vld [vmem:[#allocation17_spill] sm:$0xff]  ;;  %v13686_v23 = vld [vmem:[#allocation18_spill] sm:$0xff]  ;;  %v8447_v34 = vadd.f32 %v1240_v61, %v13688_v44 }
  0xcb   : > { %13677 = vst [vmem:[#allocation13_spill] sm:$0xff] %v8421_v56  ;;  %v8431_v57 = vadd.f32 %v1236_v59, %v13680_v42  ;;  %v8437_v9 = vadd.f32 %v1238_v40, %v13684_v32  ;;  %v8440_v63 = vadd.f32 %v1239_v15, %v13686_v23  ;;  %v13690_v51 = vld [vmem:[#allocation2_spill] sm:$0xff]  ;;  %v13692_v26 = vld [vmem:[#allocation3_spill] sm:$0xff]  ;;  %v13694_v40 = vld [vmem:[#allocation4_spill] sm:$0xff] }
  0xcc   : > { %13679 = vst [vmem:[#allocation14_spill] sm:$0xff] %v8424_v28  ;;  %13683 = vst [vmem:[#allocation16_spill] sm:$0xff] %v8434_v22  ;;  %v8450_v7 = vadd.f32 %v1241_v55, %v13690_v51  ;;  %v8453_v18 = vadd.f32 %v1242_v58, %v13692_v26  ;;  %v8456_v1 = vadd.f32 %v1243_v0, %v13694_v40  ;;  %v5418_v15 = vld [vmem:[%s6757_s17 + $0x7c] sm:$0xff]  ;;  %v5419_v43 = vld [vmem:[%s6757_s17 + $0x84] sm:$0xff] }
  0xcd   : > { %13681 = vst [vmem:[#allocation15_spill] sm:$0xff] %v8431_v57  ;;  %13685 = vst [vmem:[#allocation17_spill] sm:$0xff] %v8437_v9  ;;  %v5420_v36 = vld [vmem:[%s6757_s17 + $0x94] sm:$0xff]  ;;  %v5443_v61 = vld [vmem:[%s13465_s1 + $0xc] ss:$0 sm:$0xff] }
  0xce   : > { %13687 = vst [vmem:[#allocation18_spill] sm:$0xff] %v8440_v63  ;;  %13689 = vst [vmem:[#allocation19_spill] sm:$0xff] %v8447_v34  ;;  %v13696_v11 = vld [vmem:[#allocation5_spill] sm:$0xff]  ;;  %v13698_v49 = vld [vmem:[#allocation6_spill] sm:$0xff] }
  0xcf   : > { %13691 = vst [vmem:[#allocation2_spill] sm:$0xff] %v8450_v7  ;;  %13693 = vst [vmem:[#allocation3_spill] sm:$0xff] %v8453_v18  ;;  %v8465_v55 = vadd.f32 %v1244_v50, %v13696_v11  ;;  %v8468_v3 = vadd.f32 %v1245_v6, %v13698_v49  ;;  %v13700_v2 = vld [vmem:[#allocation7_spill] sm:$0xff]  ;;  %v13702_v27 = vld [vmem:[#allocation8_spill] sm:$0xff]  ;;  %v1321_v11 = vmul.f32 %v5443_v61, %v5410_v12 }
  0xd0   : > { %13695 = vst [vmem:[#allocation4_spill] sm:$0xff] %v8456_v1  ;;  %v8471_v48 = vadd.f32 %v1246_v5, %v13700_v2  ;;  %v8474_v59 = vadd.f32 %v1247_v16, %v13702_v27  ;;  %v5421_v58 = vld [vmem:[%s6757_s17 + $0x9c] sm:$0xff]  ;;  %v5422_v0 = vld [vmem:[%s6757_s17 + $0xac] sm:$0xff]  ;;  %v5423_v41 = vld [vmem:[%s6757_s17 + $0xb4] sm:$0xff]  ;;  %v1322_v49 = vmul.f32 %v5443_v61, %v5411_v13  ;;  %v1323_v2 = vmul.f32 %v5443_v61, %v5412_v37 }
  0xd1   : > { %13697 = vst [vmem:[#allocation5_spill] sm:$0xff] %v8465_v55  ;;  %13699 = vst [vmem:[#allocation6_spill] sm:$0xff] %v8468_v3  ;;  %v13704_v24 = vld [vmem:[#allocation9_spill] sm:$0xff]  ;;  %v13706_v50 = vld [vmem:[#allocation10_spill] sm:$0xff]  ;;  %v1329_v12 = vmul.f32 %v5443_v61, %v5418_v15  ;;  %v1330_v13 = vmul.f32 %v5443_v61, %v5419_v43  ;;  %v1331_v37 = vmul.f32 %v5443_v61, %v5420_v36 }
  0xd2   : > { %13701 = vst [vmem:[#allocation7_spill] sm:$0xff] %v8471_v48  ;;  %13703 = vst [vmem:[#allocation8_spill] sm:$0xff] %v8474_v59  ;;  %v8480_v42 = vadd.f32 %v1248_v14, %v13704_v24  ;;  %v8483_v35 = vadd.f32 %v1249_v53, %v13706_v50  ;;  %v13708_v6 = vld [vmem:[#allocation11_spill] sm:$0xff]  ;;  %v13710_v5 = vld [vmem:[#allocation12_spill] sm:$0xff]  ;;  %v1324_v53 = vmul.f32 %v5443_v61, %v5413_v38 }
  0xd3   : > { %v8486_v32 = vadd.f32 %v1250_v17, %v13708_v6  ;;  %v8489_v23 = vadd.f32 %v1251_v52, %v13710_v5  ;;  %v5424_v16 = vld [vmem:[%s6757_s17 + $0xc4] sm:$0xff]  ;;  %v5425_v44 = vld [vmem:[%s6757_s17 + $0xcc] sm:$0xff]  ;;  %v5426_v51 = vld [vmem:[%s6757_s17 + $0xdc] sm:$0xff]  ;;  %v1325_v24 = vmul.f32 %v5443_v61, %v5414_v39  ;;  %v1326_v50 = vmul.f32 %v5443_v61, %v5415_v33 }
  0xd4   : > { %13705 = vst [vmem:[#allocation9_spill] sm:$0xff] %v8480_v42  ;;  %13707 = vst [vmem:[#allocation10_spill] sm:$0xff] %v8483_v35  ;;  %v5427_v26 = vld [vmem:[%s6757_s17 + $0xe4] sm:$0xff]  ;;  %v5428_v40 = vld [vmem:[%s6757_s17 + $0xf4] sm:$0xff]  ;;  %v1327_v6 = vmul.f32 %v5443_v61, %v5416_v19  ;;  %v1328_v5 = vmul.f32 %v5443_v61, %v5417_v62  ;;  %v1332_v42 = vmul.f32 %v5443_v61, %v5421_v58 }
  0xd5   : > { %13709 = vst [vmem:[#allocation11_spill] sm:$0xff] %v8486_v32  ;;  %13711 = vst [vmem:[#allocation12_spill] sm:$0xff] %v8489_v23  ;;  %v5429_v14 = vld [vmem:[%s6757_s17 + $0xfc] sm:$0xff]  ;;  %v5430_v17 = vld [vmem:[%s6757_s17 + $0x10c] sm:$0xff]  ;;  %v1333_v3 = vmul.f32 %v5443_v61, %v5422_v0  ;;  %v1334_v55 = vmul.f32 %v5443_v61, %v5423_v41  ;;  %v1335_v1 = vmul.f32 %v5443_v61, %v5424_v16 }
  0xd6   : > { %v5431_v27 = vld [vmem:[%s6757_s17 + $0x114] sm:$0xff]  ;;  %v5432_v52 = vld [vmem:[%s6757_s17 + $0x124] sm:$0xff]  ;;  %v5433_v23 = vld [vmem:[%s6757_s17 + $0x12c] sm:$0xff]  ;;  %v1336_v39 = vmul.f32 %v5443_v61, %v5425_v44  ;;  %v1337_v62 = vmul.f32 %v5443_v61, %v5426_v51  ;;  %v1338_v7 = vmul.f32 %v5443_v61, %v5427_v26  ;;  %v1339_v34 = vmul.f32 %v5443_v61, %v5428_v40 }
  0xd7   : > { %v5434_v32 = vld [vmem:[%s6757_s17 + $0x13c] sm:$0xff]  ;;  %v5435_v35 = vld [vmem:[%s6757_s17 + $0x144] sm:$0xff]  ;;  %v5436_v38 = vld [vmem:[%s6757_s17 + $0x154] sm:$0xff]  ;;  %v1340_v63 = vmul.f32 %v5443_v61, %v5429_v14  ;;  %v1341_v9 = vmul.f32 %v5443_v61, %v5430_v17  ;;  %v1342_v22 = vmul.f32 %v5443_v61, %v5431_v27  ;;  %v1343_v15 = vmul.f32 %v5443_v61, %v5432_v52 }
  0xd8   : > { %v5437_v59 = vld [vmem:[%s6757_s17 + $0x15c] sm:$0xff]  ;;  %v5438_v48 = vld [vmem:[%s6757_s17 + $0x16c] sm:$0xff]  ;;  %v5439_v33 = vld [vmem:[%s6757_s17 + $0x174] sm:$0xff]  ;;  %v1344_v43 = vmul.f32 %v5443_v61, %v5433_v23  ;;  %v1345_v36 = vmul.f32 %v5443_v61, %v5434_v32  ;;  %v1346_v58 = vmul.f32 %v5443_v61, %v5435_v35  ;;  %v1347_v57 = vmul.f32 %v5443_v61, %v5436_v38 }
  0xd9   : > { %v5440_v19 = vld [vmem:[%s6757_s17 + $0x184] sm:$0xff]  ;;  %v5441_v18 = vld [vmem:[%s6757_s17 + $0x18c] sm:$0xff]  ;;  %v1348_v28 = vmul.f32 %v5443_v61, %v5437_v59  ;;  %v1349_v56 = vmul.f32 %v5443_v61, %v5438_v48  ;;  %v1350_v0 = vmul.f32 %v5443_v61, %v5439_v33  ;;  %v8510_v44 = vadd.f32 %v1321_v11, %v8379_v30  ;;  %v5446_v23 = vld [vmem:[%s6757_s17 + $0x35] sm:$0xff] }
  0xda   : > { %v1351_v41 = vmul.f32 %v5443_v61, %v5440_v19  ;;  %v1352_v16 = vmul.f32 %v5443_v61, %v5441_v18  ;;  %v8513_v51 = vadd.f32 %v1322_v49, %v8382_v20  ;;  %v8516_v26 = vadd.f32 %v1323_v2, %v8385_v4  ;;  %v5444_v32 = vld [vmem:[%s6757_s17 + $0x1d] sm:$0xff]  ;;  %v5448_v11 = vld [vmem:[%s6757_s17 + $0x4d] sm:$0xff]  ;;  %v5449_v49 = vld [vmem:[%s6757_s17 + $0x55] sm:$0xff] }
  0xdb   : > { %v8519_v35 = vadd.f32 %v1324_v53, %v8388_v10  ;;  %v8522_v48 = vadd.f32 %v1325_v24, %v8391_v25  ;;  %v8525_v18 = vadd.f32 %v1326_v50, %v8394_v45  ;;  %v8528_v30 = vadd.f32 %v1327_v6, %v8397_v60  ;;  %v5450_v2 = vld [vmem:[%s6757_s17 + $0x65] sm:$0xff]  ;;  %v5451_v53 = vld [vmem:[%s6757_s17 + $0x6d] sm:$0xff] }
  0xdc   : > { %v8531_v20 = vadd.f32 %v1328_v5, %v8400_v29  ;;  %v8534_v4 = vadd.f32 %v1329_v12, %v8403_v8  ;;  %v8537_v10 = vadd.f32 %v1330_v13, %v8406_v31  ;;  %v8540_v25 = vadd.f32 %v1331_v37, %v8409_v47  ;;  %v13712_v8 = vld [vmem:[#allocation13_spill] sm:$0xff]  ;;  %v13714_v31 = vld [vmem:[#allocation14_spill] sm:$0xff]  ;;  %v13724_v17 = vld [vmem:[#allocation19_spill] sm:$0xff] }
  0xdd   : > { %v8543_v45 = vadd.f32 %v1332_v42, %v8412_v54  ;;  %v8546_v60 = vadd.f32 %v1333_v3, %v8415_v21  ;;  %v8549_v29 = vadd.f32 %v1334_v55, %v8418_v46  ;;  %v8552_v61 = vadd.f32 %v1335_v1, %v13712_v8  ;;  %v5445_v47 = vld [vmem:[%s6757_s17 + $0x25] sm:$0xff]  ;;  %v5447_v54 = vld [vmem:[%s6757_s17 + $0x3d] sm:$0xff]  ;;  %v13718_v21 = vld [vmem:[#allocation16_spill] sm:$0xff] }
  0xde   : > { %v8555_v59 = vadd.f32 %v1336_v39, %v13714_v31  ;;  %v13716_v42 = vld [vmem:[#allocation15_spill] sm:$0xff]  ;;  %v8565_v3 = vadd.f32 %v1338_v7, %v13718_v21  ;;  %v13720_v46 = vld [vmem:[#allocation17_spill] sm:$0xff]  ;;  %v13722_v1 = vld [vmem:[#allocation18_spill] sm:$0xff]  ;;  %v8578_v27 = vadd.f32 %v1341_v9, %v13724_v17 }
  0xdf   : > { %13713 = vst [vmem:[#allocation13_spill] sm:$0xff] %v8552_v61  ;;  %v8562_v40 = vadd.f32 %v1337_v62, %v13716_v42  ;;  %v8568_v55 = vadd.f32 %v1339_v34, %v13720_v46  ;;  %v8571_v14 = vadd.f32 %v1340_v63, %v13722_v1  ;;  %v13726_v52 = vld [vmem:[#allocation2_spill] sm:$0xff]  ;;  %v13728_v7 = vld [vmem:[#allocation3_spill] sm:$0xff]  ;;  %v13730_v34 = vld [vmem:[#allocation4_spill] sm:$0xff] }
  0xe0   : > { %13715 = vst [vmem:[#allocation14_spill] sm:$0xff] %v8555_v59  ;;  %13719 = vst [vmem:[#allocation16_spill] sm:$0xff] %v8565_v3  ;;  %v8581_v24 = vadd.f32 %v1342_v22, %v13726_v52  ;;  %v8584_v50 = vadd.f32 %v1343_v15, %v13728_v7  ;;  %v8587_v6 = vadd.f32 %v1344_v43, %v13730_v34  ;;  %v5452_v63 = vld [vmem:[%s6757_s17 + $0x7d] sm:$0xff]  ;;  %v5453_v5 = vld [vmem:[%s6757_s17 + $0x85] sm:$0xff] }
  0xe1   : > { %13717 = vst [vmem:[#allocation15_spill] sm:$0xff] %v8562_v40  ;;  %13721 = vst [vmem:[#allocation17_spill] sm:$0xff] %v8568_v55  ;;  %v5454_v12 = vld [vmem:[%s6757_s17 + $0x95] sm:$0xff]  ;;  %v5477_v9 = vld [vmem:[%s13465_s1 + $0xd] ss:$0 sm:$0xff] }
  0xe2   : > { %13723 = vst [vmem:[#allocation18_spill] sm:$0xff] %v8571_v14  ;;  %13725 = vst [vmem:[#allocation19_spill] sm:$0xff] %v8578_v27  ;;  %v13732_v13 = vld [vmem:[#allocation5_spill] sm:$0xff]  ;;  %v13734_v37 = vld [vmem:[#allocation6_spill] sm:$0xff] }
  0xe3   : > { %13727 = vst [vmem:[#allocation2_spill] sm:$0xff] %v8581_v24  ;;  %13729 = vst [vmem:[#allocation3_spill] sm:$0xff] %v8584_v50  ;;  %v8596_v22 = vadd.f32 %v1345_v36, %v13732_v13  ;;  %v8599_v38 = vadd.f32 %v1346_v58, %v13734_v37  ;;  %v13736_v39 = vld [vmem:[#allocation7_spill] sm:$0xff]  ;;  %v13738_v19 = vld [vmem:[#allocation8_spill] sm:$0xff]  ;;  %v1422_v13 = vmul.f32 %v5477_v9, %v5444_v32 }
  0xe4   : > { %13731 = vst [vmem:[#allocation4_spill] sm:$0xff] %v8587_v6  ;;  %v8602_v33 = vadd.f32 %v1347_v57, %v13736_v39  ;;  %v8605_v62 = vadd.f32 %v1348_v28, %v13738_v19  ;;  %v5455_v15 = vld [vmem:[%s6757_s17 + $0x9d] sm:$0xff]  ;;  %v5456_v43 = vld [vmem:[%s6757_s17 + $0xad] sm:$0xff]  ;;  %v5457_v8 = vld [vmem:[%s6757_s17 + $0xb5] sm:$0xff]  ;;  %v1423_v37 = vmul.f32 %v5477_v9, %v5445_v47  ;;  %v1424_v39 = vmul.f32 %v5477_v9, %v5446_v23 }
  0xe5   : > { %13733 = vst [vmem:[#allocation5_spill] sm:$0xff] %v8596_v22  ;;  %13735 = vst [vmem:[#allocation6_spill] sm:$0xff] %v8599_v38  ;;  %v13740_v31 = vld [vmem:[#allocation9_spill] sm:$0xff]  ;;  %v13742_v36 = vld [vmem:[#allocation10_spill] sm:$0xff]  ;;  %v1430_v32 = vmul.f32 %v5477_v9, %v5452_v63  ;;  %v1431_v47 = vmul.f32 %v5477_v9, %v5453_v5  ;;  %v1432_v23 = vmul.f32 %v5477_v9, %v5454_v12 }
  0xe6   : > { %13737 = vst [vmem:[#allocation7_spill] sm:$0xff] %v8602_v33  ;;  %13739 = vst [vmem:[#allocation8_spill] sm:$0xff] %v8605_v62  ;;  %v8611_v42 = vadd.f32 %v1349_v56, %v13740_v31  ;;  %v8614_v21 = vadd.f32 %v1350_v0, %v13742_v36  ;;  %v13744_v58 = vld [vmem:[#allocation11_spill] sm:$0xff]  ;;  %v13746_v57 = vld [vmem:[#allocation12_spill] sm:$0xff]  ;;  %v1425_v0 = vmul.f32 %v5477_v9, %v5447_v54 }
  0xe7   : > { %v8617_v46 = vadd.f32 %v1351_v41, %v13744_v58  ;;  %v8620_v1 = vadd.f32 %v1352_v16, %v13746_v57  ;;  %v5458_v28 = vld [vmem:[%s6757_s17 + $0xc5] sm:$0xff]  ;;  %v5459_v17 = vld [vmem:[%s6757_s17 + $0xcd] sm:$0xff]  ;;  %v5460_v52 = vld [vmem:[%s6757_s17 + $0xdd] sm:$0xff]  ;;  %v1426_v31 = vmul.f32 %v5477_v9, %v5448_v11  ;;  %v1427_v36 = vmul.f32 %v5477_v9, %v5449_v49 }
  0xe8   : > { %13741 = vst [vmem:[#allocation9_spill] sm:$0xff] %v8611_v42  ;;  %13743 = vst [vmem:[#allocation10_spill] sm:$0xff] %v8614_v21  ;;  %v5461_v7 = vld [vmem:[%s6757_s17 + $0xe5] sm:$0xff]  ;;  %v5462_v34 = vld [vmem:[%s6757_s17 + $0xf5] sm:$0xff]  ;;  %v1428_v58 = vmul.f32 %v5477_v9, %v5450_v2  ;;  %v1429_v57 = vmul.f32 %v5477_v9, %v5451_v53  ;;  %v1433_v42 = vmul.f32 %v5477_v9, %v5455_v15 }
  0xe9   : > { %13745 = vst [vmem:[#allocation11_spill] sm:$0xff] %v8617_v46  ;;  %13747 = vst [vmem:[#allocation12_spill] sm:$0xff] %v8620_v1  ;;  %v5463_v56 = vld [vmem:[%s6757_s17 + $0xfd] sm:$0xff]  ;;  %v5464_v41 = vld [vmem:[%s6757_s17 + $0x10d] sm:$0xff]  ;;  %v1434_v38 = vmul.f32 %v5477_v9, %v5456_v43  ;;  %v1435_v22 = vmul.f32 %v5477_v9, %v5457_v8  ;;  %v1436_v6 = vmul.f32 %v5477_v9, %v5458_v28 }
  0xea   : > { %v5465_v19 = vld [vmem:[%s6757_s17 + $0x115] sm:$0xff]  ;;  %v5466_v16 = vld [vmem:[%s6757_s17 + $0x125] sm:$0xff]  ;;  %v5467_v1 = vld [vmem:[%s6757_s17 + $0x12d] sm:$0xff]  ;;  %v1437_v11 = vmul.f32 %v5477_v9, %v5459_v17  ;;  %v1438_v53 = vmul.f32 %v5477_v9, %v5460_v52  ;;  %v1439_v24 = vmul.f32 %v5477_v9, %v5461_v7  ;;  %v1440_v27 = vmul.f32 %v5477_v9, %v5462_v34 }
  0xeb   : > { %v5468_v46 = vld [vmem:[%s6757_s17 + $0x13d] sm:$0xff]  ;;  %v5469_v21 = vld [vmem:[%s6757_s17 + $0x145] sm:$0xff]  ;;  %v5470_v54 = vld [vmem:[%s6757_s17 + $0x155] sm:$0xff]  ;;  %v1441_v14 = vmul.f32 %v5477_v9, %v5463_v56  ;;  %v1442_v55 = vmul.f32 %v5477_v9, %v5464_v41  ;;  %v1443_v3 = vmul.f32 %v5477_v9, %v5465_v19  ;;  %v1444_v63 = vmul.f32 %v5477_v9, %v5466_v16 }
  0xec   : > { %v5471_v62 = vld [vmem:[%s6757_s17 + $0x15d] sm:$0xff]  ;;  %v5472_v33 = vld [vmem:[%s6757_s17 + $0x16d] sm:$0xff]  ;;  %v5473_v49 = vld [vmem:[%s6757_s17 + $0x175] sm:$0xff]  ;;  %v1445_v5 = vmul.f32 %v5477_v9, %v5467_v1  ;;  %v1446_v12 = vmul.f32 %v5477_v9, %v5468_v46  ;;  %v1447_v15 = vmul.f32 %v5477_v9, %v5469_v21  ;;  %v1448_v40 = vmul.f32 %v5477_v9, %v5470_v54 }
  0xed   : > { %v5474_v2 = vld [vmem:[%s6757_s17 + $0x185] sm:$0xff]  ;;  %v5475_v50 = vld [vmem:[%s6757_s17 + $0x18d] sm:$0xff]  ;;  %v1449_v59 = vmul.f32 %v5477_v9, %v5471_v62  ;;  %v1450_v61 = vmul.f32 %v5477_v9, %v5472_v33  ;;  %v1451_v43 = vmul.f32 %v5477_v9, %v5473_v49  ;;  %v8641_v17 = vadd.f32 %v1422_v13, %v8510_v44  ;;  %v5480_v1 = vld [vmem:[%s6757_s17 + $0x36] sm:$0xff] }
  0xee   : > { %v1452_v8 = vmul.f32 %v5477_v9, %v5474_v2  ;;  %v1453_v28 = vmul.f32 %v5477_v9, %v5475_v50  ;;  %v8644_v52 = vadd.f32 %v1423_v37, %v8513_v51  ;;  %v8647_v7 = vadd.f32 %v1424_v39, %v8516_v26  ;;  %v5478_v46 = vld [vmem:[%s6757_s17 + $0x1e] sm:$0xff]  ;;  %v5482_v13 = vld [vmem:[%s6757_s17 + $0x4e] sm:$0xff]  ;;  %v5483_v37 = vld [vmem:[%s6757_s17 + $0x56] sm:$0xff] }
  0xef   : > { %v8650_v21 = vadd.f32 %v1425_v0, %v8519_v35  ;;  %v8653_v33 = vadd.f32 %v1426_v31, %v8522_v48  ;;  %v8656_v50 = vadd.f32 %v1427_v36, %v8525_v18  ;;  %v8659_v44 = vadd.f32 %v1428_v58, %v8528_v30  ;;  %v5484_v39 = vld [vmem:[%s6757_s17 + $0x66] sm:$0xff]  ;;  %v5485_v0 = vld [vmem:[%s6757_s17 + $0x6e] sm:$0xff] }
  0xf0   : > { %v8662_v51 = vadd.f32 %v1429_v57, %v8531_v20  ;;  %v8665_v26 = vadd.f32 %v1430_v32, %v8534_v4  ;;  %v8668_v35 = vadd.f32 %v1431_v47, %v8537_v10  ;;  %v8671_v48 = vadd.f32 %v1432_v23, %v8540_v25  ;;  %v13748_v4 = vld [vmem:[#allocation13_spill] sm:$0xff]  ;;  %v13750_v10 = vld [vmem:[#allocation14_spill] sm:$0xff]  ;;  %v13760_v41 = vld [vmem:[#allocation19_spill] sm:$0xff] }
  0xf1   : > { %v8674_v18 = vadd.f32 %v1433_v42, %v8543_v45  ;;  %v8677_v30 = vadd.f32 %v1434_v38, %v8546_v60  ;;  %v8680_v20 = vadd.f32 %v1435_v22, %v8549_v29  ;;  %v8683_v9 = vadd.f32 %v1436_v6, %v13748_v4  ;;  %v5479_v25 = vld [vmem:[%s6757_s17 + $0x26] sm:$0xff]  ;;  %v5481_v45 = vld [vmem:[%s6757_s17 + $0x3e] sm:$0xff]  ;;  %v13754_v60 = vld [vmem:[#allocation16_spill] sm:$0xff] }
  0xf2   : > { %v8686_v62 = vadd.f32 %v1437_v11, %v13750_v10  ;;  %v13752_v42 = vld [vmem:[#allocation15_spill] sm:$0xff]  ;;  %v8696_v38 = vadd.f32 %v1439_v24, %v13754_v60  ;;  %v13756_v29 = vld [vmem:[#allocation17_spill] sm:$0xff]  ;;  %v13758_v6 = vld [vmem:[#allocation18_spill] sm:$0xff]  ;;  %v8709_v19 = vadd.f32 %v1442_v55, %v13760_v41 }
  0xf3   : > { %13749 = vst [vmem:[#allocation13_spill] sm:$0xff] %v8683_v9  ;;  %v8693_v34 = vadd.f32 %v1438_v53, %v13752_v42  ;;  %v8699_v22 = vadd.f32 %v1440_v27, %v13756_v29  ;;  %v8702_v56 = vadd.f32 %v1441_v14, %v13758_v6  ;;  %v13762_v16 = vld [vmem:[#allocation2_spill] sm:$0xff]  ;;  %v13764_v24 = vld [vmem:[#allocation3_spill] sm:$0xff]  ;;  %v13766_v27 = vld [vmem:[#allocation4_spill] sm:$0xff] }
  0xf4   : > { %13751 = vst [vmem:[#allocation14_spill] sm:$0xff] %v8686_v62  ;;  %13755 = vst [vmem:[#allocation16_spill] sm:$0xff] %v8696_v38  ;;  %v8712_v31 = vadd.f32 %v1443_v3, %v13762_v16  ;;  %v8715_v36 = vadd.f32 %v1444_v63, %v13764_v24  ;;  %v8718_v58 = vadd.f32 %v1445_v5, %v13766_v27  ;;  %v5486_v14 = vld [vmem:[%s6757_s17 + $0x7e] sm:$0xff]  ;;  %v5487_v57 = vld [vmem:[%s6757_s17 + $0x86] sm:$0xff] }
  0xf5   : > { %13753 = vst [vmem:[#allocation15_spill] sm:$0xff] %v8693_v34  ;;  %13757 = vst [vmem:[#allocation17_spill] sm:$0xff] %v8699_v22  ;;  %v5488_v32 = vld [vmem:[%s6757_s17 + $0x96] sm:$0xff]  ;;  %v5511_v55 = vld [vmem:[%s13465_s1 + $0xe] ss:$0 sm:$0xff] }
  0xf6   : > { %13759 = vst [vmem:[#allocation18_spill] sm:$0xff] %v8702_v56  ;;  %13761 = vst [vmem:[#allocation19_spill] sm:$0xff] %v8709_v19  ;;  %v13768_v47 = vld [vmem:[#allocation5_spill] sm:$0xff]  ;;  %v13770_v23 = vld [vmem:[#allocation6_spill] sm:$0xff] }
  0xf7   : > { %13763 = vst [vmem:[#allocation2_spill] sm:$0xff] %v8712_v31  ;;  %13765 = vst [vmem:[#allocation3_spill] sm:$0xff] %v8715_v36  ;;  %v8727_v3 = vadd.f32 %v1446_v12, %v13768_v47  ;;  %v8730_v54 = vadd.f32 %v1447_v15, %v13770_v23  ;;  %v13772_v11 = vld [vmem:[#allocation7_spill] sm:$0xff]  ;;  %v13774_v2 = vld [vmem:[#allocation8_spill] sm:$0xff]  ;;  %v1523_v47 = vmul.f32 %v5511_v55, %v5478_v46 }
  0xf8   : > { %13767 = vst [vmem:[#allocation4_spill] sm:$0xff] %v8718_v58  ;;  %v8733_v49 = vadd.f32 %v1448_v40, %v13772_v11  ;;  %v8736_v53 = vadd.f32 %v1449_v59, %v13774_v2  ;;  %v5489_v63 = vld [vmem:[%s6757_s17 + $0x9e] sm:$0xff]  ;;  %v5490_v5 = vld [vmem:[%s6757_s17 + $0xae] sm:$0xff]  ;;  %v5491_v4 = vld [vmem:[%s6757_s17 + $0xb6] sm:$0xff]  ;;  %v1524_v23 = vmul.f32 %v5511_v55, %v5479_v25  ;;  %v1525_v11 = vmul.f32 %v5511_v55, %v5480_v1 }
  0xf9   : > { %13769 = vst [vmem:[#allocation5_spill] sm:$0xff] %v8727_v3  ;;  %13771 = vst [vmem:[#allocation6_spill] sm:$0xff] %v8730_v54  ;;  %v13776_v10 = vld [vmem:[#allocation9_spill] sm:$0xff]  ;;  %v13778_v12 = vld [vmem:[#allocation10_spill] sm:$0xff]  ;;  %v1531_v46 = vmul.f32 %v5511_v55, %v5486_v14  ;;  %v1532_v25 = vmul.f32 %v5511_v55, %v5487_v57  ;;  %v1533_v1 = vmul.f32 %v5511_v55, %v5488_v32 }
  0xfa   : > { %13773 = vst [vmem:[#allocation7_spill] sm:$0xff] %v8733_v49  ;;  %13775 = vst [vmem:[#allocation8_spill] sm:$0xff] %v8736_v53  ;;  %v8742_v42 = vadd.f32 %v1450_v61, %v13776_v10  ;;  %v8745_v60 = vadd.f32 %v1451_v43, %v13778_v12  ;;  %v13780_v15 = vld [vmem:[#allocation11_spill] sm:$0xff]  ;;  %v13782_v40 = vld [vmem:[#allocation12_spill] sm:$0xff]  ;;  %v1526_v43 = vmul.f32 %v5511_v55, %v5481_v45 }
  0xfb   : > { %v8748_v29 = vadd.f32 %v1452_v8, %v13780_v15  ;;  %v8751_v6 = vadd.f32 %v1453_v28, %v13782_v40  ;;  %v5492_v59 = vld [vmem:[%s6757_s17 + $0xc6] sm:$0xff]  ;;  %v5493_v41 = vld [vmem:[%s6757_s17 + $0xce] sm:$0xff]  ;;  %v5494_v16 = vld [vmem:[%s6757_s17 + $0xde] sm:$0xff]  ;;  %v1527_v10 = vmul.f32 %v5511_v55, %v5482_v13  ;;  %v1528_v12 = vmul.f32 %v5511_v55, %v5483_v37 }
  0xfc   : > { %13777 = vst [vmem:[#allocation9_spill] sm:$0xff] %v8742_v42  ;;  %13779 = vst [vmem:[#allocation10_spill] sm:$0xff] %v8745_v60  ;;  %v5495_v24 = vld [vmem:[%s6757_s17 + $0xe6] sm:$0xff]  ;;  %v5496_v27 = vld [vmem:[%s6757_s17 + $0xf6] sm:$0xff]  ;;  %v1529_v15 = vmul.f32 %v5511_v55, %v5484_v39  ;;  %v1530_v40 = vmul.f32 %v5511_v55, %v5485_v0  ;;  %v1534_v42 = vmul.f32 %v5511_v55, %v5489_v63 }
  0xfd   : > { %13781 = vst [vmem:[#allocation11_spill] sm:$0xff] %v8748_v29  ;;  %13783 = vst [vmem:[#allocation12_spill] sm:$0xff] %v8751_v6  ;;  %v5497_v61 = vld [vmem:[%s6757_s17 + $0xfe] sm:$0xff]  ;;  %v5498_v8 = vld [vmem:[%s6757_s17 + $0x10e] sm:$0xff]  ;;  %v1535_v54 = vmul.f32 %v5511_v55, %v5490_v5  ;;  %v1536_v3 = vmul.f32 %v5511_v55, %v5491_v4  ;;  %v1537_v58 = vmul.f32 %v5511_v55, %v5492_v59 }
  0xfe   : > { %v5499_v2 = vld [vmem:[%s6757_s17 + $0x116] sm:$0xff]  ;;  %v5500_v28 = vld [vmem:[%s6757_s17 + $0x126] sm:$0xff]  ;;  %v5501_v6 = vld [vmem:[%s6757_s17 + $0x12e] sm:$0xff]  ;;  %v1538_v13 = vmul.f32 %v5511_v55, %v5493_v41  ;;  %v1539_v0 = vmul.f32 %v5511_v55, %v5494_v16  ;;  %v1540_v31 = vmul.f32 %v5511_v55, %v5495_v24  ;;  %v1541_v19 = vmul.f32 %v5511_v55, %v5496_v27 }
  0xff   : > { %v5502_v29 = vld [vmem:[%s6757_s17 + $0x13e] sm:$0xff]  ;;  %v5503_v60 = vld [vmem:[%s6757_s17 + $0x146] sm:$0xff]  ;;  %v5504_v45 = vld [vmem:[%s6757_s17 + $0x156] sm:$0xff]  ;;  %v1542_v56 = vmul.f32 %v5511_v55, %v5497_v61  ;;  %v1543_v22 = vmul.f32 %v5511_v55, %v5498_v8  ;;  %v1544_v38 = vmul.f32 %v5511_v55, %v5499_v2  ;;  %v1545_v14 = vmul.f32 %v5511_v55, %v5500_v28 }
 0x100   : > { %v5505_v53 = vld [vmem:[%s6757_s17 + $0x15e] sm:$0xff]  ;;  %v5506_v49 = vld [vmem:[%s6757_s17 + $0x16e] sm:$0xff]  ;;  %v5507_v37 = vld [vmem:[%s6757_s17 + $0x176] sm:$0xff]  ;;  %v1546_v57 = vmul.f32 %v5511_v55, %v5501_v6  ;;  %v1547_v32 = vmul.f32 %v5511_v55, %v5502_v29  ;;  %v1548_v63 = vmul.f32 %v5511_v55, %v5503_v60  ;;  %v1549_v34 = vmul.f32 %v5511_v55, %v5504_v45 }
 0x101   : > { %v5508_v39 = vld [vmem:[%s6757_s17 + $0x186] sm:$0xff]  ;;  %v5509_v36 = vld [vmem:[%s6757_s17 + $0x18e] sm:$0xff]  ;;  %v1550_v62 = vmul.f32 %v5511_v55, %v5505_v53  ;;  %v1551_v9 = vmul.f32 %v5511_v55, %v5506_v49  ;;  %v1552_v5 = vmul.f32 %v5511_v55, %v5507_v37  ;;  %v8772_v41 = vadd.f32 %v1523_v47, %v8641_v17 }
 0x102   : > { %v1553_v4 = vmul.f32 %v5511_v55, %v5508_v39  ;;  %v1554_v59 = vmul.f32 %v5511_v55, %v5509_v36  ;;  %v8775_v16 = vadd.f32 %v1524_v23, %v8644_v52  ;;  %v8778_v24 = vadd.f32 %v1525_v11, %v8647_v7  ;;  %v5512_v29 = vld [vmem:[%s6757_s17 + $0x30] sm:$0xff]  ;;  %v5514_v6 = vld [vmem:[%s6757_s17 + $0x48] sm:$0xff]  ;;  %v5516_v47 = vld [vmem:[%s6757_s17 + $0x60] sm:$0xff] }
 0x103   : > { %v8781_v60 = vadd.f32 %v1526_v43, %v8650_v21  ;;  %v8784_v49 = vadd.f32 %v1527_v10, %v8653_v33  ;;  %v8787_v36 = vadd.f32 %v1528_v12, %v8656_v50  ;;  %v8790_v17 = vadd.f32 %v1529_v15, %v8659_v44  ;;  %v5517_v23 = vld [vmem:[%s6757_s17 + $0x68] sm:$0xff]  ;;  %v5518_v11 = vld [vmem:[%s6757_s17 + $0x78] sm:$0xff]  ;;  %v5519_v43 = vld [vmem:[%s6757_s17 + $0x80] sm:$0xff] }
 0x104   : > { %v8793_v52 = vadd.f32 %v1530_v40, %v8662_v51  ;;  %v8796_v7 = vadd.f32 %v1531_v46, %v8665_v26  ;;  %v8799_v21 = vadd.f32 %v1532_v25, %v8668_v35  ;;  %v8802_v33 = vadd.f32 %v1533_v1, %v8671_v48  ;;  %v13784_v26 = vld [vmem:[#allocation13_spill] sm:$0xff]  ;;  %v13786_v35 = vld [vmem:[#allocation14_spill] sm:$0xff]  ;;  %v13796_v8 = vld [vmem:[#allocation19_spill] sm:$0xff] }
 0x105   : > { %v8805_v50 = vadd.f32 %v1534_v42, %v8674_v18  ;;  %v8808_v44 = vadd.f32 %v1535_v54, %v8677_v30  ;;  %v8811_v51 = vadd.f32 %v1536_v3, %v8680_v20  ;;  %v8814_v55 = vadd.f32 %v1537_v58, %v13784_v26  ;;  %v5513_v48 = vld [vmem:[%s6757_s17 + $0x38] sm:$0xff]  ;;  %v5515_v18 = vld [vmem:[%s6757_s17 + $0x50] sm:$0xff]  ;;  %v13788_v42 = vld [vmem:[#allocation15_spill] sm:$0xff] }
 0x106   : > { %v8817_v53 = vadd.f32 %v1538_v13, %v13786_v35  ;;  %v8824_v27 = vadd.f32 %v1539_v0, %v13788_v42  ;;  %v13790_v30 = vld [vmem:[#allocation16_spill] sm:$0xff]  ;;  %v13792_v20 = vld [vmem:[#allocation17_spill] sm:$0xff]  ;;  %v13794_v58 = vld [vmem:[#allocation18_spill] sm:$0xff]  ;;  %v8840_v2 = vadd.f32 %v1543_v22, %v13796_v8 }
 0x107   : > { %13785 = vst [vmem:[#allocation13_spill] sm:$0xff] %v8814_v55  ;;  %v8827_v54 = vadd.f32 %v1540_v31, %v13790_v30  ;;  %v8830_v3 = vadd.f32 %v1541_v19, %v13792_v20  ;;  %v8833_v61 = vadd.f32 %v1542_v56, %v13794_v58  ;;  %v13798_v28 = vld [vmem:[#allocation2_spill] sm:$0xff]  ;;  %v13800_v31 = vld [vmem:[#allocation3_spill] sm:$0xff]  ;;  %v13802_v19 = vld [vmem:[#allocation4_spill] sm:$0xff] }
 0x108   : > { %13787 = vst [vmem:[#allocation14_spill] sm:$0xff] %v8817_v53  ;;  %13789 = vst [vmem:[#allocation15_spill] sm:$0xff] %v8824_v27  ;;  %v8843_v10 = vadd.f32 %v1544_v38, %v13798_v28  ;;  %v8846_v12 = vadd.f32 %v1545_v14, %v13800_v31  ;;  %v8849_v15 = vadd.f32 %v1546_v57, %v13802_v19  ;;  %v5520_v56 = vld [vmem:[%s6757_s17 + $0x90] sm:$0xff]  ;;  %v5521_v40 = vld [vmem:[%s6757_s17 + $0x98] sm:$0xff] }
 0x109   : > { %13791 = vst [vmem:[#allocation16_spill] sm:$0xff] %v8827_v54  ;;  %13793 = vst [vmem:[#allocation17_spill] sm:$0xff] %v8830_v3  ;;  %v5522_v46 = vld [vmem:[%s6757_s17 + $0xa8] sm:$0xff]  ;;  %v5545_v22 = vld [vmem:[%s13465_s1 + $0x10] ss:$0 sm:$0xff] }
 0x10a   : > { %13795 = vst [vmem:[#allocation18_spill] sm:$0xff] %v8833_v61  ;;  %13797 = vst [vmem:[#allocation19_spill] sm:$0xff] %v8840_v2  ;;  %v13804_v25 = vld [vmem:[#allocation5_spill] sm:$0xff]  ;;  %v13806_v1 = vld [vmem:[#allocation6_spill] sm:$0xff] }
 0x10b   : > { %13799 = vst [vmem:[#allocation2_spill] sm:$0xff] %v8843_v10  ;;  %13801 = vst [vmem:[#allocation3_spill] sm:$0xff] %v8846_v12  ;;  %v8858_v38 = vadd.f32 %v1547_v32, %v13804_v25  ;;  %v8861_v45 = vadd.f32 %v1548_v63, %v13806_v1  ;;  %v13808_v13 = vld [vmem:[#allocation7_spill] sm:$0xff]  ;;  %v13810_v39 = vld [vmem:[#allocation8_spill] sm:$0xff]  ;;  %v1626_v25 = vmul.f32 %v5545_v22, %v5512_v29 }
 0x10c   : > { %13803 = vst [vmem:[#allocation4_spill] sm:$0xff] %v8849_v15  ;;  %v8864_v37 = vadd.f32 %v1549_v34, %v13808_v13  ;;  %v8867_v0 = vadd.f32 %v1550_v62, %v13810_v39  ;;  %v5523_v14 = vld [vmem:[%s6757_s17 + $0xb0] sm:$0xff]  ;;  %v5524_v57 = vld [vmem:[%s6757_s17 + $0xc0] sm:$0xff]  ;;  %v5525_v26 = vld [vmem:[%s6757_s17 + $0xc8] sm:$0xff]  ;;  %v1627_v1 = vmul.f32 %v5545_v22, %v5513_v48  ;;  %v1628_v13 = vmul.f32 %v5545_v22, %v5514_v6 }
 0x10d   : > { %13805 = vst [vmem:[#allocation5_spill] sm:$0xff] %v8858_v38  ;;  %13807 = vst [vmem:[#allocation6_spill] sm:$0xff] %v8861_v45  ;;  %v13812_v35 = vld [vmem:[#allocation9_spill] sm:$0xff]  ;;  %v13814_v32 = vld [vmem:[#allocation10_spill] sm:$0xff]  ;;  %v1634_v29 = vmul.f32 %v5545_v22, %v5520_v56  ;;  %v1635_v48 = vmul.f32 %v5545_v22, %v5521_v40  ;;  %v1636_v6 = vmul.f32 %v5545_v22, %v5522_v46 }
 0x10e   : > { %13809 = vst [vmem:[#allocation7_spill] sm:$0xff] %v8864_v37  ;;  %13811 = vst [vmem:[#allocation8_spill] sm:$0xff] %v8867_v0  ;;  %v8873_v42 = vadd.f32 %v1551_v9, %v13812_v35  ;;  %v8876_v30 = vadd.f32 %v1552_v5, %v13814_v32  ;;  %v13816_v63 = vld [vmem:[#allocation11_spill] sm:$0xff]  ;;  %v13818_v34 = vld [vmem:[#allocation12_spill] sm:$0xff]  ;;  %v1629_v5 = vmul.f32 %v5545_v22, %v5515_v18 }
 0x10f   : > { %v8879_v20 = vadd.f32 %v1553_v4, %v13816_v63  ;;  %v8882_v58 = vadd.f32 %v1554_v59, %v13818_v34  ;;  %v5526_v62 = vld [vmem:[%s6757_s17 + $0xd8] sm:$0xff]  ;;  %v5527_v8 = vld [vmem:[%s6757_s17 + $0xe0] sm:$0xff]  ;;  %v5528_v28 = vld [vmem:[%s6757_s17 + $0xf0] sm:$0xff]  ;;  %v1630_v35 = vmul.f32 %v5545_v22, %v5516_v47  ;;  %v1631_v32 = vmul.f32 %v5545_v22, %v5517_v23 }
 0x110   : > { %13813 = vst [vmem:[#allocation9_spill] sm:$0xff] %v8873_v42  ;;  %13815 = vst [vmem:[#allocation10_spill] sm:$0xff] %v8876_v30  ;;  %v5529_v31 = vld [vmem:[%s6757_s17 + $0xf8] sm:$0xff]  ;;  %v5530_v19 = vld [vmem:[%s6757_s17 + $0x108] sm:$0xff]  ;;  %v1632_v63 = vmul.f32 %v5545_v22, %v5518_v11  ;;  %v1633_v34 = vmul.f32 %v5545_v22, %v5519_v43  ;;  %v1637_v42 = vmul.f32 %v5545_v22, %v5523_v14 }
 0x111   : > { %13817 = vst [vmem:[#allocation11_spill] sm:$0xff] %v8879_v20  ;;  %13819 = vst [vmem:[#allocation12_spill] sm:$0xff] %v8882_v58  ;;  %v5531_v9 = vld [vmem:[%s6757_s17 + $0x110] sm:$0xff]  ;;  %v5532_v4 = vld [vmem:[%s6757_s17 + $0x120] sm:$0xff]  ;;  %v1638_v45 = vmul.f32 %v5545_v22, %v5524_v57  ;;  %v1639_v38 = vmul.f32 %v5545_v22, %v5525_v26  ;;  %v1640_v15 = vmul.f32 %v5545_v22, %v5526_v62 }
 0x112   : > { %v5533_v39 = vld [vmem:[%s6757_s17 + $0x128] sm:$0xff]  ;;  %v5534_v59 = vld [vmem:[%s6757_s17 + $0x138] sm:$0xff]  ;;  %v5535_v58 = vld [vmem:[%s6757_s17 + $0x140] sm:$0xff]  ;;  %v1641_v47 = vmul.f32 %v5545_v22, %v5527_v8  ;;  %v1642_v43 = vmul.f32 %v5545_v22, %v5528_v28  ;;  %v1643_v10 = vmul.f32 %v5545_v22, %v5529_v31  ;;  %v1644_v2 = vmul.f32 %v5545_v22, %v5530_v19 }
 0x113   : > { %v5536_v20 = vld [vmem:[%s6757_s17 + $0x150] sm:$0xff]  ;;  %v5537_v30 = vld [vmem:[%s6757_s17 + $0x158] sm:$0xff]  ;;  %v5538_v18 = vld [vmem:[%s6757_s17 + $0x168] sm:$0xff]  ;;  %v1645_v61 = vmul.f32 %v5545_v22, %v5531_v9  ;;  %v1646_v3 = vmul.f32 %v5545_v22, %v5532_v4  ;;  %v1647_v54 = vmul.f32 %v5545_v22, %v5533_v39  ;;  %v1648_v56 = vmul.f32 %v5545_v22, %v5534_v59 }
 0x114   : > { %v5539_v0 = vld [vmem:[%s6757_s17 + $0x170] sm:$0xff]  ;;  %v5540_v37 = vld [vmem:[%s6757_s17 + $0x180] sm:$0xff]  ;;  %v5541_v23 = vld [vmem:[%s6757_s17 + $0x188] sm:$0xff]  ;;  %v1649_v40 = vmul.f32 %v5545_v22, %v5535_v58  ;;  %v1650_v46 = vmul.f32 %v5545_v22, %v5536_v20  ;;  %v1651_v14 = vmul.f32 %v5545_v22, %v5537_v30  ;;  %v1652_v27 = vmul.f32 %v5545_v22, %v5538_v18 }
 0x115   : > { %v5542_v11 = vld [vmem:[%s6757_s17 + $0x198] sm:$0xff]  ;;  %v5543_v12 = vld [vmem:[%s6757_s17 + $0x1a0] sm:$0xff]  ;;  %v1653_v53 = vmul.f32 %v5545_v22, %v5539_v0  ;;  %v1654_v55 = vmul.f32 %v5545_v22, %v5540_v37  ;;  %v1655_v57 = vmul.f32 %v5545_v22, %v5541_v23  ;;  %v8903_v8 = vadd.f32 %v1626_v25, %v8772_v41  ;;  %v5548_v58 = vld [vmem:[%s6757_s17 + $0x49] sm:$0xff] }
 0x116   : > { %v1656_v26 = vmul.f32 %v5545_v22, %v5542_v11  ;;  %v1657_v62 = vmul.f32 %v5545_v22, %v5543_v12  ;;  %v8906_v28 = vadd.f32 %v1627_v1, %v8775_v16  ;;  %v8909_v31 = vadd.f32 %v1628_v13, %v8778_v24  ;;  %v5546_v20 = vld [vmem:[%s6757_s17 + $0x31] sm:$0xff]  ;;  %v5550_v25 = vld [vmem:[%s6757_s17 + $0x61] sm:$0xff]  ;;  %v5551_v1 = vld [vmem:[%s6757_s17 + $0x69] sm:$0xff] }
 0x117   : > { %v8912_v30 = vadd.f32 %v1629_v5, %v8781_v60  ;;  %v8915_v37 = vadd.f32 %v1630_v35, %v8784_v49  ;;  %v8918_v12 = vadd.f32 %v1631_v32, %v8787_v36  ;;  %v8921_v41 = vadd.f32 %v1632_v63, %v8790_v17  ;;  %v5552_v13 = vld [vmem:[%s6757_s17 + $0x79] sm:$0xff]  ;;  %v5553_v5 = vld [vmem:[%s6757_s17 + $0x81] sm:$0xff]  ;;  %v13846_v11 = vld [vmem:[#allocation8_spill] sm:$0xff] }
 0x118   : > { %v8924_v16 = vadd.f32 %v1633_v34, %v8793_v52  ;;  %v8927_v24 = vadd.f32 %v1634_v29, %v8796_v7  ;;  %v8930_v60 = vadd.f32 %v1635_v48, %v8799_v21  ;;  %v8933_v49 = vadd.f32 %v1636_v6, %v8802_v33  ;;  %v13820_v7 = vld [vmem:[#allocation13_spill] sm:$0xff]  ;;  %v13822_v21 = vld [vmem:[#allocation14_spill] sm:$0xff]  ;;  %v13832_v4 = vld [vmem:[#allocation19_spill] sm:$0xff] }
 0x119   : > { %v8936_v36 = vadd.f32 %v1637_v42, %v8805_v50  ;;  %v8939_v17 = vadd.f32 %v1638_v45, %v8808_v44  ;;  %v8942_v52 = vadd.f32 %v1639_v38, %v8811_v51  ;;  %v8945_v22 = vadd.f32 %v1640_v15, %v13820_v7  ;;  %v5547_v33 = vld [vmem:[%s6757_s17 + $0x39] sm:$0xff]  ;;  %v5549_v50 = vld [vmem:[%s6757_s17 + $0x51] sm:$0xff]  ;;  %v13824_v42 = vld [vmem:[#allocation15_spill] sm:$0xff] }
 0x11a   : > { %v8948_v0 = vadd.f32 %v1641_v47, %v13822_v21  ;;  %v8955_v19 = vadd.f32 %v1642_v43, %v13824_v42  ;;  %v13826_v44 = vld [vmem:[#allocation16_spill] sm:$0xff]  ;;  %v13828_v51 = vld [vmem:[#allocation17_spill] sm:$0xff]  ;;  %v13830_v15 = vld [vmem:[#allocation18_spill] sm:$0xff]  ;;  %v8971_v39 = vadd.f32 %v1646_v3, %v13832_v4  ;;  %v8998_v43 = vadd.f32 %v1653_v53, %v13846_v11 }
 0x11b   : > { %13821 = vst [vmem:[#allocation13_spill] sm:$0xff] %v8945_v22  ;;  %v8958_v45 = vadd.f32 %v1643_v10, %v13826_v44  ;;  %v8961_v38 = vadd.f32 %v1644_v2, %v13828_v51  ;;  %v8964_v9 = vadd.f32 %v1645_v61, %v13830_v15  ;;  %v13834_v59 = vld [vmem:[#allocation2_spill] sm:$0xff]  ;;  %v13836_v10 = vld [vmem:[#allocation3_spill] sm:$0xff]  ;;  %v13838_v2 = vld [vmem:[#allocation4_spill] sm:$0xff] }
 0x11c   : > { %13823 = vst [vmem:[#allocation14_spill] sm:$0xff] %v8948_v0  ;;  %13825 = vst [vmem:[#allocation15_spill] sm:$0xff] %v8955_v19  ;;  %v8974_v35 = vadd.f32 %v1647_v54, %v13834_v59  ;;  %v8977_v32 = vadd.f32 %v1648_v56, %v13836_v10  ;;  %v8980_v63 = vadd.f32 %v1649_v40, %v13838_v2  ;;  %v5554_v61 = vld [vmem:[%s6757_s17 + $0x91] sm:$0xff]  ;;  %v5555_v34 = vld [vmem:[%s6757_s17 + $0x99] sm:$0xff] }
 0x11d   : > { %13827 = vst [vmem:[#allocation16_spill] sm:$0xff] %v8958_v45  ;;  %13829 = vst [vmem:[#allocation17_spill] sm:$0xff] %v8961_v38  ;;  %v5556_v29 = vld [vmem:[%s6757_s17 + $0xa9] sm:$0xff]  ;;  %v5579_v3 = vld [vmem:[%s13465_s1 + $0x11] ss:$0 sm:$0xff] }
 0x11e   : > { %13831 = vst [vmem:[#allocation18_spill] sm:$0xff] %v8964_v9  ;;  %13833 = vst [vmem:[#allocation19_spill] sm:$0xff] %v8971_v39  ;;  %v13840_v48 = vld [vmem:[#allocation5_spill] sm:$0xff]  ;;  %v13842_v6 = vld [vmem:[#allocation6_spill] sm:$0xff] }
 0x11f   : > { %13835 = vst [vmem:[#allocation2_spill] sm:$0xff] %v8974_v35  ;;  %13837 = vst [vmem:[#allocation3_spill] sm:$0xff] %v8977_v32  ;;  %v8989_v54 = vadd.f32 %v1650_v46, %v13840_v48  ;;  %v8992_v18 = vadd.f32 %v1651_v14, %v13842_v6  ;;  %v13844_v47 = vld [vmem:[#allocation7_spill] sm:$0xff]  ;;  %v5557_v56 = vld [vmem:[%s6757_s17 + $0xb1] sm:$0xff]  ;;  %v1727_v48 = vmul.f32 %v5579_v3, %v5546_v20 }
 0x120   : > { %13839 = vst [vmem:[#allocation4_spill] sm:$0xff] %v8980_v63  ;;  %v8995_v23 = vadd.f32 %v1652_v27, %v13844_v47  ;;  %13847 = vst [vmem:[#allocation8_spill] sm:$0xff] %v8998_v43  ;;  %v5558_v40 = vld [vmem:[%s6757_s17 + $0xc1] sm:$0xff]  ;;  %v5559_v7 = vld [vmem:[%s6757_s17 + $0xc9] sm:$0xff]  ;;  %v1728_v6 = vmul.f32 %v5579_v3, %v5547_v33  ;;  %v1729_v47 = vmul.f32 %v5579_v3, %v5548_v58 }
 0x121   : > { %13841 = vst [vmem:[#allocation5_spill] sm:$0xff] %v8989_v54  ;;  %13843 = vst [vmem:[#allocation6_spill] sm:$0xff] %v8992_v18  ;;  %v13848_v21 = vld [vmem:[#allocation9_spill] sm:$0xff]  ;;  %v13850_v46 = vld [vmem:[#allocation10_spill] sm:$0xff]  ;;  %v1735_v20 = vmul.f32 %v5579_v3, %v5554_v61  ;;  %v1736_v33 = vmul.f32 %v5579_v3, %v5555_v34  ;;  %v1737_v58 = vmul.f32 %v5579_v3, %v5556_v29 }
 0x122   : > { %13845 = vst [vmem:[#allocation7_spill] sm:$0xff] %v8995_v23  ;;  %v9004_v42 = vadd.f32 %v1654_v55, %v13848_v21  ;;  %v9007_v44 = vadd.f32 %v1655_v57, %v13850_v46  ;;  %v13852_v14 = vld [vmem:[#allocation11_spill] sm:$0xff]  ;;  %v13854_v27 = vld [vmem:[#allocation12_spill] sm:$0xff]  ;;  %v5560_v53 = vld [vmem:[%s6757_s17 + $0xd9] sm:$0xff]  ;;  %v1730_v57 = vmul.f32 %v5579_v3, %v5549_v50  ;;  %v1731_v21 = vmul.f32 %v5579_v3, %v5550_v25 }
 0x123   : > { %v9010_v51 = vadd.f32 %v1656_v26, %v13852_v14  ;;  %v9013_v15 = vadd.f32 %v1657_v62, %v13854_v27  ;;  %v5561_v4 = vld [vmem:[%s6757_s17 + $0xe1] sm:$0xff]  ;;  %v5562_v59 = vld [vmem:[%s6757_s17 + $0xf1] sm:$0xff]  ;;  %v5563_v10 = vld [vmem:[%s6757_s17 + $0xf9] sm:$0xff]  ;;  %v1732_v46 = vmul.f32 %v5579_v3, %v5551_v1  ;;  %v1733_v14 = vmul.f32 %v5579_v3, %v5552_v13 }
 0x124   : > { %13849 = vst [vmem:[#allocation9_spill] sm:$0xff] %v9004_v42  ;;  %13851 = vst [vmem:[#allocation10_spill] sm:$0xff] %v9007_v44  ;;  %v5564_v2 = vld [vmem:[%s6757_s17 + $0x109] sm:$0xff]  ;;  %v5565_v55 = vld [vmem:[%s6757_s17 + $0x111] sm:$0xff]  ;;  %v1734_v27 = vmul.f32 %v5579_v3, %v5553_v5  ;;  %v1738_v42 = vmul.f32 %v5579_v3, %v5557_v56  ;;  %v1739_v18 = vmul.f32 %v5579_v3, %v5558_v40 }
 0x125   : > { %13853 = vst [vmem:[#allocation11_spill] sm:$0xff] %v9010_v51  ;;  %13855 = vst [vmem:[#allocation12_spill] sm:$0xff] %v9013_v15  ;;  %v5566_v26 = vld [vmem:[%s6757_s17 + $0x121] sm:$0xff]  ;;  %v5567_v11 = vld [vmem:[%s6757_s17 + $0x129] sm:$0xff]  ;;  %v1740_v54 = vmul.f32 %v5579_v3, %v5559_v7  ;;  %v1741_v63 = vmul.f32 %v5579_v3, %v5560_v53  ;;  %v1742_v25 = vmul.f32 %v5579_v3, %v5561_v4 }
 0x126   : > { %v5568_v62 = vld [vmem:[%s6757_s17 + $0x139] sm:$0xff]  ;;  %v5569_v15 = vld [vmem:[%s6757_s17 + $0x141] sm:$0xff]  ;;  %v5570_v51 = vld [vmem:[%s6757_s17 + $0x151] sm:$0xff]  ;;  %v1743_v5 = vmul.f32 %v5579_v3, %v5562_v59  ;;  %v1744_v35 = vmul.f32 %v5579_v3, %v5563_v10  ;;  %v1745_v39 = vmul.f32 %v5579_v3, %v5564_v2  ;;  %v1746_v9 = vmul.f32 %v5579_v3, %v5565_v55 }
 0x127   : > { %v5571_v44 = vld [vmem:[%s6757_s17 + $0x159] sm:$0xff]  ;;  %v5572_v50 = vld [vmem:[%s6757_s17 + $0x169] sm:$0xff]  ;;  %v5573_v43 = vld [vmem:[%s6757_s17 + $0x171] sm:$0xff]  ;;  %v1747_v38 = vmul.f32 %v5579_v3, %v5566_v26  ;;  %v1748_v45 = vmul.f32 %v5579_v3, %v5567_v11  ;;  %v1749_v61 = vmul.f32 %v5579_v3, %v5568_v62  ;;  %v1750_v34 = vmul.f32 %v5579_v3, %v5569_v15 }
 0x128   : > { %v5574_v23 = vld [vmem:[%s6757_s17 + $0x181] sm:$0xff]  ;;  %v5575_v1 = vld [vmem:[%s6757_s17 + $0x189] sm:$0xff]  ;;  %v5576_v13 = vld [vmem:[%s6757_s17 + $0x199] sm:$0xff]  ;;  %v1751_v29 = vmul.f32 %v5579_v3, %v5570_v51  ;;  %v1752_v56 = vmul.f32 %v5579_v3, %v5571_v44  ;;  %v1753_v19 = vmul.f32 %v5579_v3, %v5572_v50  ;;  %v1754_v0 = vmul.f32 %v5579_v3, %v5573_v43 }
 0x129   : > { %v5577_v32 = vld [vmem:[%s6757_s17 + $0x1a1] sm:$0xff]  ;;  %v1755_v22 = vmul.f32 %v5579_v3, %v5574_v23  ;;  %v1756_v40 = vmul.f32 %v5579_v3, %v5575_v1  ;;  %v1757_v7 = vmul.f32 %v5579_v3, %v5576_v13  ;;  %v9034_v4 = vadd.f32 %v1727_v48, %v8903_v8  ;;  %v5580_v51 = vld [vmem:[%s6757_s17 + $0x32] sm:$0xff]  ;;  %v5582_v15 = vld [vmem:[%s6757_s17 + $0x4a] sm:$0xff] }
 0x12a   : > { %v1758_v53 = vmul.f32 %v5579_v3, %v5577_v32  ;;  %v9037_v59 = vadd.f32 %v1728_v6, %v8906_v28  ;;  %v9040_v10 = vadd.f32 %v1729_v47, %v8909_v31  ;;  %v9043_v44 = vadd.f32 %v1730_v57, %v8912_v30  ;;  %v5584_v48 = vld [vmem:[%s6757_s17 + $0x62] sm:$0xff]  ;;  %v5585_v6 = vld [vmem:[%s6757_s17 + $0x6a] sm:$0xff]  ;;  %v5586_v47 = vld [vmem:[%s6757_s17 + $0x7a] sm:$0xff] }
 0x12b   : > { %v9046_v23 = vadd.f32 %v1731_v21, %v8915_v37  ;;  %v9049_v32 = vadd.f32 %v1732_v46, %v8918_v12  ;;  %v9052_v8 = vadd.f32 %v1733_v14, %v8921_v41  ;;  %v9055_v28 = vadd.f32 %v1734_v27, %v8924_v16  ;;  %v5587_v57 = vld [vmem:[%s6757_s17 + $0x82] sm:$0xff]  ;;  %v5589_v27 = vld [vmem:[%s6757_s17 + $0x9a] sm:$0xff]  ;;  %v13882_v13 = vld [vmem:[#allocation8_spill] sm:$0xff] }
 0x12c   : > { %v9058_v31 = vadd.f32 %v1735_v20, %v8927_v24  ;;  %v9061_v30 = vadd.f32 %v1736_v33, %v8930_v60  ;;  %v9064_v37 = vadd.f32 %v1737_v58, %v8933_v49  ;;  %v9067_v12 = vadd.f32 %v1738_v42, %v8936_v36  ;;  %v13856_v24 = vld [vmem:[#allocation13_spill] sm:$0xff]  ;;  %v13858_v60 = vld [vmem:[#allocation14_spill] sm:$0xff]  ;;  %v13860_v42 = vld [vmem:[#allocation15_spill] sm:$0xff] }
 0x12d   : > { %v9070_v41 = vadd.f32 %v1739_v18, %v8939_v17  ;;  %v9073_v16 = vadd.f32 %v1740_v54, %v8942_v52  ;;  %v9076_v3 = vadd.f32 %v1741_v63, %v13856_v24  ;;  %v9079_v43 = vadd.f32 %v1742_v25, %v13858_v60  ;;  %v5581_v49 = vld [vmem:[%s6757_s17 + $0x3a] sm:$0xff]  ;;  %v5583_v36 = vld [vmem:[%s6757_s17 + $0x52] sm:$0xff]  ;;  %v13868_v26 = vld [vmem:[#allocation19_spill] sm:$0xff] }
 0x12e   : > { %v9086_v2 = vadd.f32 %v1743_v5, %v13860_v42  ;;  %v13862_v17 = vld [vmem:[#allocation16_spill] sm:$0xff]  ;;  %v13864_v52 = vld [vmem:[#allocation17_spill] sm:$0xff]  ;;  %v13866_v63 = vld [vmem:[#allocation18_spill] sm:$0xff]  ;;  %v9102_v11 = vadd.f32 %v1747_v38, %v13868_v26  ;;  %v9129_v5 = vadd.f32 %v1754_v0, %v13882_v13 }
 0x12f   : > { %13857 = vst [vmem:[#allocation13_spill] sm:$0xff] %v9076_v3  ;;  %13859 = vst [vmem:[#allocation14_spill] sm:$0xff] %v9079_v43  ;;  %v9089_v18 = vadd.f32 %v1744_v35, %v13862_v17  ;;  %v9092_v54 = vadd.f32 %v1745_v39, %v13864_v52  ;;  %v9095_v55 = vadd.f32 %v1746_v9, %v13866_v63  ;;  %v13870_v62 = vld [vmem:[#allocation2_spill] sm:$0xff]  ;;  %v13872_v35 = vld [vmem:[#allocation3_spill] sm:$0xff] }
 0x130   : > { %13861 = vst [vmem:[#allocation15_spill] sm:$0xff] %v9086_v2  ;;  %13869 = vst [vmem:[#allocation19_spill] sm:$0xff] %v9102_v11  ;;  %v9105_v21 = vadd.f32 %v1748_v45, %v13870_v62  ;;  %v9108_v46 = vadd.f32 %v1749_v61, %v13872_v35  ;;  %v13874_v39 = vld [vmem:[#allocation4_spill] sm:$0xff]  ;;  %v13876_v33 = vld [vmem:[#allocation5_spill] sm:$0xff] }
 0x131   : > { %13863 = vst [vmem:[#allocation16_spill] sm:$0xff] %v9089_v18  ;;  %13865 = vst [vmem:[#allocation17_spill] sm:$0xff] %v9092_v54  ;;  %v9111_v14 = vadd.f32 %v1750_v34, %v13874_v39  ;;  %v5588_v9 = vld [vmem:[%s6757_s17 + $0x92] sm:$0xff]  ;;  %v5590_v20 = vld [vmem:[%s6757_s17 + $0xaa] sm:$0xff]  ;;  %v9120_v45 = vadd.f32 %v1751_v29, %v13876_v33 }
 0x132   : > { %13867 = vst [vmem:[#allocation18_spill] sm:$0xff] %v9095_v55  ;;  %13871 = vst [vmem:[#allocation2_spill] sm:$0xff] %v9105_v21  ;;  %v5613_v38 = vld [vmem:[%s13465_s1 + $0x12] ss:$0 sm:$0xff]  ;;  %v13878_v58 = vld [vmem:[#allocation6_spill] sm:$0xff] }
 0x133   : > { %13873 = vst [vmem:[#allocation3_spill] sm:$0xff] %v9108_v46  ;;  %13875 = vst [vmem:[#allocation4_spill] sm:$0xff] %v9111_v14  ;;  %v9123_v50 = vadd.f32 %v1752_v56, %v13878_v58  ;;  %v13880_v25 = vld [vmem:[#allocation7_spill] sm:$0xff]  ;;  %v5591_v61 = vld [vmem:[%s6757_s17 + $0xb2] sm:$0xff]  ;;  %v1828_v33 = vmul.f32 %v5613_v38, %v5580_v51  ;;  %v1829_v58 = vmul.f32 %v5613_v38, %v5581_v49 }
 0x134   : > { %13877 = vst [vmem:[#allocation5_spill] sm:$0xff] %v9120_v45  ;;  %v9126_v1 = vadd.f32 %v1753_v19, %v13880_v25  ;;  %13883 = vst [vmem:[#allocation8_spill] sm:$0xff] %v9129_v5  ;;  %v5592_v34 = vld [vmem:[%s6757_s17 + $0xc2] sm:$0xff]  ;;  %v5593_v24 = vld [vmem:[%s6757_s17 + $0xca] sm:$0xff]  ;;  %v1830_v25 = vmul.f32 %v5613_v38, %v5582_v15  ;;  %v1836_v51 = vmul.f32 %v5613_v38, %v5588_v9 }
 0x135   : > { %13879 = vst [vmem:[#allocation6_spill] sm:$0xff] %v9123_v50  ;;  %v13884_v60 = vld [vmem:[#allocation9_spill] sm:$0xff]  ;;  %v13886_v29 = vld [vmem:[#allocation10_spill] sm:$0xff]  ;;  %v13888_v56 = vld [vmem:[#allocation11_spill] sm:$0xff]  ;;  %v1837_v49 = vmul.f32 %v5613_v38, %v5589_v27  ;;  %v1838_v15 = vmul.f32 %v5613_v38, %v5590_v20  ;;  %v1840_v50 = vmul.f32 %v5613_v38, %v5592_v34  ;;  %v1841_v45 = vmul.f32 %v5613_v38, %v5593_v24 }
 0x136   : > { %13881 = vst [vmem:[#allocation7_spill] sm:$0xff] %v9126_v1  ;;  %v9135_v42 = vadd.f32 %v1755_v22, %v13884_v60  ;;  %v9138_v17 = vadd.f32 %v1756_v40, %v13886_v29  ;;  %v9141_v52 = vadd.f32 %v1757_v7, %v13888_v56  ;;  %v13890_v19 = vld [vmem:[#allocation12_spill] sm:$0xff]  ;;  %v5594_v0 = vld [vmem:[%s6757_s17 + $0xda] sm:$0xff]  ;;  %v5595_v26 = vld [vmem:[%s6757_s17 + $0xe2] sm:$0xff]  ;;  %v1831_v40 = vmul.f32 %v5613_v38, %v5583_v36 }
 0x137   : > { %v9144_v63 = vadd.f32 %v1758_v53, %v13890_v19  ;;  %v5596_v62 = vld [vmem:[%s6757_s17 + $0xf2] sm:$0xff]  ;;  %v5597_v35 = vld [vmem:[%s6757_s17 + $0xfa] sm:$0xff]  ;;  %v5598_v39 = vld [vmem:[%s6757_s17 + $0x10a] sm:$0xff]  ;;  %v1832_v60 = vmul.f32 %v5613_v38, %v5584_v48  ;;  %v1833_v29 = vmul.f32 %v5613_v38, %v5585_v6  ;;  %v1834_v56 = vmul.f32 %v5613_v38, %v5586_v47 }
 0x138   : > { %13885 = vst [vmem:[#allocation9_spill] sm:$0xff] %v9135_v42  ;;  %13887 = vst [vmem:[#allocation10_spill] sm:$0xff] %v9138_v17  ;;  %v5599_v22 = vld [vmem:[%s6757_s17 + $0x112] sm:$0xff]  ;;  %v5600_v7 = vld [vmem:[%s6757_s17 + $0x122] sm:$0xff]  ;;  %v1835_v19 = vmul.f32 %v5613_v38, %v5587_v57  ;;  %v1839_v42 = vmul.f32 %v5613_v38, %v5591_v61  ;;  %v1842_v14 = vmul.f32 %v5613_v38, %v5594_v0 }
 0x139   : > { %13889 = vst [vmem:[#allocation11_spill] sm:$0xff] %v9141_v52  ;;  %13891 = vst [vmem:[#allocation12_spill] sm:$0xff] %v9144_v63  ;;  %v5601_v13 = vld [vmem:[%s6757_s17 + $0x12a] sm:$0xff]  ;;  %v5602_v53 = vld [vmem:[%s6757_s17 + $0x13a] sm:$0xff]  ;;  %v1843_v48 = vmul.f32 %v5613_v38, %v5595_v26  ;;  %v1844_v57 = vmul.f32 %v5613_v38, %v5596_v62  ;;  %v1845_v21 = vmul.f32 %v5613_v38, %v5597_v35 }
 0x13a   : > { %v5603_v63 = vld [vmem:[%s6757_s17 + $0x142] sm:$0xff]  ;;  %v5604_v52 = vld [vmem:[%s6757_s17 + $0x152] sm:$0xff]  ;;  %v5605_v17 = vld [vmem:[%s6757_s17 + $0x15a] sm:$0xff]  ;;  %v1846_v11 = vmul.f32 %v5613_v38, %v5598_v39  ;;  %v1847_v55 = vmul.f32 %v5613_v38, %v5599_v22  ;;  %v1848_v54 = vmul.f32 %v5613_v38, %v5600_v7  ;;  %v1849_v18 = vmul.f32 %v5613_v38, %v5601_v13 }
 0x13b   : > { %v5606_v36 = vld [vmem:[%s6757_s17 + $0x16a] sm:$0xff]  ;;  %v5607_v5 = vld [vmem:[%s6757_s17 + $0x172] sm:$0xff]  ;;  %v5608_v1 = vld [vmem:[%s6757_s17 + $0x182] sm:$0xff]  ;;  %v1850_v9 = vmul.f32 %v5613_v38, %v5602_v53  ;;  %v1851_v27 = vmul.f32 %v5613_v38, %v5603_v63  ;;  %v1852_v20 = vmul.f32 %v5613_v38, %v5604_v52  ;;  %v1853_v61 = vmul.f32 %v5613_v38, %v5605_v17 }
 0x13c   : > { %v5609_v6 = vld [vmem:[%s6757_s17 + $0x18a] sm:$0xff]  ;;  %v5610_v47 = vld [vmem:[%s6757_s17 + $0x19a] sm:$0xff]  ;;  %v5611_v46 = vld [vmem:[%s6757_s17 + $0x1a2] sm:$0xff]  ;;  %v1854_v2 = vmul.f32 %v5613_v38, %v5606_v36  ;;  %v1855_v43 = vmul.f32 %v5613_v38, %v5607_v5  ;;  %v1856_v3 = vmul.f32 %v5613_v38, %v5608_v1  ;;  %v9165_v26 = vadd.f32 %v1828_v33, %v9034_v4 }
 0x13d   : > { %v1857_v34 = vmul.f32 %v5613_v38, %v5609_v6  ;;  %v1858_v24 = vmul.f32 %v5613_v38, %v5610_v47  ;;  %v1859_v0 = vmul.f32 %v5613_v38, %v5611_v46  ;;  %v9168_v62 = vadd.f32 %v1829_v58, %v9037_v59  ;;  %v5614_v52 = vld [vmem:[%s6757_s17 + $0x33] sm:$0xff]  ;;  %v5616_v63 = vld [vmem:[%s6757_s17 + $0x4b] sm:$0xff]  ;;  %v5618_v33 = vld [vmem:[%s6757_s17 + $0x63] sm:$0xff] }
 0x13e   : > { %v9171_v35 = vadd.f32 %v1830_v25, %v9040_v10  ;;  %v9174_v17 = vadd.f32 %v1831_v40, %v9043_v44  ;;  %v9177_v1 = vadd.f32 %v1832_v60, %v9046_v23  ;;  %v9180_v46 = vadd.f32 %v1833_v29, %v9049_v32  ;;  %v5619_v58 = vld [vmem:[%s6757_s17 + $0x6b] sm:$0xff]  ;;  %v5620_v25 = vld [vmem:[%s6757_s17 + $0x7b] sm:$0xff]  ;;  %v5621_v40 = vld [vmem:[%s6757_s17 + $0x83] sm:$0xff] }
 0x13f   : > { %v9183_v4 = vadd.f32 %v1834_v56, %v9052_v8  ;;  %v9186_v59 = vadd.f32 %v1835_v19, %v9055_v28  ;;  %v9189_v10 = vadd.f32 %v1836_v51, %v9058_v31  ;;  %v9192_v44 = vadd.f32 %v1837_v49, %v9061_v30  ;;  %v13892_v31 = vld [vmem:[#allocation13_spill] sm:$0xff]  ;;  %v13894_v30 = vld [vmem:[#allocation14_spill] sm:$0xff]  ;;  %v13904_v7 = vld [vmem:[#allocation19_spill] sm:$0xff] }
 0x140   : > { %v9195_v23 = vadd.f32 %v1838_v15, %v9064_v37  ;;  %v9198_v32 = vadd.f32 %v1839_v42, %v9067_v12  ;;  %v9201_v8 = vadd.f32 %v1840_v50, %v9070_v41  ;;  %v9204_v28 = vadd.f32 %v1841_v45, %v9073_v16  ;;  %v5615_v37 = vld [vmem:[%s6757_s17 + $0x3b] sm:$0xff]  ;;  %v5617_v12 = vld [vmem:[%s6757_s17 + $0x53] sm:$0xff]  ;;  %v13896_v42 = vld [vmem:[#allocation15_spill] sm:$0xff] }
 0x141   : > { %v9207_v38 = vadd.f32 %v1842_v14, %v13892_v31  ;;  %v9210_v5 = vadd.f32 %v1843_v48, %v13894_v30  ;;  %v9217_v39 = vadd.f32 %v1844_v57, %v13896_v42  ;;  %v13898_v41 = vld [vmem:[#allocation16_spill] sm:$0xff]  ;;  %v13900_v16 = vld [vmem:[#allocation17_spill] sm:$0xff]  ;;  %v13902_v14 = vld [vmem:[#allocation18_spill] sm:$0xff]  ;;  %v9233_v13 = vadd.f32 %v1848_v54, %v13904_v7 }
 0x142   : > { %v9220_v50 = vadd.f32 %v1845_v21, %v13898_v41  ;;  %v9223_v45 = vadd.f32 %v1846_v11, %v13900_v16  ;;  %v9226_v22 = vadd.f32 %v1847_v55, %v13902_v14  ;;  %v13906_v53 = vld [vmem:[#allocation2_spill] sm:$0xff]  ;;  %v13908_v21 = vld [vmem:[#allocation3_spill] sm:$0xff]  ;;  %v13910_v11 = vld [vmem:[#allocation4_spill] sm:$0xff] }
 0x143   : > { %13893 = vst [vmem:[#allocation13_spill] sm:$0xff] %v9207_v38  ;;  %13895 = vst [vmem:[#allocation14_spill] sm:$0xff] %v9210_v5  ;;  %v9236_v60 = vadd.f32 %v1849_v18, %v13906_v53  ;;  %v9239_v29 = vadd.f32 %v1850_v9, %v13908_v21  ;;  %v9242_v56 = vadd.f32 %v1851_v27, %v13910_v11  ;;  %v5622_v55 = vld [vmem:[%s6757_s17 + $0x93] sm:$0xff]  ;;  %v5623_v19 = vld [vmem:[%s6757_s17 + $0x9b] sm:$0xff] }
 0x144   : > { %13897 = vst [vmem:[#allocation15_spill] sm:$0xff] %v9217_v39  ;;  %13899 = vst [vmem:[#allocation16_spill] sm:$0xff] %v9220_v50  ;;  %v5624_v51 = vld [vmem:[%s6757_s17 + $0xab] sm:$0xff]  ;;  %v5647_v54 = vld [vmem:[%s13465_s1 + $0x13] ss:$0 sm:$0xff] }
 0x145   : > { %13901 = vst [vmem:[#allocation17_spill] sm:$0xff] %v9223_v45  ;;  %13903 = vst [vmem:[#allocation18_spill] sm:$0xff] %v9226_v22  ;;  %v13912_v49 = vld [vmem:[#allocation5_spill] sm:$0xff]  ;;  %v13914_v15 = vld [vmem:[#allocation6_spill] sm:$0xff] }
 0x146   : > { %13905 = vst [vmem:[#allocation19_spill] sm:$0xff] %v9233_v13  ;;  %13907 = vst [vmem:[#allocation2_spill] sm:$0xff] %v9236_v60  ;;  %v9251_v18 = vadd.f32 %v1852_v20, %v13912_v49  ;;  %v9254_v36 = vadd.f32 %v1853_v61, %v13914_v15  ;;  %v13916_v48 = vld [vmem:[#allocation7_spill] sm:$0xff]  ;;  %v13918_v47 = vld [vmem:[#allocation8_spill] sm:$0xff]  ;;  %v1929_v49 = vmul.f32 %v5647_v54, %v5614_v52 }
 0x147   : > { %13909 = vst [vmem:[#allocation3_spill] sm:$0xff] %v9239_v29  ;;  %13911 = vst [vmem:[#allocation4_spill] sm:$0xff] %v9242_v56  ;;  %v9257_v6 = vadd.f32 %v1854_v2, %v13916_v48  ;;  %v9260_v57 = vadd.f32 %v1855_v43, %v13918_v47  ;;  %v5625_v9 = vld [vmem:[%s6757_s17 + $0xb3] sm:$0xff]  ;;  %v5626_v27 = vld [vmem:[%s6757_s17 + $0xc3] sm:$0xff]  ;;  %v1930_v15 = vmul.f32 %v5647_v54, %v5615_v37 }
 0x148   : > { %13913 = vst [vmem:[#allocation5_spill] sm:$0xff] %v9251_v18  ;;  %13915 = vst [vmem:[#allocation6_spill] sm:$0xff] %v9254_v36  ;;  %v5627_v31 = vld [vmem:[%s6757_s17 + $0xcb] sm:$0xff]  ;;  %v13920_v30 = vld [vmem:[#allocation9_spill] sm:$0xff]  ;;  %v1931_v48 = vmul.f32 %v5647_v54, %v5616_v63  ;;  %v1937_v52 = vmul.f32 %v5647_v54, %v5622_v55  ;;  %v1938_v37 = vmul.f32 %v5647_v54, %v5623_v19 }
 0x149   : > { %13917 = vst [vmem:[#allocation7_spill] sm:$0xff] %v9257_v6  ;;  %13919 = vst [vmem:[#allocation8_spill] sm:$0xff] %v9260_v57  ;;  %v9266_v42 = vadd.f32 %v1856_v3, %v13920_v30  ;;  %v13922_v20 = vld [vmem:[#allocation10_spill] sm:$0xff]  ;;  %v13924_v61 = vld [vmem:[#allocation11_spill] sm:$0xff]  ;;  %v1933_v30 = vmul.f32 %v5647_v54, %v5618_v33  ;;  %v1939_v63 = vmul.f32 %v5647_v54, %v5624_v51 }
 0x14a   : > { %v9269_v41 = vadd.f32 %v1857_v34, %v13922_v20  ;;  %v9272_v16 = vadd.f32 %v1858_v24, %v13924_v61  ;;  %v13926_v2 = vld [vmem:[#allocation12_spill] sm:$0xff]  ;;  %v5628_v43 = vld [vmem:[%s6757_s17 + $0xdb] sm:$0xff]  ;;  %v5629_v7 = vld [vmem:[%s6757_s17 + $0xe3] sm:$0xff]  ;;  %v1932_v34 = vmul.f32 %v5647_v54, %v5617_v12  ;;  %v1934_v20 = vmul.f32 %v5647_v54, %v5619_v58 }
 0x14b   : > { %13921 = vst [vmem:[#allocation9_spill] sm:$0xff] %v9266_v42  ;;  %v9275_v14 = vadd.f32 %v1859_v0, %v13926_v2  ;;  %v5630_v53 = vld [vmem:[%s6757_s17 + $0xf3] sm:$0xff]  ;;  %v5631_v21 = vld [vmem:[%s6757_s17 + $0xfb] sm:$0xff]  ;;  %v5632_v11 = vld [vmem:[%s6757_s17 + $0x10b] sm:$0xff]  ;;  %v1935_v61 = vmul.f32 %v5647_v54, %v5620_v25  ;;  %v1936_v2 = vmul.f32 %v5647_v54, %v5621_v40  ;;  %v1940_v42 = vmul.f32 %v5647_v54, %v5625_v9 }
 0x14c   : > { %13923 = vst [vmem:[#allocation10_spill] sm:$0xff] %v9269_v41  ;;  %13925 = vst [vmem:[#allocation11_spill] sm:$0xff] %v9272_v16  ;;  %v5633_v3 = vld [vmem:[%s6757_s17 + $0x113] sm:$0xff]  ;;  %v5634_v24 = vld [vmem:[%s6757_s17 + $0x123] sm:$0xff]  ;;  %v1941_v36 = vmul.f32 %v5647_v54, %v5626_v27  ;;  %v1942_v18 = vmul.f32 %v5647_v54, %v5627_v31  ;;  %v1943_v56 = vmul.f32 %v5647_v54, %v5628_v43 }
 0x14d   : > { %13927 = vst [vmem:[#allocation12_spill] sm:$0xff] %v9275_v14  ;;  %v5635_v47 = vld [vmem:[%s6757_s17 + $0x12b] sm:$0xff]  ;;  %v5636_v0 = vld [vmem:[%s6757_s17 + $0x13b] sm:$0xff]  ;;  %v5637_v14 = vld [vmem:[%s6757_s17 + $0x143] sm:$0xff]  ;;  %v1944_v33 = vmul.f32 %v5647_v54, %v5629_v7  ;;  %v1945_v40 = vmul.f32 %v5647_v54, %v5630_v53  ;;  %v1946_v60 = vmul.f32 %v5647_v54, %v5631_v21  ;;  %v1947_v13 = vmul.f32 %v5647_v54, %v5632_v11 }
 0x14e   : > { %v5638_v16 = vld [vmem:[%s6757_s17 + $0x153] sm:$0xff]  ;;  %v5639_v41 = vld [vmem:[%s6757_s17 + $0x15b] sm:$0xff]  ;;  %v5640_v12 = vld [vmem:[%s6757_s17 + $0x16b] sm:$0xff]  ;;  %v1948_v22 = vmul.f32 %v5647_v54, %v5633_v3  ;;  %v1949_v45 = vmul.f32 %v5647_v54, %v5634_v24  ;;  %v1950_v50 = vmul.f32 %v5647_v54, %v5635_v47  ;;  %v1951_v55 = vmul.f32 %v5647_v54, %v5636_v0 }
 0x14f   : > { %v5641_v57 = vld [vmem:[%s6757_s17 + $0x173] sm:$0xff]  ;;  %v5642_v6 = vld [vmem:[%s6757_s17 + $0x183] sm:$0xff]  ;;  %v5643_v58 = vld [vmem:[%s6757_s17 + $0x18b] sm:$0xff]  ;;  %v1952_v19 = vmul.f32 %v5647_v54, %v5637_v14  ;;  %v1953_v51 = vmul.f32 %v5647_v54, %v5638_v16  ;;  %v1954_v9 = vmul.f32 %v5647_v54, %v5639_v41  ;;  %v1955_v39 = vmul.f32 %v5647_v54, %v5640_v12 }
 0x150   : > { %v5644_v25 = vld [vmem:[%s6757_s17 + $0x19b] sm:$0xff]  ;;  %v5645_v29 = vld [vmem:[%s6757_s17 + $0x1a3] sm:$0xff]  ;;  %v1956_v5 = vmul.f32 %v5647_v54, %v5641_v57  ;;  %v1957_v38 = vmul.f32 %v5647_v54, %v5642_v6  ;;  %v1958_v27 = vmul.f32 %v5647_v54, %v5643_v58  ;;  %v9296_v7 = vadd.f32 %v1929_v49, %v9165_v26  ;;  %v5650_v14 = vld [vmem:[%s6757_s17 + $0x4c] sm:$0xff] }
 0x151   : > { %v1959_v31 = vmul.f32 %v5647_v54, %v5644_v25  ;;  %v1960_v43 = vmul.f32 %v5647_v54, %v5645_v29  ;;  %v9299_v53 = vadd.f32 %v1930_v15, %v9168_v62  ;;  %v9302_v21 = vadd.f32 %v1931_v48, %v9171_v35  ;;  %v5648_v16 = vld [vmem:[%s6757_s17 + $0x34] sm:$0xff]  ;;  %v5652_v49 = vld [vmem:[%s6757_s17 + $0x64] sm:$0xff]  ;;  %v5653_v15 = vld [vmem:[%s6757_s17 + $0x6c] sm:$0xff] }
 0x152   : > { %v9305_v41 = vadd.f32 %v1932_v34, %v9174_v17  ;;  %v9308_v6 = vadd.f32 %v1933_v30, %v9177_v1  ;;  %v9311_v29 = vadd.f32 %v1934_v20, %v9180_v46  ;;  %v9314_v26 = vadd.f32 %v1935_v61, %v9183_v4  ;;  %v5654_v48 = vld [vmem:[%s6757_s17 + $0x7c] sm:$0xff]  ;;  %v5655_v34 = vld [vmem:[%s6757_s17 + $0x84] sm:$0xff]  ;;  %v13954_v25 = vld [vmem:[#allocation8_spill] sm:$0xff] }
 0x153   : > { %v9317_v62 = vadd.f32 %v1936_v2, %v9186_v59  ;;  %v9320_v35 = vadd.f32 %v1937_v52, %v9189_v10  ;;  %v9323_v17 = vadd.f32 %v1938_v37, %v9192_v44  ;;  %v9326_v1 = vadd.f32 %v1939_v63, %v9195_v23  ;;  %v13928_v10 = vld [vmem:[#allocation13_spill] sm:$0xff]  ;;  %v13930_v44 = vld [vmem:[#allocation14_spill] sm:$0xff]  ;;  %v13940_v24 = vld [vmem:[#allocation19_spill] sm:$0xff] }
 0x154   : > { %v9329_v46 = vadd.f32 %v1940_v42, %v9198_v32  ;;  %v9332_v4 = vadd.f32 %v1941_v36, %v9201_v8  ;;  %v9335_v59 = vadd.f32 %v1942_v18, %v9204_v28  ;;  %v9338_v54 = vadd.f32 %v1943_v56, %v13928_v10  ;;  %v5649_v23 = vld [vmem:[%s6757_s17 + $0x3c] sm:$0xff]  ;;  %v5651_v32 = vld [vmem:[%s6757_s17 + $0x54] sm:$0xff]  ;;  %v13932_v42 = vld [vmem:[#allocation15_spill] sm:$0xff] }
 0x155   : > { %v9341_v57 = vadd.f32 %v1944_v33, %v13930_v44  ;;  %v9348_v11 = vadd.f32 %v1945_v40, %v13932_v42  ;;  %v13934_v8 = vld [vmem:[#allocation16_spill] sm:$0xff]  ;;  %v13936_v28 = vld [vmem:[#allocation17_spill] sm:$0xff]  ;;  %v13938_v56 = vld [vmem:[#allocation18_spill] sm:$0xff]  ;;  %v9364_v47 = vadd.f32 %v1949_v45, %v13940_v24  ;;  %v9391_v40 = vadd.f32 %v1956_v5, %v13954_v25 }
 0x156   : > { %13929 = vst [vmem:[#allocation13_spill] sm:$0xff] %v9338_v54  ;;  %v9351_v36 = vadd.f32 %v1946_v60, %v13934_v8  ;;  %v9354_v18 = vadd.f32 %v1947_v13, %v13936_v28  ;;  %v9357_v3 = vadd.f32 %v1948_v22, %v13938_v56  ;;  %v13942_v0 = vld [vmem:[#allocation2_spill] sm:$0xff]  ;;  %v13944_v60 = vld [vmem:[#allocation3_spill] sm:$0xff]  ;;  %v13946_v13 = vld [vmem:[#allocation4_spill] sm:$0xff] }
 0x157   : > { %13931 = vst [vmem:[#allocation14_spill] sm:$0xff] %v9341_v57  ;;  %13933 = vst [vmem:[#allocation15_spill] sm:$0xff] %v9348_v11  ;;  %v9367_v30 = vadd.f32 %v1950_v50, %v13942_v0  ;;  %v9370_v20 = vadd.f32 %v1951_v55, %v13944_v60  ;;  %v9373_v61 = vadd.f32 %v1952_v19, %v13946_v13  ;;  %v5656_v22 = vld [vmem:[%s6757_s17 + $0x94] sm:$0xff]  ;;  %v5657_v2 = vld [vmem:[%s6757_s17 + $0x9c] sm:$0xff] }
 0x158   : > { %13935 = vst [vmem:[#allocation16_spill] sm:$0xff] %v9351_v36  ;;  %13937 = vst [vmem:[#allocation17_spill] sm:$0xff] %v9354_v18  ;;  %v5658_v52 = vld [vmem:[%s6757_s17 + $0xac] sm:$0xff]  ;;  %v5681_v45 = vld [vmem:[%s13465_s1 + $0x14] ss:$0 sm:$0xff] }
 0x159   : > { %13939 = vst [vmem:[#allocation18_spill] sm:$0xff] %v9357_v3  ;;  %13941 = vst [vmem:[#allocation19_spill] sm:$0xff] %v9364_v47  ;;  %v13948_v37 = vld [vmem:[#allocation5_spill] sm:$0xff]  ;;  %v13950_v63 = vld [vmem:[#allocation6_spill] sm:$0xff] }
 0x15a   : > { %13943 = vst [vmem:[#allocation2_spill] sm:$0xff] %v9367_v30  ;;  %13945 = vst [vmem:[#allocation3_spill] sm:$0xff] %v9370_v20  ;;  %v9382_v50 = vadd.f32 %v1953_v51, %v13948_v37  ;;  %v9385_v12 = vadd.f32 %v1954_v9, %v13950_v63  ;;  %v13952_v33 = vld [vmem:[#allocation7_spill] sm:$0xff]  ;;  %v5659_v55 = vld [vmem:[%s6757_s17 + $0xb4] sm:$0xff]  ;;  %v2030_v37 = vmul.f32 %v5681_v45, %v5648_v16 }
 0x15b   : > { %13947 = vst [vmem:[#allocation4_spill] sm:$0xff] %v9373_v61  ;;  %v9388_v58 = vadd.f32 %v1955_v39, %v13952_v33  ;;  %13955 = vst [vmem:[#allocation8_spill] sm:$0xff] %v9391_v40  ;;  %v5660_v19 = vld [vmem:[%s6757_s17 + $0xc4] sm:$0xff]  ;;  %v5661_v10 = vld [vmem:[%s6757_s17 + $0xcc] sm:$0xff]  ;;  %v2031_v63 = vmul.f32 %v5681_v45, %v5649_v23  ;;  %v2032_v33 = vmul.f32 %v5681_v45, %v5650_v14 }
 0x15c   : > { %13949 = vst [vmem:[#allocation5_spill] sm:$0xff] %v9382_v50  ;;  %13951 = vst [vmem:[#allocation6_spill] sm:$0xff] %v9385_v12  ;;  %v13956_v44 = vld [vmem:[#allocation9_spill] sm:$0xff]  ;;  %v13958_v51 = vld [vmem:[#allocation10_spill] sm:$0xff]  ;;  %v2038_v16 = vmul.f32 %v5681_v45, %v5656_v22  ;;  %v2039_v23 = vmul.f32 %v5681_v45, %v5657_v2  ;;  %v2040_v14 = vmul.f32 %v5681_v45, %v5658_v52 }
 0x15d   : > { %13953 = vst [vmem:[#allocation7_spill] sm:$0xff] %v9388_v58  ;;  %v9397_v42 = vadd.f32 %v1957_v38, %v13956_v44  ;;  %v9400_v8 = vadd.f32 %v1958_v27, %v13958_v51  ;;  %v13960_v9 = vld [vmem:[#allocation11_spill] sm:$0xff]  ;;  %v13962_v39 = vld [vmem:[#allocation12_spill] sm:$0xff]  ;;  %v5662_v5 = vld [vmem:[%s6757_s17 + $0xdc] sm:$0xff]  ;;  %v2033_v27 = vmul.f32 %v5681_v45, %v5651_v32  ;;  %v2034_v44 = vmul.f32 %v5681_v45, %v5652_v49 }
 0x15e   : > { %v9403_v28 = vadd.f32 %v1959_v31, %v13960_v9  ;;  %v9406_v56 = vadd.f32 %v1960_v43, %v13962_v39  ;;  %v5663_v24 = vld [vmem:[%s6757_s17 + $0xe4] sm:$0xff]  ;;  %v5664_v0 = vld [vmem:[%s6757_s17 + $0xf4] sm:$0xff]  ;;  %v5665_v60 = vld [vmem:[%s6757_s17 + $0xfc] sm:$0xff]  ;;  %v2035_v51 = vmul.f32 %v5681_v45, %v5653_v15  ;;  %v2036_v9 = vmul.f32 %v5681_v45, %v5654_v48 }
 0x15f   : > { %13957 = vst [vmem:[#allocation9_spill] sm:$0xff] %v9397_v42  ;;  %13959 = vst [vmem:[#allocation10_spill] sm:$0xff] %v9400_v8  ;;  %v5666_v13 = vld [vmem:[%s6757_s17 + $0x10c] sm:$0xff]  ;;  %v5667_v38 = vld [vmem:[%s6757_s17 + $0x114] sm:$0xff]  ;;  %v2037_v39 = vmul.f32 %v5681_v45, %v5655_v34  ;;  %v2041_v42 = vmul.f32 %v5681_v45, %v5659_v55  ;;  %v2042_v12 = vmul.f32 %v5681_v45, %v5660_v19 }
 0x160   : > { %13961 = vst [vmem:[#allocation11_spill] sm:$0xff] %v9403_v28  ;;  %13963 = vst [vmem:[#allocation12_spill] sm:$0xff] %v9406_v56  ;;  %v5668_v31 = vld [vmem:[%s6757_s17 + $0x124] sm:$0xff]  ;;  %v5669_v25 = vld [vmem:[%s6757_s17 + $0x12c] sm:$0xff]  ;;  %v2043_v50 = vmul.f32 %v5681_v45, %v5661_v10  ;;  %v2044_v61 = vmul.f32 %v5681_v45, %v5662_v5  ;;  %v2045_v49 = vmul.f32 %v5681_v45, %v5663_v24 }
 0x161   : > { %v5670_v43 = vld [vmem:[%s6757_s17 + $0x13c] sm:$0xff]  ;;  %v5671_v56 = vld [vmem:[%s6757_s17 + $0x144] sm:$0xff]  ;;  %v5672_v28 = vld [vmem:[%s6757_s17 + $0x154] sm:$0xff]  ;;  %v2046_v34 = vmul.f32 %v5681_v45, %v5664_v0  ;;  %v2047_v30 = vmul.f32 %v5681_v45, %v5665_v60  ;;  %v2048_v47 = vmul.f32 %v5681_v45, %v5666_v13  ;;  %v2049_v3 = vmul.f32 %v5681_v45, %v5667_v38 }
 0x162   : > { %v5673_v8 = vld [vmem:[%s6757_s17 + $0x15c] sm:$0xff]  ;;  %v5674_v32 = vld [vmem:[%s6757_s17 + $0x16c] sm:$0xff]  ;;  %v5675_v40 = vld [vmem:[%s6757_s17 + $0x174] sm:$0xff]  ;;  %v2050_v18 = vmul.f32 %v5681_v45, %v5668_v31  ;;  %v2051_v36 = vmul.f32 %v5681_v45, %v5669_v25  ;;  %v2052_v22 = vmul.f32 %v5681_v45, %v5670_v43  ;;  %v2053_v2 = vmul.f32 %v5681_v45, %v5671_v56 }
 0x163   : > { %v5676_v58 = vld [vmem:[%s6757_s17 + $0x184] sm:$0xff]  ;;  %v5677_v15 = vld [vmem:[%s6757_s17 + $0x18c] sm:$0xff]  ;;  %v5678_v48 = vld [vmem:[%s6757_s17 + $0x19c] sm:$0xff]  ;;  %v2054_v52 = vmul.f32 %v5681_v45, %v5672_v28  ;;  %v2055_v55 = vmul.f32 %v5681_v45, %v5673_v8  ;;  %v2056_v11 = vmul.f32 %v5681_v45, %v5674_v32  ;;  %v2057_v57 = vmul.f32 %v5681_v45, %v5675_v40 }
 0x164   : > { %v5679_v20 = vld [vmem:[%s6757_s17 + $0x1a4] sm:$0xff]  ;;  %v2058_v54 = vmul.f32 %v5681_v45, %v5676_v58  ;;  %v2059_v19 = vmul.f32 %v5681_v45, %v5677_v15  ;;  %v2060_v10 = vmul.f32 %v5681_v45, %v5678_v48  ;;  %v9427_v24 = vadd.f32 %v2030_v37, %v9296_v7  ;;  %v5682_v28 = vld [vmem:[%s6757_s17 + $0x35] sm:$0xff]  ;;  %v5684_v56 = vld [vmem:[%s6757_s17 + $0x4d] sm:$0xff] }
 0x165   : > { %v2061_v5 = vmul.f32 %v5681_v45, %v5679_v20  ;;  %v9430_v0 = vadd.f32 %v2031_v63, %v9299_v53  ;;  %v9433_v60 = vadd.f32 %v2032_v33, %v9302_v21  ;;  %v9436_v8 = vadd.f32 %v2033_v27, %v9305_v41  ;;  %v5686_v37 = vld [vmem:[%s6757_s17 + $0x65] sm:$0xff]  ;;  %v5687_v63 = vld [vmem:[%s6757_s17 + $0x6d] sm:$0xff]  ;;  %v5688_v33 = vld [vmem:[%s6757_s17 + $0x7d] sm:$0xff] }
 0x166   : > { %v9439_v58 = vadd.f32 %v2034_v44, %v9308_v6  ;;  %v9442_v20 = vadd.f32 %v2035_v51, %v9311_v29  ;;  %v9445_v7 = vadd.f32 %v2036_v9, %v9314_v26  ;;  %v9448_v53 = vadd.f32 %v2037_v39, %v9317_v62  ;;  %v5689_v27 = vld [vmem:[%s6757_s17 + $0x85] sm:$0xff]  ;;  %v5691_v39 = vld [vmem:[%s6757_s17 + $0x9d] sm:$0xff]  ;;  %v13990_v48 = vld [vmem:[#allocation8_spill] sm:$0xff] }
 0x167   : > { %v9451_v21 = vadd.f32 %v2038_v16, %v9320_v35  ;;  %v9454_v41 = vadd.f32 %v2039_v23, %v9323_v17  ;;  %v9457_v6 = vadd.f32 %v2040_v14, %v9326_v1  ;;  %v9460_v29 = vadd.f32 %v2041_v42, %v9329_v46  ;;  %v13964_v35 = vld [vmem:[#allocation13_spill] sm:$0xff]  ;;  %v13966_v17 = vld [vmem:[#allocation14_spill] sm:$0xff]  ;;  %v13968_v42 = vld [vmem:[#allocation15_spill] sm:$0xff] }
 0x168   : > { %v9463_v26 = vadd.f32 %v2042_v12, %v9332_v4  ;;  %v9466_v62 = vadd.f32 %v2043_v50, %v9335_v59  ;;  %v9469_v45 = vadd.f32 %v2044_v61, %v13964_v35  ;;  %v9472_v40 = vadd.f32 %v2045_v49, %v13966_v17  ;;  %v5683_v1 = vld [vmem:[%s6757_s17 + $0x3d] sm:$0xff]  ;;  %v5685_v46 = vld [vmem:[%s6757_s17 + $0x55] sm:$0xff]  ;;  %v13976_v31 = vld [vmem:[#allocation19_spill] sm:$0xff] }
 0x169   : > { %v9479_v13 = vadd.f32 %v2046_v34, %v13968_v42  ;;  %v13970_v4 = vld [vmem:[#allocation16_spill] sm:$0xff]  ;;  %v13972_v59 = vld [vmem:[#allocation17_spill] sm:$0xff]  ;;  %v13974_v61 = vld [vmem:[#allocation18_spill] sm:$0xff]  ;;  %v9495_v25 = vadd.f32 %v2050_v18, %v13976_v31  ;;  %v9522_v34 = vadd.f32 %v2057_v57, %v13990_v48 }
 0x16a   : > { %13965 = vst [vmem:[#allocation13_spill] sm:$0xff] %v9469_v45  ;;  %13967 = vst [vmem:[#allocation14_spill] sm:$0xff] %v9472_v40  ;;  %v9482_v12 = vadd.f32 %v2047_v30, %v13970_v4  ;;  %v9485_v50 = vadd.f32 %v2048_v47, %v13972_v59  ;;  %v9488_v38 = vadd.f32 %v2049_v3, %v13974_v61  ;;  %v13978_v43 = vld [vmem:[#allocation2_spill] sm:$0xff]  ;;  %v13980_v30 = vld [vmem:[#allocation3_spill] sm:$0xff] }
 0x16b   : > { %13969 = vst [vmem:[#allocation15_spill] sm:$0xff] %v9479_v13  ;;  %13977 = vst [vmem:[#allocation19_spill] sm:$0xff] %v9495_v25  ;;  %v9498_v44 = vadd.f32 %v2051_v36, %v13978_v43  ;;  %v9501_v51 = vadd.f32 %v2052_v22, %v13980_v30  ;;  %v13982_v47 = vld [vmem:[#allocation4_spill] sm:$0xff]  ;;  %v13984_v23 = vld [vmem:[#allocation5_spill] sm:$0xff] }
 0x16c   : > { %13971 = vst [vmem:[#allocation16_spill] sm:$0xff] %v9482_v12  ;;  %13973 = vst [vmem:[#allocation17_spill] sm:$0xff] %v9485_v50  ;;  %v9504_v9 = vadd.f32 %v2053_v2, %v13982_v47  ;;  %v5690_v3 = vld [vmem:[%s6757_s17 + $0x95] sm:$0xff]  ;;  %v5692_v16 = vld [vmem:[%s6757_s17 + $0xad] sm:$0xff]  ;;  %v9513_v36 = vadd.f32 %v2054_v52, %v13984_v23 }
 0x16d   : > { %13975 = vst [vmem:[#allocation18_spill] sm:$0xff] %v9488_v38  ;;  %13979 = vst [vmem:[#allocation2_spill] sm:$0xff] %v9498_v44  ;;  %v5715_v18 = vld [vmem:[%s13465_s1 + $0x15] ss:$0 sm:$0xff]  ;;  %v13986_v14 = vld [vmem:[#allocation6_spill] sm:$0xff] }
 0x16e   : > { %13981 = vst [vmem:[#allocation3_spill] sm:$0xff] %v9501_v51  ;;  %13983 = vst [vmem:[#allocation4_spill] sm:$0xff] %v9504_v9  ;;  %v9516_v32 = vadd.f32 %v2055_v55, %v13986_v14  ;;  %v13988_v49 = vld [vmem:[#allocation7_spill] sm:$0xff]  ;;  %v5693_v22 = vld [vmem:[%s6757_s17 + $0xb5] sm:$0xff]  ;;  %v2131_v23 = vmul.f32 %v5715_v18, %v5682_v28  ;;  %v2132_v14 = vmul.f32 %v5715_v18, %v5683_v1 }
 0x16f   : > { %13985 = vst [vmem:[#allocation5_spill] sm:$0xff] %v9513_v36  ;;  %v9519_v15 = vadd.f32 %v2056_v11, %v13988_v49  ;;  %13991 = vst [vmem:[#allocation8_spill] sm:$0xff] %v9522_v34  ;;  %v5694_v2 = vld [vmem:[%s6757_s17 + $0xc5] sm:$0xff]  ;;  %v5695_v35 = vld [vmem:[%s6757_s17 + $0xcd] sm:$0xff]  ;;  %v2133_v49 = vmul.f32 %v5715_v18, %v5684_v56  ;;  %v2139_v28 = vmul.f32 %v5715_v18, %v5690_v3 }
 0x170   : > { %13987 = vst [vmem:[#allocation6_spill] sm:$0xff] %v9516_v32  ;;  %v13992_v17 = vld [vmem:[#allocation9_spill] sm:$0xff]  ;;  %v13994_v52 = vld [vmem:[#allocation10_spill] sm:$0xff]  ;;  %v13996_v55 = vld [vmem:[#allocation11_spill] sm:$0xff]  ;;  %v2140_v1 = vmul.f32 %v5715_v18, %v5691_v39  ;;  %v2141_v56 = vmul.f32 %v5715_v18, %v5692_v16  ;;  %v2143_v32 = vmul.f32 %v5715_v18, %v5694_v2  ;;  %v2144_v36 = vmul.f32 %v5715_v18, %v5695_v35 }
 0x171   : > { %13989 = vst [vmem:[#allocation7_spill] sm:$0xff] %v9519_v15  ;;  %v9528_v42 = vadd.f32 %v2058_v54, %v13992_v17  ;;  %v9531_v4 = vadd.f32 %v2059_v19, %v13994_v52  ;;  %v9534_v59 = vadd.f32 %v2060_v10, %v13996_v55  ;;  %v13998_v11 = vld [vmem:[#allocation12_spill] sm:$0xff]  ;;  %v5696_v57 = vld [vmem:[%s6757_s17 + $0xdd] sm:$0xff]  ;;  %v5697_v31 = vld [vmem:[%s6757_s17 + $0xe5] sm:$0xff]  ;;  %v2134_v19 = vmul.f32 %v5715_v18, %v5685_v46 }
 0x172   : > { %v9537_v61 = vadd.f32 %v2061_v5, %v13998_v11  ;;  %v5698_v43 = vld [vmem:[%s6757_s17 + $0xf5] sm:$0xff]  ;;  %v5699_v30 = vld [vmem:[%s6757_s17 + $0xfd] sm:$0xff]  ;;  %v5700_v47 = vld [vmem:[%s6757_s17 + $0x10d] sm:$0xff]  ;;  %v2135_v17 = vmul.f32 %v5715_v18, %v5686_v37  ;;  %v2136_v52 = vmul.f32 %v5715_v18, %v5687_v63  ;;  %v2137_v55 = vmul.f32 %v5715_v18, %v5688_v33 }
 0x173   : > { %13993 = vst [vmem:[#allocation9_spill] sm:$0xff] %v9528_v42  ;;  %13995 = vst [vmem:[#allocation10_spill] sm:$0xff] %v9531_v4  ;;  %v5701_v54 = vld [vmem:[%s6757_s17 + $0x115] sm:$0xff]  ;;  %v5702_v10 = vld [vmem:[%s6757_s17 + $0x125] sm:$0xff]  ;;  %v2138_v11 = vmul.f32 %v5715_v18, %v5689_v27  ;;  %v2142_v42 = vmul.f32 %v5715_v18, %v5693_v22  ;;  %v2145_v9 = vmul.f32 %v5715_v18, %v5696_v57 }
 0x174   : > { %13997 = vst [vmem:[#allocation11_spill] sm:$0xff] %v9534_v59  ;;  %13999 = vst [vmem:[#allocation12_spill] sm:$0xff] %v9537_v61  ;;  %v5703_v48 = vld [vmem:[%s6757_s17 + $0x12d] sm:$0xff]  ;;  %v5704_v5 = vld [vmem:[%s6757_s17 + $0x13d] sm:$0xff]  ;;  %v2146_v37 = vmul.f32 %v5715_v18, %v5697_v31  ;;  %v2147_v27 = vmul.f32 %v5715_v18, %v5698_v43  ;;  %v2148_v44 = vmul.f32 %v5715_v18, %v5699_v30 }
 0x175   : > { %v5705_v61 = vld [vmem:[%s6757_s17 + $0x145] sm:$0xff]  ;;  %v5706_v59 = vld [vmem:[%s6757_s17 + $0x155] sm:$0xff]  ;;  %v5707_v4 = vld [vmem:[%s6757_s17 + $0x15d] sm:$0xff]  ;;  %v2149_v25 = vmul.f32 %v5715_v18, %v5700_v47  ;;  %v2150_v38 = vmul.f32 %v5715_v18, %v5701_v54  ;;  %v2151_v50 = vmul.f32 %v5715_v18, %v5702_v10  ;;  %v2152_v12 = vmul.f32 %v5715_v18, %v5703_v48 }
 0x176   : > { %v5708_v46 = vld [vmem:[%s6757_s17 + $0x16d] sm:$0xff]  ;;  %v5709_v34 = vld [vmem:[%s6757_s17 + $0x175] sm:$0xff]  ;;  %v5710_v15 = vld [vmem:[%s6757_s17 + $0x185] sm:$0xff]  ;;  %v2153_v3 = vmul.f32 %v5715_v18, %v5704_v5  ;;  %v2154_v39 = vmul.f32 %v5715_v18, %v5705_v61  ;;  %v2155_v16 = vmul.f32 %v5715_v18, %v5706_v59  ;;  %v2156_v22 = vmul.f32 %v5715_v18, %v5707_v4 }
 0x177   : > { %v5711_v63 = vld [vmem:[%s6757_s17 + $0x18d] sm:$0xff]  ;;  %v5712_v33 = vld [vmem:[%s6757_s17 + $0x19d] sm:$0xff]  ;;  %v5713_v51 = vld [vmem:[%s6757_s17 + $0x1a5] sm:$0xff]  ;;  %v2157_v13 = vmul.f32 %v5715_v18, %v5708_v46  ;;  %v2158_v40 = vmul.f32 %v5715_v18, %v5709_v34  ;;  %v2159_v45 = vmul.f32 %v5715_v18, %v5710_v15  ;;  %v9558_v31 = vadd.f32 %v2131_v23, %v9427_v24 }
 0x178   : > { %v2160_v2 = vmul.f32 %v5715_v18, %v5711_v63  ;;  %v2161_v35 = vmul.f32 %v5715_v18, %v5712_v33  ;;  %v2162_v57 = vmul.f32 %v5715_v18, %v5713_v51  ;;  %v9561_v43 = vadd.f32 %v2132_v14, %v9430_v0  ;;  %v5716_v59 = vld [vmem:[%s6757_s17 + $0x36] sm:$0xff]  ;;  %v5718_v61 = vld [vmem:[%s6757_s17 + $0x4e] sm:$0xff]  ;;  %v5720_v23 = vld [vmem:[%s6757_s17 + $0x66] sm:$0xff] }
 0x179   : > { %v9564_v30 = vadd.f32 %v2133_v49, %v9433_v60  ;;  %v9567_v4 = vadd.f32 %v2134_v19, %v9436_v8  ;;  %v9570_v15 = vadd.f32 %v2135_v17, %v9439_v58  ;;  %v9573_v51 = vadd.f32 %v2136_v52, %v9442_v20  ;;  %v5721_v14 = vld [vmem:[%s6757_s17 + $0x6e] sm:$0xff]  ;;  %v5722_v49 = vld [vmem:[%s6757_s17 + $0x7e] sm:$0xff]  ;;  %v5723_v19 = vld [vmem:[%s6757_s17 + $0x86] sm:$0xff] }
 0x17a   : > { %v9576_v24 = vadd.f32 %v2137_v55, %v9445_v7  ;;  %v9579_v0 = vadd.f32 %v2138_v11, %v9448_v53  ;;  %v9582_v60 = vadd.f32 %v2139_v28, %v9451_v21  ;;  %v9585_v8 = vadd.f32 %v2140_v1, %v9454_v41  ;;  %v14000_v21 = vld [vmem:[#allocation13_spill] sm:$0xff]  ;;  %v14002_v41 = vld [vmem:[#allocation14_spill] sm:$0xff]  ;;  %v14012_v10 = vld [vmem:[#allocation19_spill] sm:$0xff] }
 0x17b   : > { %v9588_v58 = vadd.f32 %v2141_v56, %v9457_v6  ;;  %v9591_v20 = vadd.f32 %v2142_v42, %v9460_v29  ;;  %v9594_v7 = vadd.f32 %v2143_v32, %v9463_v26  ;;  %v9597_v53 = vadd.f32 %v2144_v36, %v9466_v62  ;;  %v5717_v6 = vld [vmem:[%s6757_s17 + $0x3e] sm:$0xff]  ;;  %v5719_v29 = vld [vmem:[%s6757_s17 + $0x56] sm:$0xff]  ;;  %v14004_v42 = vld [vmem:[#allocation15_spill] sm:$0xff] }
 0x17c   : > { %v9600_v18 = vadd.f32 %v2145_v9, %v14000_v21  ;;  %v9603_v34 = vadd.f32 %v2146_v37, %v14002_v41  ;;  %v9610_v47 = vadd.f32 %v2147_v27, %v14004_v42  ;;  %v14006_v26 = vld [vmem:[#allocation16_spill] sm:$0xff]  ;;  %v14008_v62 = vld [vmem:[#allocation17_spill] sm:$0xff]  ;;  %v14010_v9 = vld [vmem:[#allocation18_spill] sm:$0xff]  ;;  %v9626_v48 = vadd.f32 %v2151_v50, %v14012_v10 }
 0x17d   : > { %v9613_v32 = vadd.f32 %v2148_v44, %v14006_v26  ;;  %v9616_v36 = vadd.f32 %v2149_v25, %v14008_v62  ;;  %v9619_v54 = vadd.f32 %v2150_v38, %v14010_v9  ;;  %v14014_v5 = vld [vmem:[#allocation2_spill] sm:$0xff]  ;;  %v14016_v44 = vld [vmem:[#allocation3_spill] sm:$0xff]  ;;  %v14018_v25 = vld [vmem:[#allocation4_spill] sm:$0xff] }
 0x17e   : > { %14001 = vst [vmem:[#allocation13_spill] sm:$0xff] %v9600_v18  ;;  %14003 = vst [vmem:[#allocation14_spill] sm:$0xff] %v9603_v34  ;;  %v9629_v17 = vadd.f32 %v2152_v12, %v14014_v5  ;;  %v9632_v52 = vadd.f32 %v2153_v3, %v14016_v44  ;;  %v9635_v55 = vadd.f32 %v2154_v39, %v14018_v25  ;;  %v5724_v38 = vld [vmem:[%s6757_s17 + $0x96] sm:$0xff]  ;;  %v5725_v11 = vld [vmem:[%s6757_s17 + $0x9e] sm:$0xff] }
 0x17f   : > { %14005 = vst [vmem:[#allocation15_spill] sm:$0xff] %v9610_v47  ;;  %14007 = vst [vmem:[#allocation16_spill] sm:$0xff] %v9613_v32  ;;  %v5726_v28 = vld [vmem:[%s6757_s17 + $0xae] sm:$0xff]  ;;  %v5749_v50 = vld [vmem:[%s13465_s1 + $0x16] ss:$0 sm:$0xff] }
 0x180   : > { %14009 = vst [vmem:[#allocation17_spill] sm:$0xff] %v9616_v36  ;;  %14011 = vst [vmem:[#allocation18_spill] sm:$0xff] %v9619_v54  ;;  %v14020_v1 = vld [vmem:[#allocation5_spill] sm:$0xff]  ;;  %v14022_v56 = vld [vmem:[#allocation6_spill] sm:$0xff] }
 0x181   : > { %14013 = vst [vmem:[#allocation19_spill] sm:$0xff] %v9626_v48  ;;  %14015 = vst [vmem:[#allocation2_spill] sm:$0xff] %v9629_v17  ;;  %v9644_v12 = vadd.f32 %v2155_v16, %v14020_v1  ;;  %v9647_v46 = vadd.f32 %v2156_v22, %v14022_v56  ;;  %v14024_v37 = vld [vmem:[#allocation7_spill] sm:$0xff]  ;;  %v14026_v33 = vld [vmem:[#allocation8_spill] sm:$0xff]  ;;  %v2232_v1 = vmul.f32 %v5749_v50, %v5716_v59 }
 0x182   : > { %14017 = vst [vmem:[#allocation3_spill] sm:$0xff] %v9632_v52  ;;  %14019 = vst [vmem:[#allocation4_spill] sm:$0xff] %v9635_v55  ;;  %v9650_v63 = vadd.f32 %v2157_v13, %v14024_v37  ;;  %v9653_v27 = vadd.f32 %v2158_v40, %v14026_v33  ;;  %v5727_v3 = vld [vmem:[%s6757_s17 + $0xb6] sm:$0xff]  ;;  %v5728_v39 = vld [vmem:[%s6757_s17 + $0xc6] sm:$0xff]  ;;  %v2233_v56 = vmul.f32 %v5749_v50, %v5717_v6 }
 0x183   : > { %14021 = vst [vmem:[#allocation5_spill] sm:$0xff] %v9644_v12  ;;  %14023 = vst [vmem:[#allocation6_spill] sm:$0xff] %v9647_v46  ;;  %v5729_v21 = vld [vmem:[%s6757_s17 + $0xce] sm:$0xff]  ;;  %v14028_v41 = vld [vmem:[#allocation9_spill] sm:$0xff]  ;;  %v2234_v37 = vmul.f32 %v5749_v50, %v5718_v61  ;;  %v2240_v59 = vmul.f32 %v5749_v50, %v5724_v38  ;;  %v2241_v6 = vmul.f32 %v5749_v50, %v5725_v11 }
 0x184   : > { %14025 = vst [vmem:[#allocation7_spill] sm:$0xff] %v9650_v63  ;;  %14027 = vst [vmem:[#allocation8_spill] sm:$0xff] %v9653_v27  ;;  %v9659_v42 = vadd.f32 %v2159_v45, %v14028_v41  ;;  %v14030_v16 = vld [vmem:[#allocation10_spill] sm:$0xff]  ;;  %v14032_v22 = vld [vmem:[#allocation11_spill] sm:$0xff]  ;;  %v2236_v41 = vmul.f32 %v5749_v50, %v5720_v23  ;;  %v2242_v61 = vmul.f32 %v5749_v50, %v5726_v28 }
 0x185   : > { %v9662_v26 = vadd.f32 %v2160_v2, %v14030_v16  ;;  %v9665_v62 = vadd.f32 %v2161_v35, %v14032_v22  ;;  %v14034_v13 = vld [vmem:[#allocation12_spill] sm:$0xff]  ;;  %v5730_v40 = vld [vmem:[%s6757_s17 + $0xde] sm:$0xff]  ;;  %v5731_v10 = vld [vmem:[%s6757_s17 + $0xe6] sm:$0xff]  ;;  %v2235_v2 = vmul.f32 %v5749_v50, %v5719_v29  ;;  %v2237_v16 = vmul.f32 %v5749_v50, %v5721_v14 }
 0x186   : > { %14029 = vst [vmem:[#allocation9_spill] sm:$0xff] %v9659_v42  ;;  %v9668_v9 = vadd.f32 %v2162_v57, %v14034_v13  ;;  %v5732_v5 = vld [vmem:[%s6757_s17 + $0xf6] sm:$0xff]  ;;  %v5733_v44 = vld [vmem:[%s6757_s17 + $0xfe] sm:$0xff]  ;;  %v5734_v25 = vld [vmem:[%s6757_s17 + $0x10e] sm:$0xff]  ;;  %v2238_v22 = vmul.f32 %v5749_v50, %v5722_v49  ;;  %v2239_v13 = vmul.f32 %v5749_v50, %v5723_v19  ;;  %v2243_v42 = vmul.f32 %v5749_v50, %v5727_v3 }
 0x187   : > { %14031 = vst [vmem:[#allocation10_spill] sm:$0xff] %v9662_v26  ;;  %14033 = vst [vmem:[#allocation11_spill] sm:$0xff] %v9665_v62  ;;  %v5735_v45 = vld [vmem:[%s6757_s17 + $0x116] sm:$0xff]  ;;  %v5736_v35 = vld [vmem:[%s6757_s17 + $0x126] sm:$0xff]  ;;  %v2244_v46 = vmul.f32 %v5749_v50, %v5728_v39  ;;  %v2245_v12 = vmul.f32 %v5749_v50, %v5729_v21  ;;  %v2246_v55 = vmul.f32 %v5749_v50, %v5730_v40 }
 0x188   : > { %14035 = vst [vmem:[#allocation12_spill] sm:$0xff] %v9668_v9  ;;  %v5737_v33 = vld [vmem:[%s6757_s17 + $0x12e] sm:$0xff]  ;;  %v5738_v57 = vld [vmem:[%s6757_s17 + $0x13e] sm:$0xff]  ;;  %v5739_v9 = vld [vmem:[%s6757_s17 + $0x146] sm:$0xff]  ;;  %v2247_v23 = vmul.f32 %v5749_v50, %v5731_v10  ;;  %v2248_v19 = vmul.f32 %v5749_v50, %v5732_v5  ;;  %v2249_v17 = vmul.f32 %v5749_v50, %v5733_v44  ;;  %v2250_v48 = vmul.f32 %v5749_v50, %v5734_v25 }
 0x189   : > { %v5740_v62 = vld [vmem:[%s6757_s17 + $0x156] sm:$0xff]  ;;  %v5741_v26 = vld [vmem:[%s6757_s17 + $0x15e] sm:$0xff]  ;;  %v5742_v29 = vld [vmem:[%s6757_s17 + $0x16e] sm:$0xff]  ;;  %v2251_v54 = vmul.f32 %v5749_v50, %v5735_v45  ;;  %v2252_v36 = vmul.f32 %v5749_v50, %v5736_v35  ;;  %v2253_v32 = vmul.f32 %v5749_v50, %v5737_v33  ;;  %v2254_v38 = vmul.f32 %v5749_v50, %v5738_v57 }
 0x18a   : > { %v5743_v27 = vld [vmem:[%s6757_s17 + $0x176] sm:$0xff]  ;;  %v5744_v63 = vld [vmem:[%s6757_s17 + $0x186] sm:$0xff]  ;;  %v5745_v14 = vld [vmem:[%s6757_s17 + $0x18e] sm:$0xff]  ;;  %v2255_v11 = vmul.f32 %v5749_v50, %v5739_v9  ;;  %v2256_v28 = vmul.f32 %v5749_v50, %v5740_v62  ;;  %v2257_v3 = vmul.f32 %v5749_v50, %v5741_v26  ;;  %v2258_v47 = vmul.f32 %v5749_v50, %v5742_v29 }
 0x18b   : > { %v5746_v49 = vld [vmem:[%s6757_s17 + $0x19e] sm:$0xff]  ;;  %v5747_v52 = vld [vmem:[%s6757_s17 + $0x1a6] sm:$0xff]  ;;  %v2259_v34 = vmul.f32 %v5749_v50, %v5743_v27  ;;  %v2260_v18 = vmul.f32 %v5749_v50, %v5744_v63  ;;  %v2261_v39 = vmul.f32 %v5749_v50, %v5745_v14  ;;  %v9689_v10 = vadd.f32 %v2232_v1, %v9558_v31 }
 0x18c   : > { %v2262_v21 = vmul.f32 %v5749_v50, %v5746_v49  ;;  %v2263_v40 = vmul.f32 %v5749_v50, %v5747_v52  ;;  %v9692_v5 = vadd.f32 %v2233_v56, %v9561_v43  ;;  %v9695_v44 = vadd.f32 %v2234_v37, %v9564_v30  ;;  %v5750_v62 = vld [vmem:[%s6757_s17 + $0x48] sm:$0xff]  ;;  %v5752_v9 = vld [vmem:[%s6757_s17 + $0x60] sm:$0xff]  ;;  %v5754_v1 = vld [vmem:[%s6757_s17 + $0x78] sm:$0xff] }
 0x18d   : > { %v9698_v26 = vadd.f32 %v2235_v2, %v9567_v4  ;;  %v9701_v63 = vadd.f32 %v2236_v41, %v9570_v15  ;;  %v9704_v52 = vadd.f32 %v2237_v16, %v9573_v51  ;;  %v9707_v31 = vadd.f32 %v2238_v22, %v9576_v24  ;;  %v5755_v56 = vld [vmem:[%s6757_s17 + $0x80] sm:$0xff]  ;;  %v5756_v37 = vld [vmem:[%s6757_s17 + $0x90] sm:$0xff]  ;;  %v5757_v2 = vld [vmem:[%s6757_s17 + $0x98] sm:$0xff] }
 0x18e   : > { %v9710_v43 = vadd.f32 %v2239_v13, %v9579_v0  ;;  %v9713_v30 = vadd.f32 %v2240_v59, %v9582_v60  ;;  %v9716_v4 = vadd.f32 %v2241_v6, %v9585_v8  ;;  %v9719_v15 = vadd.f32 %v2242_v61, %v9588_v58  ;;  %v14036_v60 = vld [vmem:[#allocation13_spill] sm:$0xff]  ;;  %v14038_v8 = vld [vmem:[#allocation14_spill] sm:$0xff]  ;;  %v5751_v58 = vld [vmem:[%s6757_s17 + $0x50] sm:$0xff] }
 0x18f   : > { %v9722_v51 = vadd.f32 %v2243_v42, %v9591_v20  ;;  %v9725_v24 = vadd.f32 %v2244_v46, %v9594_v7  ;;  %v9728_v0 = vadd.f32 %v2245_v12, %v9597_v53  ;;  %v9731_v50 = vadd.f32 %v2246_v55, %v14036_v60  ;;  %v5753_v20 = vld [vmem:[%s6757_s17 + $0x68] sm:$0xff]  ;;  %v14042_v7 = vld [vmem:[#allocation16_spill] sm:$0xff]  ;;  %v14044_v53 = vld [vmem:[#allocation17_spill] sm:$0xff] }
 0x190   : > { %v9734_v27 = vadd.f32 %v2247_v23, %v14038_v8  ;;  %v14040_v42 = vld [vmem:[#allocation15_spill] sm:$0xff]  ;;  %v9744_v46 = vadd.f32 %v2249_v17, %v14042_v7  ;;  %v9747_v12 = vadd.f32 %v2250_v48, %v14044_v53  ;;  %v14046_v55 = vld [vmem:[#allocation18_spill] sm:$0xff]  ;;  %v14054_v48 = vld [vmem:[#allocation4_spill] sm:$0xff] }
 0x191   : > { %14037 = vst [vmem:[#allocation13_spill] sm:$0xff] %v9731_v50  ;;  %v9741_v25 = vadd.f32 %v2248_v19, %v14040_v42  ;;  %v9750_v45 = vadd.f32 %v2251_v54, %v14046_v55  ;;  %v14048_v35 = vld [vmem:[#allocation19_spill] sm:$0xff]  ;;  %v14050_v57 = vld [vmem:[#allocation2_spill] sm:$0xff]  ;;  %v9766_v22 = vadd.f32 %v2255_v11, %v14054_v48  ;;  %v5759_v13 = vld [vmem:[%s6757_s17 + $0xb0] sm:$0xff] }
 0x192   : > { %14039 = vst [vmem:[#allocation14_spill] sm:$0xff] %v9734_v27  ;;  %14043 = vst [vmem:[#allocation16_spill] sm:$0xff] %v9744_v46  ;;  %v9757_v33 = vadd.f32 %v2252_v36, %v14048_v35  ;;  %v9760_v41 = vadd.f32 %v2253_v32, %v14050_v57  ;;  %v14052_v17 = vld [vmem:[#allocation3_spill] sm:$0xff]  ;;  %v5760_v59 = vld [vmem:[%s6757_s17 + $0xc0] sm:$0xff] }
 0x193   : > { %14041 = vst [vmem:[#allocation15_spill] sm:$0xff] %v9741_v25  ;;  %14045 = vst [vmem:[#allocation17_spill] sm:$0xff] %v9747_v12  ;;  %v9763_v16 = vadd.f32 %v2254_v38, %v14052_v17  ;;  %v5758_v54 = vld [vmem:[%s6757_s17 + $0xa8] sm:$0xff]  ;;  %v5783_v36 = vld [vmem:[%s13465_s1 + $0x18] ss:$0 sm:$0xff] }
 0x194   : > { %14047 = vst [vmem:[#allocation18_spill] sm:$0xff] %v9750_v45  ;;  %14049 = vst [vmem:[#allocation19_spill] sm:$0xff] %v9757_v33  ;;  %v14056_v6 = vld [vmem:[#allocation5_spill] sm:$0xff]  ;;  %v14058_v61 = vld [vmem:[#allocation6_spill] sm:$0xff] }
 0x195   : > { %14051 = vst [vmem:[#allocation2_spill] sm:$0xff] %v9760_v41  ;;  %14053 = vst [vmem:[#allocation3_spill] sm:$0xff] %v9763_v16  ;;  %v9775_v32 = vadd.f32 %v2256_v28, %v14056_v6  ;;  %v9778_v29 = vadd.f32 %v2257_v3, %v14058_v61  ;;  %v14060_v23 = vld [vmem:[#allocation7_spill] sm:$0xff]  ;;  %v14062_v49 = vld [vmem:[#allocation8_spill] sm:$0xff]  ;;  %v2335_v6 = vmul.f32 %v5783_v36, %v5750_v62 }
 0x196   : > { %14055 = vst [vmem:[#allocation4_spill] sm:$0xff] %v9766_v22  ;;  %v9781_v14 = vadd.f32 %v2258_v47, %v14060_v23  ;;  %v9784_v19 = vadd.f32 %v2259_v34, %v14062_v49  ;;  %v5761_v38 = vld [vmem:[%s6757_s17 + $0xc8] sm:$0xff]  ;;  %v5762_v11 = vld [vmem:[%s6757_s17 + $0xd8] sm:$0xff]  ;;  %v5763_v60 = vld [vmem:[%s6757_s17 + $0xe0] sm:$0xff]  ;;  %v2336_v61 = vmul.f32 %v5783_v36, %v5751_v58  ;;  %v2337_v23 = vmul.f32 %v5783_v36, %v5752_v9 }
 0x197   : > { %14057 = vst [vmem:[#allocation5_spill] sm:$0xff] %v9775_v32  ;;  %14059 = vst [vmem:[#allocation6_spill] sm:$0xff] %v9778_v29  ;;  %v14064_v8 = vld [vmem:[#allocation9_spill] sm:$0xff]  ;;  %v14066_v28 = vld [vmem:[#allocation10_spill] sm:$0xff]  ;;  %v2343_v62 = vmul.f32 %v5783_v36, %v5758_v54  ;;  %v2344_v58 = vmul.f32 %v5783_v36, %v5759_v13  ;;  %v2345_v9 = vmul.f32 %v5783_v36, %v5760_v59 }
 0x198   : > { %14061 = vst [vmem:[#allocation7_spill] sm:$0xff] %v9781_v14  ;;  %14063 = vst [vmem:[#allocation8_spill] sm:$0xff] %v9784_v19  ;;  %v9790_v42 = vadd.f32 %v2260_v18, %v14064_v8  ;;  %v9793_v7 = vadd.f32 %v2261_v39, %v14066_v28  ;;  %v14068_v3 = vld [vmem:[#allocation11_spill] sm:$0xff]  ;;  %v14070_v47 = vld [vmem:[#allocation12_spill] sm:$0xff]  ;;  %v2338_v39 = vmul.f32 %v5783_v36, %v5753_v20 }
 0x199   : > { %v9796_v53 = vadd.f32 %v2262_v21, %v14068_v3  ;;  %v9799_v55 = vadd.f32 %v2263_v40, %v14070_v47  ;;  %v5764_v34 = vld [vmem:[%s6757_s17 + $0xf0] sm:$0xff]  ;;  %v5765_v35 = vld [vmem:[%s6757_s17 + $0xf8] sm:$0xff]  ;;  %v5766_v57 = vld [vmem:[%s6757_s17 + $0x108] sm:$0xff]  ;;  %v2339_v8 = vmul.f32 %v5783_v36, %v5754_v1  ;;  %v2340_v28 = vmul.f32 %v5783_v36, %v5755_v56 }
 0x19a   : > { %14065 = vst [vmem:[#allocation9_spill] sm:$0xff] %v9790_v42  ;;  %14067 = vst [vmem:[#allocation10_spill] sm:$0xff] %v9793_v7  ;;  %v5767_v17 = vld [vmem:[%s6757_s17 + $0x110] sm:$0xff]  ;;  %v5768_v48 = vld [vmem:[%s6757_s17 + $0x120] sm:$0xff]  ;;  %v2341_v3 = vmul.f32 %v5783_v36, %v5756_v37  ;;  %v2342_v47 = vmul.f32 %v5783_v36, %v5757_v2  ;;  %v2346_v42 = vmul.f32 %v5783_v36, %v5761_v38 }
 0x19b   : > { %14069 = vst [vmem:[#allocation11_spill] sm:$0xff] %v9796_v53  ;;  %14071 = vst [vmem:[#allocation12_spill] sm:$0xff] %v9799_v55  ;;  %v5769_v18 = vld [vmem:[%s6757_s17 + $0x128] sm:$0xff]  ;;  %v5770_v21 = vld [vmem:[%s6757_s17 + $0x138] sm:$0xff]  ;;  %v2347_v29 = vmul.f32 %v5783_v36, %v5762_v11  ;;  %v2348_v32 = vmul.f32 %v5783_v36, %v5763_v60  ;;  %v2349_v22 = vmul.f32 %v5783_v36, %v5764_v34 }
 0x19c   : > { %v5771_v49 = vld [vmem:[%s6757_s17 + $0x140] sm:$0xff]  ;;  %v5772_v40 = vld [vmem:[%s6757_s17 + $0x150] sm:$0xff]  ;;  %v5773_v55 = vld [vmem:[%s6757_s17 + $0x158] sm:$0xff]  ;;  %v2350_v1 = vmul.f32 %v5783_v36, %v5765_v35  ;;  %v2351_v2 = vmul.f32 %v5783_v36, %v5766_v57  ;;  %v2352_v41 = vmul.f32 %v5783_v36, %v5767_v17  ;;  %v2353_v33 = vmul.f32 %v5783_v36, %v5768_v48 }
 0x19d   : > { %v5774_v53 = vld [vmem:[%s6757_s17 + $0x168] sm:$0xff]  ;;  %v5775_v7 = vld [vmem:[%s6757_s17 + $0x170] sm:$0xff]  ;;  %v5776_v20 = vld [vmem:[%s6757_s17 + $0x180] sm:$0xff]  ;;  %v2354_v45 = vmul.f32 %v5783_v36, %v5769_v18  ;;  %v2355_v12 = vmul.f32 %v5783_v36, %v5770_v21  ;;  %v2356_v46 = vmul.f32 %v5783_v36, %v5771_v49  ;;  %v2357_v54 = vmul.f32 %v5783_v36, %v5772_v40 }
 0x19e   : > { %v5777_v19 = vld [vmem:[%s6757_s17 + $0x188] sm:$0xff]  ;;  %v5778_v14 = vld [vmem:[%s6757_s17 + $0x198] sm:$0xff]  ;;  %v5779_v56 = vld [vmem:[%s6757_s17 + $0x1a0] sm:$0xff]  ;;  %v2358_v13 = vmul.f32 %v5783_v36, %v5773_v55  ;;  %v2359_v59 = vmul.f32 %v5783_v36, %v5774_v53  ;;  %v2360_v38 = vmul.f32 %v5783_v36, %v5775_v7  ;;  %v2361_v25 = vmul.f32 %v5783_v36, %v5776_v20 }
 0x19f   : > { %v5780_v37 = vld [vmem:[%s6757_s17 + $0x1b0] sm:$0xff]  ;;  %v5781_v16 = vld [vmem:[%s6757_s17 + $0x1b8] sm:$0xff]  ;;  %v2362_v27 = vmul.f32 %v5783_v36, %v5777_v19  ;;  %v2363_v50 = vmul.f32 %v5783_v36, %v5778_v14  ;;  %v2364_v11 = vmul.f32 %v5783_v36, %v5779_v56  ;;  %v9820_v35 = vadd.f32 %v2335_v6, %v9689_v10  ;;  %v5786_v55 = vld [vmem:[%s6757_s17 + $0x61] sm:$0xff] }
 0x1a0   : > { %v2365_v60 = vmul.f32 %v5783_v36, %v5780_v37  ;;  %v2366_v34 = vmul.f32 %v5783_v36, %v5781_v16  ;;  %v9823_v57 = vadd.f32 %v2336_v61, %v9692_v5  ;;  %v9826_v17 = vadd.f32 %v2337_v23, %v9695_v44  ;;  %v5784_v53 = vld [vmem:[%s6757_s17 + $0x49] sm:$0xff]  ;;  %v5788_v6 = vld [vmem:[%s6757_s17 + $0x79] sm:$0xff]  ;;  %v5789_v61 = vld [vmem:[%s6757_s17 + $0x81] sm:$0xff] }
 0x1a1   : > { %v9829_v7 = vadd.f32 %v2338_v39, %v9698_v26  ;;  %v9832_v14 = vadd.f32 %v2339_v8, %v9701_v63  ;;  %v9835_v16 = vadd.f32 %v2340_v28, %v9704_v52  ;;  %v9838_v10 = vadd.f32 %v2341_v3, %v9707_v31  ;;  %v5790_v23 = vld [vmem:[%s6757_s17 + $0x91] sm:$0xff]  ;;  %v5791_v39 = vld [vmem:[%s6757_s17 + $0x99] sm:$0xff]  ;;  %v14084_v21 = vld [vmem:[#allocation19_spill] sm:$0xff] }
 0x1a2   : > { %v9841_v5 = vadd.f32 %v2342_v47, %v9710_v43  ;;  %v9844_v44 = vadd.f32 %v2343_v62, %v9713_v30  ;;  %v9847_v26 = vadd.f32 %v2344_v58, %v9716_v4  ;;  %v9850_v63 = vadd.f32 %v2345_v9, %v9719_v15  ;;  %v14072_v30 = vld [vmem:[#allocation13_spill] sm:$0xff]  ;;  %v14074_v4 = vld [vmem:[#allocation14_spill] sm:$0xff]  ;;  %v14098_v37 = vld [vmem:[#allocation8_spill] sm:$0xff] }
 0x1a3   : > { %v9853_v52 = vadd.f32 %v2346_v42, %v9722_v51  ;;  %v9856_v31 = vadd.f32 %v2347_v29, %v9725_v24  ;;  %v9859_v43 = vadd.f32 %v2348_v32, %v9728_v0  ;;  %v9862_v36 = vadd.f32 %v2349_v22, %v14072_v30  ;;  %v5785_v15 = vld [vmem:[%s6757_s17 + $0x51] sm:$0xff]  ;;  %v5787_v51 = vld [vmem:[%s6757_s17 + $0x69] sm:$0xff]  ;;  %v14082_v22 = vld [vmem:[#allocation18_spill] sm:$0xff] }
 0x1a4   : > { %v9865_v19 = vadd.f32 %v2350_v1, %v14074_v4  ;;  %v14076_v42 = vld [vmem:[#allocation15_spill] sm:$0xff]  ;;  %v14078_v24 = vld [vmem:[#allocation16_spill] sm:$0xff]  ;;  %v14080_v0 = vld [vmem:[#allocation17_spill] sm:$0xff]  ;;  %v9881_v18 = vadd.f32 %v2354_v45, %v14082_v22  ;;  %v9888_v49 = vadd.f32 %v2355_v12, %v14084_v21 }
 0x1a5   : > { %14073 = vst [vmem:[#allocation13_spill] sm:$0xff] %v9862_v36  ;;  %v9872_v48 = vadd.f32 %v2351_v2, %v14076_v42  ;;  %v9875_v29 = vadd.f32 %v2352_v41, %v14078_v24  ;;  %v9878_v32 = vadd.f32 %v2353_v33, %v14080_v0  ;;  %v14086_v40 = vld [vmem:[#allocation2_spill] sm:$0xff]  ;;  %v14088_v41 = vld [vmem:[#allocation3_spill] sm:$0xff]  ;;  %v14090_v33 = vld [vmem:[#allocation4_spill] sm:$0xff]  ;;  %v9915_v2 = vadd.f32 %v2362_v27, %v14098_v37 }
 0x1a6   : > { %14075 = vst [vmem:[#allocation14_spill] sm:$0xff] %v9865_v19  ;;  %14083 = vst [vmem:[#allocation18_spill] sm:$0xff] %v9881_v18  ;;  %v9891_v8 = vadd.f32 %v2356_v46, %v14086_v40  ;;  %v9894_v28 = vadd.f32 %v2357_v54, %v14088_v41  ;;  %v9897_v3 = vadd.f32 %v2358_v13, %v14090_v33  ;;  %v5792_v45 = vld [vmem:[%s6757_s17 + $0xa9] sm:$0xff]  ;;  %v5793_v47 = vld [vmem:[%s6757_s17 + $0xb1] sm:$0xff] }
 0x1a7   : > { %14077 = vst [vmem:[#allocation15_spill] sm:$0xff] %v9872_v48  ;;  %14079 = vst [vmem:[#allocation16_spill] sm:$0xff] %v9875_v29  ;;  %v5794_v62 = vld [vmem:[%s6757_s17 + $0xc1] sm:$0xff]  ;;  %v5817_v12 = vld [vmem:[%s13465_s1 + $0x19] ss:$0 sm:$0xff] }
 0x1a8   : > { %14081 = vst [vmem:[#allocation17_spill] sm:$0xff] %v9878_v32  ;;  %14085 = vst [vmem:[#allocation19_spill] sm:$0xff] %v9888_v49  ;;  %v14092_v58 = vld [vmem:[#allocation5_spill] sm:$0xff]  ;;  %v14094_v9 = vld [vmem:[#allocation6_spill] sm:$0xff] }
 0x1a9   : > { %14087 = vst [vmem:[#allocation2_spill] sm:$0xff] %v9891_v8  ;;  %14089 = vst [vmem:[#allocation3_spill] sm:$0xff] %v9894_v28  ;;  %v9906_v46 = vadd.f32 %v2359_v59, %v14092_v58  ;;  %v9909_v20 = vadd.f32 %v2360_v38, %v14094_v9  ;;  %v14096_v1 = vld [vmem:[#allocation7_spill] sm:$0xff]  ;;  %v5796_v13 = vld [vmem:[%s6757_s17 + $0xd9] sm:$0xff]  ;;  %v2436_v58 = vmul.f32 %v5817_v12, %v5784_v53 }
 0x1aa   : > { %14091 = vst [vmem:[#allocation4_spill] sm:$0xff] %v9897_v3  ;;  %v9912_v56 = vadd.f32 %v2361_v25, %v14096_v1  ;;  %14099 = vst [vmem:[#allocation8_spill] sm:$0xff] %v9915_v2  ;;  %v5795_v54 = vld [vmem:[%s6757_s17 + $0xc9] sm:$0xff]  ;;  %v5797_v30 = vld [vmem:[%s6757_s17 + $0xe1] sm:$0xff]  ;;  %v2437_v9 = vmul.f32 %v5817_v12, %v5785_v15  ;;  %v2438_v1 = vmul.f32 %v5817_v12, %v5786_v55 }
 0x1ab   : > { %14093 = vst [vmem:[#allocation5_spill] sm:$0xff] %v9906_v46  ;;  %14095 = vst [vmem:[#allocation6_spill] sm:$0xff] %v9909_v20  ;;  %v14100_v4 = vld [vmem:[#allocation9_spill] sm:$0xff]  ;;  %v14102_v59 = vld [vmem:[#allocation10_spill] sm:$0xff]  ;;  %v2444_v53 = vmul.f32 %v5817_v12, %v5792_v45  ;;  %v2445_v15 = vmul.f32 %v5817_v12, %v5793_v47  ;;  %v2446_v55 = vmul.f32 %v5817_v12, %v5794_v62 }
 0x1ac   : > { %14097 = vst [vmem:[#allocation7_spill] sm:$0xff] %v9912_v56  ;;  %v9921_v42 = vadd.f32 %v2363_v50, %v14100_v4  ;;  %v9924_v24 = vadd.f32 %v2364_v11, %v14102_v59  ;;  %v14104_v38 = vld [vmem:[#allocation11_spill] sm:$0xff]  ;;  %v14106_v25 = vld [vmem:[#allocation12_spill] sm:$0xff]  ;;  %v5799_v21 = vld [vmem:[%s6757_s17 + $0xf9] sm:$0xff]  ;;  %v2439_v11 = vmul.f32 %v5817_v12, %v5787_v51  ;;  %v2440_v4 = vmul.f32 %v5817_v12, %v5788_v6 }
 0x1ad   : > { %v9927_v0 = vadd.f32 %v2365_v60, %v14104_v38  ;;  %v9930_v22 = vadd.f32 %v2366_v34, %v14106_v25  ;;  %v5798_v27 = vld [vmem:[%s6757_s17 + $0xf1] sm:$0xff]  ;;  %v5800_v40 = vld [vmem:[%s6757_s17 + $0x109] sm:$0xff]  ;;  %v5802_v33 = vld [vmem:[%s6757_s17 + $0x121] sm:$0xff]  ;;  %v2441_v59 = vmul.f32 %v5817_v12, %v5789_v61  ;;  %v2442_v38 = vmul.f32 %v5817_v12, %v5790_v23 }
 0x1ae   : > { %14101 = vst [vmem:[#allocation9_spill] sm:$0xff] %v9921_v42  ;;  %14103 = vst [vmem:[#allocation10_spill] sm:$0xff] %v9924_v24  ;;  %v5801_v41 = vld [vmem:[%s6757_s17 + $0x111] sm:$0xff]  ;;  %v5803_v50 = vld [vmem:[%s6757_s17 + $0x129] sm:$0xff]  ;;  %v2443_v25 = vmul.f32 %v5817_v12, %v5791_v39  ;;  %v2447_v42 = vmul.f32 %v5817_v12, %v5795_v54  ;;  %v2448_v20 = vmul.f32 %v5817_v12, %v5796_v13 }
 0x1af   : > { %14105 = vst [vmem:[#allocation11_spill] sm:$0xff] %v9927_v0  ;;  %14107 = vst [vmem:[#allocation12_spill] sm:$0xff] %v9930_v22  ;;  %v5804_v60 = vld [vmem:[%s6757_s17 + $0x139] sm:$0xff]  ;;  %v5805_v37 = vld [vmem:[%s6757_s17 + $0x141] sm:$0xff]  ;;  %v2449_v46 = vmul.f32 %v5817_v12, %v5797_v30  ;;  %v2450_v3 = vmul.f32 %v5817_v12, %v5798_v27  ;;  %v2451_v6 = vmul.f32 %v5817_v12, %v5799_v21 }
 0x1b0   : > { %v5806_v34 = vld [vmem:[%s6757_s17 + $0x151] sm:$0xff]  ;;  %v5807_v22 = vld [vmem:[%s6757_s17 + $0x159] sm:$0xff]  ;;  %v5808_v0 = vld [vmem:[%s6757_s17 + $0x169] sm:$0xff]  ;;  %v2452_v39 = vmul.f32 %v5817_v12, %v5800_v40  ;;  %v2453_v8 = vmul.f32 %v5817_v12, %v5801_v41  ;;  %v2454_v49 = vmul.f32 %v5817_v12, %v5802_v33  ;;  %v2455_v18 = vmul.f32 %v5817_v12, %v5803_v50 }
 0x1b1   : > { %v5809_v24 = vld [vmem:[%s6757_s17 + $0x171] sm:$0xff]  ;;  %v5810_v51 = vld [vmem:[%s6757_s17 + $0x181] sm:$0xff]  ;;  %v5811_v2 = vld [vmem:[%s6757_s17 + $0x189] sm:$0xff]  ;;  %v2456_v32 = vmul.f32 %v5817_v12, %v5804_v60  ;;  %v2457_v29 = vmul.f32 %v5817_v12, %v5805_v37  ;;  %v2458_v45 = vmul.f32 %v5817_v12, %v5806_v34  ;;  %v2459_v47 = vmul.f32 %v5817_v12, %v5807_v22 }
 0x1b2   : > { %v5812_v56 = vld [vmem:[%s6757_s17 + $0x199] sm:$0xff]  ;;  %v5813_v61 = vld [vmem:[%s6757_s17 + $0x1a1] sm:$0xff]  ;;  %v5814_v23 = vld [vmem:[%s6757_s17 + $0x1b1] sm:$0xff]  ;;  %v2460_v62 = vmul.f32 %v5817_v12, %v5808_v0  ;;  %v2461_v54 = vmul.f32 %v5817_v12, %v5809_v24  ;;  %v2462_v48 = vmul.f32 %v5817_v12, %v5810_v51  ;;  %v2463_v19 = vmul.f32 %v5817_v12, %v5811_v2 }
 0x1b3   : > { %v5815_v28 = vld [vmem:[%s6757_s17 + $0x1b9] sm:$0xff]  ;;  %v2464_v36 = vmul.f32 %v5817_v12, %v5812_v56  ;;  %v2465_v13 = vmul.f32 %v5817_v12, %v5813_v61  ;;  %v2466_v30 = vmul.f32 %v5817_v12, %v5814_v23  ;;  %v9951_v21 = vadd.f32 %v2436_v58, %v9820_v35  ;;  %v5818_v0 = vld [vmem:[%s6757_s17 + $0x4a] sm:$0xff]  ;;  %v5820_v22 = vld [vmem:[%s6757_s17 + $0x62] sm:$0xff] }
 0x1b4   : > { %v2467_v27 = vmul.f32 %v5817_v12, %v5815_v28  ;;  %v9954_v40 = vadd.f32 %v2437_v9, %v9823_v57  ;;  %v9957_v41 = vadd.f32 %v2438_v1, %v9826_v17  ;;  %v9960_v24 = vadd.f32 %v2439_v11, %v9829_v7  ;;  %v5822_v58 = vld [vmem:[%s6757_s17 + $0x7a] sm:$0xff]  ;;  %v5823_v9 = vld [vmem:[%s6757_s17 + $0x82] sm:$0xff]  ;;  %v5824_v1 = vld [vmem:[%s6757_s17 + $0x92] sm:$0xff] }
 0x1b5   : > { %v9963_v56 = vadd.f32 %v2440_v4, %v9832_v14  ;;  %v9966_v28 = vadd.f32 %v2441_v59, %v9835_v16  ;;  %v9969_v35 = vadd.f32 %v2442_v38, %v9838_v10  ;;  %v9972_v57 = vadd.f32 %v2443_v25, %v9841_v5  ;;  %v5825_v11 = vld [vmem:[%s6757_s17 + $0x9a] sm:$0xff]  ;;  %v14120_v60 = vld [vmem:[#allocation19_spill] sm:$0xff]  ;;  %v5827_v25 = vld [vmem:[%s6757_s17 + $0xb2] sm:$0xff] }
 0x1b6   : > { %v9975_v17 = vadd.f32 %v2444_v53, %v9844_v44  ;;  %v9978_v7 = vadd.f32 %v2445_v15, %v9847_v26  ;;  %v9981_v14 = vadd.f32 %v2446_v55, %v9850_v63  ;;  %v9984_v16 = vadd.f32 %v2447_v42, %v9853_v52  ;;  %v14108_v44 = vld [vmem:[#allocation13_spill] sm:$0xff]  ;;  %v14110_v26 = vld [vmem:[#allocation14_spill] sm:$0xff]  ;;  %v5821_v52 = vld [vmem:[%s6757_s17 + $0x6a] sm:$0xff] }
 0x1b7   : > { %v9987_v10 = vadd.f32 %v2448_v20, %v9856_v31  ;;  %v9990_v5 = vadd.f32 %v2449_v46, %v9859_v43  ;;  %v9993_v12 = vadd.f32 %v2450_v3, %v14108_v44  ;;  %v9996_v2 = vadd.f32 %v2451_v6, %v14110_v26  ;;  %v5819_v63 = vld [vmem:[%s6757_s17 + $0x52] sm:$0xff]  ;;  %v14112_v42 = vld [vmem:[#allocation15_spill] sm:$0xff]  ;;  %v14118_v3 = vld [vmem:[#allocation18_spill] sm:$0xff] }
 0x1b8   : > { %v10003_v33 = vadd.f32 %v2452_v39, %v14112_v42  ;;  %v14114_v31 = vld [vmem:[#allocation16_spill] sm:$0xff]  ;;  %v14116_v43 = vld [vmem:[#allocation17_spill] sm:$0xff]  ;;  %v10012_v50 = vadd.f32 %v2455_v18, %v14118_v3  ;;  %v10019_v37 = vadd.f32 %v2456_v32, %v14120_v60  ;;  %v14122_v34 = vld [vmem:[#allocation2_spill] sm:$0xff] }
 0x1b9   : > { %14109 = vst [vmem:[#allocation13_spill] sm:$0xff] %v9993_v12  ;;  %14111 = vst [vmem:[#allocation14_spill] sm:$0xff] %v9996_v2  ;;  %v10006_v20 = vadd.f32 %v2453_v8, %v14114_v31  ;;  %v10009_v46 = vadd.f32 %v2454_v49, %v14116_v43  ;;  %v10022_v4 = vadd.f32 %v2457_v29, %v14122_v34  ;;  %v14124_v8 = vld [vmem:[#allocation3_spill] sm:$0xff]  ;;  %v14126_v49 = vld [vmem:[#allocation4_spill] sm:$0xff] }
 0x1ba   : > { %14113 = vst [vmem:[#allocation15_spill] sm:$0xff] %v10003_v33  ;;  %14119 = vst [vmem:[#allocation18_spill] sm:$0xff] %v10012_v50  ;;  %v10025_v59 = vadd.f32 %v2458_v45, %v14124_v8  ;;  %v10028_v38 = vadd.f32 %v2459_v47, %v14126_v49  ;;  %v5826_v18 = vld [vmem:[%s6757_s17 + $0xaa] sm:$0xff]  ;;  %v5828_v53 = vld [vmem:[%s6757_s17 + $0xc2] sm:$0xff] }
 0x1bb   : > { %14115 = vst [vmem:[#allocation16_spill] sm:$0xff] %v10006_v20  ;;  %14117 = vst [vmem:[#allocation17_spill] sm:$0xff] %v10009_v46  ;;  %v5851_v32 = vld [vmem:[%s13465_s1 + $0x1a] ss:$0 sm:$0xff]  ;;  %v14130_v55 = vld [vmem:[#allocation6_spill] sm:$0xff] }
 0x1bc   : > { %14121 = vst [vmem:[#allocation19_spill] sm:$0xff] %v10019_v37  ;;  %14123 = vst [vmem:[#allocation2_spill] sm:$0xff] %v10022_v4  ;;  %v14128_v15 = vld [vmem:[#allocation5_spill] sm:$0xff]  ;;  %v10040_v51 = vadd.f32 %v2461_v54, %v14130_v55  ;;  %v14132_v6 = vld [vmem:[#allocation7_spill] sm:$0xff]  ;;  %v2538_v55 = vmul.f32 %v5851_v32, %v5819_v63  ;;  %v2546_v63 = vmul.f32 %v5851_v32, %v5827_v25 }
 0x1bd   : > { %14125 = vst [vmem:[#allocation3_spill] sm:$0xff] %v10025_v59  ;;  %14127 = vst [vmem:[#allocation4_spill] sm:$0xff] %v10028_v38  ;;  %v10037_v29 = vadd.f32 %v2460_v62, %v14128_v15  ;;  %v10043_v61 = vadd.f32 %v2462_v48, %v14132_v6  ;;  %v14134_v23 = vld [vmem:[#allocation8_spill] sm:$0xff]  ;;  %v5830_v47 = vld [vmem:[%s6757_s17 + $0xda] sm:$0xff]  ;;  %v2537_v15 = vmul.f32 %v5851_v32, %v5818_v0 }
 0x1be   : > { %14131 = vst [vmem:[#allocation6_spill] sm:$0xff] %v10040_v51  ;;  %v10046_v39 = vadd.f32 %v2463_v19, %v14134_v23  ;;  %v5829_v45 = vld [vmem:[%s6757_s17 + $0xca] sm:$0xff]  ;;  %v5831_v44 = vld [vmem:[%s6757_s17 + $0xe2] sm:$0xff]  ;;  %v14136_v26 = vld [vmem:[#allocation9_spill] sm:$0xff]  ;;  %v2539_v6 = vmul.f32 %v5851_v32, %v5820_v22  ;;  %v2545_v0 = vmul.f32 %v5851_v32, %v5826_v18  ;;  %v2547_v22 = vmul.f32 %v5851_v32, %v5828_v53 }
 0x1bf   : > { %14129 = vst [vmem:[#allocation5_spill] sm:$0xff] %v10037_v29  ;;  %14133 = vst [vmem:[#allocation7_spill] sm:$0xff] %v10043_v61  ;;  %v10052_v42 = vadd.f32 %v2464_v36, %v14136_v26  ;;  %v14138_v62 = vld [vmem:[#allocation10_spill] sm:$0xff]  ;;  %v14140_v54 = vld [vmem:[#allocation11_spill] sm:$0xff]  ;;  %v2541_v26 = vmul.f32 %v5851_v32, %v5822_v58  ;;  %v2549_v51 = vmul.f32 %v5851_v32, %v5830_v47 }
 0x1c0   : > { %14135 = vst [vmem:[#allocation8_spill] sm:$0xff] %v10046_v39  ;;  %v10055_v31 = vadd.f32 %v2465_v13, %v14138_v62  ;;  %v10058_v43 = vadd.f32 %v2466_v30, %v14140_v54  ;;  %v14142_v48 = vld [vmem:[#allocation12_spill] sm:$0xff]  ;;  %v5833_v60 = vld [vmem:[%s6757_s17 + $0xfa] sm:$0xff]  ;;  %v5836_v49 = vld [vmem:[%s6757_s17 + $0x122] sm:$0xff]  ;;  %v2540_v13 = vmul.f32 %v5851_v32, %v5821_v52  ;;  %v2542_v62 = vmul.f32 %v5851_v32, %v5823_v9 }
 0x1c1   : > { %14137 = vst [vmem:[#allocation9_spill] sm:$0xff] %v10052_v42  ;;  %v10061_v3 = vadd.f32 %v2467_v27, %v14142_v48  ;;  %v5832_v19 = vld [vmem:[%s6757_s17 + $0xf2] sm:$0xff]  ;;  %v5834_v34 = vld [vmem:[%s6757_s17 + $0x10a] sm:$0xff]  ;;  %v5838_v30 = vld [vmem:[%s6757_s17 + $0x13a] sm:$0xff]  ;;  %v2543_v54 = vmul.f32 %v5851_v32, %v5824_v1  ;;  %v2544_v48 = vmul.f32 %v5851_v32, %v5825_v11  ;;  %v2548_v42 = vmul.f32 %v5851_v32, %v5829_v45 }
 0x1c2   : > { %14139 = vst [vmem:[#allocation10_spill] sm:$0xff] %v10055_v31  ;;  %14141 = vst [vmem:[#allocation11_spill] sm:$0xff] %v10058_v43  ;;  %v5835_v8 = vld [vmem:[%s6757_s17 + $0x112] sm:$0xff]  ;;  %v5837_v36 = vld [vmem:[%s6757_s17 + $0x12a] sm:$0xff]  ;;  %v2550_v29 = vmul.f32 %v5851_v32, %v5831_v44  ;;  %v2551_v38 = vmul.f32 %v5851_v32, %v5832_v19  ;;  %v2552_v58 = vmul.f32 %v5851_v32, %v5833_v60 }
 0x1c3   : > { %14143 = vst [vmem:[#allocation12_spill] sm:$0xff] %v10061_v3  ;;  %v5839_v23 = vld [vmem:[%s6757_s17 + $0x142] sm:$0xff]  ;;  %v5840_v27 = vld [vmem:[%s6757_s17 + $0x152] sm:$0xff]  ;;  %v5841_v3 = vld [vmem:[%s6757_s17 + $0x15a] sm:$0xff]  ;;  %v2553_v11 = vmul.f32 %v5851_v32, %v5834_v34  ;;  %v2554_v4 = vmul.f32 %v5851_v32, %v5835_v8  ;;  %v2555_v37 = vmul.f32 %v5851_v32, %v5836_v49  ;;  %v2556_v50 = vmul.f32 %v5851_v32, %v5837_v36 }
 0x1c4   : > { %v5842_v43 = vld [vmem:[%s6757_s17 + $0x16a] sm:$0xff]  ;;  %v5843_v31 = vld [vmem:[%s6757_s17 + $0x172] sm:$0xff]  ;;  %v5844_v52 = vld [vmem:[%s6757_s17 + $0x182] sm:$0xff]  ;;  %v2557_v46 = vmul.f32 %v5851_v32, %v5838_v30  ;;  %v2558_v20 = vmul.f32 %v5851_v32, %v5839_v23  ;;  %v2559_v18 = vmul.f32 %v5851_v32, %v5840_v27  ;;  %v2560_v25 = vmul.f32 %v5851_v32, %v5841_v3 }
 0x1c5   : > { %v5845_v39 = vld [vmem:[%s6757_s17 + $0x18a] sm:$0xff]  ;;  %v5846_v61 = vld [vmem:[%s6757_s17 + $0x19a] sm:$0xff]  ;;  %v5847_v9 = vld [vmem:[%s6757_s17 + $0x1a2] sm:$0xff]  ;;  %v2561_v53 = vmul.f32 %v5851_v32, %v5842_v43  ;;  %v2562_v45 = vmul.f32 %v5851_v32, %v5843_v31  ;;  %v2563_v33 = vmul.f32 %v5851_v32, %v5844_v52  ;;  %v10082_v60 = vadd.f32 %v2537_v15, %v9951_v21 }
 0x1c6   : > { %v5848_v1 = vld [vmem:[%s6757_s17 + $0x1b2] sm:$0xff]  ;;  %v5849_v59 = vld [vmem:[%s6757_s17 + $0x1ba] sm:$0xff]  ;;  %v2564_v2 = vmul.f32 %v5851_v32, %v5845_v39  ;;  %v2565_v12 = vmul.f32 %v5851_v32, %v5846_v61  ;;  %v2566_v47 = vmul.f32 %v5851_v32, %v5847_v9  ;;  %v10085_v34 = vadd.f32 %v2538_v55, %v9954_v40  ;;  %v5854_v3 = vld [vmem:[%s6757_s17 + $0x63] sm:$0xff] }
 0x1c7   : > { %v2567_v44 = vmul.f32 %v5851_v32, %v5848_v1  ;;  %v2568_v19 = vmul.f32 %v5851_v32, %v5849_v59  ;;  %v10088_v8 = vadd.f32 %v2539_v6, %v9957_v41  ;;  %v10091_v31 = vadd.f32 %v2540_v13, %v9960_v24  ;;  %v5852_v43 = vld [vmem:[%s6757_s17 + $0x4b] sm:$0xff]  ;;  %v5856_v15 = vld [vmem:[%s6757_s17 + $0x7b] sm:$0xff]  ;;  %v5857_v55 = vld [vmem:[%s6757_s17 + $0x83] sm:$0xff] }
 0x1c8   : > { %v10094_v61 = vadd.f32 %v2541_v26, %v9963_v56  ;;  %v10097_v59 = vadd.f32 %v2542_v62, %v9966_v28  ;;  %v10100_v21 = vadd.f32 %v2543_v54, %v9969_v35  ;;  %v10103_v40 = vadd.f32 %v2544_v48, %v9972_v57  ;;  %v5858_v6 = vld [vmem:[%s6757_s17 + $0x93] sm:$0xff]  ;;  %v5859_v13 = vld [vmem:[%s6757_s17 + $0x9b] sm:$0xff]  ;;  %v14156_v30 = vld [vmem:[#allocation19_spill] sm:$0xff] }
 0x1c9   : > { %v10106_v41 = vadd.f32 %v2545_v0, %v9975_v17  ;;  %v10109_v24 = vadd.f32 %v2546_v63, %v9978_v7  ;;  %v10112_v56 = vadd.f32 %v2547_v22, %v9981_v14  ;;  %v10115_v28 = vadd.f32 %v2548_v42, %v9984_v16  ;;  %v14144_v17 = vld [vmem:[#allocation13_spill] sm:$0xff]  ;;  %v14146_v7 = vld [vmem:[#allocation14_spill] sm:$0xff]  ;;  %v5855_v16 = vld [vmem:[%s6757_s17 + $0x6b] sm:$0xff] }
 0x1ca   : > { %v10118_v35 = vadd.f32 %v2549_v51, %v9987_v10  ;;  %v10121_v57 = vadd.f32 %v2550_v29, %v9990_v5  ;;  %v10124_v32 = vadd.f32 %v2551_v38, %v14144_v17  ;;  %v10127_v39 = vadd.f32 %v2552_v58, %v14146_v7  ;;  %v5853_v14 = vld [vmem:[%s6757_s17 + $0x53] sm:$0xff]  ;;  %v14148_v42 = vld [vmem:[#allocation15_spill] sm:$0xff]  ;;  %v14154_v38 = vld [vmem:[#allocation18_spill] sm:$0xff] }
 0x1cb   : > { %v10134_v49 = vadd.f32 %v2553_v11, %v14148_v42  ;;  %v14150_v10 = vld [vmem:[#allocation16_spill] sm:$0xff]  ;;  %v14152_v5 = vld [vmem:[#allocation17_spill] sm:$0xff]  ;;  %v10143_v36 = vadd.f32 %v2556_v50, %v14154_v38  ;;  %v10150_v23 = vadd.f32 %v2557_v46, %v14156_v30  ;;  %v14158_v27 = vld [vmem:[#allocation2_spill] sm:$0xff] }
 0x1cc   : > { %14145 = vst [vmem:[#allocation13_spill] sm:$0xff] %v10124_v32  ;;  %14147 = vst [vmem:[#allocation14_spill] sm:$0xff] %v10127_v39  ;;  %v10137_v51 = vadd.f32 %v2554_v4, %v14150_v10  ;;  %v10140_v29 = vadd.f32 %v2555_v37, %v14152_v5  ;;  %v10153_v26 = vadd.f32 %v2558_v20, %v14158_v27  ;;  %v14160_v4 = vld [vmem:[#allocation3_spill] sm:$0xff]  ;;  %v14162_v37 = vld [vmem:[#allocation4_spill] sm:$0xff] }
 0x1cd   : > { %14149 = vst [vmem:[#allocation15_spill] sm:$0xff] %v10134_v49  ;;  %14155 = vst [vmem:[#allocation18_spill] sm:$0xff] %v10143_v36  ;;  %v10156_v62 = vadd.f32 %v2559_v18, %v14160_v4  ;;  %v10159_v54 = vadd.f32 %v2560_v25, %v14162_v37  ;;  %v5860_v50 = vld [vmem:[%s6757_s17 + $0xab] sm:$0xff]  ;;  %v5861_v48 = vld [vmem:[%s6757_s17 + $0xb3] sm:$0xff] }
 0x1ce   : > { %14151 = vst [vmem:[#allocation16_spill] sm:$0xff] %v10137_v51  ;;  %14153 = vst [vmem:[#allocation17_spill] sm:$0xff] %v10140_v29  ;;  %v5862_v0 = vld [vmem:[%s6757_s17 + $0xc3] sm:$0xff]  ;;  %v5885_v46 = vld [vmem:[%s13465_s1 + $0x1b] ss:$0 sm:$0xff] }
 0x1cf   : > { %14157 = vst [vmem:[#allocation19_spill] sm:$0xff] %v10150_v23  ;;  %14159 = vst [vmem:[#allocation2_spill] sm:$0xff] %v10153_v26  ;;  %v14164_v63 = vld [vmem:[#allocation5_spill] sm:$0xff]  ;;  %v14166_v22 = vld [vmem:[#allocation6_spill] sm:$0xff] }
 0x1d0   : > { %14161 = vst [vmem:[#allocation3_spill] sm:$0xff] %v10156_v62  ;;  %14163 = vst [vmem:[#allocation4_spill] sm:$0xff] %v10159_v54  ;;  %v10168_v20 = vadd.f32 %v2561_v53, %v14164_v63  ;;  %v10171_v52 = vadd.f32 %v2562_v45, %v14166_v22  ;;  %v14168_v58 = vld [vmem:[#allocation7_spill] sm:$0xff]  ;;  %v14170_v1 = vld [vmem:[#allocation8_spill] sm:$0xff]  ;;  %v2638_v63 = vmul.f32 %v5885_v46, %v5852_v43 }
 0x1d1   : > { %v10174_v9 = vadd.f32 %v2563_v33, %v14168_v58  ;;  %v10177_v11 = vadd.f32 %v2564_v2, %v14170_v1  ;;  %v5863_v18 = vld [vmem:[%s6757_s17 + $0xcb] sm:$0xff]  ;;  %v5864_v25 = vld [vmem:[%s6757_s17 + $0xdb] sm:$0xff]  ;;  %v5865_v17 = vld [vmem:[%s6757_s17 + $0xe3] sm:$0xff]  ;;  %v2639_v22 = vmul.f32 %v5885_v46, %v5853_v14  ;;  %v2640_v58 = vmul.f32 %v5885_v46, %v5854_v3 }
 0x1d2   : > { %14165 = vst [vmem:[#allocation5_spill] sm:$0xff] %v10168_v20  ;;  %14167 = vst [vmem:[#allocation6_spill] sm:$0xff] %v10171_v52  ;;  %v14172_v7 = vld [vmem:[#allocation9_spill] sm:$0xff]  ;;  %v14174_v53 = vld [vmem:[#allocation10_spill] sm:$0xff]  ;;  %v2646_v43 = vmul.f32 %v5885_v46, %v5860_v50  ;;  %v2647_v14 = vmul.f32 %v5885_v46, %v5861_v48  ;;  %v2648_v3 = vmul.f32 %v5885_v46, %v5862_v0 }
 0x1d3   : > { %14169 = vst [vmem:[#allocation7_spill] sm:$0xff] %v10174_v9  ;;  %14171 = vst [vmem:[#allocation8_spill] sm:$0xff] %v10177_v11  ;;  %v10183_v42 = vadd.f32 %v2565_v12, %v14172_v7  ;;  %v10186_v10 = vadd.f32 %v2566_v47, %v14174_v53  ;;  %v14176_v45 = vld [vmem:[#allocation11_spill] sm:$0xff]  ;;  %v14178_v33 = vld [vmem:[#allocation12_spill] sm:$0xff]  ;;  %v2641_v47 = vmul.f32 %v5885_v46, %v5855_v16 }
 0x1d4   : > { %v10189_v5 = vadd.f32 %v2567_v44, %v14176_v45  ;;  %v10192_v38 = vadd.f32 %v2568_v19, %v14178_v33  ;;  %v5866_v2 = vld [vmem:[%s6757_s17 + $0xf3] sm:$0xff]  ;;  %v5867_v30 = vld [vmem:[%s6757_s17 + $0xfb] sm:$0xff]  ;;  %v5868_v27 = vld [vmem:[%s6757_s17 + $0x10b] sm:$0xff]  ;;  %v2642_v7 = vmul.f32 %v5885_v46, %v5856_v15  ;;  %v2643_v53 = vmul.f32 %v5885_v46, %v5857_v55 }
 0x1d5   : > { %14173 = vst [vmem:[#allocation9_spill] sm:$0xff] %v10183_v42  ;;  %14175 = vst [vmem:[#allocation10_spill] sm:$0xff] %v10186_v10  ;;  %v5869_v4 = vld [vmem:[%s6757_s17 + $0x113] sm:$0xff]  ;;  %v5870_v37 = vld [vmem:[%s6757_s17 + $0x123] sm:$0xff]  ;;  %v2644_v45 = vmul.f32 %v5885_v46, %v5858_v6  ;;  %v2645_v33 = vmul.f32 %v5885_v46, %v5859_v13  ;;  %v2649_v42 = vmul.f32 %v5885_v46, %v5863_v18 }
 0x1d6   : > { %14177 = vst [vmem:[#allocation11_spill] sm:$0xff] %v10189_v5  ;;  %14179 = vst [vmem:[#allocation12_spill] sm:$0xff] %v10192_v38  ;;  %v5871_v12 = vld [vmem:[%s6757_s17 + $0x12b] sm:$0xff]  ;;  %v5872_v44 = vld [vmem:[%s6757_s17 + $0x13b] sm:$0xff]  ;;  %v2650_v52 = vmul.f32 %v5885_v46, %v5864_v25  ;;  %v2651_v20 = vmul.f32 %v5885_v46, %v5865_v17  ;;  %v2652_v54 = vmul.f32 %v5885_v46, %v5866_v2 }
 0x1d7   : > { %v5873_v1 = vld [vmem:[%s6757_s17 + $0x143] sm:$0xff]  ;;  %v5874_v19 = vld [vmem:[%s6757_s17 + $0x153] sm:$0xff]  ;;  %v5875_v38 = vld [vmem:[%s6757_s17 + $0x15b] sm:$0xff]  ;;  %v2653_v15 = vmul.f32 %v5885_v46, %v5867_v30  ;;  %v2654_v13 = vmul.f32 %v5885_v46, %v5868_v27  ;;  %v2655_v26 = vmul.f32 %v5885_v46, %v5869_v4  ;;  %v2656_v23 = vmul.f32 %v5885_v46, %v5870_v37 }
 0x1d8   : > { %v5876_v5 = vld [vmem:[%s6757_s17 + $0x16b] sm:$0xff]  ;;  %v5877_v10 = vld [vmem:[%s6757_s17 + $0x173] sm:$0xff]  ;;  %v5878_v16 = vld [vmem:[%s6757_s17 + $0x183] sm:$0xff]  ;;  %v2657_v36 = vmul.f32 %v5885_v46, %v5871_v12  ;;  %v2658_v29 = vmul.f32 %v5885_v46, %v5872_v44  ;;  %v2659_v51 = vmul.f32 %v5885_v46, %v5873_v1  ;;  %v2660_v50 = vmul.f32 %v5885_v46, %v5874_v19 }
 0x1d9   : > { %v5879_v11 = vld [vmem:[%s6757_s17 + $0x18b] sm:$0xff]  ;;  %v5880_v9 = vld [vmem:[%s6757_s17 + $0x19b] sm:$0xff]  ;;  %v5881_v55 = vld [vmem:[%s6757_s17 + $0x1a3] sm:$0xff]  ;;  %v2661_v48 = vmul.f32 %v5885_v46, %v5875_v38  ;;  %v2662_v0 = vmul.f32 %v5885_v46, %v5876_v5  ;;  %v2663_v18 = vmul.f32 %v5885_v46, %v5877_v10  ;;  %v2664_v49 = vmul.f32 %v5885_v46, %v5878_v16 }
 0x1da   : > { %v5882_v6 = vld [vmem:[%s6757_s17 + $0x1b3] sm:$0xff]  ;;  %v5883_v62 = vld [vmem:[%s6757_s17 + $0x1bb] sm:$0xff]  ;;  %v2665_v39 = vmul.f32 %v5885_v46, %v5879_v11  ;;  %v2666_v32 = vmul.f32 %v5885_v46, %v5880_v9  ;;  %v2667_v25 = vmul.f32 %v5885_v46, %v5881_v55  ;;  %v10213_v30 = vadd.f32 %v2638_v63, %v10082_v60  ;;  %v5888_v38 = vld [vmem:[%s6757_s17 + $0x64] sm:$0xff] }
 0x1db   : > { %v2668_v17 = vmul.f32 %v5885_v46, %v5882_v6  ;;  %v2669_v2 = vmul.f32 %v5885_v46, %v5883_v62  ;;  %v10216_v27 = vadd.f32 %v2639_v22, %v10085_v34  ;;  %v10219_v4 = vadd.f32 %v2640_v58, %v10088_v8  ;;  %v5886_v5 = vld [vmem:[%s6757_s17 + $0x4c] sm:$0xff]  ;;  %v5890_v63 = vld [vmem:[%s6757_s17 + $0x7c] sm:$0xff]  ;;  %v5891_v22 = vld [vmem:[%s6757_s17 + $0x84] sm:$0xff] }
 0x1dc   : > { %v10222_v10 = vadd.f32 %v2641_v47, %v10091_v31  ;;  %v10225_v9 = vadd.f32 %v2642_v7, %v10094_v61  ;;  %v10228_v62 = vadd.f32 %v2643_v53, %v10097_v59  ;;  %v10231_v60 = vadd.f32 %v2644_v45, %v10100_v21  ;;  %v5892_v58 = vld [vmem:[%s6757_s17 + $0x94] sm:$0xff]  ;;  %v5893_v47 = vld [vmem:[%s6757_s17 + $0x9c] sm:$0xff]  ;;  %v14192_v44 = vld [vmem:[#allocation19_spill] sm:$0xff] }
 0x1dd   : > { %v10234_v34 = vadd.f32 %v2645_v33, %v10103_v40  ;;  %v10237_v8 = vadd.f32 %v2646_v43, %v10106_v41  ;;  %v10240_v31 = vadd.f32 %v2647_v14, %v10109_v24  ;;  %v10243_v61 = vadd.f32 %v2648_v3, %v10112_v56  ;;  %v14180_v41 = vld [vmem:[#allocation13_spill] sm:$0xff]  ;;  %v14182_v24 = vld [vmem:[#allocation14_spill] sm:$0xff]  ;;  %v14206_v6 = vld [vmem:[#allocation8_spill] sm:$0xff] }
 0x1de   : > { %v10246_v59 = vadd.f32 %v2649_v42, %v10115_v28  ;;  %v10249_v21 = vadd.f32 %v2650_v52, %v10118_v35  ;;  %v10252_v40 = vadd.f32 %v2651_v20, %v10121_v57  ;;  %v10255_v46 = vadd.f32 %v2652_v54, %v14180_v41  ;;  %v5887_v56 = vld [vmem:[%s6757_s17 + $0x54] sm:$0xff]  ;;  %v5889_v28 = vld [vmem:[%s6757_s17 + $0x6c] sm:$0xff]  ;;  %v14190_v54 = vld [vmem:[#allocation18_spill] sm:$0xff] }
 0x1df   : > { %v10258_v11 = vadd.f32 %v2653_v15, %v14182_v24  ;;  %v14184_v42 = vld [vmem:[#allocation15_spill] sm:$0xff]  ;;  %v14186_v35 = vld [vmem:[#allocation16_spill] sm:$0xff]  ;;  %v14188_v57 = vld [vmem:[#allocation17_spill] sm:$0xff]  ;;  %v10274_v12 = vadd.f32 %v2657_v36, %v14190_v54  ;;  %v10281_v1 = vadd.f32 %v2658_v29, %v14192_v44 }
 0x1e0   : > { %14181 = vst [vmem:[#allocation13_spill] sm:$0xff] %v10255_v46  ;;  %v10265_v37 = vadd.f32 %v2654_v13, %v14184_v42  ;;  %v10268_v52 = vadd.f32 %v2655_v26, %v14186_v35  ;;  %v10271_v20 = vadd.f32 %v2656_v23, %v14188_v57  ;;  %v14194_v19 = vld [vmem:[#allocation2_spill] sm:$0xff]  ;;  %v14196_v26 = vld [vmem:[#allocation3_spill] sm:$0xff]  ;;  %v14198_v23 = vld [vmem:[#allocation4_spill] sm:$0xff]  ;;  %v10308_v13 = vadd.f32 %v2665_v39, %v14206_v6 }
 0x1e1   : > { %14183 = vst [vmem:[#allocation14_spill] sm:$0xff] %v10258_v11  ;;  %14191 = vst [vmem:[#allocation18_spill] sm:$0xff] %v10274_v12  ;;  %v10284_v7 = vadd.f32 %v2659_v51, %v14194_v19  ;;  %v10287_v53 = vadd.f32 %v2660_v50, %v14196_v26  ;;  %v10290_v45 = vadd.f32 %v2661_v48, %v14198_v23  ;;  %v5894_v36 = vld [vmem:[%s6757_s17 + $0xac] sm:$0xff]  ;;  %v5895_v33 = vld [vmem:[%s6757_s17 + $0xb4] sm:$0xff] }
 0x1e2   : > { %14185 = vst [vmem:[#allocation15_spill] sm:$0xff] %v10265_v37  ;;  %14187 = vst [vmem:[#allocation16_spill] sm:$0xff] %v10268_v52  ;;  %v5896_v43 = vld [vmem:[%s6757_s17 + $0xc4] sm:$0xff]  ;;  %v5919_v29 = vld [vmem:[%s13465_s1 + $0x1c] ss:$0 sm:$0xff] }
 0x1e3   : > { %14189 = vst [vmem:[#allocation17_spill] sm:$0xff] %v10271_v20  ;;  %14193 = vst [vmem:[#allocation19_spill] sm:$0xff] %v10281_v1  ;;  %v14200_v14 = vld [vmem:[#allocation5_spill] sm:$0xff]  ;;  %v14202_v3 = vld [vmem:[#allocation6_spill] sm:$0xff] }
 0x1e4   : > { %14195 = vst [vmem:[#allocation2_spill] sm:$0xff] %v10284_v7  ;;  %14197 = vst [vmem:[#allocation3_spill] sm:$0xff] %v10287_v53  ;;  %v10299_v51 = vadd.f32 %v2662_v0, %v14200_v14  ;;  %v10302_v16 = vadd.f32 %v2663_v18, %v14202_v3  ;;  %v14204_v15 = vld [vmem:[#allocation7_spill] sm:$0xff]  ;;  %v5898_v48 = vld [vmem:[%s6757_s17 + $0xdc] sm:$0xff]  ;;  %v2739_v14 = vmul.f32 %v5919_v29, %v5886_v5 }
 0x1e5   : > { %14199 = vst [vmem:[#allocation4_spill] sm:$0xff] %v10290_v45  ;;  %v10305_v55 = vadd.f32 %v2664_v49, %v14204_v15  ;;  %14207 = vst [vmem:[#allocation8_spill] sm:$0xff] %v10308_v13  ;;  %v5897_v50 = vld [vmem:[%s6757_s17 + $0xcc] sm:$0xff]  ;;  %v5899_v41 = vld [vmem:[%s6757_s17 + $0xe4] sm:$0xff]  ;;  %v2740_v3 = vmul.f32 %v5919_v29, %v5887_v56  ;;  %v2741_v15 = vmul.f32 %v5919_v29, %v5888_v38 }
 0x1e6   : > { %14201 = vst [vmem:[#allocation5_spill] sm:$0xff] %v10299_v51  ;;  %14203 = vst [vmem:[#allocation6_spill] sm:$0xff] %v10302_v16  ;;  %v14208_v24 = vld [vmem:[#allocation9_spill] sm:$0xff]  ;;  %v14210_v0 = vld [vmem:[#allocation10_spill] sm:$0xff]  ;;  %v2747_v5 = vmul.f32 %v5919_v29, %v5894_v36  ;;  %v2748_v56 = vmul.f32 %v5919_v29, %v5895_v33  ;;  %v2749_v38 = vmul.f32 %v5919_v29, %v5896_v43 }
 0x1e7   : > { %14205 = vst [vmem:[#allocation7_spill] sm:$0xff] %v10305_v55  ;;  %v10314_v42 = vadd.f32 %v2666_v32, %v14208_v24  ;;  %v10317_v35 = vadd.f32 %v2667_v25, %v14210_v0  ;;  %v14212_v18 = vld [vmem:[#allocation11_spill] sm:$0xff]  ;;  %v14214_v49 = vld [vmem:[#allocation12_spill] sm:$0xff]  ;;  %v5901_v44 = vld [vmem:[%s6757_s17 + $0xfc] sm:$0xff]  ;;  %v2742_v25 = vmul.f32 %v5919_v29, %v5889_v28  ;;  %v2743_v24 = vmul.f32 %v5919_v29, %v5890_v63 }
 0x1e8   : > { %v10320_v57 = vadd.f32 %v2668_v17, %v14212_v18  ;;  %v10323_v54 = vadd.f32 %v2669_v2, %v14214_v49  ;;  %v5900_v39 = vld [vmem:[%s6757_s17 + $0xf4] sm:$0xff]  ;;  %v5902_v19 = vld [vmem:[%s6757_s17 + $0x10c] sm:$0xff]  ;;  %v5904_v23 = vld [vmem:[%s6757_s17 + $0x124] sm:$0xff]  ;;  %v2744_v0 = vmul.f32 %v5919_v29, %v5891_v22  ;;  %v2745_v18 = vmul.f32 %v5919_v29, %v5892_v58 }
 0x1e9   : > { %14209 = vst [vmem:[#allocation9_spill] sm:$0xff] %v10314_v42  ;;  %14211 = vst [vmem:[#allocation10_spill] sm:$0xff] %v10317_v35  ;;  %v5903_v26 = vld [vmem:[%s6757_s17 + $0x114] sm:$0xff]  ;;  %v5905_v32 = vld [vmem:[%s6757_s17 + $0x12c] sm:$0xff]  ;;  %v2746_v49 = vmul.f32 %v5919_v29, %v5893_v47  ;;  %v2750_v42 = vmul.f32 %v5919_v29, %v5897_v50  ;;  %v2751_v16 = vmul.f32 %v5919_v29, %v5898_v48 }
 0x1ea   : > { %14213 = vst [vmem:[#allocation11_spill] sm:$0xff] %v10320_v57  ;;  %14215 = vst [vmem:[#allocation12_spill] sm:$0xff] %v10323_v54  ;;  %v5906_v17 = vld [vmem:[%s6757_s17 + $0x13c] sm:$0xff]  ;;  %v5907_v6 = vld [vmem:[%s6757_s17 + $0x144] sm:$0xff]  ;;  %v2752_v51 = vmul.f32 %v5919_v29, %v5899_v41  ;;  %v2753_v45 = vmul.f32 %v5919_v29, %v5900_v39  ;;  %v2754_v63 = vmul.f32 %v5919_v29, %v5901_v44 }
 0x1eb   : > { %v5908_v2 = vld [vmem:[%s6757_s17 + $0x154] sm:$0xff]  ;;  %v5909_v54 = vld [vmem:[%s6757_s17 + $0x15c] sm:$0xff]  ;;  %v5910_v57 = vld [vmem:[%s6757_s17 + $0x16c] sm:$0xff]  ;;  %v2755_v47 = vmul.f32 %v5919_v29, %v5902_v19  ;;  %v2756_v7 = vmul.f32 %v5919_v29, %v5903_v26  ;;  %v2757_v1 = vmul.f32 %v5919_v29, %v5904_v23  ;;  %v2758_v12 = vmul.f32 %v5919_v29, %v5905_v32 }
 0x1ec   : > { %v5911_v35 = vld [vmem:[%s6757_s17 + $0x174] sm:$0xff]  ;;  %v5912_v28 = vld [vmem:[%s6757_s17 + $0x184] sm:$0xff]  ;;  %v5913_v13 = vld [vmem:[%s6757_s17 + $0x18c] sm:$0xff]  ;;  %v2759_v20 = vmul.f32 %v5919_v29, %v5906_v17  ;;  %v2760_v52 = vmul.f32 %v5919_v29, %v5907_v6  ;;  %v2761_v36 = vmul.f32 %v5919_v29, %v5908_v2  ;;  %v2762_v33 = vmul.f32 %v5919_v29, %v5909_v54 }
 0x1ed   : > { %v5914_v55 = vld [vmem:[%s6757_s17 + $0x19c] sm:$0xff]  ;;  %v5915_v22 = vld [vmem:[%s6757_s17 + $0x1a4] sm:$0xff]  ;;  %v5916_v58 = vld [vmem:[%s6757_s17 + $0x1b4] sm:$0xff]  ;;  %v2763_v43 = vmul.f32 %v5919_v29, %v5910_v57  ;;  %v2764_v50 = vmul.f32 %v5919_v29, %v5911_v35  ;;  %v2765_v37 = vmul.f32 %v5919_v29, %v5912_v28  ;;  %v2766_v11 = vmul.f32 %v5919_v29, %v5913_v13 }
 0x1ee   : > { %v5917_v53 = vld [vmem:[%s6757_s17 + $0x1bc] sm:$0xff]  ;;  %v2767_v46 = vmul.f32 %v5919_v29, %v5914_v55  ;;  %v2768_v48 = vmul.f32 %v5919_v29, %v5915_v22  ;;  %v2769_v41 = vmul.f32 %v5919_v29, %v5916_v58  ;;  %v10344_v44 = vadd.f32 %v2739_v14, %v10213_v30  ;;  %v5920_v57 = vld [vmem:[%s6757_s17 + $0x4d] sm:$0xff]  ;;  %v5922_v54 = vld [vmem:[%s6757_s17 + $0x65] sm:$0xff] }
 0x1ef   : > { %v2770_v39 = vmul.f32 %v5919_v29, %v5917_v53  ;;  %v10347_v19 = vadd.f32 %v2740_v3, %v10216_v27  ;;  %v10350_v26 = vadd.f32 %v2741_v15, %v10219_v4  ;;  %v10353_v35 = vadd.f32 %v2742_v25, %v10222_v10  ;;  %v5924_v14 = vld [vmem:[%s6757_s17 + $0x7d] sm:$0xff]  ;;  %v5925_v3 = vld [vmem:[%s6757_s17 + $0x85] sm:$0xff]  ;;  %v5926_v15 = vld [vmem:[%s6757_s17 + $0x95] sm:$0xff] }
 0x1f0   : > { %v10356_v55 = vadd.f32 %v2743_v24, %v10225_v9  ;;  %v10359_v53 = vadd.f32 %v2744_v0, %v10228_v62  ;;  %v10362_v30 = vadd.f32 %v2745_v18, %v10231_v60  ;;  %v10365_v27 = vadd.f32 %v2746_v49, %v10234_v34  ;;  %v5927_v25 = vld [vmem:[%s6757_s17 + $0x9d] sm:$0xff]  ;;  %v14228_v17 = vld [vmem:[#allocation19_spill] sm:$0xff]  ;;  %v5929_v49 = vld [vmem:[%s6757_s17 + $0xb5] sm:$0xff] }
 0x1f1   : > { %v10368_v4 = vadd.f32 %v2747_v5, %v10237_v8  ;;  %v10371_v10 = vadd.f32 %v2748_v56, %v10240_v31  ;;  %v10374_v9 = vadd.f32 %v2749_v38, %v10243_v61  ;;  %v10377_v62 = vadd.f32 %v2750_v42, %v10246_v59  ;;  %v14216_v8 = vld [vmem:[#allocation13_spill] sm:$0xff]  ;;  %v14218_v31 = vld [vmem:[#allocation14_spill] sm:$0xff]  ;;  %v5923_v59 = vld [vmem:[%s6757_s17 + $0x6d] sm:$0xff] }
 0x1f2   : > { %v10380_v60 = vadd.f32 %v2751_v16, %v10249_v21  ;;  %v10383_v34 = vadd.f32 %v2752_v51, %v10252_v40  ;;  %v10386_v29 = vadd.f32 %v2753_v45, %v14216_v8  ;;  %v10389_v13 = vadd.f32 %v2754_v63, %v14218_v31  ;;  %v5921_v61 = vld [vmem:[%s6757_s17 + $0x55] sm:$0xff]  ;;  %v14220_v42 = vld [vmem:[#allocation15_spill] sm:$0xff]  ;;  %v14226_v45 = vld [vmem:[#allocation18_spill] sm:$0xff] }
 0x1f3   : > { %v10396_v23 = vadd.f32 %v2755_v47, %v14220_v42  ;;  %v14222_v21 = vld [vmem:[#allocation16_spill] sm:$0xff]  ;;  %v14224_v40 = vld [vmem:[#allocation17_spill] sm:$0xff]  ;;  %v10405_v32 = vadd.f32 %v2758_v12, %v14226_v45  ;;  %v10412_v6 = vadd.f32 %v2759_v20, %v14228_v17  ;;  %v14230_v2 = vld [vmem:[#allocation2_spill] sm:$0xff] }
 0x1f4   : > { %14217 = vst [vmem:[#allocation13_spill] sm:$0xff] %v10386_v29  ;;  %14219 = vst [vmem:[#allocation14_spill] sm:$0xff] %v10389_v13  ;;  %v10399_v16 = vadd.f32 %v2756_v7, %v14222_v21  ;;  %v10402_v51 = vadd.f32 %v2757_v1, %v14224_v40  ;;  %v10415_v24 = vadd.f32 %v2760_v52, %v14230_v2  ;;  %v14232_v7 = vld [vmem:[#allocation3_spill] sm:$0xff]  ;;  %v14234_v1 = vld [vmem:[#allocation4_spill] sm:$0xff] }
 0x1f5   : > { %14221 = vst [vmem:[#allocation15_spill] sm:$0xff] %v10396_v23  ;;  %14227 = vst [vmem:[#allocation18_spill] sm:$0xff] %v10405_v32  ;;  %v10418_v0 = vadd.f32 %v2761_v36, %v14232_v7  ;;  %v10421_v18 = vadd.f32 %v2762_v33, %v14234_v1  ;;  %v5928_v12 = vld [vmem:[%s6757_s17 + $0xad] sm:$0xff]  ;;  %v5930_v5 = vld [vmem:[%s6757_s17 + $0xc5] sm:$0xff] }
 0x1f6   : > { %14223 = vst [vmem:[#allocation16_spill] sm:$0xff] %v10399_v16  ;;  %14225 = vst [vmem:[#allocation17_spill] sm:$0xff] %v10402_v51  ;;  %v5953_v20 = vld [vmem:[%s13465_s1 + $0x1d] ss:$0 sm:$0xff]  ;;  %v14238_v38 = vld [vmem:[#allocation6_spill] sm:$0xff] }
 0x1f7   : > { %14229 = vst [vmem:[#allocation19_spill] sm:$0xff] %v10412_v6  ;;  %14231 = vst [vmem:[#allocation2_spill] sm:$0xff] %v10415_v24  ;;  %v14236_v56 = vld [vmem:[#allocation5_spill] sm:$0xff]  ;;  %v10433_v28 = vadd.f32 %v2764_v50, %v14238_v38  ;;  %v14240_v63 = vld [vmem:[#allocation7_spill] sm:$0xff]  ;;  %v2841_v38 = vmul.f32 %v5953_v20, %v5921_v61  ;;  %v2849_v61 = vmul.f32 %v5953_v20, %v5929_v49 }
 0x1f8   : > { %14233 = vst [vmem:[#allocation3_spill] sm:$0xff] %v10418_v0  ;;  %14235 = vst [vmem:[#allocation4_spill] sm:$0xff] %v10421_v18  ;;  %v10430_v52 = vadd.f32 %v2763_v43, %v14236_v56  ;;  %v10436_v22 = vadd.f32 %v2765_v37, %v14240_v63  ;;  %v14242_v58 = vld [vmem:[#allocation8_spill] sm:$0xff]  ;;  %v5932_v33 = vld [vmem:[%s6757_s17 + $0xdd] sm:$0xff]  ;;  %v2840_v56 = vmul.f32 %v5953_v20, %v5920_v57 }
 0x1f9   : > { %14239 = vst [vmem:[#allocation6_spill] sm:$0xff] %v10433_v28  ;;  %v10439_v47 = vadd.f32 %v2766_v11, %v14242_v58  ;;  %v5931_v36 = vld [vmem:[%s6757_s17 + $0xcd] sm:$0xff]  ;;  %v5933_v8 = vld [vmem:[%s6757_s17 + $0xe5] sm:$0xff]  ;;  %v14244_v31 = vld [vmem:[#allocation9_spill] sm:$0xff]  ;;  %v2842_v63 = vmul.f32 %v5953_v20, %v5922_v54  ;;  %v2848_v57 = vmul.f32 %v5953_v20, %v5928_v12  ;;  %v2850_v54 = vmul.f32 %v5953_v20, %v5930_v5 }
 0x1fa   : > { %14237 = vst [vmem:[#allocation5_spill] sm:$0xff] %v10430_v52  ;;  %14241 = vst [vmem:[#allocation7_spill] sm:$0xff] %v10436_v22  ;;  %v10445_v42 = vadd.f32 %v2767_v46, %v14244_v31  ;;  %v14246_v43 = vld [vmem:[#allocation10_spill] sm:$0xff]  ;;  %v14248_v50 = vld [vmem:[#allocation11_spill] sm:$0xff]  ;;  %v2844_v31 = vmul.f32 %v5953_v20, %v5924_v14  ;;  %v2852_v28 = vmul.f32 %v5953_v20, %v5932_v33 }
 0x1fb   : > { %14243 = vst [vmem:[#allocation8_spill] sm:$0xff] %v10439_v47  ;;  %v10448_v21 = vadd.f32 %v2768_v48, %v14246_v43  ;;  %v10451_v40 = vadd.f32 %v2769_v41, %v14248_v50  ;;  %v14250_v37 = vld [vmem:[#allocation12_spill] sm:$0xff]  ;;  %v5935_v17 = vld [vmem:[%s6757_s17 + $0xfd] sm:$0xff]  ;;  %v5938_v1 = vld [vmem:[%s6757_s17 + $0x125] sm:$0xff]  ;;  %v2843_v48 = vmul.f32 %v5953_v20, %v5923_v59  ;;  %v2845_v43 = vmul.f32 %v5953_v20, %v5925_v3 }
 0x1fc   : > { %14245 = vst [vmem:[#allocation9_spill] sm:$0xff] %v10445_v42  ;;  %v10454_v45 = vadd.f32 %v2770_v39, %v14250_v37  ;;  %v5934_v11 = vld [vmem:[%s6757_s17 + $0xf5] sm:$0xff]  ;;  %v5936_v2 = vld [vmem:[%s6757_s17 + $0x10d] sm:$0xff]  ;;  %v5940_v41 = vld [vmem:[%s6757_s17 + $0x13d] sm:$0xff]  ;;  %v2846_v50 = vmul.f32 %v5953_v20, %v5926_v15  ;;  %v2847_v37 = vmul.f32 %v5953_v20, %v5927_v25  ;;  %v2851_v42 = vmul.f32 %v5953_v20, %v5931_v36 }
 0x1fd   : > { %14247 = vst [vmem:[#allocation10_spill] sm:$0xff] %v10448_v21  ;;  %14249 = vst [vmem:[#allocation11_spill] sm:$0xff] %v10451_v40  ;;  %v5937_v7 = vld [vmem:[%s6757_s17 + $0x115] sm:$0xff]  ;;  %v5939_v46 = vld [vmem:[%s6757_s17 + $0x12d] sm:$0xff]  ;;  %v2853_v52 = vmul.f32 %v5953_v20, %v5933_v8  ;;  %v2854_v18 = vmul.f32 %v5953_v20, %v5934_v11  ;;  %v2855_v14 = vmul.f32 %v5953_v20, %v5935_v17 }
 0x1fe   : > { %14251 = vst [vmem:[#allocation12_spill] sm:$0xff] %v10454_v45  ;;  %v5941_v58 = vld [vmem:[%s6757_s17 + $0x145] sm:$0xff]  ;;  %v5942_v39 = vld [vmem:[%s6757_s17 + $0x155] sm:$0xff]  ;;  %v5943_v45 = vld [vmem:[%s6757_s17 + $0x15d] sm:$0xff]  ;;  %v2856_v25 = vmul.f32 %v5953_v20, %v5936_v2  ;;  %v2857_v24 = vmul.f32 %v5953_v20, %v5937_v7  ;;  %v2858_v6 = vmul.f32 %v5953_v20, %v5938_v1  ;;  %v2859_v32 = vmul.f32 %v5953_v20, %v5939_v46 }
 0x1ff   : > { %v5944_v40 = vld [vmem:[%s6757_s17 + $0x16d] sm:$0xff]  ;;  %v5945_v21 = vld [vmem:[%s6757_s17 + $0x175] sm:$0xff]  ;;  %v5946_v59 = vld [vmem:[%s6757_s17 + $0x185] sm:$0xff]  ;;  %v2860_v51 = vmul.f32 %v5953_v20, %v5940_v41  ;;  %v2861_v16 = vmul.f32 %v5953_v20, %v5941_v58  ;;  %v2862_v12 = vmul.f32 %v5953_v20, %v5942_v39  ;;  %v2863_v49 = vmul.f32 %v5953_v20, %v5943_v45 }
 0x200   : > { %v5947_v47 = vld [vmem:[%s6757_s17 + $0x18d] sm:$0xff]  ;;  %v5948_v22 = vld [vmem:[%s6757_s17 + $0x19d] sm:$0xff]  ;;  %v5949_v3 = vld [vmem:[%s6757_s17 + $0x1a5] sm:$0xff]  ;;  %v2864_v5 = vmul.f32 %v5953_v20, %v5944_v40  ;;  %v2865_v36 = vmul.f32 %v5953_v20, %v5945_v21  ;;  %v2866_v23 = vmul.f32 %v5953_v20, %v5946_v59  ;;  %v10475_v17 = vadd.f32 %v2840_v56, %v10344_v44 }
 0x201   : > { %v5950_v15 = vld [vmem:[%s6757_s17 + $0x1b5] sm:$0xff]  ;;  %v5951_v0 = vld [vmem:[%s6757_s17 + $0x1bd] sm:$0xff]  ;;  %v2867_v13 = vmul.f32 %v5953_v20, %v5947_v47  ;;  %v2868_v29 = vmul.f32 %v5953_v20, %v5948_v22  ;;  %v2869_v33 = vmul.f32 %v5953_v20, %v5949_v3  ;;  %v10478_v2 = vadd.f32 %v2841_v38, %v10347_v19  ;;  %v5956_v45 = vld [vmem:[%s6757_s17 + $0x66] sm:$0xff] }
 0x202   : > { %v2870_v8 = vmul.f32 %v5953_v20, %v5950_v15  ;;  %v2871_v11 = vmul.f32 %v5953_v20, %v5951_v0  ;;  %v10481_v7 = vadd.f32 %v2842_v63, %v10350_v26  ;;  %v10484_v21 = vadd.f32 %v2843_v48, %v10353_v35  ;;  %v5954_v40 = vld [vmem:[%s6757_s17 + $0x4e] sm:$0xff]  ;;  %v5958_v56 = vld [vmem:[%s6757_s17 + $0x7e] sm:$0xff]  ;;  %v5959_v38 = vld [vmem:[%s6757_s17 + $0x86] sm:$0xff] }
 0x203   : > { %v10487_v22 = vadd.f32 %v2844_v31, %v10356_v55  ;;  %v10490_v0 = vadd.f32 %v2845_v43, %v10359_v53  ;;  %v10493_v44 = vadd.f32 %v2846_v50, %v10362_v30  ;;  %v10496_v19 = vadd.f32 %v2847_v37, %v10365_v27  ;;  %v5960_v63 = vld [vmem:[%s6757_s17 + $0x96] sm:$0xff]  ;;  %v5961_v48 = vld [vmem:[%s6757_s17 + $0x9e] sm:$0xff]  ;;  %v14264_v41 = vld [vmem:[#allocation19_spill] sm:$0xff] }
 0x204   : > { %v10499_v26 = vadd.f32 %v2848_v57, %v10368_v4  ;;  %v10502_v35 = vadd.f32 %v2849_v61, %v10371_v10  ;;  %v10505_v55 = vadd.f32 %v2850_v54, %v10374_v9  ;;  %v10508_v53 = vadd.f32 %v2851_v42, %v10377_v62  ;;  %v14252_v4 = vld [vmem:[#allocation13_spill] sm:$0xff]  ;;  %v14254_v10 = vld [vmem:[#allocation14_spill] sm:$0xff]  ;;  %v5957_v62 = vld [vmem:[%s6757_s17 + $0x6e] sm:$0xff] }
 0x205   : > { %v10511_v30 = vadd.f32 %v2852_v28, %v10380_v60  ;;  %v10514_v27 = vadd.f32 %v2853_v52, %v10383_v34  ;;  %v10517_v20 = vadd.f32 %v2854_v18, %v14252_v4  ;;  %v10520_v47 = vadd.f32 %v2855_v14, %v14254_v10  ;;  %v5955_v9 = vld [vmem:[%s6757_s17 + $0x56] sm:$0xff]  ;;  %v14256_v42 = vld [vmem:[#allocation15_spill] sm:$0xff]  ;;  %v14262_v18 = vld [vmem:[#allocation18_spill] sm:$0xff] }
 0x206   : > { %v10527_v1 = vadd.f32 %v2856_v25, %v14256_v42  ;;  %v14258_v60 = vld [vmem:[#allocation16_spill] sm:$0xff]  ;;  %v14260_v34 = vld [vmem:[#allocation17_spill] sm:$0xff]  ;;  %v10536_v46 = vadd.f32 %v2859_v32, %v14262_v18  ;;  %v10543_v58 = vadd.f32 %v2860_v51, %v14264_v41  ;;  %v14266_v39 = vld [vmem:[#allocation2_spill] sm:$0xff] }
 0x207   : > { %14253 = vst [vmem:[#allocation13_spill] sm:$0xff] %v10517_v20  ;;  %14255 = vst [vmem:[#allocation14_spill] sm:$0xff] %v10520_v47  ;;  %v10530_v28 = vadd.f32 %v2857_v24, %v14258_v60  ;;  %v10533_v52 = vadd.f32 %v2858_v6, %v14260_v34  ;;  %v10546_v31 = vadd.f32 %v2861_v16, %v14266_v39  ;;  %v14268_v24 = vld [vmem:[#allocation3_spill] sm:$0xff]  ;;  %v14270_v6 = vld [vmem:[#allocation4_spill] sm:$0xff] }
 0x208   : > { %14257 = vst [vmem:[#allocation15_spill] sm:$0xff] %v10527_v1  ;;  %14263 = vst [vmem:[#allocation18_spill] sm:$0xff] %v10536_v46  ;;  %v10549_v43 = vadd.f32 %v2862_v12, %v14268_v24  ;;  %v10552_v50 = vadd.f32 %v2863_v49, %v14270_v6  ;;  %v5962_v32 = vld [vmem:[%s6757_s17 + $0xae] sm:$0xff]  ;;  %v5963_v37 = vld [vmem:[%s6757_s17 + $0xb6] sm:$0xff] }
 0x209   : > { %14259 = vst [vmem:[#allocation16_spill] sm:$0xff] %v10530_v28  ;;  %14261 = vst [vmem:[#allocation17_spill] sm:$0xff] %v10533_v52  ;;  %v5964_v57 = vld [vmem:[%s6757_s17 + $0xc6] sm:$0xff]  ;;  %v5987_v51 = vld [vmem:[%s13465_s1 + $0x1e] ss:$0 sm:$0xff] }
 0x20a   : > { %14265 = vst [vmem:[#allocation19_spill] sm:$0xff] %v10543_v58  ;;  %14267 = vst [vmem:[#allocation2_spill] sm:$0xff] %v10546_v31  ;;  %v14272_v61 = vld [vmem:[#allocation5_spill] sm:$0xff]  ;;  %v14274_v54 = vld [vmem:[#allocation6_spill] sm:$0xff] }
 0x20b   : > { %14269 = vst [vmem:[#allocation3_spill] sm:$0xff] %v10549_v43  ;;  %14271 = vst [vmem:[#allocation4_spill] sm:$0xff] %v10552_v50  ;;  %v10561_v16 = vadd.f32 %v2864_v5, %v14272_v61  ;;  %v10564_v59 = vadd.f32 %v2865_v36, %v14274_v54  ;;  %v14276_v14 = vld [vmem:[#allocation7_spill] sm:$0xff]  ;;  %v14278_v15 = vld [vmem:[#allocation8_spill] sm:$0xff]  ;;  %v2941_v61 = vmul.f32 %v5987_v51, %v5954_v40 }
 0x20c   : > { %v10567_v3 = vadd.f32 %v2866_v23, %v14276_v14  ;;  %v10570_v25 = vadd.f32 %v2867_v13, %v14278_v15  ;;  %v5965_v12 = vld [vmem:[%s6757_s17 + $0xce] sm:$0xff]  ;;  %v5966_v49 = vld [vmem:[%s6757_s17 + $0xde] sm:$0xff]  ;;  %v5967_v4 = vld [vmem:[%s6757_s17 + $0xe6] sm:$0xff]  ;;  %v2942_v54 = vmul.f32 %v5987_v51, %v5955_v9  ;;  %v2943_v14 = vmul.f32 %v5987_v51, %v5956_v45 }
 0x20d   : > { %14273 = vst [vmem:[#allocation5_spill] sm:$0xff] %v10561_v16  ;;  %14275 = vst [vmem:[#allocation6_spill] sm:$0xff] %v10564_v59  ;;  %v14280_v10 = vld [vmem:[#allocation9_spill] sm:$0xff]  ;;  %v14282_v5 = vld [vmem:[#allocation10_spill] sm:$0xff]  ;;  %v2949_v40 = vmul.f32 %v5987_v51, %v5962_v32  ;;  %v2950_v9 = vmul.f32 %v5987_v51, %v5963_v37  ;;  %v2951_v45 = vmul.f32 %v5987_v51, %v5964_v57 }
 0x20e   : > { %14277 = vst [vmem:[#allocation7_spill] sm:$0xff] %v10567_v3  ;;  %14279 = vst [vmem:[#allocation8_spill] sm:$0xff] %v10570_v25  ;;  %v10576_v42 = vadd.f32 %v2868_v29, %v14280_v10  ;;  %v10579_v60 = vadd.f32 %v2869_v33, %v14282_v5  ;;  %v14284_v36 = vld [vmem:[#allocation11_spill] sm:$0xff]  ;;  %v14286_v23 = vld [vmem:[#allocation12_spill] sm:$0xff]  ;;  %v2944_v33 = vmul.f32 %v5987_v51, %v5957_v62 }
 0x20f   : > { %v10582_v34 = vadd.f32 %v2870_v8, %v14284_v36  ;;  %v10585_v18 = vadd.f32 %v2871_v11, %v14286_v23  ;;  %v5968_v13 = vld [vmem:[%s6757_s17 + $0xf6] sm:$0xff]  ;;  %v5969_v41 = vld [vmem:[%s6757_s17 + $0xfe] sm:$0xff]  ;;  %v5970_v39 = vld [vmem:[%s6757_s17 + $0x10e] sm:$0xff]  ;;  %v2945_v10 = vmul.f32 %v5987_v51, %v5958_v56  ;;  %v2946_v5 = vmul.f32 %v5987_v51, %v5959_v38 }
 0x210   : > { %14281 = vst [vmem:[#allocation9_spill] sm:$0xff] %v10576_v42  ;;  %14283 = vst [vmem:[#allocation10_spill] sm:$0xff] %v10579_v60  ;;  %v5971_v24 = vld [vmem:[%s6757_s17 + $0x116] sm:$0xff]  ;;  %v5972_v6 = vld [vmem:[%s6757_s17 + $0x126] sm:$0xff]  ;;  %v2947_v36 = vmul.f32 %v5987_v51, %v5960_v63  ;;  %v2948_v23 = vmul.f32 %v5987_v51, %v5961_v48  ;;  %v2952_v42 = vmul.f32 %v5987_v51, %v5965_v12 }
 0x211   : > { %14285 = vst [vmem:[#allocation11_spill] sm:$0xff] %v10582_v34  ;;  %14287 = vst [vmem:[#allocation12_spill] sm:$0xff] %v10585_v18  ;;  %v5973_v29 = vld [vmem:[%s6757_s17 + $0x12e] sm:$0xff]  ;;  %v5974_v8 = vld [vmem:[%s6757_s17 + $0x13e] sm:$0xff]  ;;  %v2953_v59 = vmul.f32 %v5987_v51, %v5966_v49  ;;  %v2954_v16 = vmul.f32 %v5987_v51, %v5967_v4  ;;  %v2955_v50 = vmul.f32 %v5987_v51, %v5968_v13 }
 0x212   : > { %v5975_v15 = vld [vmem:[%s6757_s17 + $0x146] sm:$0xff]  ;;  %v5976_v11 = vld [vmem:[%s6757_s17 + $0x156] sm:$0xff]  ;;  %v5977_v18 = vld [vmem:[%s6757_s17 + $0x15e] sm:$0xff]  ;;  %v2956_v56 = vmul.f32 %v5987_v51, %v5969_v41  ;;  %v2957_v48 = vmul.f32 %v5987_v51, %v5970_v39  ;;  %v2958_v31 = vmul.f32 %v5987_v51, %v5971_v24  ;;  %v2959_v58 = vmul.f32 %v5987_v51, %v5972_v6 }
 0x213   : > { %v5978_v34 = vld [vmem:[%s6757_s17 + $0x16e] sm:$0xff]  ;;  %v5979_v60 = vld [vmem:[%s6757_s17 + $0x176] sm:$0xff]  ;;  %v5980_v62 = vld [vmem:[%s6757_s17 + $0x186] sm:$0xff]  ;;  %v2960_v46 = vmul.f32 %v5987_v51, %v5973_v29  ;;  %v2961_v52 = vmul.f32 %v5987_v51, %v5974_v8  ;;  %v2962_v28 = vmul.f32 %v5987_v51, %v5975_v15  ;;  %v2963_v32 = vmul.f32 %v5987_v51, %v5976_v11 }
 0x214   : > { %v5981_v25 = vld [vmem:[%s6757_s17 + $0x18e] sm:$0xff]  ;;  %v5982_v3 = vld [vmem:[%s6757_s17 + $0x19e] sm:$0xff]  ;;  %v5983_v38 = vld [vmem:[%s6757_s17 + $0x1a6] sm:$0xff]  ;;  %v2964_v37 = vmul.f32 %v5987_v51, %v5977_v18  ;;  %v2965_v57 = vmul.f32 %v5987_v51, %v5978_v34  ;;  %v2966_v12 = vmul.f32 %v5987_v51, %v5979_v60  ;;  %v2967_v1 = vmul.f32 %v5987_v51, %v5980_v62 }
 0x215   : > { %v5984_v63 = vld [vmem:[%s6757_s17 + $0x1b6] sm:$0xff]  ;;  %v5985_v43 = vld [vmem:[%s6757_s17 + $0x1be] sm:$0xff]  ;;  %v2968_v47 = vmul.f32 %v5987_v51, %v5981_v25  ;;  %v2969_v20 = vmul.f32 %v5987_v51, %v5982_v3  ;;  %v2970_v49 = vmul.f32 %v5987_v51, %v5983_v38  ;;  %v10606_v41 = vadd.f32 %v2941_v61, %v10475_v17  ;;  %v14300_v8 = vld [vmem:[#allocation19_spill] sm:$0xff] }
 0x216   : > { %v2971_v4 = vmul.f32 %v5987_v51, %v5984_v63  ;;  %v2972_v13 = vmul.f32 %v5987_v51, %v5985_v43  ;;  %v10609_v39 = vadd.f32 %v2942_v54, %v10478_v2  ;;  %v10612_v24 = vadd.f32 %v2943_v14, %v10481_v7  ;;  %v5988_v34 = vld [vmem:[%s6757_s17 + $0x60] sm:$0xff]  ;;  %v5990_v18 = vld [vmem:[%s6757_s17 + $0x78] sm:$0xff]  ;;  %v5992_v61 = vld [vmem:[%s6757_s17 + $0x90] sm:$0xff] }
 0x217   : > { %v10615_v60 = vadd.f32 %v2944_v33, %v10484_v21  ;;  %v10618_v3 = vadd.f32 %v2945_v10, %v10487_v22  ;;  %v10621_v43 = vadd.f32 %v2946_v5, %v10490_v0  ;;  %v10624_v17 = vadd.f32 %v2947_v36, %v10493_v44  ;;  %v5993_v54 = vld [vmem:[%s6757_s17 + $0x98] sm:$0xff]  ;;  %v5994_v14 = vld [vmem:[%s6757_s17 + $0xa8] sm:$0xff]  ;;  %v5995_v33 = vld [vmem:[%s6757_s17 + $0xb0] sm:$0xff] }
 0x218   : > { %v10627_v2 = vadd.f32 %v2948_v23, %v10496_v19  ;;  %v10630_v7 = vadd.f32 %v2949_v40, %v10499_v26  ;;  %v10633_v21 = vadd.f32 %v2950_v9, %v10502_v35  ;;  %v10636_v22 = vadd.f32 %v2951_v45, %v10505_v55  ;;  %v14288_v26 = vld [vmem:[#allocation13_spill] sm:$0xff]  ;;  %v14290_v35 = vld [vmem:[#allocation14_spill] sm:$0xff]  ;;  %v5989_v55 = vld [vmem:[%s6757_s17 + $0x68] sm:$0xff] }
 0x219   : > { %v10639_v0 = vadd.f32 %v2952_v42, %v10508_v53  ;;  %v10642_v44 = vadd.f32 %v2953_v59, %v10511_v30  ;;  %v10645_v19 = vadd.f32 %v2954_v16, %v10514_v27  ;;  %v10648_v51 = vadd.f32 %v2955_v50, %v14288_v26  ;;  %v5991_v53 = vld [vmem:[%s6757_s17 + $0x80] sm:$0xff]  ;;  %v14292_v42 = vld [vmem:[#allocation15_spill] sm:$0xff]  ;;  %v14294_v30 = vld [vmem:[#allocation16_spill] sm:$0xff] }
 0x21a   : > { %v10651_v25 = vadd.f32 %v2956_v56, %v14290_v35  ;;  %v10658_v6 = vadd.f32 %v2957_v48, %v14292_v42  ;;  %v10661_v59 = vadd.f32 %v2958_v31, %v14294_v30  ;;  %v14296_v27 = vld [vmem:[#allocation17_spill] sm:$0xff]  ;;  %v14298_v50 = vld [vmem:[#allocation18_spill] sm:$0xff]  ;;  %v10674_v15 = vadd.f32 %v2961_v52, %v14300_v8  ;;  %v14304_v31 = vld [vmem:[#allocation3_spill] sm:$0xff] }
 0x21b   : > { %14289 = vst [vmem:[#allocation13_spill] sm:$0xff] %v10648_v51  ;;  %v10664_v16 = vadd.f32 %v2959_v58, %v14296_v27  ;;  %v10667_v29 = vadd.f32 %v2960_v46, %v14298_v50  ;;  %v14302_v11 = vld [vmem:[#allocation2_spill] sm:$0xff]  ;;  %v10680_v5 = vadd.f32 %v2963_v32, %v14304_v31  ;;  %v14306_v58 = vld [vmem:[#allocation4_spill] sm:$0xff]  ;;  %v5997_v23 = vld [vmem:[%s6757_s17 + $0xc8] sm:$0xff] }
 0x21c   : > { %14291 = vst [vmem:[#allocation14_spill] sm:$0xff] %v10651_v25  ;;  %14293 = vst [vmem:[#allocation15_spill] sm:$0xff] %v10658_v6  ;;  %v10677_v10 = vadd.f32 %v2962_v28, %v14302_v11  ;;  %v10683_v36 = vadd.f32 %v2964_v37, %v14306_v58  ;;  %v5996_v46 = vld [vmem:[%s6757_s17 + $0xc0] sm:$0xff]  ;;  %v5998_v40 = vld [vmem:[%s6757_s17 + $0xd8] sm:$0xff] }
 0x21d   : > { %14295 = vst [vmem:[#allocation16_spill] sm:$0xff] %v10661_v59  ;;  %14297 = vst [vmem:[#allocation17_spill] sm:$0xff] %v10664_v16  ;;  %v6021_v52 = vld [vmem:[%s13465_s1 + $0x20] ss:$0 sm:$0xff]  ;;  %v14308_v9 = vld [vmem:[#allocation5_spill] sm:$0xff] }
 0x21e   : > { %14299 = vst [vmem:[#allocation18_spill] sm:$0xff] %v10667_v29  ;;  %14301 = vst [vmem:[#allocation19_spill] sm:$0xff] %v10674_v15  ;;  %v10692_v28 = vadd.f32 %v2965_v57, %v14308_v9  ;;  %v14310_v45 = vld [vmem:[#allocation6_spill] sm:$0xff]  ;;  %v14312_v56 = vld [vmem:[#allocation7_spill] sm:$0xff]  ;;  %v3044_v9 = vmul.f32 %v6021_v52, %v5988_v34  ;;  %v3052_v34 = vmul.f32 %v6021_v52, %v5996_v46 }
 0x21f   : > { %14303 = vst [vmem:[#allocation2_spill] sm:$0xff] %v10677_v10  ;;  %14305 = vst [vmem:[#allocation3_spill] sm:$0xff] %v10680_v5  ;;  %v10695_v62 = vadd.f32 %v2966_v12, %v14310_v45  ;;  %v10698_v38 = vadd.f32 %v2967_v1, %v14312_v56  ;;  %v14314_v63 = vld [vmem:[#allocation8_spill] sm:$0xff]  ;;  %v5999_v32 = vld [vmem:[%s6757_s17 + $0xe0] sm:$0xff]  ;;  %v3045_v45 = vmul.f32 %v6021_v52, %v5989_v55 }
 0x220   : > { %14307 = vst [vmem:[#allocation4_spill] sm:$0xff] %v10683_v36  ;;  %14309 = vst [vmem:[#allocation5_spill] sm:$0xff] %v10692_v28  ;;  %v10701_v48 = vadd.f32 %v2968_v47, %v14314_v63  ;;  %v6000_v37 = vld [vmem:[%s6757_s17 + $0xf0] sm:$0xff]  ;;  %v6001_v26 = vld [vmem:[%s6757_s17 + $0xf8] sm:$0xff]  ;;  %v3046_v56 = vmul.f32 %v6021_v52, %v5990_v18  ;;  %v3053_v55 = vmul.f32 %v6021_v52, %v5997_v23 }
 0x221   : > { %14311 = vst [vmem:[#allocation6_spill] sm:$0xff] %v10695_v62  ;;  %14313 = vst [vmem:[#allocation7_spill] sm:$0xff] %v10698_v38  ;;  %v14316_v35 = vld [vmem:[#allocation9_spill] sm:$0xff]  ;;  %v14318_v57 = vld [vmem:[#allocation10_spill] sm:$0xff]  ;;  %v3054_v18 = vmul.f32 %v6021_v52, %v5998_v40  ;;  %v3056_v62 = vmul.f32 %v6021_v52, %v6000_v37  ;;  %v3057_v28 = vmul.f32 %v6021_v52, %v6001_v26 }
 0x222   : > { %14315 = vst [vmem:[#allocation8_spill] sm:$0xff] %v10701_v48  ;;  %v10707_v42 = vadd.f32 %v2969_v20, %v14316_v35  ;;  %v10710_v30 = vadd.f32 %v2970_v49, %v14318_v57  ;;  %v14320_v12 = vld [vmem:[#allocation11_spill] sm:$0xff]  ;;  %v14322_v1 = vld [vmem:[#allocation12_spill] sm:$0xff]  ;;  %v6004_v11 = vld [vmem:[%s6757_s17 + $0x120] sm:$0xff]  ;;  %v3047_v49 = vmul.f32 %v6021_v52, %v5991_v53  ;;  %v3048_v35 = vmul.f32 %v6021_v52, %v5992_v61 }
 0x223   : > { %v10713_v27 = vadd.f32 %v2971_v4, %v14320_v12  ;;  %v10716_v50 = vadd.f32 %v2972_v13, %v14322_v1  ;;  %v6002_v47 = vld [vmem:[%s6757_s17 + $0x108] sm:$0xff]  ;;  %v6003_v8 = vld [vmem:[%s6757_s17 + $0x110] sm:$0xff]  ;;  %v6006_v58 = vld [vmem:[%s6757_s17 + $0x138] sm:$0xff]  ;;  %v3049_v57 = vmul.f32 %v6021_v52, %v5993_v54  ;;  %v3050_v12 = vmul.f32 %v6021_v52, %v5994_v14 }
 0x224   : > { %14317 = vst [vmem:[#allocation9_spill] sm:$0xff] %v10707_v42  ;;  %14319 = vst [vmem:[#allocation10_spill] sm:$0xff] %v10710_v30  ;;  %v6005_v31 = vld [vmem:[%s6757_s17 + $0x128] sm:$0xff]  ;;  %v6007_v20 = vld [vmem:[%s6757_s17 + $0x140] sm:$0xff]  ;;  %v3051_v1 = vmul.f32 %v6021_v52, %v5995_v33  ;;  %v3055_v42 = vmul.f32 %v6021_v52, %v5999_v32  ;;  %v3058_v36 = vmul.f32 %v6021_v52, %v6002_v47 }
 0x225   : > { %14321 = vst [vmem:[#allocation11_spill] sm:$0xff] %v10713_v27  ;;  %14323 = vst [vmem:[#allocation12_spill] sm:$0xff] %v10716_v50  ;;  %v6008_v4 = vld [vmem:[%s6757_s17 + $0x150] sm:$0xff]  ;;  %v6009_v63 = vld [vmem:[%s6757_s17 + $0x158] sm:$0xff]  ;;  %v3059_v61 = vmul.f32 %v6021_v52, %v6003_v8  ;;  %v3060_v33 = vmul.f32 %v6021_v52, %v6004_v11  ;;  %v3061_v10 = vmul.f32 %v6021_v52, %v6005_v31 }
 0x226   : > { %v6010_v13 = vld [vmem:[%s6757_s17 + $0x168] sm:$0xff]  ;;  %v6011_v50 = vld [vmem:[%s6757_s17 + $0x170] sm:$0xff]  ;;  %v6012_v27 = vld [vmem:[%s6757_s17 + $0x180] sm:$0xff]  ;;  %v3062_v15 = vmul.f32 %v6021_v52, %v6006_v58  ;;  %v3063_v29 = vmul.f32 %v6021_v52, %v6007_v20  ;;  %v3064_v16 = vmul.f32 %v6021_v52, %v6008_v4  ;;  %v3065_v59 = vmul.f32 %v6021_v52, %v6009_v63 }
 0x227   : > { %v6013_v30 = vld [vmem:[%s6757_s17 + $0x188] sm:$0xff]  ;;  %v6014_v53 = vld [vmem:[%s6757_s17 + $0x198] sm:$0xff]  ;;  %v6015_v48 = vld [vmem:[%s6757_s17 + $0x1a0] sm:$0xff]  ;;  %v3066_v46 = vmul.f32 %v6021_v52, %v6010_v13  ;;  %v3067_v23 = vmul.f32 %v6021_v52, %v6011_v50  ;;  %v3068_v40 = vmul.f32 %v6021_v52, %v6012_v27  ;;  %v10737_v8 = vadd.f32 %v3044_v9, %v10606_v41 }
 0x228   : > { %v6016_v38 = vld [vmem:[%s6757_s17 + $0x1b0] sm:$0xff]  ;;  %v6017_v54 = vld [vmem:[%s6757_s17 + $0x1b8] sm:$0xff]  ;;  %v6018_v14 = vld [vmem:[%s6757_s17 + $0x1c8] sm:$0xff]  ;;  %v3069_v32 = vmul.f32 %v6021_v52, %v6013_v30  ;;  %v3070_v6 = vmul.f32 %v6021_v52, %v6014_v53  ;;  %v3071_v25 = vmul.f32 %v6021_v52, %v6015_v48  ;;  %v10740_v11 = vadd.f32 %v3045_v45, %v10609_v39 }
 0x229   : > { %v6019_v5 = vld [vmem:[%s6757_s17 + $0x1d0] sm:$0xff]  ;;  %v3072_v51 = vmul.f32 %v6021_v52, %v6016_v38  ;;  %v3073_v37 = vmul.f32 %v6021_v52, %v6017_v54  ;;  %v3074_v26 = vmul.f32 %v6021_v52, %v6018_v14  ;;  %v10743_v31 = vadd.f32 %v3046_v56, %v10612_v24  ;;  %v6022_v27 = vld [vmem:[%s6757_s17 + $0x61] sm:$0xff]  ;;  %v6024_v50 = vld [vmem:[%s6757_s17 + $0x79] sm:$0xff] }
 0x22a   : > { %v3075_v47 = vmul.f32 %v6021_v52, %v6019_v5  ;;  %v10746_v30 = vadd.f32 %v3047_v49, %v10615_v60  ;;  %v10749_v38 = vadd.f32 %v3048_v35, %v10618_v3  ;;  %v10752_v5 = vadd.f32 %v3049_v57, %v10621_v43  ;;  %v6026_v9 = vld [vmem:[%s6757_s17 + $0x91] sm:$0xff]  ;;  %v6027_v45 = vld [vmem:[%s6757_s17 + $0x99] sm:$0xff]  ;;  %v6028_v56 = vld [vmem:[%s6757_s17 + $0xa9] sm:$0xff] }
 0x22b   : > { %v10755_v41 = vadd.f32 %v3050_v12, %v10624_v17  ;;  %v10758_v39 = vadd.f32 %v3051_v1, %v10627_v2  ;;  %v10761_v24 = vadd.f32 %v3052_v34, %v10630_v7  ;;  %v10764_v60 = vadd.f32 %v3053_v55, %v10633_v21  ;;  %v14324_v7 = vld [vmem:[#allocation13_spill] sm:$0xff]  ;;  %v14326_v21 = vld [vmem:[#allocation14_spill] sm:$0xff]  ;;  %v14336_v4 = vld [vmem:[#allocation19_spill] sm:$0xff] }
 0x22c   : > { %v10767_v3 = vadd.f32 %v3054_v18, %v10636_v22  ;;  %v10770_v43 = vadd.f32 %v3055_v42, %v10639_v0  ;;  %v10773_v17 = vadd.f32 %v3056_v62, %v10642_v44  ;;  %v10776_v2 = vadd.f32 %v3057_v28, %v10645_v19  ;;  %v6023_v22 = vld [vmem:[%s6757_s17 + $0x69] sm:$0xff]  ;;  %v6025_v0 = vld [vmem:[%s6757_s17 + $0x81] sm:$0xff]  ;;  %v14332_v19 = vld [vmem:[#allocation17_spill] sm:$0xff] }
 0x22d   : > { %v10779_v52 = vadd.f32 %v3058_v36, %v14324_v7  ;;  %v10782_v48 = vadd.f32 %v3059_v61, %v14326_v21  ;;  %v14328_v42 = vld [vmem:[#allocation15_spill] sm:$0xff]  ;;  %v14330_v44 = vld [vmem:[#allocation16_spill] sm:$0xff]  ;;  %v10795_v28 = vadd.f32 %v3062_v15, %v14332_v19  ;;  %v14334_v36 = vld [vmem:[#allocation18_spill] sm:$0xff]  ;;  %v10805_v63 = vadd.f32 %v3064_v16, %v14336_v4 }
 0x22e   : > { %v10789_v58 = vadd.f32 %v3060_v33, %v14328_v42  ;;  %v10792_v62 = vadd.f32 %v3061_v10, %v14330_v44  ;;  %v10798_v20 = vadd.f32 %v3063_v29, %v14334_v36  ;;  %v6029_v49 = vld [vmem:[%s6757_s17 + $0xb1] sm:$0xff]  ;;  %v14338_v13 = vld [vmem:[#allocation2_spill] sm:$0xff]  ;;  %v14340_v10 = vld [vmem:[#allocation3_spill] sm:$0xff] }
 0x22f   : > { %14325 = vst [vmem:[#allocation13_spill] sm:$0xff] %v10779_v52  ;;  %14327 = vst [vmem:[#allocation14_spill] sm:$0xff] %v10782_v48  ;;  %v10808_v35 = vadd.f32 %v3065_v59, %v14338_v13  ;;  %v10811_v57 = vadd.f32 %v3066_v46, %v14340_v10  ;;  %v14342_v15 = vld [vmem:[#allocation4_spill] sm:$0xff]  ;;  %v6030_v29 = vld [vmem:[%s6757_s17 + $0xc1] sm:$0xff] }
 0x230   : > { %14329 = vst [vmem:[#allocation15_spill] sm:$0xff] %v10789_v58  ;;  %14331 = vst [vmem:[#allocation16_spill] sm:$0xff] %v10792_v62  ;;  %v10814_v12 = vadd.f32 %v3067_v23, %v14342_v15  ;;  %v6031_v1 = vld [vmem:[%s6757_s17 + $0xc9] sm:$0xff]  ;;  %v6032_v34 = vld [vmem:[%s6757_s17 + $0xd9] sm:$0xff] }
 0x231   : > { %14333 = vst [vmem:[#allocation17_spill] sm:$0xff] %v10795_v28  ;;  %14335 = vst [vmem:[#allocation18_spill] sm:$0xff] %v10798_v20  ;;  %v6055_v16 = vld [vmem:[%s13465_s1 + $0x21] ss:$0 sm:$0xff]  ;;  %v14344_v55 = vld [vmem:[#allocation5_spill] sm:$0xff] }
 0x232   : > { %14337 = vst [vmem:[#allocation19_spill] sm:$0xff] %v10805_v63  ;;  %14339 = vst [vmem:[#allocation2_spill] sm:$0xff] %v10808_v35  ;;  %v10823_v59 = vadd.f32 %v3068_v40, %v14344_v55  ;;  %v14346_v18 = vld [vmem:[#allocation6_spill] sm:$0xff]  ;;  %v14348_v61 = vld [vmem:[#allocation7_spill] sm:$0xff]  ;;  %v3145_v55 = vmul.f32 %v6055_v16, %v6022_v27  ;;  %v3153_v27 = vmul.f32 %v6055_v16, %v6030_v29 }
 0x233   : > { %14341 = vst [vmem:[#allocation3_spill] sm:$0xff] %v10811_v57  ;;  %14343 = vst [vmem:[#allocation4_spill] sm:$0xff] %v10814_v12  ;;  %v10826_v53 = vadd.f32 %v3069_v32, %v14346_v18  ;;  %v10829_v54 = vadd.f32 %v3070_v6, %v14348_v61  ;;  %v14350_v14 = vld [vmem:[#allocation8_spill] sm:$0xff]  ;;  %v6033_v46 = vld [vmem:[%s6757_s17 + $0xe1] sm:$0xff]  ;;  %v3146_v18 = vmul.f32 %v6055_v16, %v6023_v22 }
 0x234   : > { %14345 = vst [vmem:[#allocation5_spill] sm:$0xff] %v10823_v59  ;;  %v10832_v33 = vadd.f32 %v3071_v25, %v14350_v14  ;;  %v6034_v23 = vld [vmem:[%s6757_s17 + $0xf1] sm:$0xff]  ;;  %v6035_v7 = vld [vmem:[%s6757_s17 + $0xf9] sm:$0xff]  ;;  %v14356_v32 = vld [vmem:[#allocation11_spill] sm:$0xff]  ;;  %v3147_v61 = vmul.f32 %v6055_v16, %v6024_v50  ;;  %v3154_v22 = vmul.f32 %v6055_v16, %v6031_v1  ;;  %v3155_v50 = vmul.f32 %v6055_v16, %v6032_v34 }
 0x235   : > { %14347 = vst [vmem:[#allocation6_spill] sm:$0xff] %v10826_v53  ;;  %14349 = vst [vmem:[#allocation7_spill] sm:$0xff] %v10829_v54  ;;  %v14352_v21 = vld [vmem:[#allocation9_spill] sm:$0xff]  ;;  %v14354_v40 = vld [vmem:[#allocation10_spill] sm:$0xff]  ;;  %v10844_v19 = vadd.f32 %v3074_v26, %v14356_v32  ;;  %v3151_v32 = vmul.f32 %v6055_v16, %v6028_v56  ;;  %v3157_v53 = vmul.f32 %v6055_v16, %v6034_v23 }
 0x236   : > { %14351 = vst [vmem:[#allocation8_spill] sm:$0xff] %v10832_v33  ;;  %v10838_v42 = vadd.f32 %v3072_v51, %v14352_v21  ;;  %v10841_v44 = vadd.f32 %v3073_v37, %v14354_v40  ;;  %v14358_v6 = vld [vmem:[#allocation12_spill] sm:$0xff]  ;;  %v6038_v13 = vld [vmem:[%s6757_s17 + $0x121] sm:$0xff]  ;;  %v6040_v15 = vld [vmem:[%s6757_s17 + $0x139] sm:$0xff]  ;;  %v3148_v37 = vmul.f32 %v6055_v16, %v6025_v0  ;;  %v3149_v21 = vmul.f32 %v6055_v16, %v6026_v9 }
 0x237   : > { %14357 = vst [vmem:[#allocation11_spill] sm:$0xff] %v10844_v19  ;;  %v10847_v36 = vadd.f32 %v3075_v47, %v14358_v6  ;;  %v6036_v25 = vld [vmem:[%s6757_s17 + $0x109] sm:$0xff]  ;;  %v6037_v4 = vld [vmem:[%s6757_s17 + $0x111] sm:$0xff]  ;;  %v6041_v51 = vld [vmem:[%s6757_s17 + $0x141] sm:$0xff]  ;;  %v3150_v40 = vmul.f32 %v6055_v16, %v6027_v45  ;;  %v3152_v6 = vmul.f32 %v6055_v16, %v6029_v49  ;;  %v3158_v59 = vmul.f32 %v6055_v16, %v6035_v7 }
 0x238   : > { %14353 = vst [vmem:[#allocation9_spill] sm:$0xff] %v10838_v42  ;;  %14355 = vst [vmem:[#allocation10_spill] sm:$0xff] %v10841_v44  ;;  %v6039_v10 = vld [vmem:[%s6757_s17 + $0x129] sm:$0xff]  ;;  %v6042_v26 = vld [vmem:[%s6757_s17 + $0x151] sm:$0xff]  ;;  %v3156_v42 = vmul.f32 %v6055_v16, %v6033_v46  ;;  %v3159_v12 = vmul.f32 %v6055_v16, %v6036_v25  ;;  %v3160_v9 = vmul.f32 %v6055_v16, %v6037_v4 }
 0x239   : > { %14359 = vst [vmem:[#allocation12_spill] sm:$0xff] %v10847_v36  ;;  %v6043_v14 = vld [vmem:[%s6757_s17 + $0x159] sm:$0xff]  ;;  %v6044_v47 = vld [vmem:[%s6757_s17 + $0x169] sm:$0xff]  ;;  %v6045_v36 = vld [vmem:[%s6757_s17 + $0x171] sm:$0xff]  ;;  %v3161_v49 = vmul.f32 %v6055_v16, %v6038_v13  ;;  %v3162_v35 = vmul.f32 %v6055_v16, %v6039_v10  ;;  %v3163_v63 = vmul.f32 %v6055_v16, %v6040_v15  ;;  %v3164_v20 = vmul.f32 %v6055_v16, %v6041_v51 }
 0x23a   : > { %v6046_v19 = vld [vmem:[%s6757_s17 + $0x181] sm:$0xff]  ;;  %v6047_v44 = vld [vmem:[%s6757_s17 + $0x189] sm:$0xff]  ;;  %v6048_v0 = vld [vmem:[%s6757_s17 + $0x199] sm:$0xff]  ;;  %v3165_v28 = vmul.f32 %v6055_v16, %v6042_v26  ;;  %v3166_v62 = vmul.f32 %v6055_v16, %v6043_v14  ;;  %v3167_v29 = vmul.f32 %v6055_v16, %v6044_v47  ;;  %v3168_v1 = vmul.f32 %v6055_v16, %v6045_v36 }
 0x23b   : > { %v6049_v33 = vld [vmem:[%s6757_s17 + $0x1a1] sm:$0xff]  ;;  %v6050_v54 = vld [vmem:[%s6757_s17 + $0x1b1] sm:$0xff]  ;;  %v6051_v45 = vld [vmem:[%s6757_s17 + $0x1b9] sm:$0xff]  ;;  %v3169_v34 = vmul.f32 %v6055_v16, %v6046_v19  ;;  %v3170_v46 = vmul.f32 %v6055_v16, %v6047_v44  ;;  %v3171_v58 = vmul.f32 %v6055_v16, %v6048_v0  ;;  %v10868_v4 = vadd.f32 %v3145_v55, %v10737_v8 }
 0x23c   : > { %v6052_v56 = vld [vmem:[%s6757_s17 + $0x1c9] sm:$0xff]  ;;  %v6053_v57 = vld [vmem:[%s6757_s17 + $0x1d1] sm:$0xff]  ;;  %v3172_v48 = vmul.f32 %v6055_v16, %v6049_v33  ;;  %v3173_v52 = vmul.f32 %v6055_v16, %v6050_v54  ;;  %v3174_v23 = vmul.f32 %v6055_v16, %v6051_v45  ;;  %v10871_v13 = vadd.f32 %v3146_v18, %v10740_v11  ;;  %v6058_v36 = vld [vmem:[%s6757_s17 + $0x7a] sm:$0xff] }
 0x23d   : > { %v3175_v7 = vmul.f32 %v6055_v16, %v6052_v56  ;;  %v3176_v25 = vmul.f32 %v6055_v16, %v6053_v57  ;;  %v10874_v10 = vadd.f32 %v3147_v61, %v10743_v31  ;;  %v10877_v44 = vadd.f32 %v3148_v37, %v10746_v30  ;;  %v6056_v19 = vld [vmem:[%s6757_s17 + $0x62] sm:$0xff]  ;;  %v6060_v55 = vld [vmem:[%s6757_s17 + $0x92] sm:$0xff]  ;;  %v6061_v18 = vld [vmem:[%s6757_s17 + $0x9a] sm:$0xff] }
 0x23e   : > { %v10880_v54 = vadd.f32 %v3149_v21, %v10749_v38  ;;  %v10883_v57 = vadd.f32 %v3150_v40, %v10752_v5  ;;  %v10886_v8 = vadd.f32 %v3151_v32, %v10755_v41  ;;  %v10889_v11 = vadd.f32 %v3152_v6, %v10758_v39  ;;  %v6062_v61 = vld [vmem:[%s6757_s17 + $0xaa] sm:$0xff]  ;;  %v6063_v37 = vld [vmem:[%s6757_s17 + $0xb2] sm:$0xff]  ;;  %v14374_v47 = vld [vmem:[#allocation2_spill] sm:$0xff] }
 0x23f   : > { %v10892_v31 = vadd.f32 %v3153_v27, %v10761_v24  ;;  %v10895_v30 = vadd.f32 %v3154_v22, %v10764_v60  ;;  %v10898_v38 = vadd.f32 %v3155_v50, %v10767_v3  ;;  %v10901_v5 = vadd.f32 %v3156_v42, %v10770_v43  ;;  %v14360_v24 = vld [vmem:[#allocation13_spill] sm:$0xff]  ;;  %v14362_v60 = vld [vmem:[#allocation14_spill] sm:$0xff]  ;;  %v6057_v3 = vld [vmem:[%s6757_s17 + $0x6a] sm:$0xff] }
 0x240   : > { %v10904_v41 = vadd.f32 %v3157_v53, %v10773_v17  ;;  %v10907_v39 = vadd.f32 %v3158_v59, %v10776_v2  ;;  %v10910_v16 = vadd.f32 %v3159_v12, %v14360_v24  ;;  %v10913_v33 = vadd.f32 %v3160_v9, %v14362_v60  ;;  %v6059_v43 = vld [vmem:[%s6757_s17 + $0x82] sm:$0xff]  ;;  %v14366_v17 = vld [vmem:[#allocation16_spill] sm:$0xff]  ;;  %v14368_v2 = vld [vmem:[#allocation17_spill] sm:$0xff] }
 0x241   : > { %v14364_v42 = vld [vmem:[#allocation15_spill] sm:$0xff]  ;;  %v10923_v53 = vadd.f32 %v3162_v35, %v14366_v17  ;;  %v10926_v59 = vadd.f32 %v3163_v63, %v14368_v2  ;;  %v14370_v12 = vld [vmem:[#allocation18_spill] sm:$0xff]  ;;  %v10939_v21 = vadd.f32 %v3166_v62, %v14374_v47  ;;  %v14378_v63 = vld [vmem:[#allocation4_spill] sm:$0xff] }
 0x242   : > { %14361 = vst [vmem:[#allocation13_spill] sm:$0xff] %v10910_v16  ;;  %14363 = vst [vmem:[#allocation14_spill] sm:$0xff] %v10913_v33  ;;  %v10920_v15 = vadd.f32 %v3161_v49, %v14364_v42  ;;  %v10929_v51 = vadd.f32 %v3164_v20, %v14370_v12  ;;  %v14372_v26 = vld [vmem:[#allocation19_spill] sm:$0xff]  ;;  %v10945_v32 = vadd.f32 %v3168_v1, %v14378_v63  ;;  %v6066_v27 = vld [vmem:[%s6757_s17 + $0xda] sm:$0xff] }
 0x243   : > { %14367 = vst [vmem:[#allocation16_spill] sm:$0xff] %v10923_v53  ;;  %14369 = vst [vmem:[#allocation17_spill] sm:$0xff] %v10926_v59  ;;  %v10936_v14 = vadd.f32 %v3165_v28, %v14372_v26  ;;  %v14376_v35 = vld [vmem:[#allocation3_spill] sm:$0xff]  ;;  %v6089_v28 = vld [vmem:[%s13465_s1 + $0x22] ss:$0 sm:$0xff] }
 0x244   : > { %14365 = vst [vmem:[#allocation15_spill] sm:$0xff] %v10920_v15  ;;  %14371 = vst [vmem:[#allocation18_spill] sm:$0xff] %v10929_v51  ;;  %v10942_v40 = vadd.f32 %v3167_v29, %v14376_v35  ;;  %v6064_v20 = vld [vmem:[%s6757_s17 + $0xc2] sm:$0xff]  ;;  %v6065_v6 = vld [vmem:[%s6757_s17 + $0xca] sm:$0xff] }
 0x245   : > { %14373 = vst [vmem:[#allocation19_spill] sm:$0xff] %v10936_v14  ;;  %14375 = vst [vmem:[#allocation2_spill] sm:$0xff] %v10939_v21  ;;  %v14380_v22 = vld [vmem:[#allocation5_spill] sm:$0xff]  ;;  %v14382_v50 = vld [vmem:[#allocation6_spill] sm:$0xff] }
 0x246   : > { %14377 = vst [vmem:[#allocation3_spill] sm:$0xff] %v10942_v40  ;;  %14379 = vst [vmem:[#allocation4_spill] sm:$0xff] %v10945_v32  ;;  %v10954_v62 = vadd.f32 %v3169_v34, %v14380_v22  ;;  %v10957_v0 = vadd.f32 %v3170_v46, %v14382_v50  ;;  %v14384_v9 = vld [vmem:[#allocation7_spill] sm:$0xff]  ;;  %v14386_v56 = vld [vmem:[#allocation8_spill] sm:$0xff]  ;;  %v3246_v22 = vmul.f32 %v6089_v28, %v6056_v19 }
 0x247   : > { %v10960_v45 = vadd.f32 %v3171_v58, %v14384_v9  ;;  %v10963_v49 = vadd.f32 %v3172_v48, %v14386_v56  ;;  %v6067_v29 = vld [vmem:[%s6757_s17 + $0xe2] sm:$0xff]  ;;  %v6068_v1 = vld [vmem:[%s6757_s17 + $0xf2] sm:$0xff]  ;;  %v6069_v24 = vld [vmem:[%s6757_s17 + $0xfa] sm:$0xff]  ;;  %v3247_v50 = vmul.f32 %v6089_v28, %v6057_v3  ;;  %v3248_v9 = vmul.f32 %v6089_v28, %v6058_v36 }
 0x248   : > { %14381 = vst [vmem:[#allocation5_spill] sm:$0xff] %v10954_v62  ;;  %14383 = vst [vmem:[#allocation6_spill] sm:$0xff] %v10957_v0  ;;  %v14388_v60 = vld [vmem:[#allocation9_spill] sm:$0xff]  ;;  %v14390_v34 = vld [vmem:[#allocation10_spill] sm:$0xff]  ;;  %v3254_v19 = vmul.f32 %v6089_v28, %v6064_v20  ;;  %v3255_v3 = vmul.f32 %v6089_v28, %v6065_v6  ;;  %v3256_v36 = vmul.f32 %v6089_v28, %v6066_v27 }
 0x249   : > { %14385 = vst [vmem:[#allocation7_spill] sm:$0xff] %v10960_v45  ;;  %14387 = vst [vmem:[#allocation8_spill] sm:$0xff] %v10963_v49  ;;  %v10969_v42 = vadd.f32 %v3173_v52, %v14388_v60  ;;  %v10972_v17 = vadd.f32 %v3174_v23, %v14390_v34  ;;  %v14392_v46 = vld [vmem:[#allocation11_spill] sm:$0xff]  ;;  %v14394_v58 = vld [vmem:[#allocation12_spill] sm:$0xff]  ;;  %v3249_v23 = vmul.f32 %v6089_v28, %v6059_v43 }
 0x24a   : > { %v10975_v2 = vadd.f32 %v3175_v7, %v14392_v46  ;;  %v10978_v12 = vadd.f32 %v3176_v25, %v14394_v58  ;;  %v6070_v48 = vld [vmem:[%s6757_s17 + $0x10a] sm:$0xff]  ;;  %v6071_v26 = vld [vmem:[%s6757_s17 + $0x112] sm:$0xff]  ;;  %v6072_v47 = vld [vmem:[%s6757_s17 + $0x122] sm:$0xff]  ;;  %v3250_v60 = vmul.f32 %v6089_v28, %v6060_v55  ;;  %v3251_v34 = vmul.f32 %v6089_v28, %v6061_v18 }
 0x24b   : > { %14389 = vst [vmem:[#allocation9_spill] sm:$0xff] %v10969_v42  ;;  %14391 = vst [vmem:[#allocation10_spill] sm:$0xff] %v10972_v17  ;;  %v6073_v35 = vld [vmem:[%s6757_s17 + $0x12a] sm:$0xff]  ;;  %v6074_v63 = vld [vmem:[%s6757_s17 + $0x13a] sm:$0xff]  ;;  %v3252_v46 = vmul.f32 %v6089_v28, %v6062_v61  ;;  %v3253_v58 = vmul.f32 %v6089_v28, %v6063_v37  ;;  %v3257_v42 = vmul.f32 %v6089_v28, %v6067_v29 }
 0x24c   : > { %14393 = vst [vmem:[#allocation11_spill] sm:$0xff] %v10975_v2  ;;  %14395 = vst [vmem:[#allocation12_spill] sm:$0xff] %v10978_v12  ;;  %v6075_v52 = vld [vmem:[%s6757_s17 + $0x142] sm:$0xff]  ;;  %v6076_v7 = vld [vmem:[%s6757_s17 + $0x152] sm:$0xff]  ;;  %v3258_v0 = vmul.f32 %v6089_v28, %v6068_v1  ;;  %v3259_v62 = vmul.f32 %v6089_v28, %v6069_v24  ;;  %v3260_v32 = vmul.f32 %v6089_v28, %v6070_v48 }
 0x24d   : > { %v6077_v56 = vld [vmem:[%s6757_s17 + $0x15a] sm:$0xff]  ;;  %v6078_v25 = vld [vmem:[%s6757_s17 + $0x16a] sm:$0xff]  ;;  %v6079_v12 = vld [vmem:[%s6757_s17 + $0x172] sm:$0xff]  ;;  %v3261_v55 = vmul.f32 %v6089_v28, %v6071_v26  ;;  %v3262_v37 = vmul.f32 %v6089_v28, %v6072_v47  ;;  %v3263_v21 = vmul.f32 %v6089_v28, %v6073_v35  ;;  %v3264_v14 = vmul.f32 %v6089_v28, %v6074_v63 }
 0x24e   : > { %v6080_v2 = vld [vmem:[%s6757_s17 + $0x182] sm:$0xff]  ;;  %v6081_v17 = vld [vmem:[%s6757_s17 + $0x18a] sm:$0xff]  ;;  %v6082_v43 = vld [vmem:[%s6757_s17 + $0x19a] sm:$0xff]  ;;  %v3265_v51 = vmul.f32 %v6089_v28, %v6075_v52  ;;  %v3266_v59 = vmul.f32 %v6089_v28, %v6076_v7  ;;  %v3267_v53 = vmul.f32 %v6089_v28, %v6077_v56  ;;  %v3268_v20 = vmul.f32 %v6089_v28, %v6078_v25 }
 0x24f   : > { %v6083_v49 = vld [vmem:[%s6757_s17 + $0x1a2] sm:$0xff]  ;;  %v6084_v45 = vld [vmem:[%s6757_s17 + $0x1b2] sm:$0xff]  ;;  %v6085_v18 = vld [vmem:[%s6757_s17 + $0x1ba] sm:$0xff]  ;;  %v3269_v6 = vmul.f32 %v6089_v28, %v6079_v12  ;;  %v3270_v27 = vmul.f32 %v6089_v28, %v6080_v2  ;;  %v3271_v29 = vmul.f32 %v6089_v28, %v6081_v17  ;;  %v3272_v15 = vmul.f32 %v6089_v28, %v6082_v43 }
 0x250   : > { %v6086_v61 = vld [vmem:[%s6757_s17 + $0x1ca] sm:$0xff]  ;;  %v6087_v40 = vld [vmem:[%s6757_s17 + $0x1d2] sm:$0xff]  ;;  %v3273_v33 = vmul.f32 %v6089_v28, %v6083_v49  ;;  %v3274_v16 = vmul.f32 %v6089_v28, %v6084_v45  ;;  %v3275_v1 = vmul.f32 %v6089_v28, %v6085_v18  ;;  %v10999_v26 = vadd.f32 %v3246_v22, %v10868_v4  ;;  %v6092_v12 = vld [vmem:[%s6757_s17 + $0x7b] sm:$0xff] }
 0x251   : > { %v3276_v24 = vmul.f32 %v6089_v28, %v6086_v61  ;;  %v3277_v48 = vmul.f32 %v6089_v28, %v6087_v40  ;;  %v11002_v47 = vadd.f32 %v3247_v50, %v10871_v13  ;;  %v11005_v35 = vadd.f32 %v3248_v9, %v10874_v10  ;;  %v6090_v2 = vld [vmem:[%s6757_s17 + $0x63] sm:$0xff]  ;;  %v6094_v22 = vld [vmem:[%s6757_s17 + $0x93] sm:$0xff]  ;;  %v6095_v50 = vld [vmem:[%s6757_s17 + $0x9b] sm:$0xff] }
 0x252   : > { %v11008_v17 = vadd.f32 %v3249_v23, %v10877_v44  ;;  %v11011_v45 = vadd.f32 %v3250_v60, %v10880_v54  ;;  %v11014_v40 = vadd.f32 %v3251_v34, %v10883_v57  ;;  %v11017_v4 = vadd.f32 %v3252_v46, %v10886_v8  ;;  %v6096_v9 = vld [vmem:[%s6757_s17 + $0xab] sm:$0xff]  ;;  %v6097_v23 = vld [vmem:[%s6757_s17 + $0xb3] sm:$0xff]  ;;  %v14410_v25 = vld [vmem:[#allocation2_spill] sm:$0xff] }
 0x253   : > { %v11020_v13 = vadd.f32 %v3253_v58, %v10889_v11  ;;  %v11023_v10 = vadd.f32 %v3254_v19, %v10892_v31  ;;  %v11026_v44 = vadd.f32 %v3255_v3, %v10895_v30  ;;  %v11029_v54 = vadd.f32 %v3256_v36, %v10898_v38  ;;  %v14396_v31 = vld [vmem:[#allocation13_spill] sm:$0xff]  ;;  %v14398_v30 = vld [vmem:[#allocation14_spill] sm:$0xff]  ;;  %v6091_v38 = vld [vmem:[%s6757_s17 + $0x6b] sm:$0xff] }
 0x254   : > { %v11032_v57 = vadd.f32 %v3257_v42, %v10901_v5  ;;  %v11035_v8 = vadd.f32 %v3258_v0, %v10904_v41  ;;  %v11038_v11 = vadd.f32 %v3259_v62, %v10907_v39  ;;  %v11041_v28 = vadd.f32 %v3260_v32, %v14396_v31  ;;  %v6093_v5 = vld [vmem:[%s6757_s17 + $0x83] sm:$0xff]  ;;  %v14402_v41 = vld [vmem:[#allocation16_spill] sm:$0xff]  ;;  %v14404_v39 = vld [vmem:[#allocation17_spill] sm:$0xff] }
 0x255   : > { %v11044_v49 = vadd.f32 %v3261_v55, %v14398_v30  ;;  %v14400_v42 = vld [vmem:[#allocation15_spill] sm:$0xff]  ;;  %v11054_v0 = vadd.f32 %v3263_v21, %v14402_v41  ;;  %v11057_v62 = vadd.f32 %v3264_v14, %v14404_v39  ;;  %v14406_v32 = vld [vmem:[#allocation18_spill] sm:$0xff]  ;;  %v11070_v60 = vadd.f32 %v3267_v53, %v14410_v25  ;;  %v14414_v14 = vld [vmem:[#allocation4_spill] sm:$0xff] }
 0x256   : > { %14397 = vst [vmem:[#allocation13_spill] sm:$0xff] %v11041_v28  ;;  %v11051_v63 = vadd.f32 %v3262_v37, %v14400_v42  ;;  %v11060_v52 = vadd.f32 %v3265_v51, %v14406_v32  ;;  %v14408_v7 = vld [vmem:[#allocation19_spill] sm:$0xff]  ;;  %v11076_v46 = vadd.f32 %v3269_v6, %v14414_v14  ;;  %v6100_v19 = vld [vmem:[%s6757_s17 + $0xdb] sm:$0xff]  ;;  %v14422_v61 = vld [vmem:[#allocation8_spill] sm:$0xff] }
 0x257   : > { %14399 = vst [vmem:[#allocation14_spill] sm:$0xff] %v11044_v49  ;;  %14403 = vst [vmem:[#allocation16_spill] sm:$0xff] %v11054_v0  ;;  %v11067_v56 = vadd.f32 %v3266_v59, %v14408_v7  ;;  %v14412_v21 = vld [vmem:[#allocation3_spill] sm:$0xff]  ;;  %v6123_v59 = vld [vmem:[%s13465_s1 + $0x23] ss:$0 sm:$0xff]  ;;  %v11094_v37 = vadd.f32 %v3273_v33, %v14422_v61 }
 0x258   : > { %14401 = vst [vmem:[#allocation15_spill] sm:$0xff] %v11051_v63  ;;  %14405 = vst [vmem:[#allocation17_spill] sm:$0xff] %v11057_v62  ;;  %v11073_v34 = vadd.f32 %v3268_v20, %v14412_v21  ;;  %v6098_v51 = vld [vmem:[%s6757_s17 + $0xc3] sm:$0xff]  ;;  %v6099_v58 = vld [vmem:[%s6757_s17 + $0xcb] sm:$0xff] }
 0x259   : > { %14407 = vst [vmem:[#allocation18_spill] sm:$0xff] %v11060_v52  ;;  %14409 = vst [vmem:[#allocation19_spill] sm:$0xff] %v11067_v56  ;;  %v14416_v3 = vld [vmem:[#allocation5_spill] sm:$0xff]  ;;  %v14418_v36 = vld [vmem:[#allocation6_spill] sm:$0xff] }
 0x25a   : > { %14411 = vst [vmem:[#allocation2_spill] sm:$0xff] %v11070_v60  ;;  %14413 = vst [vmem:[#allocation3_spill] sm:$0xff] %v11073_v34  ;;  %v11085_v53 = vadd.f32 %v3270_v27, %v14416_v3  ;;  %v11088_v43 = vadd.f32 %v3271_v29, %v14418_v36  ;;  %v14420_v55 = vld [vmem:[#allocation7_spill] sm:$0xff]  ;;  %v6102_v6 = vld [vmem:[%s6757_s17 + $0xf3] sm:$0xff]  ;;  %v3347_v3 = vmul.f32 %v6123_v59, %v6090_v2 }
 0x25b   : > { %14415 = vst [vmem:[#allocation4_spill] sm:$0xff] %v11076_v46  ;;  %v11091_v18 = vadd.f32 %v3272_v15, %v14420_v55  ;;  %14423 = vst [vmem:[#allocation8_spill] sm:$0xff] %v11094_v37  ;;  %v6101_v20 = vld [vmem:[%s6757_s17 + $0xe3] sm:$0xff]  ;;  %v6103_v31 = vld [vmem:[%s6757_s17 + $0xfb] sm:$0xff]  ;;  %v3348_v36 = vmul.f32 %v6123_v59, %v6091_v38  ;;  %v3349_v55 = vmul.f32 %v6123_v59, %v6092_v12 }
 0x25c   : > { %14417 = vst [vmem:[#allocation5_spill] sm:$0xff] %v11085_v53  ;;  %14419 = vst [vmem:[#allocation6_spill] sm:$0xff] %v11088_v43  ;;  %v14424_v30 = vld [vmem:[#allocation9_spill] sm:$0xff]  ;;  %v14426_v27 = vld [vmem:[#allocation10_spill] sm:$0xff]  ;;  %v3355_v2 = vmul.f32 %v6123_v59, %v6098_v51  ;;  %v3356_v38 = vmul.f32 %v6123_v59, %v6099_v58  ;;  %v3357_v12 = vmul.f32 %v6123_v59, %v6100_v19 }
 0x25d   : > { %14421 = vst [vmem:[#allocation7_spill] sm:$0xff] %v11091_v18  ;;  %v11100_v42 = vadd.f32 %v3274_v16, %v14424_v30  ;;  %v11103_v41 = vadd.f32 %v3275_v1, %v14426_v27  ;;  %v14428_v29 = vld [vmem:[#allocation11_spill] sm:$0xff]  ;;  %v14430_v15 = vld [vmem:[#allocation12_spill] sm:$0xff]  ;;  %v6108_v14 = vld [vmem:[%s6757_s17 + $0x13b] sm:$0xff]  ;;  %v3350_v1 = vmul.f32 %v6123_v59, %v6093_v5  ;;  %v3351_v30 = vmul.f32 %v6123_v59, %v6094_v22 }
 0x25e   : > { %v11106_v39 = vadd.f32 %v3276_v24, %v14428_v29  ;;  %v11109_v32 = vadd.f32 %v3277_v48, %v14430_v15  ;;  %v6104_v33 = vld [vmem:[%s6757_s17 + $0x10b] sm:$0xff]  ;;  %v6105_v7 = vld [vmem:[%s6757_s17 + $0x113] sm:$0xff]  ;;  %v6106_v25 = vld [vmem:[%s6757_s17 + $0x123] sm:$0xff]  ;;  %v3352_v27 = vmul.f32 %v6123_v59, %v6095_v50  ;;  %v3353_v29 = vmul.f32 %v6123_v59, %v6096_v9 }
 0x25f   : > { %14425 = vst [vmem:[#allocation9_spill] sm:$0xff] %v11100_v42  ;;  %14427 = vst [vmem:[#allocation10_spill] sm:$0xff] %v11103_v41  ;;  %v6107_v21 = vld [vmem:[%s6757_s17 + $0x12b] sm:$0xff]  ;;  %v6109_v16 = vld [vmem:[%s6757_s17 + $0x143] sm:$0xff]  ;;  %v3354_v15 = vmul.f32 %v6123_v59, %v6097_v23  ;;  %v3358_v42 = vmul.f32 %v6123_v59, %v6101_v20  ;;  %v3359_v43 = vmul.f32 %v6123_v59, %v6102_v6 }
 0x260   : > { %14429 = vst [vmem:[#allocation11_spill] sm:$0xff] %v11106_v39  ;;  %14431 = vst [vmem:[#allocation12_spill] sm:$0xff] %v11109_v32  ;;  %v6110_v24 = vld [vmem:[%s6757_s17 + $0x153] sm:$0xff]  ;;  %v6111_v61 = vld [vmem:[%s6757_s17 + $0x15b] sm:$0xff]  ;;  %v3360_v53 = vmul.f32 %v6123_v59, %v6103_v31  ;;  %v3361_v46 = vmul.f32 %v6123_v59, %v6104_v33  ;;  %v3362_v22 = vmul.f32 %v6123_v59, %v6105_v7 }
 0x261   : > { %v6112_v48 = vld [vmem:[%s6757_s17 + $0x16b] sm:$0xff]  ;;  %v6113_v32 = vld [vmem:[%s6757_s17 + $0x173] sm:$0xff]  ;;  %v6114_v39 = vld [vmem:[%s6757_s17 + $0x183] sm:$0xff]  ;;  %v3363_v23 = vmul.f32 %v6123_v59, %v6106_v25  ;;  %v3364_v60 = vmul.f32 %v6123_v59, %v6107_v21  ;;  %v3365_v56 = vmul.f32 %v6123_v59, %v6108_v14  ;;  %v3366_v52 = vmul.f32 %v6123_v59, %v6109_v16 }
 0x262   : > { %v6115_v41 = vld [vmem:[%s6757_s17 + $0x18b] sm:$0xff]  ;;  %v6116_v5 = vld [vmem:[%s6757_s17 + $0x19b] sm:$0xff]  ;;  %v6117_v37 = vld [vmem:[%s6757_s17 + $0x1a3] sm:$0xff]  ;;  %v3367_v62 = vmul.f32 %v6123_v59, %v6110_v24  ;;  %v3368_v0 = vmul.f32 %v6123_v59, %v6111_v61  ;;  %v3369_v51 = vmul.f32 %v6123_v59, %v6112_v48  ;;  %v3370_v58 = vmul.f32 %v6123_v59, %v6113_v32 }
 0x263   : > { %v6118_v18 = vld [vmem:[%s6757_s17 + $0x1b3] sm:$0xff]  ;;  %v6119_v50 = vld [vmem:[%s6757_s17 + $0x1bb] sm:$0xff]  ;;  %v6120_v9 = vld [vmem:[%s6757_s17 + $0x1cb] sm:$0xff]  ;;  %v3371_v19 = vmul.f32 %v6123_v59, %v6114_v39  ;;  %v3372_v20 = vmul.f32 %v6123_v59, %v6115_v41  ;;  %v3373_v63 = vmul.f32 %v6123_v59, %v6116_v5  ;;  %v3374_v49 = vmul.f32 %v6123_v59, %v6117_v37 }
 0x264   : > { %v6121_v34 = vld [vmem:[%s6757_s17 + $0x1d3] sm:$0xff]  ;;  %v3375_v28 = vmul.f32 %v6123_v59, %v6118_v18  ;;  %v3376_v6 = vmul.f32 %v6123_v59, %v6119_v50  ;;  %v3377_v31 = vmul.f32 %v6123_v59, %v6120_v9  ;;  %v11130_v7 = vadd.f32 %v3347_v3, %v10999_v26  ;;  %v6124_v39 = vld [vmem:[%s6757_s17 + $0x64] sm:$0xff]  ;;  %v6126_v32 = vld [vmem:[%s6757_s17 + $0x7c] sm:$0xff] }
 0x265   : > { %v3378_v33 = vmul.f32 %v6123_v59, %v6121_v34  ;;  %v11133_v25 = vadd.f32 %v3348_v36, %v11002_v47  ;;  %v11136_v21 = vadd.f32 %v3349_v55, %v11005_v35  ;;  %v11139_v41 = vadd.f32 %v3350_v1, %v11008_v17  ;;  %v6128_v3 = vld [vmem:[%s6757_s17 + $0x94] sm:$0xff]  ;;  %v6129_v36 = vld [vmem:[%s6757_s17 + $0x9c] sm:$0xff]  ;;  %v6130_v55 = vld [vmem:[%s6757_s17 + $0xac] sm:$0xff] }
 0x266   : > { %v11142_v18 = vadd.f32 %v3351_v30, %v11011_v45  ;;  %v11145_v34 = vadd.f32 %v3352_v27, %v11014_v40  ;;  %v11148_v26 = vadd.f32 %v3353_v29, %v11017_v4  ;;  %v11151_v47 = vadd.f32 %v3354_v15, %v11020_v13  ;;  %v6131_v1 = vld [vmem:[%s6757_s17 + $0xb4] sm:$0xff]  ;;  %v14444_v24 = vld [vmem:[#allocation19_spill] sm:$0xff]  ;;  %v14446_v48 = vld [vmem:[#allocation2_spill] sm:$0xff] }
 0x267   : > { %v11154_v35 = vadd.f32 %v3355_v2, %v11023_v10  ;;  %v11157_v17 = vadd.f32 %v3356_v38, %v11026_v44  ;;  %v11160_v45 = vadd.f32 %v3357_v12, %v11029_v54  ;;  %v11163_v40 = vadd.f32 %v3358_v42, %v11032_v57  ;;  %v14432_v10 = vld [vmem:[#allocation13_spill] sm:$0xff]  ;;  %v14434_v44 = vld [vmem:[#allocation14_spill] sm:$0xff]  ;;  %v6125_v54 = vld [vmem:[%s6757_s17 + $0x6c] sm:$0xff] }
 0x268   : > { %v11166_v4 = vadd.f32 %v3359_v43, %v11035_v8  ;;  %v11169_v13 = vadd.f32 %v3360_v53, %v11038_v11  ;;  %v11172_v59 = vadd.f32 %v3361_v46, %v14432_v10  ;;  %v11175_v37 = vadd.f32 %v3362_v22, %v14434_v44  ;;  %v6127_v57 = vld [vmem:[%s6757_s17 + $0x84] sm:$0xff]  ;;  %v14438_v8 = vld [vmem:[#allocation16_spill] sm:$0xff]  ;;  %v14440_v11 = vld [vmem:[#allocation17_spill] sm:$0xff] }
 0x269   : > { %v14436_v42 = vld [vmem:[#allocation15_spill] sm:$0xff]  ;;  %v11185_v43 = vadd.f32 %v3364_v60, %v14438_v8  ;;  %v11188_v53 = vadd.f32 %v3365_v56, %v14440_v11  ;;  %v14442_v46 = vld [vmem:[#allocation18_spill] sm:$0xff]  ;;  %v11198_v61 = vadd.f32 %v3367_v62, %v14444_v24  ;;  %v11201_v30 = vadd.f32 %v3368_v0, %v14446_v48  ;;  %v14450_v56 = vld [vmem:[#allocation4_spill] sm:$0xff] }
 0x26a   : > { %14433 = vst [vmem:[#allocation13_spill] sm:$0xff] %v11172_v59  ;;  %14435 = vst [vmem:[#allocation14_spill] sm:$0xff] %v11175_v37  ;;  %v11182_v14 = vadd.f32 %v3363_v23, %v14436_v42  ;;  %v11191_v16 = vadd.f32 %v3366_v52, %v14442_v46  ;;  %v14448_v60 = vld [vmem:[#allocation3_spill] sm:$0xff]  ;;  %v11207_v29 = vadd.f32 %v3370_v58, %v14450_v56  ;;  %v6134_v2 = vld [vmem:[%s6757_s17 + $0xdc] sm:$0xff] }
 0x26b   : > { %14439 = vst [vmem:[#allocation16_spill] sm:$0xff] %v11185_v43  ;;  %14441 = vst [vmem:[#allocation17_spill] sm:$0xff] %v11188_v53  ;;  %v11204_v27 = vadd.f32 %v3369_v51, %v14448_v60  ;;  %v6132_v52 = vld [vmem:[%s6757_s17 + $0xc4] sm:$0xff]  ;;  %v6133_v15 = vld [vmem:[%s6757_s17 + $0xcc] sm:$0xff] }
 0x26c   : > { %14437 = vst [vmem:[#allocation15_spill] sm:$0xff] %v11182_v14  ;;  %14443 = vst [vmem:[#allocation18_spill] sm:$0xff] %v11191_v16  ;;  %v6157_v62 = vld [vmem:[%s13465_s1 + $0x24] ss:$0 sm:$0xff]  ;;  %v14452_v38 = vld [vmem:[#allocation5_spill] sm:$0xff] }
 0x26d   : > { %14445 = vst [vmem:[#allocation19_spill] sm:$0xff] %v11198_v61  ;;  %14447 = vst [vmem:[#allocation2_spill] sm:$0xff] %v11201_v30  ;;  %v11216_v0 = vadd.f32 %v3371_v19, %v14452_v38  ;;  %v14454_v12 = vld [vmem:[#allocation6_spill] sm:$0xff]  ;;  %v14456_v22 = vld [vmem:[#allocation7_spill] sm:$0xff]  ;;  %v3448_v38 = vmul.f32 %v6157_v62, %v6124_v39  ;;  %v3456_v39 = vmul.f32 %v6157_v62, %v6132_v52 }
 0x26e   : > { %14449 = vst [vmem:[#allocation3_spill] sm:$0xff] %v11204_v27  ;;  %14451 = vst [vmem:[#allocation4_spill] sm:$0xff] %v11207_v29  ;;  %v11219_v5 = vadd.f32 %v3372_v20, %v14454_v12  ;;  %v11222_v50 = vadd.f32 %v3373_v63, %v14456_v22  ;;  %v14458_v9 = vld [vmem:[#allocation8_spill] sm:$0xff]  ;;  %v6135_v51 = vld [vmem:[%s6757_s17 + $0xe4] sm:$0xff]  ;;  %v3449_v12 = vmul.f32 %v6157_v62, %v6125_v54 }
 0x26f   : > { %14453 = vst [vmem:[#allocation5_spill] sm:$0xff] %v11216_v0  ;;  %v11225_v23 = vadd.f32 %v3374_v49, %v14458_v9  ;;  %v6136_v58 = vld [vmem:[%s6757_s17 + $0xf4] sm:$0xff]  ;;  %v6137_v10 = vld [vmem:[%s6757_s17 + $0xfc] sm:$0xff]  ;;  %v14464_v20 = vld [vmem:[#allocation11_spill] sm:$0xff]  ;;  %v3450_v22 = vmul.f32 %v6157_v62, %v6126_v32  ;;  %v3457_v54 = vmul.f32 %v6157_v62, %v6133_v15  ;;  %v3458_v32 = vmul.f32 %v6157_v62, %v6134_v2 }
 0x270   : > { %14455 = vst [vmem:[#allocation6_spill] sm:$0xff] %v11219_v5  ;;  %14457 = vst [vmem:[#allocation7_spill] sm:$0xff] %v11222_v50  ;;  %v14460_v44 = vld [vmem:[#allocation9_spill] sm:$0xff]  ;;  %v14462_v19 = vld [vmem:[#allocation10_spill] sm:$0xff]  ;;  %v11237_v11 = vadd.f32 %v3377_v31, %v14464_v20  ;;  %v3454_v20 = vmul.f32 %v6157_v62, %v6130_v55  ;;  %v3460_v5 = vmul.f32 %v6157_v62, %v6136_v58 }
 0x271   : > { %14459 = vst [vmem:[#allocation8_spill] sm:$0xff] %v11225_v23  ;;  %v11231_v42 = vadd.f32 %v3375_v28, %v14460_v44  ;;  %v11234_v8 = vadd.f32 %v3376_v6, %v14462_v19  ;;  %v14466_v63 = vld [vmem:[#allocation12_spill] sm:$0xff]  ;;  %v6140_v48 = vld [vmem:[%s6757_s17 + $0x124] sm:$0xff]  ;;  %v6142_v56 = vld [vmem:[%s6757_s17 + $0x13c] sm:$0xff]  ;;  %v3451_v6 = vmul.f32 %v6157_v62, %v6127_v57  ;;  %v3452_v44 = vmul.f32 %v6157_v62, %v6128_v3 }
 0x272   : > { %14465 = vst [vmem:[#allocation11_spill] sm:$0xff] %v11237_v11  ;;  %v11240_v46 = vadd.f32 %v3378_v33, %v14466_v63  ;;  %v6138_v49 = vld [vmem:[%s6757_s17 + $0x10c] sm:$0xff]  ;;  %v6139_v24 = vld [vmem:[%s6757_s17 + $0x114] sm:$0xff]  ;;  %v6143_v28 = vld [vmem:[%s6757_s17 + $0x144] sm:$0xff]  ;;  %v3453_v19 = vmul.f32 %v6157_v62, %v6129_v36  ;;  %v3455_v63 = vmul.f32 %v6157_v62, %v6131_v1  ;;  %v3461_v0 = vmul.f32 %v6157_v62, %v6137_v10 }
 0x273   : > { %14461 = vst [vmem:[#allocation9_spill] sm:$0xff] %v11231_v42  ;;  %14463 = vst [vmem:[#allocation10_spill] sm:$0xff] %v11234_v8  ;;  %v6141_v60 = vld [vmem:[%s6757_s17 + $0x12c] sm:$0xff]  ;;  %v6144_v31 = vld [vmem:[%s6757_s17 + $0x154] sm:$0xff]  ;;  %v3459_v42 = vmul.f32 %v6157_v62, %v6135_v51  ;;  %v3462_v29 = vmul.f32 %v6157_v62, %v6138_v49  ;;  %v3463_v3 = vmul.f32 %v6157_v62, %v6139_v24 }
 0x274   : > { %14467 = vst [vmem:[#allocation12_spill] sm:$0xff] %v11240_v46  ;;  %v6145_v9 = vld [vmem:[%s6757_s17 + $0x15c] sm:$0xff]  ;;  %v6146_v33 = vld [vmem:[%s6757_s17 + $0x16c] sm:$0xff]  ;;  %v6147_v46 = vld [vmem:[%s6757_s17 + $0x174] sm:$0xff]  ;;  %v3464_v1 = vmul.f32 %v6157_v62, %v6140_v48  ;;  %v3465_v30 = vmul.f32 %v6157_v62, %v6141_v60  ;;  %v3466_v61 = vmul.f32 %v6157_v62, %v6142_v56  ;;  %v3467_v16 = vmul.f32 %v6157_v62, %v6143_v28 }
 0x275   : > { %v6148_v11 = vld [vmem:[%s6757_s17 + $0x184] sm:$0xff]  ;;  %v6149_v8 = vld [vmem:[%s6757_s17 + $0x18c] sm:$0xff]  ;;  %v6150_v57 = vld [vmem:[%s6757_s17 + $0x19c] sm:$0xff]  ;;  %v3468_v53 = vmul.f32 %v6157_v62, %v6144_v31  ;;  %v3469_v43 = vmul.f32 %v6157_v62, %v6145_v9  ;;  %v3470_v52 = vmul.f32 %v6157_v62, %v6146_v33  ;;  %v3471_v15 = vmul.f32 %v6157_v62, %v6147_v46 }
 0x276   : > { %v6151_v23 = vld [vmem:[%s6757_s17 + $0x1a4] sm:$0xff]  ;;  %v6152_v50 = vld [vmem:[%s6757_s17 + $0x1b4] sm:$0xff]  ;;  %v6153_v36 = vld [vmem:[%s6757_s17 + $0x1bc] sm:$0xff]  ;;  %v3472_v2 = vmul.f32 %v6157_v62, %v6148_v11  ;;  %v3473_v51 = vmul.f32 %v6157_v62, %v6149_v8  ;;  %v3474_v14 = vmul.f32 %v6157_v62, %v6150_v57  ;;  %v11261_v24 = vadd.f32 %v3448_v38, %v11130_v7 }
 0x277   : > { %v6154_v55 = vld [vmem:[%s6757_s17 + $0x1cc] sm:$0xff]  ;;  %v6155_v27 = vld [vmem:[%s6757_s17 + $0x1d4] sm:$0xff]  ;;  %v3475_v37 = vmul.f32 %v6157_v62, %v6151_v23  ;;  %v3476_v59 = vmul.f32 %v6157_v62, %v6152_v50  ;;  %v3477_v58 = vmul.f32 %v6157_v62, %v6153_v36  ;;  %v11264_v48 = vadd.f32 %v3449_v12, %v11133_v25  ;;  %v6160_v46 = vld [vmem:[%s6757_s17 + $0x7d] sm:$0xff] }
 0x278   : > { %v3478_v10 = vmul.f32 %v6157_v62, %v6154_v55  ;;  %v3479_v49 = vmul.f32 %v6157_v62, %v6155_v27  ;;  %v11267_v60 = vadd.f32 %v3450_v22, %v11136_v21  ;;  %v11270_v8 = vadd.f32 %v3451_v6, %v11139_v41  ;;  %v6158_v11 = vld [vmem:[%s6757_s17 + $0x65] sm:$0xff]  ;;  %v6162_v38 = vld [vmem:[%s6757_s17 + $0x95] sm:$0xff]  ;;  %v6163_v12 = vld [vmem:[%s6757_s17 + $0x9d] sm:$0xff] }
 0x279   : > { %v11273_v50 = vadd.f32 %v3452_v44, %v11142_v18  ;;  %v11276_v27 = vadd.f32 %v3453_v19, %v11145_v34  ;;  %v11279_v7 = vadd.f32 %v3454_v20, %v11148_v26  ;;  %v11282_v25 = vadd.f32 %v3455_v63, %v11151_v47  ;;  %v6164_v22 = vld [vmem:[%s6757_s17 + $0xad] sm:$0xff]  ;;  %v6165_v6 = vld [vmem:[%s6757_s17 + $0xb5] sm:$0xff]  ;;  %v14482_v33 = vld [vmem:[#allocation2_spill] sm:$0xff] }
 0x27a   : > { %v11285_v21 = vadd.f32 %v3456_v39, %v11154_v35  ;;  %v11288_v41 = vadd.f32 %v3457_v54, %v11157_v17  ;;  %v11291_v18 = vadd.f32 %v3458_v32, %v11160_v45  ;;  %v11294_v34 = vadd.f32 %v3459_v42, %v11163_v40  ;;  %v14468_v35 = vld [vmem:[#allocation13_spill] sm:$0xff]  ;;  %v14470_v17 = vld [vmem:[#allocation14_spill] sm:$0xff]  ;;  %v6159_v45 = vld [vmem:[%s6757_s17 + $0x6d] sm:$0xff] }
 0x27b   : > { %v11297_v26 = vadd.f32 %v3460_v5, %v11166_v4  ;;  %v11300_v47 = vadd.f32 %v3461_v0, %v11169_v13  ;;  %v11303_v62 = vadd.f32 %v3462_v29, %v14468_v35  ;;  %v11306_v23 = vadd.f32 %v3463_v3, %v14470_v17  ;;  %v6161_v40 = vld [vmem:[%s6757_s17 + $0x85] sm:$0xff]  ;;  %v14474_v4 = vld [vmem:[#allocation16_spill] sm:$0xff]  ;;  %v14476_v13 = vld [vmem:[#allocation17_spill] sm:$0xff] }
 0x27c   : > { %v14472_v42 = vld [vmem:[#allocation15_spill] sm:$0xff]  ;;  %v11316_v5 = vadd.f32 %v3465_v30, %v14474_v4  ;;  %v11319_v0 = vadd.f32 %v3466_v61, %v14476_v13  ;;  %v14478_v29 = vld [vmem:[#allocation18_spill] sm:$0xff]  ;;  %v11332_v44 = vadd.f32 %v3469_v43, %v14482_v33  ;;  %v14486_v61 = vld [vmem:[#allocation4_spill] sm:$0xff] }
 0x27d   : > { %14469 = vst [vmem:[#allocation13_spill] sm:$0xff] %v11303_v62  ;;  %14471 = vst [vmem:[#allocation14_spill] sm:$0xff] %v11306_v23  ;;  %v11313_v56 = vadd.f32 %v3464_v1, %v14472_v42  ;;  %v11322_v28 = vadd.f32 %v3467_v16, %v14478_v29  ;;  %v14480_v31 = vld [vmem:[#allocation19_spill] sm:$0xff]  ;;  %v11338_v20 = vadd.f32 %v3471_v15, %v14486_v61  ;;  %v6168_v39 = vld [vmem:[%s6757_s17 + $0xdd] sm:$0xff] }
 0x27e   : > { %14475 = vst [vmem:[#allocation16_spill] sm:$0xff] %v11316_v5  ;;  %14477 = vst [vmem:[#allocation17_spill] sm:$0xff] %v11319_v0  ;;  %v11329_v9 = vadd.f32 %v3468_v53, %v14480_v31  ;;  %v14484_v30 = vld [vmem:[#allocation3_spill] sm:$0xff]  ;;  %v6191_v53 = vld [vmem:[%s13465_s1 + $0x25] ss:$0 sm:$0xff] }
 0x27f   : > { %14473 = vst [vmem:[#allocation15_spill] sm:$0xff] %v11313_v56  ;;  %14479 = vst [vmem:[#allocation18_spill] sm:$0xff] %v11322_v28  ;;  %v11335_v19 = vadd.f32 %v3470_v52, %v14484_v30  ;;  %v6166_v16 = vld [vmem:[%s6757_s17 + $0xc5] sm:$0xff]  ;;  %v6167_v63 = vld [vmem:[%s6757_s17 + $0xcd] sm:$0xff] }
 0x280   : > { %14481 = vst [vmem:[#allocation19_spill] sm:$0xff] %v11329_v9  ;;  %14483 = vst [vmem:[#allocation2_spill] sm:$0xff] %v11332_v44  ;;  %v14488_v54 = vld [vmem:[#allocation5_spill] sm:$0xff]  ;;  %v14490_v32 = vld [vmem:[#allocation6_spill] sm:$0xff] }
 0x281   : > { %14485 = vst [vmem:[#allocation3_spill] sm:$0xff] %v11335_v19  ;;  %14487 = vst [vmem:[#allocation4_spill] sm:$0xff] %v11338_v20  ;;  %v11347_v43 = vadd.f32 %v3472_v2, %v14488_v54  ;;  %v11350_v57 = vadd.f32 %v3473_v51, %v14490_v32  ;;  %v14492_v3 = vld [vmem:[#allocation7_spill] sm:$0xff]  ;;  %v14494_v55 = vld [vmem:[#allocation8_spill] sm:$0xff]  ;;  %v3549_v54 = vmul.f32 %v6191_v53, %v6158_v11 }
 0x282   : > { %v11353_v36 = vadd.f32 %v3474_v14, %v14492_v3  ;;  %v11356_v1 = vadd.f32 %v3475_v37, %v14494_v55  ;;  %v6169_v52 = vld [vmem:[%s6757_s17 + $0xe5] sm:$0xff]  ;;  %v6170_v15 = vld [vmem:[%s6757_s17 + $0xf5] sm:$0xff]  ;;  %v6171_v35 = vld [vmem:[%s6757_s17 + $0xfd] sm:$0xff]  ;;  %v3550_v32 = vmul.f32 %v6191_v53, %v6159_v45  ;;  %v3551_v3 = vmul.f32 %v6191_v53, %v6160_v46 }
 0x283   : > { %14489 = vst [vmem:[#allocation5_spill] sm:$0xff] %v11347_v43  ;;  %14491 = vst [vmem:[#allocation6_spill] sm:$0xff] %v11350_v57  ;;  %v14496_v17 = vld [vmem:[#allocation9_spill] sm:$0xff]  ;;  %v14498_v2 = vld [vmem:[#allocation10_spill] sm:$0xff]  ;;  %v3557_v11 = vmul.f32 %v6191_v53, %v6166_v16  ;;  %v3558_v45 = vmul.f32 %v6191_v53, %v6167_v63  ;;  %v3559_v46 = vmul.f32 %v6191_v53, %v6168_v39 }
 0x284   : > { %14493 = vst [vmem:[#allocation7_spill] sm:$0xff] %v11353_v36  ;;  %14495 = vst [vmem:[#allocation8_spill] sm:$0xff] %v11356_v1  ;;  %v11362_v42 = vadd.f32 %v3476_v59, %v14496_v17  ;;  %v11365_v4 = vadd.f32 %v3477_v58, %v14498_v2  ;;  %v14500_v51 = vld [vmem:[#allocation11_spill] sm:$0xff]  ;;  %v14502_v14 = vld [vmem:[#allocation12_spill] sm:$0xff]  ;;  %v3552_v58 = vmul.f32 %v6191_v53, %v6161_v40 }
 0x285   : > { %v11368_v13 = vadd.f32 %v3478_v10, %v14500_v51  ;;  %v11371_v29 = vadd.f32 %v3479_v49, %v14502_v14  ;;  %v6172_v37 = vld [vmem:[%s6757_s17 + $0x10d] sm:$0xff]  ;;  %v6173_v31 = vld [vmem:[%s6757_s17 + $0x115] sm:$0xff]  ;;  %v6174_v33 = vld [vmem:[%s6757_s17 + $0x125] sm:$0xff]  ;;  %v3553_v17 = vmul.f32 %v6191_v53, %v6162_v38  ;;  %v3554_v2 = vmul.f32 %v6191_v53, %v6163_v12 }
 0x286   : > { %14497 = vst [vmem:[#allocation9_spill] sm:$0xff] %v11362_v42  ;;  %14499 = vst [vmem:[#allocation10_spill] sm:$0xff] %v11365_v4  ;;  %v6175_v30 = vld [vmem:[%s6757_s17 + $0x12d] sm:$0xff]  ;;  %v6176_v61 = vld [vmem:[%s6757_s17 + $0x13d] sm:$0xff]  ;;  %v3555_v51 = vmul.f32 %v6191_v53, %v6164_v22  ;;  %v3556_v14 = vmul.f32 %v6191_v53, %v6165_v6  ;;  %v3560_v42 = vmul.f32 %v6191_v53, %v6169_v52 }
 0x287   : > { %14501 = vst [vmem:[#allocation11_spill] sm:$0xff] %v11368_v13  ;;  %14503 = vst [vmem:[#allocation12_spill] sm:$0xff] %v11371_v29  ;;  %v6177_v59 = vld [vmem:[%s6757_s17 + $0x145] sm:$0xff]  ;;  %v6178_v10 = vld [vmem:[%s6757_s17 + $0x155] sm:$0xff]  ;;  %v3561_v57 = vmul.f32 %v6191_v53, %v6170_v15  ;;  %v3562_v43 = vmul.f32 %v6191_v53, %v6171_v35  ;;  %v3563_v20 = vmul.f32 %v6191_v53, %v6172_v37 }
 0x288   : > { %v6179_v55 = vld [vmem:[%s6757_s17 + $0x15d] sm:$0xff]  ;;  %v6180_v49 = vld [vmem:[%s6757_s17 + $0x16d] sm:$0xff]  ;;  %v6181_v29 = vld [vmem:[%s6757_s17 + $0x175] sm:$0xff]  ;;  %v3564_v38 = vmul.f32 %v6191_v53, %v6173_v31  ;;  %v3565_v6 = vmul.f32 %v6191_v53, %v6174_v33  ;;  %v3566_v44 = vmul.f32 %v6191_v53, %v6175_v30  ;;  %v3567_v9 = vmul.f32 %v6191_v53, %v6176_v61 }
 0x289   : > { %v6182_v13 = vld [vmem:[%s6757_s17 + $0x185] sm:$0xff]  ;;  %v6183_v4 = vld [vmem:[%s6757_s17 + $0x18d] sm:$0xff]  ;;  %v6184_v40 = vld [vmem:[%s6757_s17 + $0x19d] sm:$0xff]  ;;  %v3568_v28 = vmul.f32 %v6191_v53, %v6177_v59  ;;  %v3569_v0 = vmul.f32 %v6191_v53, %v6178_v10  ;;  %v3570_v5 = vmul.f32 %v6191_v53, %v6179_v55  ;;  %v3571_v16 = vmul.f32 %v6191_v53, %v6180_v49 }
 0x28a   : > { %v6185_v1 = vld [vmem:[%s6757_s17 + $0x1a5] sm:$0xff]  ;;  %v6186_v36 = vld [vmem:[%s6757_s17 + $0x1b5] sm:$0xff]  ;;  %v6187_v12 = vld [vmem:[%s6757_s17 + $0x1bd] sm:$0xff]  ;;  %v3572_v63 = vmul.f32 %v6191_v53, %v6181_v29  ;;  %v3573_v39 = vmul.f32 %v6191_v53, %v6182_v13  ;;  %v3574_v52 = vmul.f32 %v6191_v53, %v6183_v4  ;;  %v3575_v56 = vmul.f32 %v6191_v53, %v6184_v40 }
 0x28b   : > { %v6188_v22 = vld [vmem:[%s6757_s17 + $0x1cd] sm:$0xff]  ;;  %v6189_v19 = vld [vmem:[%s6757_s17 + $0x1d5] sm:$0xff]  ;;  %v3576_v23 = vmul.f32 %v6191_v53, %v6185_v1  ;;  %v3577_v62 = vmul.f32 %v6191_v53, %v6186_v36  ;;  %v3578_v15 = vmul.f32 %v6191_v53, %v6187_v12  ;;  %v11392_v31 = vadd.f32 %v3549_v54, %v11261_v24  ;;  %v6194_v29 = vld [vmem:[%s6757_s17 + $0x7e] sm:$0xff] }
 0x28c   : > { %v3579_v35 = vmul.f32 %v6191_v53, %v6188_v22  ;;  %v3580_v37 = vmul.f32 %v6191_v53, %v6189_v19  ;;  %v11395_v33 = vadd.f32 %v3550_v32, %v11264_v48  ;;  %v11398_v30 = vadd.f32 %v3551_v3, %v11267_v60  ;;  %v6192_v13 = vld [vmem:[%s6757_s17 + $0x66] sm:$0xff]  ;;  %v6196_v54 = vld [vmem:[%s6757_s17 + $0x96] sm:$0xff]  ;;  %v6197_v32 = vld [vmem:[%s6757_s17 + $0x9e] sm:$0xff] }
 0x28d   : > { %v11401_v4 = vadd.f32 %v3552_v58, %v11270_v8  ;;  %v11404_v36 = vadd.f32 %v3553_v17, %v11273_v50  ;;  %v11407_v19 = vadd.f32 %v3554_v2, %v11276_v27  ;;  %v11410_v24 = vadd.f32 %v3555_v51, %v11279_v7  ;;  %v6198_v3 = vld [vmem:[%s6757_s17 + $0xae] sm:$0xff]  ;;  %v6199_v58 = vld [vmem:[%s6757_s17 + $0xb6] sm:$0xff]  ;;  %v14518_v49 = vld [vmem:[#allocation2_spill] sm:$0xff] }
 0x28e   : > { %v11413_v48 = vadd.f32 %v3556_v14, %v11282_v25  ;;  %v11416_v60 = vadd.f32 %v3557_v11, %v11285_v21  ;;  %v11419_v8 = vadd.f32 %v3558_v45, %v11288_v41  ;;  %v11422_v50 = vadd.f32 %v3559_v46, %v11291_v18  ;;  %v14504_v21 = vld [vmem:[#allocation13_spill] sm:$0xff]  ;;  %v14506_v41 = vld [vmem:[#allocation14_spill] sm:$0xff]  ;;  %v6193_v18 = vld [vmem:[%s6757_s17 + $0x6e] sm:$0xff] }
 0x28f   : > { %v11425_v27 = vadd.f32 %v3560_v42, %v11294_v34  ;;  %v11428_v7 = vadd.f32 %v3561_v57, %v11297_v26  ;;  %v11431_v25 = vadd.f32 %v3562_v43, %v11300_v47  ;;  %v11434_v53 = vadd.f32 %v3563_v20, %v14504_v21  ;;  %v6195_v34 = vld [vmem:[%s6757_s17 + $0x86] sm:$0xff]  ;;  %v14510_v26 = vld [vmem:[#allocation16_spill] sm:$0xff]  ;;  %v14512_v47 = vld [vmem:[#allocation17_spill] sm:$0xff] }
 0x290   : > { %v11437_v1 = vadd.f32 %v3564_v38, %v14506_v41  ;;  %v14508_v42 = vld [vmem:[#allocation15_spill] sm:$0xff]  ;;  %v11447_v57 = vadd.f32 %v3566_v44, %v14510_v26  ;;  %v11450_v43 = vadd.f32 %v3567_v9, %v14512_v47  ;;  %v14514_v20 = vld [vmem:[#allocation18_spill] sm:$0xff]  ;;  %v11463_v17 = vadd.f32 %v3570_v5, %v14518_v49  ;;  %v14522_v9 = vld [vmem:[#allocation4_spill] sm:$0xff] }
 0x291   : > { %14505 = vst [vmem:[#allocation13_spill] sm:$0xff] %v11434_v53  ;;  %v11444_v61 = vadd.f32 %v3565_v6, %v14508_v42  ;;  %v11453_v59 = vadd.f32 %v3568_v28, %v14514_v20  ;;  %v14516_v10 = vld [vmem:[#allocation19_spill] sm:$0xff]  ;;  %v11469_v51 = vadd.f32 %v3572_v63, %v14522_v9  ;;  %v6202_v11 = vld [vmem:[%s6757_s17 + $0xde] sm:$0xff]  ;;  %v14530_v22 = vld [vmem:[#allocation8_spill] sm:$0xff] }
 0x292   : > { %14507 = vst [vmem:[#allocation14_spill] sm:$0xff] %v11437_v1  ;;  %14511 = vst [vmem:[#allocation16_spill] sm:$0xff] %v11447_v57  ;;  %v11460_v55 = vadd.f32 %v3569_v0, %v14516_v10  ;;  %v14520_v44 = vld [vmem:[#allocation3_spill] sm:$0xff]  ;;  %v6225_v0 = vld [vmem:[%s13465_s1 + $0x26] ss:$0 sm:$0xff]  ;;  %v11487_v6 = vadd.f32 %v3576_v23, %v14530_v22 }
 0x293   : > { %14509 = vst [vmem:[#allocation15_spill] sm:$0xff] %v11444_v61  ;;  %14513 = vst [vmem:[#allocation17_spill] sm:$0xff] %v11450_v43  ;;  %v11466_v2 = vadd.f32 %v3571_v16, %v14520_v44  ;;  %v6200_v28 = vld [vmem:[%s6757_s17 + $0xc6] sm:$0xff]  ;;  %v6201_v14 = vld [vmem:[%s6757_s17 + $0xce] sm:$0xff] }
 0x294   : > { %14515 = vst [vmem:[#allocation18_spill] sm:$0xff] %v11453_v59  ;;  %14517 = vst [vmem:[#allocation19_spill] sm:$0xff] %v11460_v55  ;;  %v14524_v45 = vld [vmem:[#allocation5_spill] sm:$0xff]  ;;  %v14526_v46 = vld [vmem:[#allocation6_spill] sm:$0xff] }
 0x295   : > { %14519 = vst [vmem:[#allocation2_spill] sm:$0xff] %v11463_v17  ;;  %14521 = vst [vmem:[#allocation3_spill] sm:$0xff] %v11466_v2  ;;  %v11478_v5 = vadd.f32 %v3573_v39, %v14524_v45  ;;  %v11481_v40 = vadd.f32 %v3574_v52, %v14526_v46  ;;  %v14528_v38 = vld [vmem:[#allocation7_spill] sm:$0xff]  ;;  %v6204_v63 = vld [vmem:[%s6757_s17 + $0xf6] sm:$0xff]  ;;  %v3650_v45 = vmul.f32 %v6225_v0, %v6192_v13 }
 0x296   : > { %14523 = vst [vmem:[#allocation4_spill] sm:$0xff] %v11469_v51  ;;  %v11484_v12 = vadd.f32 %v3575_v56, %v14528_v38  ;;  %14531 = vst [vmem:[#allocation8_spill] sm:$0xff] %v11487_v6  ;;  %v6203_v16 = vld [vmem:[%s6757_s17 + $0xe6] sm:$0xff]  ;;  %v6205_v21 = vld [vmem:[%s6757_s17 + $0xfe] sm:$0xff]  ;;  %v3651_v46 = vmul.f32 %v6225_v0, %v6193_v18  ;;  %v3652_v38 = vmul.f32 %v6225_v0, %v6194_v29 }
 0x297   : > { %14525 = vst [vmem:[#allocation5_spill] sm:$0xff] %v11478_v5  ;;  %14527 = vst [vmem:[#allocation6_spill] sm:$0xff] %v11481_v40  ;;  %v14532_v41 = vld [vmem:[#allocation9_spill] sm:$0xff]  ;;  %v14534_v39 = vld [vmem:[#allocation10_spill] sm:$0xff]  ;;  %v3658_v13 = vmul.f32 %v6225_v0, %v6200_v28  ;;  %v3659_v18 = vmul.f32 %v6225_v0, %v6201_v14  ;;  %v3660_v29 = vmul.f32 %v6225_v0, %v6202_v11 }
 0x298   : > { %14529 = vst [vmem:[#allocation7_spill] sm:$0xff] %v11484_v12  ;;  %v11493_v42 = vadd.f32 %v3577_v62, %v14532_v41  ;;  %v11496_v26 = vadd.f32 %v3578_v15, %v14534_v39  ;;  %v14536_v52 = vld [vmem:[#allocation11_spill] sm:$0xff]  ;;  %v14538_v56 = vld [vmem:[#allocation12_spill] sm:$0xff]  ;;  %v6210_v9 = vld [vmem:[%s6757_s17 + $0x13e] sm:$0xff]  ;;  %v3653_v15 = vmul.f32 %v6225_v0, %v6195_v34  ;;  %v3654_v41 = vmul.f32 %v6225_v0, %v6196_v54 }
 0x299   : > { %v11499_v47 = vadd.f32 %v3579_v35, %v14536_v52  ;;  %v11502_v20 = vadd.f32 %v3580_v37, %v14538_v56  ;;  %v6206_v23 = vld [vmem:[%s6757_s17 + $0x10e] sm:$0xff]  ;;  %v6207_v10 = vld [vmem:[%s6757_s17 + $0x116] sm:$0xff]  ;;  %v6208_v49 = vld [vmem:[%s6757_s17 + $0x126] sm:$0xff]  ;;  %v3655_v39 = vmul.f32 %v6225_v0, %v6197_v32  ;;  %v3656_v52 = vmul.f32 %v6225_v0, %v6198_v3 }
 0x29a   : > { %14533 = vst [vmem:[#allocation9_spill] sm:$0xff] %v11493_v42  ;;  %14535 = vst [vmem:[#allocation10_spill] sm:$0xff] %v11496_v26  ;;  %v6209_v44 = vld [vmem:[%s6757_s17 + $0x12e] sm:$0xff]  ;;  %v6211_v62 = vld [vmem:[%s6757_s17 + $0x146] sm:$0xff]  ;;  %v3657_v56 = vmul.f32 %v6225_v0, %v6199_v58  ;;  %v3661_v42 = vmul.f32 %v6225_v0, %v6203_v16  ;;  %v3662_v40 = vmul.f32 %v6225_v0, %v6204_v63 }
 0x29b   : > { %14537 = vst [vmem:[#allocation11_spill] sm:$0xff] %v11499_v47  ;;  %14539 = vst [vmem:[#allocation12_spill] sm:$0xff] %v11502_v20  ;;  %v6212_v35 = vld [vmem:[%s6757_s17 + $0x156] sm:$0xff]  ;;  %v6213_v22 = vld [vmem:[%s6757_s17 + $0x15e] sm:$0xff]  ;;  %v3663_v5 = vmul.f32 %v6225_v0, %v6205_v21  ;;  %v3664_v51 = vmul.f32 %v6225_v0, %v6206_v23  ;;  %v3665_v54 = vmul.f32 %v6225_v0, %v6207_v10 }
 0x29c   : > { %v6214_v37 = vld [vmem:[%s6757_s17 + $0x16e] sm:$0xff]  ;;  %v6215_v20 = vld [vmem:[%s6757_s17 + $0x176] sm:$0xff]  ;;  %v6216_v47 = vld [vmem:[%s6757_s17 + $0x186] sm:$0xff]  ;;  %v3666_v58 = vmul.f32 %v6225_v0, %v6208_v49  ;;  %v3667_v17 = vmul.f32 %v6225_v0, %v6209_v44  ;;  %v3668_v55 = vmul.f32 %v6225_v0, %v6210_v9  ;;  %v3669_v59 = vmul.f32 %v6225_v0, %v6211_v62 }
 0x29d   : > { %v6217_v26 = vld [vmem:[%s6757_s17 + $0x18e] sm:$0xff]  ;;  %v6218_v34 = vld [vmem:[%s6757_s17 + $0x19e] sm:$0xff]  ;;  %v6219_v6 = vld [vmem:[%s6757_s17 + $0x1a6] sm:$0xff]  ;;  %v3670_v43 = vmul.f32 %v6225_v0, %v6212_v35  ;;  %v3671_v57 = vmul.f32 %v6225_v0, %v6213_v22  ;;  %v3672_v28 = vmul.f32 %v6225_v0, %v6214_v37  ;;  %v3673_v14 = vmul.f32 %v6225_v0, %v6215_v20 }
 0x29e   : > { %v6220_v12 = vld [vmem:[%s6757_s17 + $0x1b6] sm:$0xff]  ;;  %v6221_v32 = vld [vmem:[%s6757_s17 + $0x1be] sm:$0xff]  ;;  %v6222_v3 = vld [vmem:[%s6757_s17 + $0x1ce] sm:$0xff]  ;;  %v3674_v11 = vmul.f32 %v6225_v0, %v6216_v47  ;;  %v3675_v16 = vmul.f32 %v6225_v0, %v6217_v26  ;;  %v3676_v61 = vmul.f32 %v6225_v0, %v6218_v34  ;;  %v3677_v1 = vmul.f32 %v6225_v0, %v6219_v6 }
 0x29f   : > { %v6223_v2 = vld [vmem:[%s6757_s17 + $0x1d6] sm:$0xff]  ;;  %v3678_v53 = vmul.f32 %v6225_v0, %v6220_v12  ;;  %v3679_v63 = vmul.f32 %v6225_v0, %v6221_v32  ;;  %v3680_v21 = vmul.f32 %v6225_v0, %v6222_v3  ;;  %v11523_v10 = vadd.f32 %v3650_v45, %v11392_v31  ;;  %v6230_v45 = vld [vmem:[%s6757_s17 + $0xa8] sm:$0xff]  ;;  %v14554_v37 = vld [vmem:[#allocation2_spill] sm:$0xff] }
 0x2a0   : > { %v3681_v23 = vmul.f32 %v6225_v0, %v6223_v2  ;;  %v11526_v49 = vadd.f32 %v3651_v46, %v11395_v33  ;;  %v11529_v44 = vadd.f32 %v3652_v38, %v11398_v30  ;;  %v11532_v26 = vadd.f32 %v3653_v15, %v11401_v4  ;;  %v6226_v47 = vld [vmem:[%s6757_s17 + $0x78] sm:$0xff]  ;;  %v6228_v20 = vld [vmem:[%s6757_s17 + $0x90] sm:$0xff]  ;;  %v6232_v38 = vld [vmem:[%s6757_s17 + $0xc0] sm:$0xff] }
 0x2a1   : > { %v11535_v12 = vadd.f32 %v3654_v41, %v11404_v36  ;;  %v11538_v2 = vadd.f32 %v3655_v39, %v11407_v19  ;;  %v11541_v31 = vadd.f32 %v3656_v52, %v11410_v24  ;;  %v11544_v33 = vadd.f32 %v3657_v56, %v11413_v48  ;;  %v6231_v46 = vld [vmem:[%s6757_s17 + $0xb0] sm:$0xff]  ;;  %v6233_v15 = vld [vmem:[%s6757_s17 + $0xc8] sm:$0xff]  ;;  %v6235_v56 = vld [vmem:[%s6757_s17 + $0xe0] sm:$0xff] }
 0x2a2   : > { %v11547_v30 = vadd.f32 %v3658_v13, %v11416_v60  ;;  %v11550_v4 = vadd.f32 %v3659_v18, %v11419_v8  ;;  %v11553_v36 = vadd.f32 %v3660_v29, %v11422_v50  ;;  %v11556_v19 = vadd.f32 %v3661_v42, %v11425_v27  ;;  %v14540_v60 = vld [vmem:[#allocation13_spill] sm:$0xff]  ;;  %v14542_v8 = vld [vmem:[#allocation14_spill] sm:$0xff]  ;;  %v14544_v42 = vld [vmem:[#allocation15_spill] sm:$0xff] }
 0x2a3   : > { %v11559_v24 = vadd.f32 %v3662_v40, %v11428_v7  ;;  %v11562_v48 = vadd.f32 %v3663_v5, %v11431_v25  ;;  %v11565_v0 = vadd.f32 %v3664_v51, %v14540_v60  ;;  %v11568_v6 = vadd.f32 %v3665_v54, %v14542_v8  ;;  %v6227_v50 = vld [vmem:[%s6757_s17 + $0x80] sm:$0xff]  ;;  %v6229_v27 = vld [vmem:[%s6757_s17 + $0x98] sm:$0xff]  ;;  %v14546_v7 = vld [vmem:[#allocation16_spill] sm:$0xff] }
 0x2a4   : > { %v11575_v9 = vadd.f32 %v3666_v58, %v14544_v42  ;;  %v11578_v40 = vadd.f32 %v3667_v17, %v14546_v7  ;;  %v14548_v25 = vld [vmem:[#allocation17_spill] sm:$0xff]  ;;  %v14550_v51 = vld [vmem:[#allocation18_spill] sm:$0xff]  ;;  %v14552_v35 = vld [vmem:[#allocation19_spill] sm:$0xff]  ;;  %v11594_v41 = vadd.f32 %v3671_v57, %v14554_v37 }
 0x2a5   : > { %14541 = vst [vmem:[#allocation13_spill] sm:$0xff] %v11565_v0  ;;  %14543 = vst [vmem:[#allocation14_spill] sm:$0xff] %v11568_v6  ;;  %v11581_v5 = vadd.f32 %v3668_v55, %v14548_v25  ;;  %v11584_v62 = vadd.f32 %v3669_v59, %v14550_v51  ;;  %v11591_v22 = vadd.f32 %v3670_v43, %v14552_v35  ;;  %v14556_v17 = vld [vmem:[#allocation3_spill] sm:$0xff]  ;;  %v14558_v55 = vld [vmem:[#allocation4_spill] sm:$0xff] }
 0x2a6   : > { %14545 = vst [vmem:[#allocation15_spill] sm:$0xff] %v11575_v9  ;;  %14547 = vst [vmem:[#allocation16_spill] sm:$0xff] %v11578_v40  ;;  %v11597_v39 = vadd.f32 %v3672_v28, %v14556_v17  ;;  %v11600_v52 = vadd.f32 %v3673_v14, %v14558_v55  ;;  %v6234_v59 = vld [vmem:[%s6757_s17 + $0xd8] sm:$0xff]  ;;  %v6236_v13 = vld [vmem:[%s6757_s17 + $0xf0] sm:$0xff] }
 0x2a7   : > { %14549 = vst [vmem:[#allocation17_spill] sm:$0xff] %v11581_v5  ;;  %14551 = vst [vmem:[#allocation18_spill] sm:$0xff] %v11584_v62  ;;  %v6259_v43 = vld [vmem:[%s13465_s1 + $0x28] ss:$0 sm:$0xff]  ;;  %v14560_v18 = vld [vmem:[#allocation5_spill] sm:$0xff] }
 0x2a8   : > { %14553 = vst [vmem:[#allocation19_spill] sm:$0xff] %v11591_v22  ;;  %14555 = vst [vmem:[#allocation2_spill] sm:$0xff] %v11594_v41  ;;  %v11609_v57 = vadd.f32 %v3674_v11, %v14560_v18  ;;  %v14562_v29 = vld [vmem:[#allocation6_spill] sm:$0xff]  ;;  %v14564_v54 = vld [vmem:[#allocation7_spill] sm:$0xff]  ;;  %v3753_v18 = vmul.f32 %v6259_v43, %v6226_v47  ;;  %v3761_v47 = vmul.f32 %v6259_v43, %v6234_v59 }
 0x2a9   : > { %14557 = vst [vmem:[#allocation3_spill] sm:$0xff] %v11597_v39  ;;  %14559 = vst [vmem:[#allocation4_spill] sm:$0xff] %v11600_v52  ;;  %v11612_v34 = vadd.f32 %v3675_v16, %v14562_v29  ;;  %v11615_v32 = vadd.f32 %v3676_v61, %v14564_v54  ;;  %v14566_v3 = vld [vmem:[#allocation8_spill] sm:$0xff]  ;;  %v6237_v28 = vld [vmem:[%s6757_s17 + $0xf8] sm:$0xff]  ;;  %v3754_v29 = vmul.f32 %v6259_v43, %v6227_v50 }
 0x2aa   : > { %14561 = vst [vmem:[#allocation5_spill] sm:$0xff] %v11609_v57  ;;  %v11618_v58 = vadd.f32 %v3677_v1, %v14566_v3  ;;  %v6238_v14 = vld [vmem:[%s6757_s17 + $0x108] sm:$0xff]  ;;  %v6239_v60 = vld [vmem:[%s6757_s17 + $0x110] sm:$0xff]  ;;  %v14568_v8 = vld [vmem:[#allocation9_spill] sm:$0xff]  ;;  %v3755_v54 = vmul.f32 %v6259_v43, %v6228_v20  ;;  %v3762_v50 = vmul.f32 %v6259_v43, %v6235_v56  ;;  %v3763_v20 = vmul.f32 %v6259_v43, %v6236_v13 }
 0x2ab   : > { %14563 = vst [vmem:[#allocation6_spill] sm:$0xff] %v11612_v34  ;;  %14565 = vst [vmem:[#allocation7_spill] sm:$0xff] %v11615_v32  ;;  %v11624_v42 = vadd.f32 %v3678_v53, %v14568_v8  ;;  %v14570_v11 = vld [vmem:[#allocation10_spill] sm:$0xff]  ;;  %v14572_v16 = vld [vmem:[#allocation11_spill] sm:$0xff]  ;;  %v3757_v8 = vmul.f32 %v6259_v43, %v6230_v45  ;;  %v3765_v34 = vmul.f32 %v6259_v43, %v6238_v14 }
 0x2ac   : > { %14567 = vst [vmem:[#allocation8_spill] sm:$0xff] %v11618_v58  ;;  %v11627_v7 = vadd.f32 %v3679_v63, %v14570_v11  ;;  %v11630_v25 = vadd.f32 %v3680_v21, %v14572_v16  ;;  %v14574_v61 = vld [vmem:[#allocation12_spill] sm:$0xff]  ;;  %v6240_v1 = vld [vmem:[%s6757_s17 + $0x120] sm:$0xff]  ;;  %v6241_v35 = vld [vmem:[%s6757_s17 + $0x128] sm:$0xff]  ;;  %v3756_v63 = vmul.f32 %v6259_v43, %v6229_v27  ;;  %v3758_v11 = vmul.f32 %v6259_v43, %v6231_v46 }
 0x2ad   : > { %14569 = vst [vmem:[#allocation9_spill] sm:$0xff] %v11624_v42  ;;  %v11633_v51 = vadd.f32 %v3681_v23, %v14574_v61  ;;  %v6242_v37 = vld [vmem:[%s6757_s17 + $0x138] sm:$0xff]  ;;  %v6243_v17 = vld [vmem:[%s6757_s17 + $0x140] sm:$0xff]  ;;  %v6244_v55 = vld [vmem:[%s6757_s17 + $0x150] sm:$0xff]  ;;  %v3759_v16 = vmul.f32 %v6259_v43, %v6232_v38  ;;  %v3760_v61 = vmul.f32 %v6259_v43, %v6233_v15  ;;  %v3764_v42 = vmul.f32 %v6259_v43, %v6237_v28 }
 0x2ae   : > { %14571 = vst [vmem:[#allocation10_spill] sm:$0xff] %v11627_v7  ;;  %14573 = vst [vmem:[#allocation11_spill] sm:$0xff] %v11630_v25  ;;  %v6245_v53 = vld [vmem:[%s6757_s17 + $0x158] sm:$0xff]  ;;  %v6246_v21 = vld [vmem:[%s6757_s17 + $0x168] sm:$0xff]  ;;  %v3766_v57 = vmul.f32 %v6259_v43, %v6239_v60  ;;  %v3767_v52 = vmul.f32 %v6259_v43, %v6240_v1  ;;  %v3768_v45 = vmul.f32 %v6259_v43, %v6241_v35 }
 0x2af   : > { %14575 = vst [vmem:[#allocation12_spill] sm:$0xff] %v11633_v51  ;;  %v6247_v3 = vld [vmem:[%s6757_s17 + $0x170] sm:$0xff]  ;;  %v6248_v23 = vld [vmem:[%s6757_s17 + $0x180] sm:$0xff]  ;;  %v6249_v51 = vld [vmem:[%s6757_s17 + $0x188] sm:$0xff]  ;;  %v3769_v15 = vmul.f32 %v6259_v43, %v6242_v37  ;;  %v3770_v41 = vmul.f32 %v6259_v43, %v6243_v17  ;;  %v3771_v22 = vmul.f32 %v6259_v43, %v6244_v55  ;;  %v3772_v62 = vmul.f32 %v6259_v43, %v6245_v53 }
 0x2b0   : > { %v6250_v25 = vld [vmem:[%s6757_s17 + $0x198] sm:$0xff]  ;;  %v6251_v7 = vld [vmem:[%s6757_s17 + $0x1a0] sm:$0xff]  ;;  %v6252_v27 = vld [vmem:[%s6757_s17 + $0x1b0] sm:$0xff]  ;;  %v3773_v5 = vmul.f32 %v6259_v43, %v6246_v21  ;;  %v3774_v40 = vmul.f32 %v6259_v43, %v6247_v3  ;;  %v3775_v59 = vmul.f32 %v6259_v43, %v6248_v23  ;;  %v3776_v56 = vmul.f32 %v6259_v43, %v6249_v51 }
 0x2b1   : > { %v6253_v58 = vld [vmem:[%s6757_s17 + $0x1b8] sm:$0xff]  ;;  %v6254_v32 = vld [vmem:[%s6757_s17 + $0x1c8] sm:$0xff]  ;;  %v6255_v46 = vld [vmem:[%s6757_s17 + $0x1d0] sm:$0xff]  ;;  %v3777_v13 = vmul.f32 %v6259_v43, %v6250_v25  ;;  %v3778_v28 = vmul.f32 %v6259_v43, %v6251_v7  ;;  %v3779_v9 = vmul.f32 %v6259_v43, %v6252_v27  ;;  %v11654_v35 = vadd.f32 %v3753_v18, %v11523_v10 }
 0x2b2   : > { %v6256_v38 = vld [vmem:[%s6757_s17 + $0x1e0] sm:$0xff]  ;;  %v6257_v39 = vld [vmem:[%s6757_s17 + $0x1e8] sm:$0xff]  ;;  %v3780_v6 = vmul.f32 %v6259_v43, %v6253_v58  ;;  %v3781_v0 = vmul.f32 %v6259_v43, %v6254_v32  ;;  %v3782_v14 = vmul.f32 %v6259_v43, %v6255_v46  ;;  %v11657_v37 = vadd.f32 %v3754_v29, %v11526_v49  ;;  %v6262_v51 = vld [vmem:[%s6757_s17 + $0x91] sm:$0xff] }
 0x2b3   : > { %v3783_v60 = vmul.f32 %v6259_v43, %v6256_v38  ;;  %v3784_v1 = vmul.f32 %v6259_v43, %v6257_v39  ;;  %v11660_v17 = vadd.f32 %v3755_v54, %v11529_v44  ;;  %v11663_v7 = vadd.f32 %v3756_v63, %v11532_v26  ;;  %v6260_v25 = vld [vmem:[%s6757_s17 + $0x79] sm:$0xff]  ;;  %v6264_v18 = vld [vmem:[%s6757_s17 + $0xa9] sm:$0xff]  ;;  %v6265_v29 = vld [vmem:[%s6757_s17 + $0xb1] sm:$0xff] }
 0x2b4   : > { %v11666_v32 = vadd.f32 %v3757_v8, %v11535_v12  ;;  %v11669_v39 = vadd.f32 %v3758_v11, %v11538_v2  ;;  %v11672_v10 = vadd.f32 %v3759_v16, %v11541_v31  ;;  %v11675_v49 = vadd.f32 %v3760_v61, %v11544_v33  ;;  %v6266_v54 = vld [vmem:[%s6757_s17 + $0xc1] sm:$0xff]  ;;  %v6267_v63 = vld [vmem:[%s6757_s17 + $0xc9] sm:$0xff] }
 0x2b5   : > { %v11678_v44 = vadd.f32 %v3761_v47, %v11547_v30  ;;  %v11681_v26 = vadd.f32 %v3762_v50, %v11550_v4  ;;  %v11684_v12 = vadd.f32 %v3763_v20, %v11553_v36  ;;  %v11687_v2 = vadd.f32 %v3764_v42, %v11556_v19  ;;  %v14576_v30 = vld [vmem:[#allocation13_spill] sm:$0xff]  ;;  %v14578_v4 = vld [vmem:[#allocation14_spill] sm:$0xff]  ;;  %v14580_v42 = vld [vmem:[#allocation15_spill] sm:$0xff] }
 0x2b6   : > { %v11690_v31 = vadd.f32 %v3765_v34, %v11559_v24  ;;  %v11693_v33 = vadd.f32 %v3766_v57, %v11562_v48  ;;  %v11696_v43 = vadd.f32 %v3767_v52, %v14576_v30  ;;  %v11699_v58 = vadd.f32 %v3768_v45, %v14578_v4  ;;  %v6261_v36 = vld [vmem:[%s6757_s17 + $0x81] sm:$0xff]  ;;  %v6263_v19 = vld [vmem:[%s6757_s17 + $0x99] sm:$0xff]  ;;  %v14582_v24 = vld [vmem:[#allocation16_spill] sm:$0xff] }
 0x2b7   : > { %v11706_v55 = vadd.f32 %v3769_v15, %v14580_v42  ;;  %v11709_v34 = vadd.f32 %v3770_v41, %v14582_v24  ;;  %v14584_v48 = vld [vmem:[#allocation17_spill] sm:$0xff]  ;;  %v14586_v52 = vld [vmem:[#allocation18_spill] sm:$0xff]  ;;  %v14588_v21 = vld [vmem:[#allocation19_spill] sm:$0xff] }
 0x2b8   : > { %14577 = vst [vmem:[#allocation13_spill] sm:$0xff] %v11696_v43  ;;  %14579 = vst [vmem:[#allocation14_spill] sm:$0xff] %v11699_v58  ;;  %v11712_v57 = vadd.f32 %v3771_v22, %v14584_v48  ;;  %v11715_v53 = vadd.f32 %v3772_v62, %v14586_v52  ;;  %v11722_v3 = vadd.f32 %v3773_v5, %v14588_v21  ;;  %v14590_v23 = vld [vmem:[#allocation2_spill] sm:$0xff]  ;;  %v14592_v41 = vld [vmem:[#allocation3_spill] sm:$0xff] }
 0x2b9   : > { %14581 = vst [vmem:[#allocation15_spill] sm:$0xff] %v11706_v55  ;;  %14583 = vst [vmem:[#allocation16_spill] sm:$0xff] %v11709_v34  ;;  %v11725_v8 = vadd.f32 %v3774_v40, %v14590_v23  ;;  %v11728_v11 = vadd.f32 %v3775_v59, %v14592_v41  ;;  %v14594_v22 = vld [vmem:[#allocation4_spill] sm:$0xff]  ;;  %v6268_v62 = vld [vmem:[%s6757_s17 + $0xd9] sm:$0xff] }
 0x2ba   : > { %14585 = vst [vmem:[#allocation17_spill] sm:$0xff] %v11712_v57  ;;  %14587 = vst [vmem:[#allocation18_spill] sm:$0xff] %v11715_v53  ;;  %v11731_v16 = vadd.f32 %v3776_v56, %v14594_v22  ;;  %v6269_v61 = vld [vmem:[%s6757_s17 + $0xe1] sm:$0xff]  ;;  %v6270_v47 = vld [vmem:[%s6757_s17 + $0xf1] sm:$0xff] }
 0x2bb   : > { %14589 = vst [vmem:[#allocation19_spill] sm:$0xff] %v11722_v3  ;;  %14591 = vst [vmem:[#allocation2_spill] sm:$0xff] %v11725_v8  ;;  %v6293_v5 = vld [vmem:[%s13465_s1 + $0x29] ss:$0 sm:$0xff]  ;;  %v14596_v50 = vld [vmem:[#allocation5_spill] sm:$0xff] }
 0x2bc   : > { %14593 = vst [vmem:[#allocation3_spill] sm:$0xff] %v11728_v11  ;;  %14595 = vst [vmem:[#allocation4_spill] sm:$0xff] %v11731_v16  ;;  %v11740_v40 = vadd.f32 %v3777_v13, %v14596_v50  ;;  %v14598_v20 = vld [vmem:[#allocation6_spill] sm:$0xff]  ;;  %v14600_v45 = vld [vmem:[#allocation7_spill] sm:$0xff]  ;;  %v3854_v50 = vmul.f32 %v6293_v5, %v6260_v25  ;;  %v3862_v25 = vmul.f32 %v6293_v5, %v6268_v62 }
 0x2bd   : > { %v11743_v27 = vadd.f32 %v3778_v28, %v14598_v20  ;;  %v11746_v46 = vadd.f32 %v3779_v9, %v14600_v45  ;;  %v14602_v38 = vld [vmem:[#allocation8_spill] sm:$0xff]  ;;  %v6271_v59 = vld [vmem:[%s6757_s17 + $0xf9] sm:$0xff]  ;;  %v14608_v28 = vld [vmem:[#allocation11_spill] sm:$0xff]  ;;  %v3855_v20 = vmul.f32 %v6293_v5, %v6261_v36  ;;  %v3856_v45 = vmul.f32 %v6293_v5, %v6262_v51 }
 0x2be   : > { %14597 = vst [vmem:[#allocation5_spill] sm:$0xff] %v11740_v40  ;;  %v11749_v15 = vadd.f32 %v3780_v6, %v14602_v38  ;;  %v6272_v56 = vld [vmem:[%s6757_s17 + $0x109] sm:$0xff]  ;;  %v6273_v30 = vld [vmem:[%s6757_s17 + $0x111] sm:$0xff]  ;;  %v14606_v13 = vld [vmem:[#allocation10_spill] sm:$0xff]  ;;  %v11761_v48 = vadd.f32 %v3783_v60, %v14608_v28  ;;  %v3860_v28 = vmul.f32 %v6293_v5, %v6266_v54  ;;  %v3863_v36 = vmul.f32 %v6293_v5, %v6269_v61 }
 0x2bf   : > { %14599 = vst [vmem:[#allocation6_spill] sm:$0xff] %v11743_v27  ;;  %14601 = vst [vmem:[#allocation7_spill] sm:$0xff] %v11746_v46  ;;  %v14604_v4 = vld [vmem:[#allocation9_spill] sm:$0xff]  ;;  %v11758_v24 = vadd.f32 %v3782_v14, %v14606_v13  ;;  %v14610_v9 = vld [vmem:[#allocation12_spill] sm:$0xff]  ;;  %v3857_v14 = vmul.f32 %v6293_v5, %v6263_v19  ;;  %v3859_v13 = vmul.f32 %v6293_v5, %v6265_v29 }
 0x2c0   : > { %14603 = vst [vmem:[#allocation8_spill] sm:$0xff] %v11749_v15  ;;  %v11755_v42 = vadd.f32 %v3781_v0, %v14604_v4  ;;  %14609 = vst [vmem:[#allocation11_spill] sm:$0xff] %v11761_v48  ;;  %v11764_v52 = vadd.f32 %v3784_v1, %v14610_v9  ;;  %v6274_v6 = vld [vmem:[%s6757_s17 + $0x121] sm:$0xff]  ;;  %v6275_v21 = vld [vmem:[%s6757_s17 + $0x129] sm:$0xff]  ;;  %v3858_v4 = vmul.f32 %v6293_v5, %v6264_v18 }
 0x2c1   : > { %14607 = vst [vmem:[#allocation10_spill] sm:$0xff] %v11758_v24  ;;  %v6276_v23 = vld [vmem:[%s6757_s17 + $0x139] sm:$0xff]  ;;  %v6277_v41 = vld [vmem:[%s6757_s17 + $0x141] sm:$0xff]  ;;  %v6278_v22 = vld [vmem:[%s6757_s17 + $0x151] sm:$0xff]  ;;  %v3861_v9 = vmul.f32 %v6293_v5, %v6267_v63  ;;  %v3864_v51 = vmul.f32 %v6293_v5, %v6270_v47  ;;  %v3866_v27 = vmul.f32 %v6293_v5, %v6272_v56  ;;  %v3867_v40 = vmul.f32 %v6293_v5, %v6273_v30 }
 0x2c2   : > { %14605 = vst [vmem:[#allocation9_spill] sm:$0xff] %v11755_v42  ;;  %14611 = vst [vmem:[#allocation12_spill] sm:$0xff] %v11764_v52  ;;  %v6279_v0 = vld [vmem:[%s6757_s17 + $0x159] sm:$0xff]  ;;  %v6280_v60 = vld [vmem:[%s6757_s17 + $0x169] sm:$0xff]  ;;  %v3865_v42 = vmul.f32 %v6293_v5, %v6271_v59  ;;  %v3868_v16 = vmul.f32 %v6293_v5, %v6274_v6  ;;  %v3869_v18 = vmul.f32 %v6293_v5, %v6275_v21 }
 0x2c3   : > { %v6281_v38 = vld [vmem:[%s6757_s17 + $0x171] sm:$0xff]  ;;  %v6282_v1 = vld [vmem:[%s6757_s17 + $0x181] sm:$0xff]  ;;  %v6283_v52 = vld [vmem:[%s6757_s17 + $0x189] sm:$0xff]  ;;  %v3870_v63 = vmul.f32 %v6293_v5, %v6276_v23  ;;  %v3871_v8 = vmul.f32 %v6293_v5, %v6277_v41  ;;  %v3872_v3 = vmul.f32 %v6293_v5, %v6278_v22  ;;  %v3873_v53 = vmul.f32 %v6293_v5, %v6279_v0 }
 0x2c4   : > { %v6284_v48 = vld [vmem:[%s6757_s17 + $0x199] sm:$0xff]  ;;  %v6285_v24 = vld [vmem:[%s6757_s17 + $0x1a1] sm:$0xff]  ;;  %v6286_v19 = vld [vmem:[%s6757_s17 + $0x1b1] sm:$0xff]  ;;  %v3874_v57 = vmul.f32 %v6293_v5, %v6280_v60  ;;  %v3875_v34 = vmul.f32 %v6293_v5, %v6281_v38  ;;  %v3876_v62 = vmul.f32 %v6293_v5, %v6282_v1  ;;  %v3877_v61 = vmul.f32 %v6293_v5, %v6283_v52 }
 0x2c5   : > { %v6287_v15 = vld [vmem:[%s6757_s17 + $0x1b9] sm:$0xff]  ;;  %v6288_v46 = vld [vmem:[%s6757_s17 + $0x1c9] sm:$0xff]  ;;  %v6289_v29 = vld [vmem:[%s6757_s17 + $0x1d1] sm:$0xff]  ;;  %v3878_v47 = vmul.f32 %v6293_v5, %v6284_v48  ;;  %v3879_v59 = vmul.f32 %v6293_v5, %v6285_v24  ;;  %v3880_v55 = vmul.f32 %v6293_v5, %v6286_v19  ;;  %v11785_v21 = vadd.f32 %v3854_v50, %v11654_v35 }
 0x2c6   : > { %v6290_v54 = vld [vmem:[%s6757_s17 + $0x1e1] sm:$0xff]  ;;  %v6291_v11 = vld [vmem:[%s6757_s17 + $0x1e9] sm:$0xff]  ;;  %v3881_v58 = vmul.f32 %v6293_v5, %v6287_v15  ;;  %v3882_v43 = vmul.f32 %v6293_v5, %v6288_v46  ;;  %v3883_v56 = vmul.f32 %v6293_v5, %v6289_v29  ;;  %v11788_v23 = vadd.f32 %v3855_v20, %v11657_v37  ;;  %v6296_v52 = vld [vmem:[%s6757_s17 + $0x92] sm:$0xff] }
 0x2c7   : > { %v3884_v30 = vmul.f32 %v6293_v5, %v6290_v54  ;;  %v3885_v6 = vmul.f32 %v6293_v5, %v6291_v11  ;;  %v11791_v41 = vadd.f32 %v3856_v45, %v11660_v17  ;;  %v11794_v24 = vadd.f32 %v3857_v14, %v11663_v7  ;;  %v6294_v48 = vld [vmem:[%s6757_s17 + $0x7a] sm:$0xff]  ;;  %v6298_v50 = vld [vmem:[%s6757_s17 + $0xaa] sm:$0xff]  ;;  %v6299_v20 = vld [vmem:[%s6757_s17 + $0xb2] sm:$0xff] }
 0x2c8   : > { %v11797_v46 = vadd.f32 %v3858_v4, %v11666_v32  ;;  %v11800_v11 = vadd.f32 %v3859_v13, %v11669_v39  ;;  %v11803_v35 = vadd.f32 %v3860_v28, %v11672_v10  ;;  %v11806_v37 = vadd.f32 %v3861_v9, %v11675_v49  ;;  %v6300_v45 = vld [vmem:[%s6757_s17 + $0xc2] sm:$0xff]  ;;  %v6301_v14 = vld [vmem:[%s6757_s17 + $0xca] sm:$0xff] }
 0x2c9   : > { %v11809_v17 = vadd.f32 %v3862_v25, %v11678_v44  ;;  %v11812_v7 = vadd.f32 %v3863_v36, %v11681_v26  ;;  %v11815_v32 = vadd.f32 %v3864_v51, %v11684_v12  ;;  %v11818_v39 = vadd.f32 %v3865_v42, %v11687_v2  ;;  %v14612_v44 = vld [vmem:[#allocation13_spill] sm:$0xff]  ;;  %v14614_v26 = vld [vmem:[#allocation14_spill] sm:$0xff]  ;;  %v14616_v42 = vld [vmem:[#allocation15_spill] sm:$0xff] }
 0x2ca   : > { %v11821_v10 = vadd.f32 %v3866_v27, %v11690_v31  ;;  %v11824_v49 = vadd.f32 %v3867_v40, %v11693_v33  ;;  %v11827_v5 = vadd.f32 %v3868_v16, %v14612_v44  ;;  %v11830_v15 = vadd.f32 %v3869_v18, %v14614_v26  ;;  %v6295_v12 = vld [vmem:[%s6757_s17 + $0x82] sm:$0xff]  ;;  %v6297_v2 = vld [vmem:[%s6757_s17 + $0x9a] sm:$0xff]  ;;  %v14618_v31 = vld [vmem:[#allocation16_spill] sm:$0xff] }
 0x2cb   : > { %v11837_v22 = vadd.f32 %v3870_v63, %v14616_v42  ;;  %v11840_v27 = vadd.f32 %v3871_v8, %v14618_v31  ;;  %v14620_v33 = vld [vmem:[#allocation17_spill] sm:$0xff]  ;;  %v14622_v16 = vld [vmem:[#allocation18_spill] sm:$0xff]  ;;  %v14624_v60 = vld [vmem:[#allocation19_spill] sm:$0xff] }
 0x2cc   : > { %14613 = vst [vmem:[#allocation13_spill] sm:$0xff] %v11827_v5  ;;  %14615 = vst [vmem:[#allocation14_spill] sm:$0xff] %v11830_v15  ;;  %v11843_v40 = vadd.f32 %v3872_v3, %v14620_v33  ;;  %v11846_v0 = vadd.f32 %v3873_v53, %v14622_v16  ;;  %v11853_v38 = vadd.f32 %v3874_v57, %v14624_v60  ;;  %v14626_v1 = vld [vmem:[#allocation2_spill] sm:$0xff]  ;;  %v14628_v8 = vld [vmem:[#allocation3_spill] sm:$0xff] }
 0x2cd   : > { %14617 = vst [vmem:[#allocation15_spill] sm:$0xff] %v11837_v22  ;;  %14619 = vst [vmem:[#allocation16_spill] sm:$0xff] %v11840_v27  ;;  %v11856_v4 = vadd.f32 %v3875_v34, %v14626_v1  ;;  %v11859_v13 = vadd.f32 %v3876_v62, %v14628_v8  ;;  %v14630_v3 = vld [vmem:[#allocation4_spill] sm:$0xff]  ;;  %v6302_v53 = vld [vmem:[%s6757_s17 + $0xda] sm:$0xff] }
 0x2ce   : > { %14621 = vst [vmem:[#allocation17_spill] sm:$0xff] %v11843_v40  ;;  %14623 = vst [vmem:[#allocation18_spill] sm:$0xff] %v11846_v0  ;;  %v11862_v28 = vadd.f32 %v3877_v61, %v14630_v3  ;;  %v6303_v9 = vld [vmem:[%s6757_s17 + $0xe2] sm:$0xff]  ;;  %v6304_v25 = vld [vmem:[%s6757_s17 + $0xf2] sm:$0xff] }
 0x2cf   : > { %14625 = vst [vmem:[#allocation19_spill] sm:$0xff] %v11853_v38  ;;  %14627 = vst [vmem:[#allocation2_spill] sm:$0xff] %v11856_v4  ;;  %v6327_v57 = vld [vmem:[%s13465_s1 + $0x2a] ss:$0 sm:$0xff]  ;;  %v14632_v36 = vld [vmem:[#allocation5_spill] sm:$0xff] }
 0x2d0   : > { %14629 = vst [vmem:[#allocation3_spill] sm:$0xff] %v11859_v13  ;;  %14631 = vst [vmem:[#allocation4_spill] sm:$0xff] %v11862_v28  ;;  %v11871_v34 = vadd.f32 %v3878_v47, %v14632_v36  ;;  %v14634_v51 = vld [vmem:[#allocation6_spill] sm:$0xff]  ;;  %v14636_v18 = vld [vmem:[#allocation7_spill] sm:$0xff]  ;;  %v3955_v36 = vmul.f32 %v6327_v57, %v6294_v48  ;;  %v3963_v48 = vmul.f32 %v6327_v57, %v6302_v53 }
 0x2d1   : > { %v11874_v19 = vadd.f32 %v3879_v59, %v14634_v51  ;;  %v11877_v29 = vadd.f32 %v3880_v55, %v14636_v18  ;;  %v14638_v54 = vld [vmem:[#allocation8_spill] sm:$0xff]  ;;  %v6305_v62 = vld [vmem:[%s6757_s17 + $0xfa] sm:$0xff]  ;;  %v14644_v59 = vld [vmem:[#allocation11_spill] sm:$0xff]  ;;  %v3956_v51 = vmul.f32 %v6327_v57, %v6295_v12  ;;  %v3957_v18 = vmul.f32 %v6327_v57, %v6296_v52 }
 0x2d2   : > { %14633 = vst [vmem:[#allocation5_spill] sm:$0xff] %v11871_v34  ;;  %v11880_v63 = vadd.f32 %v3881_v58, %v14638_v54  ;;  %v6306_v61 = vld [vmem:[%s6757_s17 + $0x10a] sm:$0xff]  ;;  %v6307_v44 = vld [vmem:[%s6757_s17 + $0x112] sm:$0xff]  ;;  %v14642_v47 = vld [vmem:[#allocation10_spill] sm:$0xff]  ;;  %v11892_v33 = vadd.f32 %v3884_v30, %v14644_v59  ;;  %v3961_v59 = vmul.f32 %v6327_v57, %v6300_v45  ;;  %v3964_v12 = vmul.f32 %v6327_v57, %v6303_v9 }
 0x2d3   : > { %14635 = vst [vmem:[#allocation6_spill] sm:$0xff] %v11874_v19  ;;  %14637 = vst [vmem:[#allocation7_spill] sm:$0xff] %v11877_v29  ;;  %v14640_v26 = vld [vmem:[#allocation9_spill] sm:$0xff]  ;;  %v11889_v31 = vadd.f32 %v3883_v56, %v14642_v47  ;;  %v14646_v55 = vld [vmem:[#allocation12_spill] sm:$0xff]  ;;  %v3958_v56 = vmul.f32 %v6327_v57, %v6297_v2  ;;  %v3960_v47 = vmul.f32 %v6327_v57, %v6299_v20 }
 0x2d4   : > { %14639 = vst [vmem:[#allocation8_spill] sm:$0xff] %v11880_v63  ;;  %v11886_v42 = vadd.f32 %v3882_v43, %v14640_v26  ;;  %14645 = vst [vmem:[#allocation11_spill] sm:$0xff] %v11892_v33  ;;  %v11895_v16 = vadd.f32 %v3885_v6, %v14646_v55  ;;  %v6308_v58 = vld [vmem:[%s6757_s17 + $0x122] sm:$0xff]  ;;  %v6309_v60 = vld [vmem:[%s6757_s17 + $0x12a] sm:$0xff]  ;;  %v3959_v26 = vmul.f32 %v6327_v57, %v6298_v50 }
 0x2d5   : > { %14643 = vst [vmem:[#allocation10_spill] sm:$0xff] %v11889_v31  ;;  %v6310_v1 = vld [vmem:[%s6757_s17 + $0x13a] sm:$0xff]  ;;  %v6311_v8 = vld [vmem:[%s6757_s17 + $0x142] sm:$0xff]  ;;  %v6312_v3 = vld [vmem:[%s6757_s17 + $0x152] sm:$0xff]  ;;  %v3962_v55 = vmul.f32 %v6327_v57, %v6301_v14  ;;  %v3965_v52 = vmul.f32 %v6327_v57, %v6304_v25  ;;  %v3967_v19 = vmul.f32 %v6327_v57, %v6306_v61  ;;  %v3968_v34 = vmul.f32 %v6327_v57, %v6307_v44 }
 0x2d6   : > { %14641 = vst [vmem:[#allocation9_spill] sm:$0xff] %v11886_v42  ;;  %14647 = vst [vmem:[#allocation12_spill] sm:$0xff] %v11895_v16  ;;  %v6313_v43 = vld [vmem:[%s6757_s17 + $0x15a] sm:$0xff]  ;;  %v6314_v30 = vld [vmem:[%s6757_s17 + $0x16a] sm:$0xff]  ;;  %v3966_v42 = vmul.f32 %v6327_v57, %v6305_v62  ;;  %v3969_v28 = vmul.f32 %v6327_v57, %v6308_v58  ;;  %v3970_v50 = vmul.f32 %v6327_v57, %v6309_v60 }
 0x2d7   : > { %v6315_v54 = vld [vmem:[%s6757_s17 + $0x172] sm:$0xff]  ;;  %v6316_v6 = vld [vmem:[%s6757_s17 + $0x182] sm:$0xff]  ;;  %v6317_v16 = vld [vmem:[%s6757_s17 + $0x18a] sm:$0xff]  ;;  %v3971_v14 = vmul.f32 %v6327_v57, %v6310_v1  ;;  %v3972_v4 = vmul.f32 %v6327_v57, %v6311_v8  ;;  %v3973_v38 = vmul.f32 %v6327_v57, %v6312_v3  ;;  %v3974_v0 = vmul.f32 %v6327_v57, %v6313_v43 }
 0x2d8   : > { %v6318_v33 = vld [vmem:[%s6757_s17 + $0x19a] sm:$0xff]  ;;  %v6319_v31 = vld [vmem:[%s6757_s17 + $0x1a2] sm:$0xff]  ;;  %v6320_v2 = vld [vmem:[%s6757_s17 + $0x1b2] sm:$0xff]  ;;  %v3975_v40 = vmul.f32 %v6327_v57, %v6314_v30  ;;  %v3976_v27 = vmul.f32 %v6327_v57, %v6315_v54  ;;  %v3977_v53 = vmul.f32 %v6327_v57, %v6316_v6  ;;  %v3978_v9 = vmul.f32 %v6327_v57, %v6317_v16 }
 0x2d9   : > { %v6321_v63 = vld [vmem:[%s6757_s17 + $0x1ba] sm:$0xff]  ;;  %v6322_v29 = vld [vmem:[%s6757_s17 + $0x1ca] sm:$0xff]  ;;  %v6323_v20 = vld [vmem:[%s6757_s17 + $0x1d2] sm:$0xff]  ;;  %v3979_v25 = vmul.f32 %v6327_v57, %v6318_v33  ;;  %v3980_v62 = vmul.f32 %v6327_v57, %v6319_v31  ;;  %v3981_v22 = vmul.f32 %v6327_v57, %v6320_v2  ;;  %v11916_v60 = vadd.f32 %v3955_v36, %v11785_v21 }
 0x2da   : > { %v6324_v45 = vld [vmem:[%s6757_s17 + $0x1e2] sm:$0xff]  ;;  %v6325_v13 = vld [vmem:[%s6757_s17 + $0x1ea] sm:$0xff]  ;;  %v3982_v15 = vmul.f32 %v6327_v57, %v6321_v63  ;;  %v3983_v5 = vmul.f32 %v6327_v57, %v6322_v29  ;;  %v3984_v61 = vmul.f32 %v6327_v57, %v6323_v20  ;;  %v11919_v1 = vadd.f32 %v3956_v51, %v11788_v23  ;;  %v6330_v16 = vld [vmem:[%s6757_s17 + $0x93] sm:$0xff] }
 0x2db   : > { %v3985_v44 = vmul.f32 %v6327_v57, %v6324_v45  ;;  %v3986_v58 = vmul.f32 %v6327_v57, %v6325_v13  ;;  %v11922_v8 = vadd.f32 %v3957_v18, %v11791_v41  ;;  %v11925_v31 = vadd.f32 %v3958_v56, %v11794_v24  ;;  %v6328_v33 = vld [vmem:[%s6757_s17 + $0x7b] sm:$0xff]  ;;  %v6332_v36 = vld [vmem:[%s6757_s17 + $0xab] sm:$0xff]  ;;  %v6333_v51 = vld [vmem:[%s6757_s17 + $0xb3] sm:$0xff] }
 0x2dc   : > { %v11928_v29 = vadd.f32 %v3959_v26, %v11797_v46  ;;  %v11931_v13 = vadd.f32 %v3960_v47, %v11800_v11  ;;  %v11934_v21 = vadd.f32 %v3961_v59, %v11803_v35  ;;  %v11937_v23 = vadd.f32 %v3962_v55, %v11806_v37  ;;  %v6334_v18 = vld [vmem:[%s6757_s17 + $0xc3] sm:$0xff]  ;;  %v6335_v56 = vld [vmem:[%s6757_s17 + $0xcb] sm:$0xff] }
 0x2dd   : > { %v11940_v41 = vadd.f32 %v3963_v48, %v11809_v17  ;;  %v11943_v24 = vadd.f32 %v3964_v12, %v11812_v7  ;;  %v11946_v46 = vadd.f32 %v3965_v52, %v11815_v32  ;;  %v11949_v11 = vadd.f32 %v3966_v42, %v11818_v39  ;;  %v14648_v17 = vld [vmem:[#allocation13_spill] sm:$0xff]  ;;  %v14650_v7 = vld [vmem:[#allocation14_spill] sm:$0xff]  ;;  %v14652_v42 = vld [vmem:[#allocation15_spill] sm:$0xff] }
 0x2de   : > { %v11952_v35 = vadd.f32 %v3967_v19, %v11821_v10  ;;  %v11955_v37 = vadd.f32 %v3968_v34, %v11824_v49  ;;  %v11958_v57 = vadd.f32 %v3969_v28, %v14648_v17  ;;  %v11961_v63 = vadd.f32 %v3970_v50, %v14650_v7  ;;  %v6329_v32 = vld [vmem:[%s6757_s17 + $0x83] sm:$0xff]  ;;  %v6331_v39 = vld [vmem:[%s6757_s17 + $0x9b] sm:$0xff]  ;;  %v14654_v10 = vld [vmem:[#allocation16_spill] sm:$0xff] }
 0x2df   : > { %v11968_v3 = vadd.f32 %v3971_v14, %v14652_v42  ;;  %v11971_v19 = vadd.f32 %v3972_v4, %v14654_v10  ;;  %v14656_v49 = vld [vmem:[#allocation17_spill] sm:$0xff]  ;;  %v14658_v28 = vld [vmem:[#allocation18_spill] sm:$0xff]  ;;  %v14660_v30 = vld [vmem:[#allocation19_spill] sm:$0xff] }
 0x2e0   : > { %14649 = vst [vmem:[#allocation13_spill] sm:$0xff] %v11958_v57  ;;  %14651 = vst [vmem:[#allocation14_spill] sm:$0xff] %v11961_v63  ;;  %v11974_v34 = vadd.f32 %v3973_v38, %v14656_v49  ;;  %v11977_v43 = vadd.f32 %v3974_v0, %v14658_v28  ;;  %v11984_v54 = vadd.f32 %v3975_v40, %v14660_v30  ;;  %v14662_v6 = vld [vmem:[#allocation2_spill] sm:$0xff]  ;;  %v14664_v4 = vld [vmem:[#allocation3_spill] sm:$0xff] }
 0x2e1   : > { %14653 = vst [vmem:[#allocation15_spill] sm:$0xff] %v11968_v3  ;;  %14655 = vst [vmem:[#allocation16_spill] sm:$0xff] %v11971_v19  ;;  %v11987_v26 = vadd.f32 %v3976_v27, %v14662_v6  ;;  %v11990_v47 = vadd.f32 %v3977_v53, %v14664_v4  ;;  %v14666_v38 = vld [vmem:[#allocation4_spill] sm:$0xff]  ;;  %v6336_v0 = vld [vmem:[%s6757_s17 + $0xdb] sm:$0xff] }
 0x2e2   : > { %14657 = vst [vmem:[#allocation17_spill] sm:$0xff] %v11974_v34  ;;  %14659 = vst [vmem:[#allocation18_spill] sm:$0xff] %v11977_v43  ;;  %v11993_v59 = vadd.f32 %v3978_v9, %v14666_v38  ;;  %v6337_v55 = vld [vmem:[%s6757_s17 + $0xe3] sm:$0xff]  ;;  %v6338_v48 = vld [vmem:[%s6757_s17 + $0xf3] sm:$0xff] }
 0x2e3   : > { %14661 = vst [vmem:[#allocation19_spill] sm:$0xff] %v11984_v54  ;;  %14663 = vst [vmem:[#allocation2_spill] sm:$0xff] %v11987_v26  ;;  %v6361_v40 = vld [vmem:[%s13465_s1 + $0x2b] ss:$0 sm:$0xff]  ;;  %v14668_v12 = vld [vmem:[#allocation5_spill] sm:$0xff] }
 0x2e4   : > { %14665 = vst [vmem:[#allocation3_spill] sm:$0xff] %v11990_v47  ;;  %14667 = vst [vmem:[#allocation4_spill] sm:$0xff] %v11993_v59  ;;  %v12002_v27 = vadd.f32 %v3979_v25, %v14668_v12  ;;  %v14670_v52 = vld [vmem:[#allocation6_spill] sm:$0xff]  ;;  %v14672_v50 = vld [vmem:[#allocation7_spill] sm:$0xff]  ;;  %v4056_v12 = vmul.f32 %v6361_v40, %v6328_v33  ;;  %v4064_v33 = vmul.f32 %v6361_v40, %v6336_v0 }
 0x2e5   : > { %v12005_v2 = vadd.f32 %v3980_v62, %v14670_v52  ;;  %v12008_v20 = vadd.f32 %v3981_v22, %v14672_v50  ;;  %v14674_v45 = vld [vmem:[#allocation8_spill] sm:$0xff]  ;;  %v6339_v53 = vld [vmem:[%s6757_s17 + $0xfb] sm:$0xff]  ;;  %v14680_v62 = vld [vmem:[#allocation11_spill] sm:$0xff]  ;;  %v4057_v52 = vmul.f32 %v6361_v40, %v6329_v32  ;;  %v4058_v50 = vmul.f32 %v6361_v40, %v6330_v16 }
 0x2e6   : > { %14669 = vst [vmem:[#allocation5_spill] sm:$0xff] %v12002_v27  ;;  %v12011_v14 = vadd.f32 %v3982_v15, %v14674_v45  ;;  %v6340_v9 = vld [vmem:[%s6757_s17 + $0x10b] sm:$0xff]  ;;  %v6341_v17 = vld [vmem:[%s6757_s17 + $0x113] sm:$0xff]  ;;  %v14678_v25 = vld [vmem:[#allocation10_spill] sm:$0xff]  ;;  %v12023_v49 = vadd.f32 %v3985_v44, %v14680_v62  ;;  %v4062_v62 = vmul.f32 %v6361_v40, %v6334_v18  ;;  %v4065_v32 = vmul.f32 %v6361_v40, %v6337_v55 }
 0x2e7   : > { %14671 = vst [vmem:[#allocation6_spill] sm:$0xff] %v12005_v2  ;;  %14673 = vst [vmem:[#allocation7_spill] sm:$0xff] %v12008_v20  ;;  %v14676_v7 = vld [vmem:[#allocation9_spill] sm:$0xff]  ;;  %v12020_v10 = vadd.f32 %v3984_v61, %v14678_v25  ;;  %v14682_v22 = vld [vmem:[#allocation12_spill] sm:$0xff]  ;;  %v4059_v61 = vmul.f32 %v6361_v40, %v6331_v39  ;;  %v4061_v25 = vmul.f32 %v6361_v40, %v6333_v51 }
 0x2e8   : > { %14675 = vst [vmem:[#allocation8_spill] sm:$0xff] %v12011_v14  ;;  %v12017_v42 = vadd.f32 %v3983_v5, %v14676_v7  ;;  %14681 = vst [vmem:[#allocation11_spill] sm:$0xff] %v12023_v49  ;;  %v12026_v28 = vadd.f32 %v3986_v58, %v14682_v22  ;;  %v6342_v15 = vld [vmem:[%s6757_s17 + $0x123] sm:$0xff]  ;;  %v6343_v30 = vld [vmem:[%s6757_s17 + $0x12b] sm:$0xff]  ;;  %v4060_v7 = vmul.f32 %v6361_v40, %v6332_v36 }
 0x2e9   : > { %14679 = vst [vmem:[#allocation10_spill] sm:$0xff] %v12020_v10  ;;  %v6344_v6 = vld [vmem:[%s6757_s17 + $0x13b] sm:$0xff]  ;;  %v6345_v4 = vld [vmem:[%s6757_s17 + $0x143] sm:$0xff]  ;;  %v6346_v38 = vld [vmem:[%s6757_s17 + $0x153] sm:$0xff]  ;;  %v4063_v22 = vmul.f32 %v6361_v40, %v6335_v56  ;;  %v4066_v16 = vmul.f32 %v6361_v40, %v6338_v48  ;;  %v4068_v2 = vmul.f32 %v6361_v40, %v6340_v9  ;;  %v4069_v27 = vmul.f32 %v6361_v40, %v6341_v17 }
 0x2ea   : > { %14677 = vst [vmem:[#allocation9_spill] sm:$0xff] %v12017_v42  ;;  %14683 = vst [vmem:[#allocation12_spill] sm:$0xff] %v12026_v28  ;;  %v6347_v5 = vld [vmem:[%s6757_s17 + $0x15b] sm:$0xff]  ;;  %v6348_v44 = vld [vmem:[%s6757_s17 + $0x16b] sm:$0xff]  ;;  %v4067_v42 = vmul.f32 %v6361_v40, %v6339_v53  ;;  %v4070_v59 = vmul.f32 %v6361_v40, %v6342_v15  ;;  %v4071_v36 = vmul.f32 %v6361_v40, %v6343_v30 }
 0x2eb   : > { %v6349_v45 = vld [vmem:[%s6757_s17 + $0x173] sm:$0xff]  ;;  %v6350_v58 = vld [vmem:[%s6757_s17 + $0x183] sm:$0xff]  ;;  %v6351_v28 = vld [vmem:[%s6757_s17 + $0x18b] sm:$0xff]  ;;  %v4072_v56 = vmul.f32 %v6361_v40, %v6344_v6  ;;  %v4073_v26 = vmul.f32 %v6361_v40, %v6345_v4  ;;  %v4074_v54 = vmul.f32 %v6361_v40, %v6346_v38  ;;  %v4075_v43 = vmul.f32 %v6361_v40, %v6347_v5 }
 0x2ec   : > { %v6352_v49 = vld [vmem:[%s6757_s17 + $0x19b] sm:$0xff]  ;;  %v6353_v10 = vld [vmem:[%s6757_s17 + $0x1a3] sm:$0xff]  ;;  %v6354_v39 = vld [vmem:[%s6757_s17 + $0x1b3] sm:$0xff]  ;;  %v4076_v34 = vmul.f32 %v6361_v40, %v6348_v44  ;;  %v4077_v19 = vmul.f32 %v6361_v40, %v6349_v45  ;;  %v4078_v0 = vmul.f32 %v6361_v40, %v6350_v58  ;;  %v4079_v55 = vmul.f32 %v6361_v40, %v6351_v28 }
 0x2ed   : > { %v6355_v14 = vld [vmem:[%s6757_s17 + $0x1bb] sm:$0xff]  ;;  %v6356_v20 = vld [vmem:[%s6757_s17 + $0x1cb] sm:$0xff]  ;;  %v6357_v51 = vld [vmem:[%s6757_s17 + $0x1d3] sm:$0xff]  ;;  %v4080_v48 = vmul.f32 %v6361_v40, %v6352_v49  ;;  %v4081_v53 = vmul.f32 %v6361_v40, %v6353_v10  ;;  %v4082_v3 = vmul.f32 %v6361_v40, %v6354_v39  ;;  %v12047_v30 = vadd.f32 %v4056_v12, %v11916_v60 }
 0x2ee   : > { %v6358_v18 = vld [vmem:[%s6757_s17 + $0x1e3] sm:$0xff]  ;;  %v6359_v47 = vld [vmem:[%s6757_s17 + $0x1eb] sm:$0xff]  ;;  %v4083_v63 = vmul.f32 %v6361_v40, %v6355_v14  ;;  %v4084_v57 = vmul.f32 %v6361_v40, %v6356_v20  ;;  %v4085_v9 = vmul.f32 %v6361_v40, %v6357_v51  ;;  %v12050_v6 = vadd.f32 %v4057_v52, %v11919_v1  ;;  %v6364_v28 = vld [vmem:[%s6757_s17 + $0x94] sm:$0xff] }
 0x2ef   : > { %v4086_v17 = vmul.f32 %v6361_v40, %v6358_v18  ;;  %v4087_v15 = vmul.f32 %v6361_v40, %v6359_v47  ;;  %v12053_v4 = vadd.f32 %v4058_v50, %v11922_v8  ;;  %v12056_v10 = vadd.f32 %v4059_v61, %v11925_v31  ;;  %v6362_v49 = vld [vmem:[%s6757_s17 + $0x7c] sm:$0xff]  ;;  %v6366_v12 = vld [vmem:[%s6757_s17 + $0xac] sm:$0xff]  ;;  %v6367_v52 = vld [vmem:[%s6757_s17 + $0xb4] sm:$0xff] }
 0x2f0   : > { %v12059_v20 = vadd.f32 %v4060_v7, %v11928_v29  ;;  %v12062_v47 = vadd.f32 %v4061_v25, %v11931_v13  ;;  %v12065_v60 = vadd.f32 %v4062_v62, %v11934_v21  ;;  %v12068_v1 = vadd.f32 %v4063_v22, %v11937_v23  ;;  %v6368_v50 = vld [vmem:[%s6757_s17 + $0xc4] sm:$0xff]  ;;  %v6369_v61 = vld [vmem:[%s6757_s17 + $0xcc] sm:$0xff] }
 0x2f1   : > { %v12071_v8 = vadd.f32 %v4064_v33, %v11940_v41  ;;  %v12074_v31 = vadd.f32 %v4065_v32, %v11943_v24  ;;  %v12077_v29 = vadd.f32 %v4066_v16, %v11946_v46  ;;  %v12080_v13 = vadd.f32 %v4067_v42, %v11949_v11  ;;  %v14684_v41 = vld [vmem:[#allocation13_spill] sm:$0xff]  ;;  %v14686_v24 = vld [vmem:[#allocation14_spill] sm:$0xff]  ;;  %v14688_v42 = vld [vmem:[#allocation15_spill] sm:$0xff] }
 0x2f2   : > { %v12083_v21 = vadd.f32 %v4068_v2, %v11952_v35  ;;  %v12086_v23 = vadd.f32 %v4069_v27, %v11955_v37  ;;  %v12089_v40 = vadd.f32 %v4070_v59, %v14684_v41  ;;  %v12092_v14 = vadd.f32 %v4071_v36, %v14686_v24  ;;  %v6363_v46 = vld [vmem:[%s6757_s17 + $0x84] sm:$0xff]  ;;  %v6365_v11 = vld [vmem:[%s6757_s17 + $0x9c] sm:$0xff]  ;;  %v14690_v35 = vld [vmem:[#allocation16_spill] sm:$0xff] }
 0x2f3   : > { %v12099_v38 = vadd.f32 %v4072_v56, %v14688_v42  ;;  %v12102_v2 = vadd.f32 %v4073_v26, %v14690_v35  ;;  %v14692_v37 = vld [vmem:[#allocation17_spill] sm:$0xff]  ;;  %v14694_v59 = vld [vmem:[#allocation18_spill] sm:$0xff]  ;;  %v14696_v44 = vld [vmem:[#allocation19_spill] sm:$0xff] }
 0x2f4   : > { %14685 = vst [vmem:[#allocation13_spill] sm:$0xff] %v12089_v40  ;;  %14687 = vst [vmem:[#allocation14_spill] sm:$0xff] %v12092_v14  ;;  %v12105_v27 = vadd.f32 %v4074_v54, %v14692_v37  ;;  %v12108_v5 = vadd.f32 %v4075_v43, %v14694_v59  ;;  %v12115_v45 = vadd.f32 %v4076_v34, %v14696_v44  ;;  %v14698_v58 = vld [vmem:[#allocation2_spill] sm:$0xff]  ;;  %v14700_v26 = vld [vmem:[#allocation3_spill] sm:$0xff] }
 0x2f5   : > { %14689 = vst [vmem:[#allocation15_spill] sm:$0xff] %v12099_v38  ;;  %14691 = vst [vmem:[#allocation16_spill] sm:$0xff] %v12102_v2  ;;  %v12118_v7 = vadd.f32 %v4077_v19, %v14698_v58  ;;  %v12121_v25 = vadd.f32 %v4078_v0, %v14700_v26  ;;  %v14702_v54 = vld [vmem:[#allocation4_spill] sm:$0xff]  ;;  %v6370_v43 = vld [vmem:[%s6757_s17 + $0xdc] sm:$0xff] }
 0x2f6   : > { %14693 = vst [vmem:[#allocation17_spill] sm:$0xff] %v12105_v27  ;;  %14695 = vst [vmem:[#allocation18_spill] sm:$0xff] %v12108_v5  ;;  %v12124_v62 = vadd.f32 %v4079_v55, %v14702_v54  ;;  %v6371_v22 = vld [vmem:[%s6757_s17 + $0xe4] sm:$0xff]  ;;  %v6372_v33 = vld [vmem:[%s6757_s17 + $0xf4] sm:$0xff] }
 0x2f7   : > { %14697 = vst [vmem:[#allocation19_spill] sm:$0xff] %v12115_v45  ;;  %14699 = vst [vmem:[#allocation2_spill] sm:$0xff] %v12118_v7  ;;  %v6395_v34 = vld [vmem:[%s13465_s1 + $0x2c] ss:$0 sm:$0xff]  ;;  %v14704_v32 = vld [vmem:[#allocation5_spill] sm:$0xff] }
 0x2f8   : > { %14701 = vst [vmem:[#allocation3_spill] sm:$0xff] %v12121_v25  ;;  %14703 = vst [vmem:[#allocation4_spill] sm:$0xff] %v12124_v62  ;;  %v12133_v19 = vadd.f32 %v4080_v48, %v14704_v32  ;;  %v14706_v16 = vld [vmem:[#allocation6_spill] sm:$0xff]  ;;  %v14708_v36 = vld [vmem:[#allocation7_spill] sm:$0xff]  ;;  %v4157_v32 = vmul.f32 %v6395_v34, %v6362_v49  ;;  %v4165_v49 = vmul.f32 %v6395_v34, %v6370_v43 }
 0x2f9   : > { %v12136_v39 = vadd.f32 %v4081_v53, %v14706_v16  ;;  %v12139_v51 = vadd.f32 %v4082_v3, %v14708_v36  ;;  %v14710_v18 = vld [vmem:[#allocation8_spill] sm:$0xff]  ;;  %v6373_v0 = vld [vmem:[%s6757_s17 + $0xfc] sm:$0xff]  ;;  %v14716_v53 = vld [vmem:[#allocation11_spill] sm:$0xff]  ;;  %v4158_v16 = vmul.f32 %v6395_v34, %v6363_v46  ;;  %v4159_v36 = vmul.f32 %v6395_v34, %v6364_v28 }
 0x2fa   : > { %14705 = vst [vmem:[#allocation5_spill] sm:$0xff] %v12133_v19  ;;  %v12142_v56 = vadd.f32 %v4083_v63, %v14710_v18  ;;  %v6374_v55 = vld [vmem:[%s6757_s17 + $0x10c] sm:$0xff]  ;;  %v6375_v41 = vld [vmem:[%s6757_s17 + $0x114] sm:$0xff]  ;;  %v14714_v48 = vld [vmem:[#allocation10_spill] sm:$0xff]  ;;  %v12154_v37 = vadd.f32 %v4086_v17, %v14716_v53  ;;  %v4163_v53 = vmul.f32 %v6395_v34, %v6368_v50  ;;  %v4166_v46 = vmul.f32 %v6395_v34, %v6371_v22 }
 0x2fb   : > { %14707 = vst [vmem:[#allocation6_spill] sm:$0xff] %v12136_v39  ;;  %14709 = vst [vmem:[#allocation7_spill] sm:$0xff] %v12139_v51  ;;  %v14712_v24 = vld [vmem:[#allocation9_spill] sm:$0xff]  ;;  %v12151_v35 = vadd.f32 %v4085_v9, %v14714_v48  ;;  %v14718_v3 = vld [vmem:[#allocation12_spill] sm:$0xff]  ;;  %v4160_v9 = vmul.f32 %v6395_v34, %v6365_v11  ;;  %v4162_v48 = vmul.f32 %v6395_v34, %v6367_v52 }
 0x2fc   : > { %14711 = vst [vmem:[#allocation8_spill] sm:$0xff] %v12142_v56  ;;  %v12148_v42 = vadd.f32 %v4084_v57, %v14712_v24  ;;  %14717 = vst [vmem:[#allocation11_spill] sm:$0xff] %v12154_v37  ;;  %v12157_v59 = vadd.f32 %v4087_v15, %v14718_v3  ;;  %v6376_v63 = vld [vmem:[%s6757_s17 + $0x124] sm:$0xff]  ;;  %v6377_v44 = vld [vmem:[%s6757_s17 + $0x12c] sm:$0xff]  ;;  %v4161_v24 = vmul.f32 %v6395_v34, %v6366_v12 }
 0x2fd   : > { %14715 = vst [vmem:[#allocation10_spill] sm:$0xff] %v12151_v35  ;;  %v6378_v58 = vld [vmem:[%s6757_s17 + $0x13c] sm:$0xff]  ;;  %v6379_v26 = vld [vmem:[%s6757_s17 + $0x144] sm:$0xff]  ;;  %v6380_v54 = vld [vmem:[%s6757_s17 + $0x154] sm:$0xff]  ;;  %v4164_v3 = vmul.f32 %v6395_v34, %v6369_v61  ;;  %v4167_v28 = vmul.f32 %v6395_v34, %v6372_v33  ;;  %v4169_v39 = vmul.f32 %v6395_v34, %v6374_v55  ;;  %v4170_v19 = vmul.f32 %v6395_v34, %v6375_v41 }
 0x2fe   : > { %14713 = vst [vmem:[#allocation9_spill] sm:$0xff] %v12148_v42  ;;  %14719 = vst [vmem:[#allocation12_spill] sm:$0xff] %v12157_v59  ;;  %v6381_v57 = vld [vmem:[%s6757_s17 + $0x15c] sm:$0xff]  ;;  %v6382_v17 = vld [vmem:[%s6757_s17 + $0x16c] sm:$0xff]  ;;  %v4168_v42 = vmul.f32 %v6395_v34, %v6373_v0  ;;  %v4171_v62 = vmul.f32 %v6395_v34, %v6376_v63  ;;  %v4172_v12 = vmul.f32 %v6395_v34, %v6377_v44 }
 0x2ff   : > { %v6383_v18 = vld [vmem:[%s6757_s17 + $0x174] sm:$0xff]  ;;  %v6384_v15 = vld [vmem:[%s6757_s17 + $0x184] sm:$0xff]  ;;  %v6385_v59 = vld [vmem:[%s6757_s17 + $0x18c] sm:$0xff]  ;;  %v4173_v61 = vmul.f32 %v6395_v34, %v6378_v58  ;;  %v4174_v7 = vmul.f32 %v6395_v34, %v6379_v26  ;;  %v4175_v45 = vmul.f32 %v6395_v34, %v6380_v54  ;;  %v4176_v5 = vmul.f32 %v6395_v34, %v6381_v57 }
 0x300   : > { %v6386_v37 = vld [vmem:[%s6757_s17 + $0x19c] sm:$0xff]  ;;  %v6387_v35 = vld [vmem:[%s6757_s17 + $0x1a4] sm:$0xff]  ;;  %v6388_v11 = vld [vmem:[%s6757_s17 + $0x1b4] sm:$0xff]  ;;  %v4177_v27 = vmul.f32 %v6395_v34, %v6382_v17  ;;  %v4178_v2 = vmul.f32 %v6395_v34, %v6383_v18  ;;  %v4179_v43 = vmul.f32 %v6395_v34, %v6384_v15  ;;  %v4180_v22 = vmul.f32 %v6395_v34, %v6385_v59 }
 0x301   : > { %v6389_v56 = vld [vmem:[%s6757_s17 + $0x1bc] sm:$0xff]  ;;  %v6390_v51 = vld [vmem:[%s6757_s17 + $0x1cc] sm:$0xff]  ;;  %v6391_v52 = vld [vmem:[%s6757_s17 + $0x1d4] sm:$0xff]  ;;  %v4181_v33 = vmul.f32 %v6395_v34, %v6386_v37  ;;  %v4182_v0 = vmul.f32 %v6395_v34, %v6387_v35  ;;  %v4183_v38 = vmul.f32 %v6395_v34, %v6388_v11  ;;  %v12178_v44 = vadd.f32 %v4157_v32, %v12047_v30 }
 0x302   : > { %v6392_v50 = vld [vmem:[%s6757_s17 + $0x1e4] sm:$0xff]  ;;  %v6393_v25 = vld [vmem:[%s6757_s17 + $0x1ec] sm:$0xff]  ;;  %v4184_v14 = vmul.f32 %v6395_v34, %v6389_v56  ;;  %v4185_v40 = vmul.f32 %v6395_v34, %v6390_v51  ;;  %v4186_v55 = vmul.f32 %v6395_v34, %v6391_v52  ;;  %v12181_v58 = vadd.f32 %v4158_v16, %v12050_v6  ;;  %v6398_v59 = vld [vmem:[%s6757_s17 + $0x95] sm:$0xff] }
 0x303   : > { %v4187_v41 = vmul.f32 %v6395_v34, %v6392_v50  ;;  %v4188_v63 = vmul.f32 %v6395_v34, %v6393_v25  ;;  %v12184_v26 = vadd.f32 %v4159_v36, %v12053_v4  ;;  %v12187_v35 = vadd.f32 %v4160_v9, %v12056_v10  ;;  %v6396_v37 = vld [vmem:[%s6757_s17 + $0x7d] sm:$0xff]  ;;  %v6400_v32 = vld [vmem:[%s6757_s17 + $0xad] sm:$0xff]  ;;  %v6401_v16 = vld [vmem:[%s6757_s17 + $0xb5] sm:$0xff] }
 0x304   : > { %v12190_v51 = vadd.f32 %v4161_v24, %v12059_v20  ;;  %v12193_v25 = vadd.f32 %v4162_v48, %v12062_v47  ;;  %v12196_v30 = vadd.f32 %v4163_v53, %v12065_v60  ;;  %v12199_v6 = vadd.f32 %v4164_v3, %v12068_v1  ;;  %v6402_v36 = vld [vmem:[%s6757_s17 + $0xc5] sm:$0xff]  ;;  %v6403_v9 = vld [vmem:[%s6757_s17 + $0xcd] sm:$0xff] }
 0x305   : > { %v12202_v4 = vadd.f32 %v4165_v49, %v12071_v8  ;;  %v12205_v10 = vadd.f32 %v4166_v46, %v12074_v31  ;;  %v12208_v20 = vadd.f32 %v4167_v28, %v12077_v29  ;;  %v12211_v47 = vadd.f32 %v4168_v42, %v12080_v13  ;;  %v14720_v8 = vld [vmem:[#allocation13_spill] sm:$0xff]  ;;  %v14722_v31 = vld [vmem:[#allocation14_spill] sm:$0xff]  ;;  %v14724_v42 = vld [vmem:[#allocation15_spill] sm:$0xff] }
 0x306   : > { %v12214_v60 = vadd.f32 %v4169_v39, %v12083_v21  ;;  %v12217_v1 = vadd.f32 %v4170_v19, %v12086_v23  ;;  %v12220_v34 = vadd.f32 %v4171_v62, %v14720_v8  ;;  %v12223_v56 = vadd.f32 %v4172_v12, %v14722_v31  ;;  %v6397_v29 = vld [vmem:[%s6757_s17 + $0x85] sm:$0xff]  ;;  %v6399_v13 = vld [vmem:[%s6757_s17 + $0x9d] sm:$0xff]  ;;  %v14726_v21 = vld [vmem:[#allocation16_spill] sm:$0xff] }
 0x307   : > { %v12230_v54 = vadd.f32 %v4173_v61, %v14724_v42  ;;  %v12233_v39 = vadd.f32 %v4174_v7, %v14726_v21  ;;  %v14728_v23 = vld [vmem:[#allocation17_spill] sm:$0xff]  ;;  %v14730_v62 = vld [vmem:[#allocation18_spill] sm:$0xff]  ;;  %v14732_v17 = vld [vmem:[#allocation19_spill] sm:$0xff] }
 0x308   : > { %14721 = vst [vmem:[#allocation13_spill] sm:$0xff] %v12220_v34  ;;  %14723 = vst [vmem:[#allocation14_spill] sm:$0xff] %v12223_v56  ;;  %v12236_v19 = vadd.f32 %v4175_v45, %v14728_v23  ;;  %v12239_v57 = vadd.f32 %v4176_v5, %v14730_v62  ;;  %v12246_v18 = vadd.f32 %v4177_v27, %v14732_v17  ;;  %v14734_v15 = vld [vmem:[#allocation2_spill] sm:$0xff]  ;;  %v14736_v7 = vld [vmem:[#allocation3_spill] sm:$0xff] }
 0x309   : > { %14725 = vst [vmem:[#allocation15_spill] sm:$0xff] %v12230_v54  ;;  %14727 = vst [vmem:[#allocation16_spill] sm:$0xff] %v12233_v39  ;;  %v12249_v24 = vadd.f32 %v4178_v2, %v14734_v15  ;;  %v12252_v48 = vadd.f32 %v4179_v43, %v14736_v7  ;;  %v14738_v45 = vld [vmem:[#allocation4_spill] sm:$0xff]  ;;  %v6404_v5 = vld [vmem:[%s6757_s17 + $0xdd] sm:$0xff] }
 0x30a   : > { %14729 = vst [vmem:[#allocation17_spill] sm:$0xff] %v12236_v19  ;;  %14731 = vst [vmem:[#allocation18_spill] sm:$0xff] %v12239_v57  ;;  %v12255_v53 = vadd.f32 %v4180_v22, %v14738_v45  ;;  %v6405_v3 = vld [vmem:[%s6757_s17 + $0xe5] sm:$0xff]  ;;  %v6406_v49 = vld [vmem:[%s6757_s17 + $0xf5] sm:$0xff] }
 0x30b   : > { %14733 = vst [vmem:[#allocation19_spill] sm:$0xff] %v12246_v18  ;;  %14735 = vst [vmem:[#allocation2_spill] sm:$0xff] %v12249_v24  ;;  %v6429_v27 = vld [vmem:[%s13465_s1 + $0x2d] ss:$0 sm:$0xff]  ;;  %v14740_v46 = vld [vmem:[#allocation5_spill] sm:$0xff] }
 0x30c   : > { %14737 = vst [vmem:[#allocation3_spill] sm:$0xff] %v12252_v48  ;;  %14739 = vst [vmem:[#allocation4_spill] sm:$0xff] %v12255_v53  ;;  %v12264_v2 = vadd.f32 %v4181_v33, %v14740_v46  ;;  %v14742_v28 = vld [vmem:[#allocation6_spill] sm:$0xff]  ;;  %v14744_v12 = vld [vmem:[#allocation7_spill] sm:$0xff]  ;;  %v4258_v46 = vmul.f32 %v6429_v27, %v6396_v37  ;;  %v4266_v37 = vmul.f32 %v6429_v27, %v6404_v5 }
 0x30d   : > { %v12267_v11 = vadd.f32 %v4182_v0, %v14742_v28  ;;  %v12270_v52 = vadd.f32 %v4183_v38, %v14744_v12  ;;  %v14746_v50 = vld [vmem:[#allocation8_spill] sm:$0xff]  ;;  %v6407_v43 = vld [vmem:[%s6757_s17 + $0xfd] sm:$0xff]  ;;  %v14752_v0 = vld [vmem:[#allocation11_spill] sm:$0xff]  ;;  %v4259_v28 = vmul.f32 %v6429_v27, %v6397_v29  ;;  %v4260_v12 = vmul.f32 %v6429_v27, %v6398_v59 }
 0x30e   : > { %14741 = vst [vmem:[#allocation5_spill] sm:$0xff] %v12264_v2  ;;  %v12273_v61 = vadd.f32 %v4184_v14, %v14746_v50  ;;  %v6408_v22 = vld [vmem:[%s6757_s17 + $0x10d] sm:$0xff]  ;;  %v6409_v8 = vld [vmem:[%s6757_s17 + $0x115] sm:$0xff]  ;;  %v14750_v33 = vld [vmem:[#allocation10_spill] sm:$0xff]  ;;  %v12285_v23 = vadd.f32 %v4187_v41, %v14752_v0  ;;  %v4264_v0 = vmul.f32 %v6429_v27, %v6402_v36  ;;  %v4267_v29 = vmul.f32 %v6429_v27, %v6405_v3 }
 0x30f   : > { %14743 = vst [vmem:[#allocation6_spill] sm:$0xff] %v12267_v11  ;;  %14745 = vst [vmem:[#allocation7_spill] sm:$0xff] %v12270_v52  ;;  %v14748_v31 = vld [vmem:[#allocation9_spill] sm:$0xff]  ;;  %v12282_v21 = vadd.f32 %v4186_v55, %v14750_v33  ;;  %v14754_v38 = vld [vmem:[#allocation12_spill] sm:$0xff]  ;;  %v4261_v55 = vmul.f32 %v6429_v27, %v6399_v13  ;;  %v4263_v33 = vmul.f32 %v6429_v27, %v6401_v16 }
 0x310   : > { %14747 = vst [vmem:[#allocation8_spill] sm:$0xff] %v12273_v61  ;;  %v12279_v42 = vadd.f32 %v4185_v40, %v14748_v31  ;;  %14753 = vst [vmem:[#allocation11_spill] sm:$0xff] %v12285_v23  ;;  %v12288_v62 = vadd.f32 %v4188_v63, %v14754_v38  ;;  %v6410_v14 = vld [vmem:[%s6757_s17 + $0x125] sm:$0xff]  ;;  %v6411_v17 = vld [vmem:[%s6757_s17 + $0x12d] sm:$0xff]  ;;  %v4262_v31 = vmul.f32 %v6429_v27, %v6400_v32 }
 0x311   : > { %14751 = vst [vmem:[#allocation10_spill] sm:$0xff] %v12282_v21  ;;  %v6412_v15 = vld [vmem:[%s6757_s17 + $0x13d] sm:$0xff]  ;;  %v6413_v7 = vld [vmem:[%s6757_s17 + $0x145] sm:$0xff]  ;;  %v6414_v45 = vld [vmem:[%s6757_s17 + $0x155] sm:$0xff]  ;;  %v4265_v38 = vmul.f32 %v6429_v27, %v6403_v9  ;;  %v4268_v59 = vmul.f32 %v6429_v27, %v6406_v49  ;;  %v4270_v11 = vmul.f32 %v6429_v27, %v6408_v22  ;;  %v4271_v2 = vmul.f32 %v6429_v27, %v6409_v8 }
 0x312   : > { %14749 = vst [vmem:[#allocation9_spill] sm:$0xff] %v12279_v42  ;;  %14755 = vst [vmem:[#allocation12_spill] sm:$0xff] %v12288_v62  ;;  %v6415_v40 = vld [vmem:[%s6757_s17 + $0x15d] sm:$0xff]  ;;  %v6416_v41 = vld [vmem:[%s6757_s17 + $0x16d] sm:$0xff]  ;;  %v4269_v42 = vmul.f32 %v6429_v27, %v6407_v43  ;;  %v4272_v53 = vmul.f32 %v6429_v27, %v6410_v14  ;;  %v4273_v32 = vmul.f32 %v6429_v27, %v6411_v17 }
 0x313   : > { %v6417_v50 = vld [vmem:[%s6757_s17 + $0x175] sm:$0xff]  ;;  %v6418_v63 = vld [vmem:[%s6757_s17 + $0x185] sm:$0xff]  ;;  %v6419_v62 = vld [vmem:[%s6757_s17 + $0x18d] sm:$0xff]  ;;  %v4274_v9 = vmul.f32 %v6429_v27, %v6412_v15  ;;  %v4275_v24 = vmul.f32 %v6429_v27, %v6413_v7  ;;  %v4276_v18 = vmul.f32 %v6429_v27, %v6414_v45  ;;  %v4277_v57 = vmul.f32 %v6429_v27, %v6415_v40 }
 0x314   : > { %v6420_v23 = vld [vmem:[%s6757_s17 + $0x19d] sm:$0xff]  ;;  %v6421_v21 = vld [vmem:[%s6757_s17 + $0x1a5] sm:$0xff]  ;;  %v6422_v13 = vld [vmem:[%s6757_s17 + $0x1b5] sm:$0xff]  ;;  %v4278_v19 = vmul.f32 %v6429_v27, %v6416_v41  ;;  %v4279_v39 = vmul.f32 %v6429_v27, %v6417_v50  ;;  %v4280_v5 = vmul.f32 %v6429_v27, %v6418_v63  ;;  %v4281_v3 = vmul.f32 %v6429_v27, %v6419_v62 }
 0x315   : > { %v6423_v61 = vld [vmem:[%s6757_s17 + $0x1bd] sm:$0xff]  ;;  %v6424_v52 = vld [vmem:[%s6757_s17 + $0x1cd] sm:$0xff]  ;;  %v6425_v16 = vld [vmem:[%s6757_s17 + $0x1d5] sm:$0xff]  ;;  %v4282_v49 = vmul.f32 %v6429_v27, %v6420_v23  ;;  %v4283_v43 = vmul.f32 %v6429_v27, %v6421_v21  ;;  %v4284_v54 = vmul.f32 %v6429_v27, %v6422_v13  ;;  %v12309_v17 = vadd.f32 %v4258_v46, %v12178_v44 }
 0x316   : > { %v6426_v36 = vld [vmem:[%s6757_s17 + $0x1e5] sm:$0xff]  ;;  %v6427_v48 = vld [vmem:[%s6757_s17 + $0x1ed] sm:$0xff]  ;;  %v4285_v56 = vmul.f32 %v6429_v27, %v6423_v61  ;;  %v4286_v34 = vmul.f32 %v6429_v27, %v6424_v52  ;;  %v4287_v22 = vmul.f32 %v6429_v27, %v6425_v16  ;;  %v12312_v15 = vadd.f32 %v4259_v28, %v12181_v58  ;;  %v6432_v62 = vld [vmem:[%s6757_s17 + $0x96] sm:$0xff] }
 0x317   : > { %v4288_v8 = vmul.f32 %v6429_v27, %v6426_v36  ;;  %v4289_v14 = vmul.f32 %v6429_v27, %v6427_v48  ;;  %v12315_v7 = vadd.f32 %v4260_v12, %v12184_v26  ;;  %v12318_v21 = vadd.f32 %v4261_v55, %v12187_v35  ;;  %v6430_v23 = vld [vmem:[%s6757_s17 + $0x7e] sm:$0xff]  ;;  %v6434_v46 = vld [vmem:[%s6757_s17 + $0xae] sm:$0xff]  ;;  %v6435_v28 = vld [vmem:[%s6757_s17 + $0xb6] sm:$0xff] }
 0x318   : > { %v12321_v52 = vadd.f32 %v4262_v31, %v12190_v51  ;;  %v12324_v48 = vadd.f32 %v4263_v33, %v12193_v25  ;;  %v12327_v44 = vadd.f32 %v4264_v0, %v12196_v30  ;;  %v12330_v58 = vadd.f32 %v4265_v38, %v12199_v6  ;;  %v6436_v12 = vld [vmem:[%s6757_s17 + $0xc6] sm:$0xff]  ;;  %v6437_v55 = vld [vmem:[%s6757_s17 + $0xce] sm:$0xff] }
 0x319   : > { %v12333_v26 = vadd.f32 %v4266_v37, %v12202_v4  ;;  %v12336_v35 = vadd.f32 %v4267_v29, %v12205_v10  ;;  %v12339_v51 = vadd.f32 %v4268_v59, %v12208_v20  ;;  %v12342_v25 = vadd.f32 %v4269_v42, %v12211_v47  ;;  %v14756_v4 = vld [vmem:[#allocation13_spill] sm:$0xff]  ;;  %v14758_v10 = vld [vmem:[#allocation14_spill] sm:$0xff]  ;;  %v14760_v42 = vld [vmem:[#allocation15_spill] sm:$0xff] }
 0x31a   : > { %v12345_v30 = vadd.f32 %v4270_v11, %v12214_v60  ;;  %v12348_v6 = vadd.f32 %v4271_v2, %v12217_v1  ;;  %v12351_v27 = vadd.f32 %v4272_v53, %v14756_v4  ;;  %v12354_v61 = vadd.f32 %v4273_v32, %v14758_v10  ;;  %v6431_v20 = vld [vmem:[%s6757_s17 + $0x86] sm:$0xff]  ;;  %v6433_v47 = vld [vmem:[%s6757_s17 + $0x9e] sm:$0xff]  ;;  %v14762_v60 = vld [vmem:[#allocation16_spill] sm:$0xff] }
 0x31b   : > { %v12361_v45 = vadd.f32 %v4274_v9, %v14760_v42  ;;  %v12364_v11 = vadd.f32 %v4275_v24, %v14762_v60  ;;  %v14764_v1 = vld [vmem:[#allocation17_spill] sm:$0xff]  ;;  %v14766_v53 = vld [vmem:[#allocation18_spill] sm:$0xff]  ;;  %v14768_v41 = vld [vmem:[#allocation19_spill] sm:$0xff] }
 0x31c   : > { %14757 = vst [vmem:[#allocation13_spill] sm:$0xff] %v12351_v27  ;;  %14759 = vst [vmem:[#allocation14_spill] sm:$0xff] %v12354_v61  ;;  %v12367_v2 = vadd.f32 %v4276_v18, %v14764_v1  ;;  %v12370_v40 = vadd.f32 %v4277_v57, %v14766_v53  ;;  %v12377_v50 = vadd.f32 %v4278_v19, %v14768_v41  ;;  %v14770_v63 = vld [vmem:[#allocation2_spill] sm:$0xff]  ;;  %v14772_v24 = vld [vmem:[#allocation3_spill] sm:$0xff] }
 0x31d   : > { %14761 = vst [vmem:[#allocation15_spill] sm:$0xff] %v12361_v45  ;;  %14763 = vst [vmem:[#allocation16_spill] sm:$0xff] %v12364_v11  ;;  %v12380_v31 = vadd.f32 %v4279_v39, %v14770_v63  ;;  %v12383_v33 = vadd.f32 %v4280_v5, %v14772_v24  ;;  %v14774_v18 = vld [vmem:[#allocation4_spill] sm:$0xff]  ;;  %v6438_v57 = vld [vmem:[%s6757_s17 + $0xde] sm:$0xff] }
 0x31e   : > { %14765 = vst [vmem:[#allocation17_spill] sm:$0xff] %v12367_v2  ;;  %14767 = vst [vmem:[#allocation18_spill] sm:$0xff] %v12370_v40  ;;  %v12386_v0 = vadd.f32 %v4281_v3, %v14774_v18  ;;  %v6439_v38 = vld [vmem:[%s6757_s17 + $0xe6] sm:$0xff]  ;;  %v6440_v37 = vld [vmem:[%s6757_s17 + $0xf6] sm:$0xff] }
 0x31f   : > { %14769 = vst [vmem:[#allocation19_spill] sm:$0xff] %v12377_v50  ;;  %14771 = vst [vmem:[#allocation2_spill] sm:$0xff] %v12380_v31  ;;  %v6463_v19 = vld [vmem:[%s13465_s1 + $0x2e] ss:$0 sm:$0xff]  ;;  %v14776_v29 = vld [vmem:[#allocation5_spill] sm:$0xff] }
 0x320   : > { %14773 = vst [vmem:[#allocation3_spill] sm:$0xff] %v12383_v33  ;;  %14775 = vst [vmem:[#allocation4_spill] sm:$0xff] %v12386_v0  ;;  %v12395_v39 = vadd.f32 %v4282_v49, %v14776_v29  ;;  %v14778_v59 = vld [vmem:[#allocation6_spill] sm:$0xff]  ;;  %v14780_v32 = vld [vmem:[#allocation7_spill] sm:$0xff]  ;;  %v4359_v29 = vmul.f32 %v6463_v19, %v6430_v23  ;;  %v4367_v23 = vmul.f32 %v6463_v19, %v6438_v57 }
 0x321   : > { %v12398_v13 = vadd.f32 %v4283_v43, %v14778_v59  ;;  %v12401_v16 = vadd.f32 %v4284_v54, %v14780_v32  ;;  %v14782_v36 = vld [vmem:[#allocation8_spill] sm:$0xff]  ;;  %v6441_v5 = vld [vmem:[%s6757_s17 + $0xfe] sm:$0xff]  ;;  %v14788_v43 = vld [vmem:[#allocation11_spill] sm:$0xff]  ;;  %v4360_v59 = vmul.f32 %v6463_v19, %v6431_v20  ;;  %v4361_v32 = vmul.f32 %v6463_v19, %v6432_v62 }
 0x322   : > { %14777 = vst [vmem:[#allocation5_spill] sm:$0xff] %v12395_v39  ;;  %v12404_v9 = vadd.f32 %v4285_v56, %v14782_v36  ;;  %v6442_v3 = vld [vmem:[%s6757_s17 + $0x10e] sm:$0xff]  ;;  %v6443_v4 = vld [vmem:[%s6757_s17 + $0x116] sm:$0xff]  ;;  %v14786_v49 = vld [vmem:[#allocation10_spill] sm:$0xff]  ;;  %v12416_v1 = vadd.f32 %v4288_v8, %v14788_v43  ;;  %v4365_v43 = vmul.f32 %v6463_v19, %v6436_v12  ;;  %v4368_v20 = vmul.f32 %v6463_v19, %v6439_v38 }
 0x323   : > { %14779 = vst [vmem:[#allocation6_spill] sm:$0xff] %v12398_v13  ;;  %14781 = vst [vmem:[#allocation7_spill] sm:$0xff] %v12401_v16  ;;  %v14784_v10 = vld [vmem:[#allocation9_spill] sm:$0xff]  ;;  %v12413_v60 = vadd.f32 %v4287_v22, %v14786_v49  ;;  %v14790_v54 = vld [vmem:[#allocation12_spill] sm:$0xff]  ;;  %v4362_v22 = vmul.f32 %v6463_v19, %v6433_v47  ;;  %v4364_v49 = vmul.f32 %v6463_v19, %v6435_v28 }
 0x324   : > { %14783 = vst [vmem:[#allocation8_spill] sm:$0xff] %v12404_v9  ;;  %v12410_v42 = vadd.f32 %v4286_v34, %v14784_v10  ;;  %14789 = vst [vmem:[#allocation11_spill] sm:$0xff] %v12416_v1  ;;  %v12419_v53 = vadd.f32 %v4289_v14, %v14790_v54  ;;  %v6444_v56 = vld [vmem:[%s6757_s17 + $0x126] sm:$0xff]  ;;  %v6445_v41 = vld [vmem:[%s6757_s17 + $0x12e] sm:$0xff]  ;;  %v4363_v10 = vmul.f32 %v6463_v19, %v6434_v46 }
 0x325   : > { %14787 = vst [vmem:[#allocation10_spill] sm:$0xff] %v12413_v60  ;;  %v6446_v63 = vld [vmem:[%s6757_s17 + $0x13e] sm:$0xff]  ;;  %v6447_v24 = vld [vmem:[%s6757_s17 + $0x146] sm:$0xff]  ;;  %v6448_v18 = vld [vmem:[%s6757_s17 + $0x156] sm:$0xff]  ;;  %v4366_v54 = vmul.f32 %v6463_v19, %v6437_v55  ;;  %v4369_v62 = vmul.f32 %v6463_v19, %v6440_v37  ;;  %v4371_v13 = vmul.f32 %v6463_v19, %v6442_v3  ;;  %v4372_v39 = vmul.f32 %v6463_v19, %v6443_v4 }
 0x326   : > { %14785 = vst [vmem:[#allocation9_spill] sm:$0xff] %v12410_v42  ;;  %14791 = vst [vmem:[#allocation12_spill] sm:$0xff] %v12419_v53  ;;  %v6449_v34 = vld [vmem:[%s6757_s17 + $0x15e] sm:$0xff]  ;;  %v6450_v8 = vld [vmem:[%s6757_s17 + $0x16e] sm:$0xff]  ;;  %v4370_v42 = vmul.f32 %v6463_v19, %v6441_v5  ;;  %v4373_v0 = vmul.f32 %v6463_v19, %v6444_v56  ;;  %v4374_v46 = vmul.f32 %v6463_v19, %v6445_v41 }
 0x327   : > { %v6451_v36 = vld [vmem:[%s6757_s17 + $0x176] sm:$0xff]  ;;  %v6452_v14 = vld [vmem:[%s6757_s17 + $0x186] sm:$0xff]  ;;  %v6453_v53 = vld [vmem:[%s6757_s17 + $0x18e] sm:$0xff]  ;;  %v4375_v55 = vmul.f32 %v6463_v19, %v6446_v63  ;;  %v4376_v31 = vmul.f32 %v6463_v19, %v6447_v24  ;;  %v4377_v50 = vmul.f32 %v6463_v19, %v6448_v18  ;;  %v4378_v40 = vmul.f32 %v6463_v19, %v6449_v34 }
 0x328   : > { %v6454_v1 = vld [vmem:[%s6757_s17 + $0x19e] sm:$0xff]  ;;  %v6455_v60 = vld [vmem:[%s6757_s17 + $0x1a6] sm:$0xff]  ;;  %v6456_v47 = vld [vmem:[%s6757_s17 + $0x1b6] sm:$0xff]  ;;  %v4379_v2 = vmul.f32 %v6463_v19, %v6450_v8  ;;  %v4380_v11 = vmul.f32 %v6463_v19, %v6451_v36  ;;  %v4381_v57 = vmul.f32 %v6463_v19, %v6452_v14  ;;  %v4382_v38 = vmul.f32 %v6463_v19, %v6453_v53 }
 0x329   : > { %v6457_v9 = vld [vmem:[%s6757_s17 + $0x1be] sm:$0xff]  ;;  %v6458_v16 = vld [vmem:[%s6757_s17 + $0x1ce] sm:$0xff]  ;;  %v6459_v28 = vld [vmem:[%s6757_s17 + $0x1d6] sm:$0xff]  ;;  %v4383_v37 = vmul.f32 %v6463_v19, %v6454_v1  ;;  %v4384_v5 = vmul.f32 %v6463_v19, %v6455_v60  ;;  %v4385_v45 = vmul.f32 %v6463_v19, %v6456_v47  ;;  %v12440_v41 = vadd.f32 %v4359_v29, %v12309_v17 }
 0x32a   : > { %v6460_v12 = vld [vmem:[%s6757_s17 + $0x1e6] sm:$0xff]  ;;  %v6461_v33 = vld [vmem:[%s6757_s17 + $0x1ee] sm:$0xff]  ;;  %v4386_v61 = vmul.f32 %v6463_v19, %v6457_v9  ;;  %v4387_v27 = vmul.f32 %v6463_v19, %v6458_v16  ;;  %v4388_v3 = vmul.f32 %v6463_v19, %v6459_v28  ;;  %v12443_v63 = vadd.f32 %v4360_v59, %v12312_v15 }
 0x32b   : > { %v4389_v4 = vmul.f32 %v6463_v19, %v6460_v12  ;;  %v4390_v56 = vmul.f32 %v6463_v19, %v6461_v33  ;;  %v12446_v24 = vadd.f32 %v4361_v32, %v12315_v7  ;;  %v12449_v60 = vadd.f32 %v4362_v22, %v12318_v21  ;;  %v6464_v1 = vld [vmem:[%s6757_s17 + $0x90] sm:$0xff]  ;;  %v6466_v53 = vld [vmem:[%s6757_s17 + $0xa8] sm:$0xff]  ;;  %v6468_v29 = vld [vmem:[%s6757_s17 + $0xc0] sm:$0xff] }
 0x32c   : > { %v12452_v16 = vadd.f32 %v4363_v10, %v12321_v52  ;;  %v12455_v33 = vadd.f32 %v4364_v49, %v12324_v48  ;;  %v12458_v17 = vadd.f32 %v4365_v43, %v12327_v44  ;;  %v12461_v15 = vadd.f32 %v4366_v54, %v12330_v58  ;;  %v6469_v59 = vld [vmem:[%s6757_s17 + $0xc8] sm:$0xff]  ;;  %v6470_v32 = vld [vmem:[%s6757_s17 + $0xd8] sm:$0xff]  ;;  %v6471_v22 = vld [vmem:[%s6757_s17 + $0xe0] sm:$0xff] }
 0x32d   : > { %v12464_v7 = vadd.f32 %v4367_v23, %v12333_v26  ;;  %v12467_v21 = vadd.f32 %v4368_v20, %v12336_v35  ;;  %v12470_v52 = vadd.f32 %v4369_v62, %v12339_v51  ;;  %v12473_v48 = vadd.f32 %v4370_v42, %v12342_v25  ;;  %v14792_v26 = vld [vmem:[#allocation13_spill] sm:$0xff]  ;;  %v14794_v35 = vld [vmem:[#allocation14_spill] sm:$0xff]  ;;  %v6467_v25 = vld [vmem:[%s6757_s17 + $0xb0] sm:$0xff] }
 0x32e   : > { %v12476_v44 = vadd.f32 %v4371_v13, %v12345_v30  ;;  %v12479_v58 = vadd.f32 %v4372_v39, %v12348_v6  ;;  %v12482_v19 = vadd.f32 %v4373_v0, %v14792_v26  ;;  %v12485_v9 = vadd.f32 %v4374_v46, %v14794_v35  ;;  %v6465_v51 = vld [vmem:[%s6757_s17 + $0x98] sm:$0xff]  ;;  %v14796_v42 = vld [vmem:[#allocation15_spill] sm:$0xff]  ;;  %v14798_v30 = vld [vmem:[#allocation16_spill] sm:$0xff] }
 0x32f   : > { %v12492_v18 = vadd.f32 %v4375_v55, %v14796_v42  ;;  %v12495_v13 = vadd.f32 %v4376_v31, %v14798_v30  ;;  %v14800_v6 = vld [vmem:[#allocation17_spill] sm:$0xff]  ;;  %v14802_v0 = vld [vmem:[#allocation18_spill] sm:$0xff]  ;;  %v14804_v8 = vld [vmem:[#allocation19_spill] sm:$0xff] }
 0x330   : > { %14793 = vst [vmem:[#allocation13_spill] sm:$0xff] %v12482_v19  ;;  %14795 = vst [vmem:[#allocation14_spill] sm:$0xff] %v12485_v9  ;;  %v12498_v39 = vadd.f32 %v4377_v50, %v14800_v6  ;;  %v12501_v34 = vadd.f32 %v4378_v40, %v14802_v0  ;;  %v12508_v36 = vadd.f32 %v4379_v2, %v14804_v8  ;;  %v14806_v14 = vld [vmem:[#allocation2_spill] sm:$0xff]  ;;  %v14808_v31 = vld [vmem:[#allocation3_spill] sm:$0xff] }
 0x331   : > { %14797 = vst [vmem:[#allocation15_spill] sm:$0xff] %v12492_v18  ;;  %14799 = vst [vmem:[#allocation16_spill] sm:$0xff] %v12495_v13  ;;  %v12511_v10 = vadd.f32 %v4380_v11, %v14806_v14  ;;  %v12514_v49 = vadd.f32 %v4381_v57, %v14808_v31  ;;  %v14810_v50 = vld [vmem:[#allocation4_spill] sm:$0xff]  ;;  %v6473_v54 = vld [vmem:[%s6757_s17 + $0xf8] sm:$0xff] }
 0x332   : > { %14801 = vst [vmem:[#allocation17_spill] sm:$0xff] %v12498_v39  ;;  %14803 = vst [vmem:[#allocation18_spill] sm:$0xff] %v12501_v34  ;;  %v12517_v43 = vadd.f32 %v4382_v38, %v14810_v50  ;;  %v6472_v40 = vld [vmem:[%s6757_s17 + $0xf0] sm:$0xff]  ;;  %v6474_v23 = vld [vmem:[%s6757_s17 + $0x108] sm:$0xff] }
 0x333   : > { %14805 = vst [vmem:[#allocation19_spill] sm:$0xff] %v12508_v36  ;;  %14807 = vst [vmem:[#allocation2_spill] sm:$0xff] %v12511_v10  ;;  %v6497_v2 = vld [vmem:[%s13465_s1 + $0x30] ss:$0 sm:$0xff]  ;;  %v14812_v20 = vld [vmem:[#allocation5_spill] sm:$0xff] }
 0x334   : > { %14809 = vst [vmem:[#allocation3_spill] sm:$0xff] %v12514_v49  ;;  %14811 = vst [vmem:[#allocation4_spill] sm:$0xff] %v12517_v43  ;;  %v12526_v11 = vadd.f32 %v4383_v37, %v14812_v20  ;;  %v14814_v62 = vld [vmem:[#allocation6_spill] sm:$0xff]  ;;  %v14816_v46 = vld [vmem:[#allocation7_spill] sm:$0xff]  ;;  %v4462_v20 = vmul.f32 %v6497_v2, %v6464_v1  ;;  %v4470_v1 = vmul.f32 %v6497_v2, %v6472_v40 }
 0x335   : > { %v12529_v47 = vadd.f32 %v4384_v5, %v14814_v62  ;;  %v12532_v28 = vadd.f32 %v4385_v45, %v14816_v46  ;;  %v14818_v12 = vld [vmem:[#allocation8_spill] sm:$0xff]  ;;  %v6476_v38 = vld [vmem:[%s6757_s17 + $0x120] sm:$0xff]  ;;  %v6477_v26 = vld [vmem:[%s6757_s17 + $0x128] sm:$0xff]  ;;  %v4463_v62 = vmul.f32 %v6497_v2, %v6465_v51  ;;  %v4464_v46 = vmul.f32 %v6497_v2, %v6466_v53 }
 0x336   : > { %14813 = vst [vmem:[#allocation5_spill] sm:$0xff] %v12526_v11  ;;  %v12535_v55 = vadd.f32 %v4386_v61, %v14818_v12  ;;  %v6475_v57 = vld [vmem:[%s6757_s17 + $0x110] sm:$0xff]  ;;  %v14820_v35 = vld [vmem:[#allocation9_spill] sm:$0xff]  ;;  %v14822_v37 = vld [vmem:[#allocation10_spill] sm:$0xff]  ;;  %v4471_v51 = vmul.f32 %v6497_v2, %v6473_v54  ;;  %v4472_v53 = vmul.f32 %v6497_v2, %v6474_v23  ;;  %v4475_v11 = vmul.f32 %v6497_v2, %v6477_v26 }
 0x337   : > { %14815 = vst [vmem:[#allocation6_spill] sm:$0xff] %v12529_v47  ;;  %14817 = vst [vmem:[#allocation7_spill] sm:$0xff] %v12532_v28  ;;  %v12541_v42 = vadd.f32 %v4387_v27, %v14820_v35  ;;  %v12544_v30 = vadd.f32 %v4388_v3, %v14822_v37  ;;  %v14824_v5 = vld [vmem:[#allocation11_spill] sm:$0xff]  ;;  %v14826_v45 = vld [vmem:[#allocation12_spill] sm:$0xff]  ;;  %v4465_v3 = vmul.f32 %v6497_v2, %v6467_v25 }
 0x338   : > { %14819 = vst [vmem:[#allocation8_spill] sm:$0xff] %v12535_v55  ;;  %v12547_v6 = vadd.f32 %v4389_v4, %v14824_v5  ;;  %v12550_v0 = vadd.f32 %v4390_v56, %v14826_v45  ;;  %v6478_v61 = vld [vmem:[%s6757_s17 + $0x138] sm:$0xff]  ;;  %v6479_v8 = vld [vmem:[%s6757_s17 + $0x140] sm:$0xff]  ;;  %v6480_v14 = vld [vmem:[%s6757_s17 + $0x150] sm:$0xff]  ;;  %v4466_v35 = vmul.f32 %v6497_v2, %v6468_v29  ;;  %v4467_v37 = vmul.f32 %v6497_v2, %v6469_v59 }
 0x339   : > { %14821 = vst [vmem:[#allocation9_spill] sm:$0xff] %v12541_v42  ;;  %14823 = vst [vmem:[#allocation10_spill] sm:$0xff] %v12544_v30  ;;  %v6481_v31 = vld [vmem:[%s6757_s17 + $0x158] sm:$0xff]  ;;  %v6482_v50 = vld [vmem:[%s6757_s17 + $0x168] sm:$0xff]  ;;  %v4468_v5 = vmul.f32 %v6497_v2, %v6470_v32  ;;  %v4469_v45 = vmul.f32 %v6497_v2, %v6471_v22  ;;  %v4473_v42 = vmul.f32 %v6497_v2, %v6475_v57 }
 0x33a   : > { %14825 = vst [vmem:[#allocation11_spill] sm:$0xff] %v12547_v6  ;;  %14827 = vst [vmem:[#allocation12_spill] sm:$0xff] %v12550_v0  ;;  %v6483_v27 = vld [vmem:[%s6757_s17 + $0x170] sm:$0xff]  ;;  %v6484_v4 = vld [vmem:[%s6757_s17 + $0x180] sm:$0xff]  ;;  %v4474_v47 = vmul.f32 %v6497_v2, %v6476_v38  ;;  %v4476_v43 = vmul.f32 %v6497_v2, %v6478_v61  ;;  %v4477_v29 = vmul.f32 %v6497_v2, %v6479_v8 }
 0x33b   : > { %v6485_v12 = vld [vmem:[%s6757_s17 + $0x188] sm:$0xff]  ;;  %v6486_v56 = vld [vmem:[%s6757_s17 + $0x198] sm:$0xff]  ;;  %v6487_v0 = vld [vmem:[%s6757_s17 + $0x1a0] sm:$0xff]  ;;  %v4478_v22 = vmul.f32 %v6497_v2, %v6480_v14  ;;  %v4479_v10 = vmul.f32 %v6497_v2, %v6481_v31  ;;  %v4480_v36 = vmul.f32 %v6497_v2, %v6482_v50  ;;  %v4481_v34 = vmul.f32 %v6497_v2, %v6483_v27 }
 0x33c   : > { %v6488_v6 = vld [vmem:[%s6757_s17 + $0x1b0] sm:$0xff]  ;;  %v6489_v30 = vld [vmem:[%s6757_s17 + $0x1b8] sm:$0xff]  ;;  %v6490_v25 = vld [vmem:[%s6757_s17 + $0x1c8] sm:$0xff]  ;;  %v4482_v39 = vmul.f32 %v6497_v2, %v6484_v4  ;;  %v4483_v13 = vmul.f32 %v6497_v2, %v6485_v12  ;;  %v4484_v40 = vmul.f32 %v6497_v2, %v6486_v56  ;;  %v4485_v54 = vmul.f32 %v6497_v2, %v6487_v0 }
 0x33d   : > { %v6491_v55 = vld [vmem:[%s6757_s17 + $0x1d0] sm:$0xff]  ;;  %v6492_v28 = vld [vmem:[%s6757_s17 + $0x1e0] sm:$0xff]  ;;  %v6493_v59 = vld [vmem:[%s6757_s17 + $0x1e8] sm:$0xff]  ;;  %v4486_v23 = vmul.f32 %v6497_v2, %v6488_v6  ;;  %v4487_v57 = vmul.f32 %v6497_v2, %v6489_v30  ;;  %v4488_v18 = vmul.f32 %v6497_v2, %v6490_v25  ;;  %v12571_v8 = vadd.f32 %v4462_v20, %v12440_v41 }
 0x33e   : > { %v6494_v32 = vld [vmem:[%s6757_s17 + $0x1f8] sm:$0xff]  ;;  %v6495_v49 = vld [vmem:[%s6757_s17 + $0x200] sm:$0xff]  ;;  %v4489_v9 = vmul.f32 %v6497_v2, %v6491_v55  ;;  %v4490_v19 = vmul.f32 %v6497_v2, %v6492_v28  ;;  %v4491_v38 = vmul.f32 %v6497_v2, %v6493_v59  ;;  %v12574_v14 = vadd.f32 %v4463_v62, %v12443_v63  ;;  %v6500_v0 = vld [vmem:[%s6757_s17 + $0xa9] sm:$0xff] }
 0x33f   : > { %v4492_v26 = vmul.f32 %v6497_v2, %v6494_v32  ;;  %v4493_v61 = vmul.f32 %v6497_v2, %v6495_v49  ;;  %v12577_v31 = vadd.f32 %v4464_v46, %v12446_v24  ;;  %v12580_v30 = vadd.f32 %v4465_v3, %v12449_v60  ;;  %v6498_v6 = vld [vmem:[%s6757_s17 + $0x91] sm:$0xff]  ;;  %v6502_v20 = vld [vmem:[%s6757_s17 + $0xc1] sm:$0xff]  ;;  %v6503_v62 = vld [vmem:[%s6757_s17 + $0xc9] sm:$0xff] }
 0x340   : > { %v12583_v28 = vadd.f32 %v4466_v35, %v12452_v16  ;;  %v12586_v49 = vadd.f32 %v4467_v37, %v12455_v33  ;;  %v12589_v41 = vadd.f32 %v4468_v5, %v12458_v17  ;;  %v12592_v63 = vadd.f32 %v4469_v45, %v12461_v15  ;;  %v6504_v46 = vld [vmem:[%s6757_s17 + $0xd9] sm:$0xff]  ;;  %v6505_v3 = vld [vmem:[%s6757_s17 + $0xe1] sm:$0xff]  ;;  %v14854_v32 = vld [vmem:[#allocation8_spill] sm:$0xff] }
 0x341   : > { %v12595_v24 = vadd.f32 %v4470_v1, %v12464_v7  ;;  %v12598_v60 = vadd.f32 %v4471_v51, %v12467_v21  ;;  %v12601_v16 = vadd.f32 %v4472_v53, %v12470_v52  ;;  %v12604_v33 = vadd.f32 %v4473_v42, %v12473_v48  ;;  %v14828_v7 = vld [vmem:[#allocation13_spill] sm:$0xff]  ;;  %v14830_v21 = vld [vmem:[#allocation14_spill] sm:$0xff]  ;;  %v14832_v42 = vld [vmem:[#allocation15_spill] sm:$0xff] }
 0x342   : > { %v12607_v17 = vadd.f32 %v4474_v47, %v12476_v44  ;;  %v12610_v15 = vadd.f32 %v4475_v11, %v12479_v58  ;;  %v12613_v2 = vadd.f32 %v4476_v43, %v14828_v7  ;;  %v12616_v55 = vadd.f32 %v4477_v29, %v14830_v21  ;;  %v6499_v52 = vld [vmem:[%s6757_s17 + $0x99] sm:$0xff]  ;;  %v6501_v48 = vld [vmem:[%s6757_s17 + $0xb1] sm:$0xff]  ;;  %v14840_v4 = vld [vmem:[#allocation19_spill] sm:$0xff] }
 0x343   : > { %v12623_v50 = vadd.f32 %v4478_v22, %v14832_v42  ;;  %v14834_v44 = vld [vmem:[#allocation16_spill] sm:$0xff]  ;;  %v14836_v58 = vld [vmem:[#allocation17_spill] sm:$0xff]  ;;  %v14838_v43 = vld [vmem:[#allocation18_spill] sm:$0xff]  ;;  %v12639_v12 = vadd.f32 %v4482_v39, %v14840_v4  ;;  %v12666_v22 = vadd.f32 %v4489_v9, %v14854_v32 }
 0x344   : > { %14829 = vst [vmem:[#allocation13_spill] sm:$0xff] %v12613_v2  ;;  %14831 = vst [vmem:[#allocation14_spill] sm:$0xff] %v12616_v55  ;;  %v12626_v47 = vadd.f32 %v4479_v10, %v14834_v44  ;;  %v12629_v11 = vadd.f32 %v4480_v36, %v14836_v58  ;;  %v12632_v27 = vadd.f32 %v4481_v34, %v14838_v43  ;;  %v14842_v56 = vld [vmem:[#allocation2_spill] sm:$0xff]  ;;  %v14844_v10 = vld [vmem:[#allocation3_spill] sm:$0xff] }
 0x345   : > { %14833 = vst [vmem:[#allocation15_spill] sm:$0xff] %v12623_v50  ;;  %14841 = vst [vmem:[#allocation19_spill] sm:$0xff] %v12639_v12  ;;  %v12642_v35 = vadd.f32 %v4483_v13, %v14842_v56  ;;  %v12645_v37 = vadd.f32 %v4484_v40, %v14844_v10  ;;  %v14846_v36 = vld [vmem:[#allocation4_spill] sm:$0xff]  ;;  %v6507_v45 = vld [vmem:[%s6757_s17 + $0xf9] sm:$0xff] }
 0x346   : > { %14835 = vst [vmem:[#allocation16_spill] sm:$0xff] %v12626_v47  ;;  %14837 = vst [vmem:[#allocation17_spill] sm:$0xff] %v12629_v11  ;;  %v12648_v5 = vadd.f32 %v4485_v54, %v14846_v36  ;;  %v6506_v34 = vld [vmem:[%s6757_s17 + $0xf1] sm:$0xff]  ;;  %v6508_v1 = vld [vmem:[%s6757_s17 + $0x109] sm:$0xff] }
 0x347   : > { %14839 = vst [vmem:[#allocation18_spill] sm:$0xff] %v12632_v27  ;;  %14843 = vst [vmem:[#allocation2_spill] sm:$0xff] %v12642_v35  ;;  %v6531_v39 = vld [vmem:[%s13465_s1 + $0x31] ss:$0 sm:$0xff]  ;;  %v14848_v51 = vld [vmem:[#allocation5_spill] sm:$0xff] }
 0x348   : > { %14845 = vst [vmem:[#allocation3_spill] sm:$0xff] %v12645_v37  ;;  %14847 = vst [vmem:[#allocation4_spill] sm:$0xff] %v12648_v5  ;;  %v12657_v13 = vadd.f32 %v4486_v23, %v14848_v51  ;;  %v14850_v53 = vld [vmem:[#allocation6_spill] sm:$0xff]  ;;  %v14852_v29 = vld [vmem:[#allocation7_spill] sm:$0xff]  ;;  %v4563_v51 = vmul.f32 %v6531_v39, %v6498_v6  ;;  %v4571_v6 = vmul.f32 %v6531_v39, %v6506_v34 }
 0x349   : > { %v12660_v25 = vadd.f32 %v4487_v57, %v14850_v53  ;;  %v12663_v59 = vadd.f32 %v4488_v18, %v14852_v29  ;;  %14855 = vst [vmem:[#allocation8_spill] sm:$0xff] %v12666_v22  ;;  %v6509_v40 = vld [vmem:[%s6757_s17 + $0x111] sm:$0xff]  ;;  %v6510_v54 = vld [vmem:[%s6757_s17 + $0x121] sm:$0xff]  ;;  %v6511_v7 = vld [vmem:[%s6757_s17 + $0x129] sm:$0xff]  ;;  %v4564_v53 = vmul.f32 %v6531_v39, %v6499_v52  ;;  %v4565_v29 = vmul.f32 %v6531_v39, %v6500_v0 }
 0x34a   : > { %14849 = vst [vmem:[#allocation5_spill] sm:$0xff] %v12657_v13  ;;  %v14856_v21 = vld [vmem:[#allocation9_spill] sm:$0xff]  ;;  %v14858_v23 = vld [vmem:[#allocation10_spill] sm:$0xff]  ;;  %v14860_v57 = vld [vmem:[#allocation11_spill] sm:$0xff]  ;;  %v4572_v52 = vmul.f32 %v6531_v39, %v6507_v45  ;;  %v4573_v0 = vmul.f32 %v6531_v39, %v6508_v1  ;;  %v4576_v13 = vmul.f32 %v6531_v39, %v6511_v7 }
 0x34b   : > { %14851 = vst [vmem:[#allocation6_spill] sm:$0xff] %v12660_v25  ;;  %14853 = vst [vmem:[#allocation7_spill] sm:$0xff] %v12663_v59  ;;  %v12672_v42 = vadd.f32 %v4490_v19, %v14856_v21  ;;  %v12675_v44 = vadd.f32 %v4491_v38, %v14858_v23  ;;  %v12678_v58 = vadd.f32 %v4492_v26, %v14860_v57  ;;  %v14862_v18 = vld [vmem:[#allocation12_spill] sm:$0xff]  ;;  %v6512_v9 = vld [vmem:[%s6757_s17 + $0x139] sm:$0xff] }
 0x34c   : > { %v12681_v43 = vadd.f32 %v4493_v61, %v14862_v18  ;;  %v6513_v4 = vld [vmem:[%s6757_s17 + $0x141] sm:$0xff]  ;;  %v6514_v56 = vld [vmem:[%s6757_s17 + $0x151] sm:$0xff]  ;;  %v6515_v10 = vld [vmem:[%s6757_s17 + $0x159] sm:$0xff]  ;;  %v4566_v38 = vmul.f32 %v6531_v39, %v6501_v48  ;;  %v4567_v21 = vmul.f32 %v6531_v39, %v6502_v20  ;;  %v4568_v23 = vmul.f32 %v6531_v39, %v6503_v62 }
 0x34d   : > { %14857 = vst [vmem:[#allocation9_spill] sm:$0xff] %v12672_v42  ;;  %14859 = vst [vmem:[#allocation10_spill] sm:$0xff] %v12675_v44  ;;  %v6516_v36 = vld [vmem:[%s6757_s17 + $0x169] sm:$0xff]  ;;  %v6517_v19 = vld [vmem:[%s6757_s17 + $0x171] sm:$0xff]  ;;  %v4569_v57 = vmul.f32 %v6531_v39, %v6504_v46  ;;  %v4570_v18 = vmul.f32 %v6531_v39, %v6505_v3  ;;  %v4574_v42 = vmul.f32 %v6531_v39, %v6509_v40 }
 0x34e   : > { %14861 = vst [vmem:[#allocation11_spill] sm:$0xff] %v12678_v58  ;;  %14863 = vst [vmem:[#allocation12_spill] sm:$0xff] %v12681_v43  ;;  %v6518_v26 = vld [vmem:[%s6757_s17 + $0x181] sm:$0xff]  ;;  %v6519_v32 = vld [vmem:[%s6757_s17 + $0x189] sm:$0xff]  ;;  %v4575_v25 = vmul.f32 %v6531_v39, %v6510_v54  ;;  %v4577_v5 = vmul.f32 %v6531_v39, %v6512_v9  ;;  %v4578_v20 = vmul.f32 %v6531_v39, %v6513_v4 }
 0x34f   : > { %v6520_v61 = vld [vmem:[%s6757_s17 + $0x199] sm:$0xff]  ;;  %v6521_v43 = vld [vmem:[%s6757_s17 + $0x1a1] sm:$0xff]  ;;  %v6522_v58 = vld [vmem:[%s6757_s17 + $0x1b1] sm:$0xff]  ;;  %v4579_v3 = vmul.f32 %v6531_v39, %v6514_v56  ;;  %v4580_v35 = vmul.f32 %v6531_v39, %v6515_v10  ;;  %v4581_v12 = vmul.f32 %v6531_v39, %v6516_v36  ;;  %v4582_v27 = vmul.f32 %v6531_v39, %v6517_v19 }
 0x350   : > { %v6523_v44 = vld [vmem:[%s6757_s17 + $0x1b9] sm:$0xff]  ;;  %v6524_v48 = vld [vmem:[%s6757_s17 + $0x1c9] sm:$0xff]  ;;  %v6525_v22 = vld [vmem:[%s6757_s17 + $0x1d1] sm:$0xff]  ;;  %v4583_v11 = vmul.f32 %v6531_v39, %v6518_v26  ;;  %v4584_v47 = vmul.f32 %v6531_v39, %v6519_v32  ;;  %v4585_v34 = vmul.f32 %v6531_v39, %v6520_v61  ;;  %v4586_v45 = vmul.f32 %v6531_v39, %v6521_v43 }
 0x351   : > { %v6526_v59 = vld [vmem:[%s6757_s17 + $0x1e1] sm:$0xff]  ;;  %v6527_v62 = vld [vmem:[%s6757_s17 + $0x1e9] sm:$0xff]  ;;  %v6528_v46 = vld [vmem:[%s6757_s17 + $0x1f9] sm:$0xff]  ;;  %v4587_v1 = vmul.f32 %v6531_v39, %v6522_v58  ;;  %v4588_v40 = vmul.f32 %v6531_v39, %v6523_v44  ;;  %v4589_v50 = vmul.f32 %v6531_v39, %v6524_v48  ;;  %v4590_v55 = vmul.f32 %v6531_v39, %v6525_v22 }
 0x352   : > { %v6529_v37 = vld [vmem:[%s6757_s17 + $0x201] sm:$0xff]  ;;  %v4591_v2 = vmul.f32 %v6531_v39, %v6526_v59  ;;  %v4592_v54 = vmul.f32 %v6531_v39, %v6527_v62  ;;  %v4593_v7 = vmul.f32 %v6531_v39, %v6528_v46  ;;  %v12702_v4 = vadd.f32 %v4563_v51, %v12571_v8  ;;  %v6532_v58 = vld [vmem:[%s6757_s17 + $0x92] sm:$0xff]  ;;  %v6534_v43 = vld [vmem:[%s6757_s17 + $0xaa] sm:$0xff] }
 0x353   : > { %v4594_v9 = vmul.f32 %v6531_v39, %v6529_v37  ;;  %v12705_v56 = vadd.f32 %v4564_v53, %v12574_v14  ;;  %v12708_v10 = vadd.f32 %v4565_v29, %v12577_v31  ;;  %v12711_v44 = vadd.f32 %v4566_v38, %v12580_v30  ;;  %v6536_v51 = vld [vmem:[%s6757_s17 + $0xc2] sm:$0xff]  ;;  %v6537_v53 = vld [vmem:[%s6757_s17 + $0xca] sm:$0xff]  ;;  %v6538_v29 = vld [vmem:[%s6757_s17 + $0xda] sm:$0xff] }
 0x354   : > { %v12714_v59 = vadd.f32 %v4567_v21, %v12583_v28  ;;  %v12717_v37 = vadd.f32 %v4568_v23, %v12586_v49  ;;  %v12720_v8 = vadd.f32 %v4569_v57, %v12589_v41  ;;  %v12723_v14 = vadd.f32 %v4570_v18, %v12592_v63  ;;  %v6539_v38 = vld [vmem:[%s6757_s17 + $0xe2] sm:$0xff]  ;;  %v6541_v18 = vld [vmem:[%s6757_s17 + $0xfa] sm:$0xff]  ;;  %v14890_v46 = vld [vmem:[#allocation8_spill] sm:$0xff] }
 0x355   : > { %v12726_v31 = vadd.f32 %v4571_v6, %v12595_v24  ;;  %v12729_v30 = vadd.f32 %v4572_v52, %v12598_v60  ;;  %v12732_v28 = vadd.f32 %v4573_v0, %v12601_v16  ;;  %v12735_v49 = vadd.f32 %v4574_v42, %v12604_v33  ;;  %v14864_v24 = vld [vmem:[#allocation13_spill] sm:$0xff]  ;;  %v14866_v60 = vld [vmem:[#allocation14_spill] sm:$0xff]  ;;  %v14868_v42 = vld [vmem:[#allocation15_spill] sm:$0xff] }
 0x356   : > { %v12738_v41 = vadd.f32 %v4575_v25, %v12607_v17  ;;  %v12741_v63 = vadd.f32 %v4576_v13, %v12610_v15  ;;  %v12744_v39 = vadd.f32 %v4577_v5, %v14864_v24  ;;  %v12747_v22 = vadd.f32 %v4578_v20, %v14866_v60  ;;  %v6533_v16 = vld [vmem:[%s6757_s17 + $0x9a] sm:$0xff]  ;;  %v6535_v33 = vld [vmem:[%s6757_s17 + $0xb2] sm:$0xff]  ;;  %v14876_v26 = vld [vmem:[#allocation19_spill] sm:$0xff] }
 0x357   : > { %v12754_v36 = vadd.f32 %v4579_v3, %v14868_v42  ;;  %v14870_v17 = vld [vmem:[#allocation16_spill] sm:$0xff]  ;;  %v14872_v15 = vld [vmem:[#allocation17_spill] sm:$0xff]  ;;  %v14874_v5 = vld [vmem:[#allocation18_spill] sm:$0xff]  ;;  %v12770_v32 = vadd.f32 %v4583_v11, %v14876_v26  ;;  %v12797_v3 = vadd.f32 %v4590_v55, %v14890_v46 }
 0x358   : > { %14865 = vst [vmem:[#allocation13_spill] sm:$0xff] %v12744_v39  ;;  %14867 = vst [vmem:[#allocation14_spill] sm:$0xff] %v12747_v22  ;;  %v12757_v25 = vadd.f32 %v4580_v35, %v14870_v17  ;;  %v12760_v13 = vadd.f32 %v4581_v12, %v14872_v15  ;;  %v12763_v19 = vadd.f32 %v4582_v27, %v14874_v5  ;;  %v14878_v61 = vld [vmem:[#allocation2_spill] sm:$0xff]  ;;  %v14880_v35 = vld [vmem:[#allocation3_spill] sm:$0xff] }
 0x359   : > { %14869 = vst [vmem:[#allocation15_spill] sm:$0xff] %v12754_v36  ;;  %14877 = vst [vmem:[#allocation19_spill] sm:$0xff] %v12770_v32  ;;  %v12773_v21 = vadd.f32 %v4584_v47, %v14878_v61  ;;  %v12776_v23 = vadd.f32 %v4585_v34, %v14880_v35  ;;  %v14882_v12 = vld [vmem:[#allocation4_spill] sm:$0xff]  ;;  %v14884_v52 = vld [vmem:[#allocation5_spill] sm:$0xff] }
 0x35a   : > { %14871 = vst [vmem:[#allocation16_spill] sm:$0xff] %v12757_v25  ;;  %14873 = vst [vmem:[#allocation17_spill] sm:$0xff] %v12760_v13  ;;  %v12779_v57 = vadd.f32 %v4586_v45, %v14882_v12  ;;  %v6540_v27 = vld [vmem:[%s6757_s17 + $0xf2] sm:$0xff]  ;;  %v6542_v6 = vld [vmem:[%s6757_s17 + $0x10a] sm:$0xff]  ;;  %v12788_v47 = vadd.f32 %v4587_v1, %v14884_v52 }
 0x35b   : > { %14875 = vst [vmem:[#allocation18_spill] sm:$0xff] %v12763_v19  ;;  %14879 = vst [vmem:[#allocation2_spill] sm:$0xff] %v12773_v21  ;;  %v6565_v11 = vld [vmem:[%s13465_s1 + $0x32] ss:$0 sm:$0xff]  ;;  %v14886_v0 = vld [vmem:[#allocation6_spill] sm:$0xff] }
 0x35c   : > { %14881 = vst [vmem:[#allocation3_spill] sm:$0xff] %v12776_v23  ;;  %14883 = vst [vmem:[#allocation4_spill] sm:$0xff] %v12779_v57  ;;  %v12791_v48 = vadd.f32 %v4588_v40, %v14886_v0  ;;  %v14888_v20 = vld [vmem:[#allocation7_spill] sm:$0xff]  ;;  %v6543_v34 = vld [vmem:[%s6757_s17 + $0x112] sm:$0xff]  ;;  %v4664_v52 = vmul.f32 %v6565_v11, %v6532_v58  ;;  %v4665_v0 = vmul.f32 %v6565_v11, %v6533_v16 }
 0x35d   : > { %14885 = vst [vmem:[#allocation5_spill] sm:$0xff] %v12788_v47  ;;  %v12794_v62 = vadd.f32 %v4589_v50, %v14888_v20  ;;  %14891 = vst [vmem:[#allocation8_spill] sm:$0xff] %v12797_v3  ;;  %v6544_v45 = vld [vmem:[%s6757_s17 + $0x122] sm:$0xff]  ;;  %v6545_v24 = vld [vmem:[%s6757_s17 + $0x12a] sm:$0xff]  ;;  %v4666_v20 = vmul.f32 %v6565_v11, %v6534_v43  ;;  %v4672_v58 = vmul.f32 %v6565_v11, %v6540_v27 }
 0x35e   : > { %14887 = vst [vmem:[#allocation6_spill] sm:$0xff] %v12791_v48  ;;  %v14892_v60 = vld [vmem:[#allocation9_spill] sm:$0xff]  ;;  %v14894_v1 = vld [vmem:[#allocation10_spill] sm:$0xff]  ;;  %v14896_v40 = vld [vmem:[#allocation11_spill] sm:$0xff]  ;;  %v4673_v16 = vmul.f32 %v6565_v11, %v6541_v18  ;;  %v4674_v43 = vmul.f32 %v6565_v11, %v6542_v6  ;;  %v4676_v48 = vmul.f32 %v6565_v11, %v6544_v45  ;;  %v4677_v47 = vmul.f32 %v6565_v11, %v6545_v24 }
 0x35f   : > { %14889 = vst [vmem:[#allocation7_spill] sm:$0xff] %v12794_v62  ;;  %v12803_v42 = vadd.f32 %v4591_v2, %v14892_v60  ;;  %v12806_v17 = vadd.f32 %v4592_v54, %v14894_v1  ;;  %v12809_v15 = vadd.f32 %v4593_v7, %v14896_v40  ;;  %v14898_v50 = vld [vmem:[#allocation12_spill] sm:$0xff]  ;;  %v6546_v55 = vld [vmem:[%s6757_s17 + $0x13a] sm:$0xff]  ;;  %v6547_v26 = vld [vmem:[%s6757_s17 + $0x142] sm:$0xff]  ;;  %v4667_v54 = vmul.f32 %v6565_v11, %v6535_v33 }
 0x360   : > { %v12812_v5 = vadd.f32 %v4594_v9, %v14898_v50  ;;  %v6548_v61 = vld [vmem:[%s6757_s17 + $0x152] sm:$0xff]  ;;  %v6549_v35 = vld [vmem:[%s6757_s17 + $0x15a] sm:$0xff]  ;;  %v6550_v12 = vld [vmem:[%s6757_s17 + $0x16a] sm:$0xff]  ;;  %v4668_v60 = vmul.f32 %v6565_v11, %v6536_v51  ;;  %v4669_v1 = vmul.f32 %v6565_v11, %v6537_v53  ;;  %v4670_v40 = vmul.f32 %v6565_v11, %v6538_v29 }
 0x361   : > { %14893 = vst [vmem:[#allocation9_spill] sm:$0xff] %v12803_v42  ;;  %14895 = vst [vmem:[#allocation10_spill] sm:$0xff] %v12806_v17  ;;  %v6551_v2 = vld [vmem:[%s6757_s17 + $0x172] sm:$0xff]  ;;  %v6552_v7 = vld [vmem:[%s6757_s17 + $0x182] sm:$0xff]  ;;  %v4671_v50 = vmul.f32 %v6565_v11, %v6539_v38  ;;  %v4675_v42 = vmul.f32 %v6565_v11, %v6543_v34  ;;  %v4678_v57 = vmul.f32 %v6565_v11, %v6546_v55 }
 0x362   : > { %14897 = vst [vmem:[#allocation11_spill] sm:$0xff] %v12809_v15  ;;  %14899 = vst [vmem:[#allocation12_spill] sm:$0xff] %v12812_v5  ;;  %v6553_v46 = vld [vmem:[%s6757_s17 + $0x18a] sm:$0xff]  ;;  %v6554_v9 = vld [vmem:[%s6757_s17 + $0x19a] sm:$0xff]  ;;  %v4679_v51 = vmul.f32 %v6565_v11, %v6547_v26  ;;  %v4680_v38 = vmul.f32 %v6565_v11, %v6548_v61  ;;  %v4681_v21 = vmul.f32 %v6565_v11, %v6549_v35 }
 0x363   : > { %v6555_v5 = vld [vmem:[%s6757_s17 + $0x1a2] sm:$0xff]  ;;  %v6556_v15 = vld [vmem:[%s6757_s17 + $0x1b2] sm:$0xff]  ;;  %v6557_v17 = vld [vmem:[%s6757_s17 + $0x1ba] sm:$0xff]  ;;  %v4682_v32 = vmul.f32 %v6565_v11, %v6550_v12  ;;  %v4683_v19 = vmul.f32 %v6565_v11, %v6551_v2  ;;  %v4684_v13 = vmul.f32 %v6565_v11, %v6552_v7  ;;  %v4685_v25 = vmul.f32 %v6565_v11, %v6553_v46 }
 0x364   : > { %v6558_v33 = vld [vmem:[%s6757_s17 + $0x1ca] sm:$0xff]  ;;  %v6559_v3 = vld [vmem:[%s6757_s17 + $0x1d2] sm:$0xff]  ;;  %v6560_v62 = vld [vmem:[%s6757_s17 + $0x1e2] sm:$0xff]  ;;  %v4686_v27 = vmul.f32 %v6565_v11, %v6554_v9  ;;  %v4687_v18 = vmul.f32 %v6565_v11, %v6555_v5  ;;  %v4688_v6 = vmul.f32 %v6565_v11, %v6556_v15  ;;  %v4689_v34 = vmul.f32 %v6565_v11, %v6557_v17 }
 0x365   : > { %v6561_v53 = vld [vmem:[%s6757_s17 + $0x1ea] sm:$0xff]  ;;  %v6562_v29 = vld [vmem:[%s6757_s17 + $0x1fa] sm:$0xff]  ;;  %v6563_v23 = vld [vmem:[%s6757_s17 + $0x202] sm:$0xff]  ;;  %v4690_v36 = vmul.f32 %v6565_v11, %v6558_v33  ;;  %v4691_v22 = vmul.f32 %v6565_v11, %v6559_v3  ;;  %v4692_v39 = vmul.f32 %v6565_v11, %v6560_v62  ;;  %v12833_v26 = vadd.f32 %v4664_v52, %v12702_v4 }
 0x366   : > { %v4693_v45 = vmul.f32 %v6565_v11, %v6561_v53  ;;  %v4694_v24 = vmul.f32 %v6565_v11, %v6562_v29  ;;  %v4695_v55 = vmul.f32 %v6565_v11, %v6563_v23  ;;  %v12836_v61 = vadd.f32 %v4665_v0, %v12705_v56  ;;  %v6566_v15 = vld [vmem:[%s6757_s17 + $0x93] sm:$0xff]  ;;  %v6568_v5 = vld [vmem:[%s6757_s17 + $0xab] sm:$0xff]  ;;  %v6570_v52 = vld [vmem:[%s6757_s17 + $0xc3] sm:$0xff] }
 0x367   : > { %v12839_v35 = vadd.f32 %v4666_v20, %v12708_v10  ;;  %v12842_v17 = vadd.f32 %v4667_v54, %v12711_v44  ;;  %v12845_v62 = vadd.f32 %v4668_v60, %v12714_v59  ;;  %v12848_v23 = vadd.f32 %v4669_v1, %v12717_v37  ;;  %v6571_v0 = vld [vmem:[%s6757_s17 + $0xcb] sm:$0xff]  ;;  %v6572_v20 = vld [vmem:[%s6757_s17 + $0xdb] sm:$0xff]  ;;  %v6573_v54 = vld [vmem:[%s6757_s17 + $0xe3] sm:$0xff] }
 0x368   : > { %v12851_v4 = vadd.f32 %v4670_v40, %v12720_v8  ;;  %v12854_v56 = vadd.f32 %v4671_v50, %v12723_v14  ;;  %v12857_v10 = vadd.f32 %v4672_v58, %v12726_v31  ;;  %v12860_v44 = vadd.f32 %v4673_v16, %v12729_v30  ;;  %v14900_v31 = vld [vmem:[#allocation13_spill] sm:$0xff]  ;;  %v14902_v30 = vld [vmem:[#allocation14_spill] sm:$0xff]  ;;  %v14912_v7 = vld [vmem:[#allocation19_spill] sm:$0xff] }
 0x369   : > { %v12863_v59 = vadd.f32 %v4674_v43, %v12732_v28  ;;  %v12866_v37 = vadd.f32 %v4675_v42, %v12735_v49  ;;  %v12869_v8 = vadd.f32 %v4676_v48, %v12738_v41  ;;  %v12872_v14 = vadd.f32 %v4677_v47, %v12741_v63  ;;  %v6567_v28 = vld [vmem:[%s6757_s17 + $0x9b] sm:$0xff]  ;;  %v6569_v49 = vld [vmem:[%s6757_s17 + $0xb3] sm:$0xff]  ;;  %v14904_v42 = vld [vmem:[#allocation15_spill] sm:$0xff] }
 0x36a   : > { %v12875_v11 = vadd.f32 %v4678_v57, %v14900_v31  ;;  %v12878_v3 = vadd.f32 %v4679_v51, %v14902_v30  ;;  %v12885_v12 = vadd.f32 %v4680_v38, %v14904_v42  ;;  %v14906_v41 = vld [vmem:[#allocation16_spill] sm:$0xff]  ;;  %v14908_v63 = vld [vmem:[#allocation17_spill] sm:$0xff]  ;;  %v14910_v57 = vld [vmem:[#allocation18_spill] sm:$0xff]  ;;  %v12901_v46 = vadd.f32 %v4684_v13, %v14912_v7 }
 0x36b   : > { %v12888_v48 = vadd.f32 %v4681_v21, %v14906_v41  ;;  %v12891_v47 = vadd.f32 %v4682_v32, %v14908_v63  ;;  %v12894_v2 = vadd.f32 %v4683_v19, %v14910_v57  ;;  %v14914_v9 = vld [vmem:[#allocation2_spill] sm:$0xff]  ;;  %v14916_v21 = vld [vmem:[#allocation3_spill] sm:$0xff]  ;;  %v14918_v32 = vld [vmem:[#allocation4_spill] sm:$0xff] }
 0x36c   : > { %14901 = vst [vmem:[#allocation13_spill] sm:$0xff] %v12875_v11  ;;  %14903 = vst [vmem:[#allocation14_spill] sm:$0xff] %v12878_v3  ;;  %v12904_v60 = vadd.f32 %v4685_v25, %v14914_v9  ;;  %v12907_v1 = vadd.f32 %v4686_v27, %v14916_v21  ;;  %v12910_v40 = vadd.f32 %v4687_v18, %v14918_v32  ;;  %v6574_v19 = vld [vmem:[%s6757_s17 + $0xf3] sm:$0xff]  ;;  %v6575_v50 = vld [vmem:[%s6757_s17 + $0xfb] sm:$0xff] }
 0x36d   : > { %14905 = vst [vmem:[#allocation15_spill] sm:$0xff] %v12885_v12  ;;  %14907 = vst [vmem:[#allocation16_spill] sm:$0xff] %v12888_v48  ;;  %v6576_v58 = vld [vmem:[%s6757_s17 + $0x10b] sm:$0xff]  ;;  %v6599_v13 = vld [vmem:[%s13465_s1 + $0x33] ss:$0 sm:$0xff] }
 0x36e   : > { %14909 = vst [vmem:[#allocation17_spill] sm:$0xff] %v12891_v47  ;;  %14911 = vst [vmem:[#allocation18_spill] sm:$0xff] %v12894_v2  ;;  %v14920_v16 = vld [vmem:[#allocation5_spill] sm:$0xff]  ;;  %v14922_v43 = vld [vmem:[#allocation6_spill] sm:$0xff] }
 0x36f   : > { %14913 = vst [vmem:[#allocation19_spill] sm:$0xff] %v12901_v46  ;;  %14915 = vst [vmem:[#allocation2_spill] sm:$0xff] %v12904_v60  ;;  %v12919_v25 = vadd.f32 %v4688_v6, %v14920_v16  ;;  %v12922_v33 = vadd.f32 %v4689_v34, %v14922_v43  ;;  %v14924_v51 = vld [vmem:[#allocation7_spill] sm:$0xff]  ;;  %v14926_v29 = vld [vmem:[#allocation8_spill] sm:$0xff]  ;;  %v4765_v16 = vmul.f32 %v6599_v13, %v6566_v15 }
 0x370   : > { %14917 = vst [vmem:[#allocation3_spill] sm:$0xff] %v12907_v1  ;;  %14919 = vst [vmem:[#allocation4_spill] sm:$0xff] %v12910_v40  ;;  %v12925_v53 = vadd.f32 %v4690_v36, %v14924_v51  ;;  %v12928_v38 = vadd.f32 %v4691_v22, %v14926_v29  ;;  %v6577_v27 = vld [vmem:[%s6757_s17 + $0x113] sm:$0xff]  ;;  %v6578_v18 = vld [vmem:[%s6757_s17 + $0x123] sm:$0xff]  ;;  %v4766_v43 = vmul.f32 %v6599_v13, %v6567_v28 }
 0x371   : > { %14921 = vst [vmem:[#allocation5_spill] sm:$0xff] %v12919_v25  ;;  %14923 = vst [vmem:[#allocation6_spill] sm:$0xff] %v12922_v33  ;;  %v6579_v31 = vld [vmem:[%s6757_s17 + $0x12b] sm:$0xff]  ;;  %v14928_v30 = vld [vmem:[#allocation9_spill] sm:$0xff]  ;;  %v4767_v51 = vmul.f32 %v6599_v13, %v6568_v5  ;;  %v4773_v15 = vmul.f32 %v6599_v13, %v6574_v19  ;;  %v4774_v28 = vmul.f32 %v6599_v13, %v6575_v50 }
 0x372   : > { %14925 = vst [vmem:[#allocation7_spill] sm:$0xff] %v12925_v53  ;;  %14927 = vst [vmem:[#allocation8_spill] sm:$0xff] %v12928_v38  ;;  %v12934_v42 = vadd.f32 %v4692_v39, %v14928_v30  ;;  %v14930_v6 = vld [vmem:[#allocation10_spill] sm:$0xff]  ;;  %v14932_v34 = vld [vmem:[#allocation11_spill] sm:$0xff]  ;;  %v4769_v30 = vmul.f32 %v6599_v13, %v6570_v52  ;;  %v4775_v5 = vmul.f32 %v6599_v13, %v6576_v58 }
 0x373   : > { %v12937_v41 = vadd.f32 %v4693_v45, %v14930_v6  ;;  %v12940_v63 = vadd.f32 %v4694_v24, %v14932_v34  ;;  %v14934_v36 = vld [vmem:[#allocation12_spill] sm:$0xff]  ;;  %v6580_v22 = vld [vmem:[%s6757_s17 + $0x13b] sm:$0xff]  ;;  %v6581_v7 = vld [vmem:[%s6757_s17 + $0x143] sm:$0xff]  ;;  %v4768_v45 = vmul.f32 %v6599_v13, %v6569_v49  ;;  %v4770_v6 = vmul.f32 %v6599_v13, %v6571_v0 }
 0x374   : > { %14929 = vst [vmem:[#allocation9_spill] sm:$0xff] %v12934_v42  ;;  %v12943_v57 = vadd.f32 %v4695_v55, %v14934_v36  ;;  %v6582_v9 = vld [vmem:[%s6757_s17 + $0x153] sm:$0xff]  ;;  %v6583_v21 = vld [vmem:[%s6757_s17 + $0x15b] sm:$0xff]  ;;  %v6584_v32 = vld [vmem:[%s6757_s17 + $0x16b] sm:$0xff]  ;;  %v4771_v34 = vmul.f32 %v6599_v13, %v6572_v20  ;;  %v4772_v36 = vmul.f32 %v6599_v13, %v6573_v54  ;;  %v4776_v42 = vmul.f32 %v6599_v13, %v6577_v27 }
 0x375   : > { %14931 = vst [vmem:[#allocation10_spill] sm:$0xff] %v12937_v41  ;;  %14933 = vst [vmem:[#allocation11_spill] sm:$0xff] %v12940_v63  ;;  %v6585_v39 = vld [vmem:[%s6757_s17 + $0x173] sm:$0xff]  ;;  %v6586_v24 = vld [vmem:[%s6757_s17 + $0x183] sm:$0xff]  ;;  %v4777_v33 = vmul.f32 %v6599_v13, %v6578_v18  ;;  %v4778_v25 = vmul.f32 %v6599_v13, %v6579_v31  ;;  %v4779_v40 = vmul.f32 %v6599_v13, %v6580_v22 }
 0x376   : > { %14935 = vst [vmem:[#allocation12_spill] sm:$0xff] %v12943_v57  ;;  %v6587_v29 = vld [vmem:[%s6757_s17 + $0x18b] sm:$0xff]  ;;  %v6588_v55 = vld [vmem:[%s6757_s17 + $0x19b] sm:$0xff]  ;;  %v6589_v57 = vld [vmem:[%s6757_s17 + $0x1a3] sm:$0xff]  ;;  %v4780_v52 = vmul.f32 %v6599_v13, %v6581_v7  ;;  %v4781_v54 = vmul.f32 %v6599_v13, %v6582_v9  ;;  %v4782_v60 = vmul.f32 %v6599_v13, %v6583_v21  ;;  %v4783_v46 = vmul.f32 %v6599_v13, %v6584_v32 }
 0x377   : > { %v6590_v63 = vld [vmem:[%s6757_s17 + $0x1b3] sm:$0xff]  ;;  %v6591_v41 = vld [vmem:[%s6757_s17 + $0x1bb] sm:$0xff]  ;;  %v6592_v49 = vld [vmem:[%s6757_s17 + $0x1cb] sm:$0xff]  ;;  %v4784_v2 = vmul.f32 %v6599_v13, %v6585_v39  ;;  %v4785_v47 = vmul.f32 %v6599_v13, %v6586_v24  ;;  %v4786_v48 = vmul.f32 %v6599_v13, %v6587_v29  ;;  %v4787_v19 = vmul.f32 %v6599_v13, %v6588_v55 }
 0x378   : > { %v6593_v38 = vld [vmem:[%s6757_s17 + $0x1d3] sm:$0xff]  ;;  %v6594_v53 = vld [vmem:[%s6757_s17 + $0x1e3] sm:$0xff]  ;;  %v6595_v0 = vld [vmem:[%s6757_s17 + $0x1eb] sm:$0xff]  ;;  %v4788_v50 = vmul.f32 %v6599_v13, %v6589_v57  ;;  %v4789_v58 = vmul.f32 %v6599_v13, %v6590_v63  ;;  %v4790_v27 = vmul.f32 %v6599_v13, %v6591_v41  ;;  %v4791_v12 = vmul.f32 %v6599_v13, %v6592_v49 }
 0x379   : > { %v6596_v20 = vld [vmem:[%s6757_s17 + $0x1fb] sm:$0xff]  ;;  %v6597_v1 = vld [vmem:[%s6757_s17 + $0x203] sm:$0xff]  ;;  %v4792_v3 = vmul.f32 %v6599_v13, %v6593_v38  ;;  %v4793_v11 = vmul.f32 %v6599_v13, %v6594_v53  ;;  %v4794_v18 = vmul.f32 %v6599_v13, %v6595_v0  ;;  %v12964_v7 = vadd.f32 %v4765_v16, %v12833_v26  ;;  %v6602_v57 = vld [vmem:[%s6757_s17 + $0xac] sm:$0xff] }
 0x37a   : > { %v4795_v31 = vmul.f32 %v6599_v13, %v6596_v20  ;;  %v4796_v22 = vmul.f32 %v6599_v13, %v6597_v1  ;;  %v12967_v9 = vadd.f32 %v4766_v43, %v12836_v61  ;;  %v12970_v21 = vadd.f32 %v4767_v51, %v12839_v35  ;;  %v6600_v63 = vld [vmem:[%s6757_s17 + $0x94] sm:$0xff]  ;;  %v6604_v16 = vld [vmem:[%s6757_s17 + $0xc4] sm:$0xff]  ;;  %v6605_v43 = vld [vmem:[%s6757_s17 + $0xcc] sm:$0xff] }
 0x37b   : > { %v12973_v41 = vadd.f32 %v4768_v45, %v12842_v17  ;;  %v12976_v53 = vadd.f32 %v4769_v30, %v12845_v62  ;;  %v12979_v1 = vadd.f32 %v4770_v6, %v12848_v23  ;;  %v12982_v26 = vadd.f32 %v4771_v34, %v12851_v4  ;;  %v6606_v51 = vld [vmem:[%s6757_s17 + $0xdc] sm:$0xff]  ;;  %v6607_v45 = vld [vmem:[%s6757_s17 + $0xe4] sm:$0xff]  ;;  %v14962_v20 = vld [vmem:[#allocation8_spill] sm:$0xff] }
 0x37c   : > { %v12985_v61 = vadd.f32 %v4772_v36, %v12854_v56  ;;  %v12988_v35 = vadd.f32 %v4773_v15, %v12857_v10  ;;  %v12991_v17 = vadd.f32 %v4774_v28, %v12860_v44  ;;  %v12994_v62 = vadd.f32 %v4775_v5, %v12863_v59  ;;  %v14936_v10 = vld [vmem:[#allocation13_spill] sm:$0xff]  ;;  %v14938_v44 = vld [vmem:[#allocation14_spill] sm:$0xff]  ;;  %v14948_v24 = vld [vmem:[#allocation19_spill] sm:$0xff] }
 0x37d   : > { %v12997_v23 = vadd.f32 %v4776_v42, %v12866_v37  ;;  %v13000_v4 = vadd.f32 %v4777_v33, %v12869_v8  ;;  %v13003_v56 = vadd.f32 %v4778_v25, %v12872_v14  ;;  %v13006_v13 = vadd.f32 %v4779_v40, %v14936_v10  ;;  %v6601_v59 = vld [vmem:[%s6757_s17 + $0x9c] sm:$0xff]  ;;  %v6603_v37 = vld [vmem:[%s6757_s17 + $0xb4] sm:$0xff]  ;;  %v14940_v42 = vld [vmem:[#allocation15_spill] sm:$0xff] }
 0x37e   : > { %v13009_v38 = vadd.f32 %v4780_v52, %v14938_v44  ;;  %v13016_v32 = vadd.f32 %v4781_v54, %v14940_v42  ;;  %v14942_v8 = vld [vmem:[#allocation16_spill] sm:$0xff]  ;;  %v14944_v14 = vld [vmem:[#allocation17_spill] sm:$0xff]  ;;  %v14946_v40 = vld [vmem:[#allocation18_spill] sm:$0xff]  ;;  %v13032_v29 = vadd.f32 %v4785_v47, %v14948_v24  ;;  %v13059_v54 = vadd.f32 %v4792_v3, %v14962_v20 }
 0x37f   : > { %14937 = vst [vmem:[#allocation13_spill] sm:$0xff] %v13006_v13  ;;  %v13019_v33 = vadd.f32 %v4782_v60, %v14942_v8  ;;  %v13022_v25 = vadd.f32 %v4783_v46, %v14944_v14  ;;  %v13025_v39 = vadd.f32 %v4784_v2, %v14946_v40  ;;  %v14950_v55 = vld [vmem:[#allocation2_spill] sm:$0xff]  ;;  %v14952_v60 = vld [vmem:[#allocation3_spill] sm:$0xff]  ;;  %v14954_v46 = vld [vmem:[#allocation4_spill] sm:$0xff] }
 0x380   : > { %14939 = vst [vmem:[#allocation14_spill] sm:$0xff] %v13009_v38  ;;  %14941 = vst [vmem:[#allocation15_spill] sm:$0xff] %v13016_v32  ;;  %v13035_v30 = vadd.f32 %v4786_v48, %v14950_v55  ;;  %v13038_v6 = vadd.f32 %v4787_v19, %v14952_v60  ;;  %v13041_v34 = vadd.f32 %v4788_v50, %v14954_v46  ;;  %v6608_v2 = vld [vmem:[%s6757_s17 + $0xf4] sm:$0xff]  ;;  %v6609_v36 = vld [vmem:[%s6757_s17 + $0xfc] sm:$0xff] }
 0x381   : > { %14943 = vst [vmem:[#allocation16_spill] sm:$0xff] %v13019_v33  ;;  %14945 = vst [vmem:[#allocation17_spill] sm:$0xff] %v13022_v25  ;;  %v6610_v15 = vld [vmem:[%s6757_s17 + $0x10c] sm:$0xff]  ;;  %v6633_v47 = vld [vmem:[%s13465_s1 + $0x34] ss:$0 sm:$0xff] }
 0x382   : > { %14947 = vst [vmem:[#allocation18_spill] sm:$0xff] %v13025_v39  ;;  %14949 = vst [vmem:[#allocation19_spill] sm:$0xff] %v13032_v29  ;;  %v14956_v28 = vld [vmem:[#allocation5_spill] sm:$0xff]  ;;  %v14958_v5 = vld [vmem:[#allocation6_spill] sm:$0xff] }
 0x383   : > { %14951 = vst [vmem:[#allocation2_spill] sm:$0xff] %v13035_v30  ;;  %14953 = vst [vmem:[#allocation3_spill] sm:$0xff] %v13038_v6  ;;  %v13050_v48 = vadd.f32 %v4789_v58, %v14956_v28  ;;  %v13053_v49 = vadd.f32 %v4790_v27, %v14958_v5  ;;  %v14960_v52 = vld [vmem:[#allocation7_spill] sm:$0xff]  ;;  %v6611_v19 = vld [vmem:[%s6757_s17 + $0x114] sm:$0xff]  ;;  %v4866_v28 = vmul.f32 %v6633_v47, %v6600_v63 }
 0x384   : > { %14955 = vst [vmem:[#allocation4_spill] sm:$0xff] %v13041_v34  ;;  %v13056_v0 = vadd.f32 %v4791_v12, %v14960_v52  ;;  %14963 = vst [vmem:[#allocation8_spill] sm:$0xff] %v13059_v54  ;;  %v6612_v50 = vld [vmem:[%s6757_s17 + $0x124] sm:$0xff]  ;;  %v6613_v10 = vld [vmem:[%s6757_s17 + $0x12c] sm:$0xff]  ;;  %v4867_v5 = vmul.f32 %v6633_v47, %v6601_v59  ;;  %v4868_v52 = vmul.f32 %v6633_v47, %v6602_v57 }
 0x385   : > { %14957 = vst [vmem:[#allocation5_spill] sm:$0xff] %v13050_v48  ;;  %14959 = vst [vmem:[#allocation6_spill] sm:$0xff] %v13053_v49  ;;  %v14964_v44 = vld [vmem:[#allocation9_spill] sm:$0xff]  ;;  %v14966_v58 = vld [vmem:[#allocation10_spill] sm:$0xff]  ;;  %v4874_v63 = vmul.f32 %v6633_v47, %v6608_v2  ;;  %v4875_v59 = vmul.f32 %v6633_v47, %v6609_v36  ;;  %v4876_v57 = vmul.f32 %v6633_v47, %v6610_v15 }
 0x386   : > { %14961 = vst [vmem:[#allocation7_spill] sm:$0xff] %v13056_v0  ;;  %v13065_v42 = vadd.f32 %v4793_v11, %v14964_v44  ;;  %v13068_v8 = vadd.f32 %v4794_v18, %v14966_v58  ;;  %v14968_v27 = vld [vmem:[#allocation11_spill] sm:$0xff]  ;;  %v14970_v12 = vld [vmem:[#allocation12_spill] sm:$0xff]  ;;  %v6614_v3 = vld [vmem:[%s6757_s17 + $0x13c] sm:$0xff]  ;;  %v4869_v18 = vmul.f32 %v6633_v47, %v6603_v37  ;;  %v4870_v44 = vmul.f32 %v6633_v47, %v6604_v16 }
 0x387   : > { %v13071_v14 = vadd.f32 %v4795_v31, %v14968_v27  ;;  %v13074_v40 = vadd.f32 %v4796_v22, %v14970_v12  ;;  %v6615_v24 = vld [vmem:[%s6757_s17 + $0x144] sm:$0xff]  ;;  %v6616_v55 = vld [vmem:[%s6757_s17 + $0x154] sm:$0xff]  ;;  %v6617_v60 = vld [vmem:[%s6757_s17 + $0x15c] sm:$0xff]  ;;  %v4871_v58 = vmul.f32 %v6633_v47, %v6605_v43  ;;  %v4872_v27 = vmul.f32 %v6633_v47, %v6606_v51 }
 0x388   : > { %14965 = vst [vmem:[#allocation9_spill] sm:$0xff] %v13065_v42  ;;  %14967 = vst [vmem:[#allocation10_spill] sm:$0xff] %v13068_v8  ;;  %v6618_v46 = vld [vmem:[%s6757_s17 + $0x16c] sm:$0xff]  ;;  %v6619_v11 = vld [vmem:[%s6757_s17 + $0x174] sm:$0xff]  ;;  %v4873_v12 = vmul.f32 %v6633_v47, %v6607_v45  ;;  %v4877_v42 = vmul.f32 %v6633_v47, %v6611_v19  ;;  %v4878_v49 = vmul.f32 %v6633_v47, %v6612_v50 }
 0x389   : > { %14969 = vst [vmem:[#allocation11_spill] sm:$0xff] %v13071_v14  ;;  %14971 = vst [vmem:[#allocation12_spill] sm:$0xff] %v13074_v40  ;;  %v6620_v31 = vld [vmem:[%s6757_s17 + $0x184] sm:$0xff]  ;;  %v6621_v20 = vld [vmem:[%s6757_s17 + $0x18c] sm:$0xff]  ;;  %v4879_v48 = vmul.f32 %v6633_v47, %v6613_v10  ;;  %v4880_v34 = vmul.f32 %v6633_v47, %v6614_v3  ;;  %v4881_v16 = vmul.f32 %v6633_v47, %v6615_v24 }
 0x38a   : > { %v6622_v22 = vld [vmem:[%s6757_s17 + $0x19c] sm:$0xff]  ;;  %v6623_v40 = vld [vmem:[%s6757_s17 + $0x1a4] sm:$0xff]  ;;  %v6624_v14 = vld [vmem:[%s6757_s17 + $0x1b4] sm:$0xff]  ;;  %v4882_v45 = vmul.f32 %v6633_v47, %v6616_v55  ;;  %v4883_v30 = vmul.f32 %v6633_v47, %v6617_v60  ;;  %v4884_v29 = vmul.f32 %v6633_v47, %v6618_v46  ;;  %v4885_v39 = vmul.f32 %v6633_v47, %v6619_v11 }
 0x38b   : > { %v6625_v8 = vld [vmem:[%s6757_s17 + $0x1bc] sm:$0xff]  ;;  %v6626_v37 = vld [vmem:[%s6757_s17 + $0x1cc] sm:$0xff]  ;;  %v6627_v54 = vld [vmem:[%s6757_s17 + $0x1d4] sm:$0xff]  ;;  %v4886_v25 = vmul.f32 %v6633_v47, %v6620_v31  ;;  %v4887_v33 = vmul.f32 %v6633_v47, %v6621_v20  ;;  %v4888_v2 = vmul.f32 %v6633_v47, %v6622_v22  ;;  %v4889_v36 = vmul.f32 %v6633_v47, %v6623_v40 }
 0x38c   : > { %v6628_v0 = vld [vmem:[%s6757_s17 + $0x1e4] sm:$0xff]  ;;  %v6629_v43 = vld [vmem:[%s6757_s17 + $0x1ec] sm:$0xff]  ;;  %v6630_v51 = vld [vmem:[%s6757_s17 + $0x1fc] sm:$0xff]  ;;  %v4890_v15 = vmul.f32 %v6633_v47, %v6624_v14  ;;  %v4891_v19 = vmul.f32 %v6633_v47, %v6625_v8  ;;  %v4892_v32 = vmul.f32 %v6633_v47, %v6626_v37  ;;  %v4893_v38 = vmul.f32 %v6633_v47, %v6627_v54 }
 0x38d   : > { %v6631_v6 = vld [vmem:[%s6757_s17 + $0x204] sm:$0xff]  ;;  %v4894_v13 = vmul.f32 %v6633_v47, %v6628_v0  ;;  %v4895_v50 = vmul.f32 %v6633_v47, %v6629_v43  ;;  %v4896_v10 = vmul.f32 %v6633_v47, %v6630_v51  ;;  %v13095_v24 = vadd.f32 %v4866_v28, %v12964_v7  ;;  %v6634_v14 = vld [vmem:[%s6757_s17 + $0x95] sm:$0xff]  ;;  %v6636_v40 = vld [vmem:[%s6757_s17 + $0xad] sm:$0xff] }
 0x38e   : > { %v4897_v3 = vmul.f32 %v6633_v47, %v6631_v6  ;;  %v13098_v55 = vadd.f32 %v4867_v5, %v12967_v9  ;;  %v13101_v60 = vadd.f32 %v4868_v52, %v12970_v21  ;;  %v13104_v8 = vadd.f32 %v4869_v18, %v12973_v41  ;;  %v6638_v28 = vld [vmem:[%s6757_s17 + $0xc5] sm:$0xff]  ;;  %v6639_v5 = vld [vmem:[%s6757_s17 + $0xcd] sm:$0xff]  ;;  %v6640_v52 = vld [vmem:[%s6757_s17 + $0xdd] sm:$0xff] }
 0x38f   : > { %v13107_v0 = vadd.f32 %v4870_v44, %v12976_v53  ;;  %v13110_v6 = vadd.f32 %v4871_v58, %v12979_v1  ;;  %v13113_v7 = vadd.f32 %v4872_v27, %v12982_v26  ;;  %v13116_v9 = vadd.f32 %v4873_v12, %v12985_v61  ;;  %v6641_v18 = vld [vmem:[%s6757_s17 + $0xe5] sm:$0xff]  ;;  %v6643_v12 = vld [vmem:[%s6757_s17 + $0xfd] sm:$0xff]  ;;  %v14998_v51 = vld [vmem:[#allocation8_spill] sm:$0xff] }
 0x390   : > { %v13119_v21 = vadd.f32 %v4874_v63, %v12988_v35  ;;  %v13122_v41 = vadd.f32 %v4875_v59, %v12991_v17  ;;  %v13125_v53 = vadd.f32 %v4876_v57, %v12994_v62  ;;  %v13128_v1 = vadd.f32 %v4877_v42, %v12997_v23  ;;  %v14972_v35 = vld [vmem:[#allocation13_spill] sm:$0xff]  ;;  %v14974_v17 = vld [vmem:[#allocation14_spill] sm:$0xff]  ;;  %v14976_v42 = vld [vmem:[#allocation15_spill] sm:$0xff] }
 0x391   : > { %v13131_v26 = vadd.f32 %v4878_v49, %v13000_v4  ;;  %v13134_v61 = vadd.f32 %v4879_v48, %v13003_v56  ;;  %v13137_v47 = vadd.f32 %v4880_v34, %v14972_v35  ;;  %v13140_v54 = vadd.f32 %v4881_v16, %v14974_v17  ;;  %v6635_v62 = vld [vmem:[%s6757_s17 + $0x9d] sm:$0xff]  ;;  %v6637_v23 = vld [vmem:[%s6757_s17 + $0xb5] sm:$0xff]  ;;  %v14984_v31 = vld [vmem:[#allocation19_spill] sm:$0xff] }
 0x392   : > { %v13147_v46 = vadd.f32 %v4882_v45, %v14976_v42  ;;  %v14978_v4 = vld [vmem:[#allocation16_spill] sm:$0xff]  ;;  %v14980_v56 = vld [vmem:[#allocation17_spill] sm:$0xff]  ;;  %v14982_v34 = vld [vmem:[#allocation18_spill] sm:$0xff]  ;;  %v13163_v20 = vadd.f32 %v4886_v25, %v14984_v31  ;;  %v13190_v45 = vadd.f32 %v4893_v38, %v14998_v51 }
 0x393   : > { %14973 = vst [vmem:[#allocation13_spill] sm:$0xff] %v13137_v47  ;;  %14975 = vst [vmem:[#allocation14_spill] sm:$0xff] %v13140_v54  ;;  %v13150_v49 = vadd.f32 %v4883_v30, %v14978_v4  ;;  %v13153_v48 = vadd.f32 %v4884_v29, %v14980_v56  ;;  %v13156_v11 = vadd.f32 %v4885_v39, %v14982_v34  ;;  %v14986_v22 = vld [vmem:[#allocation2_spill] sm:$0xff]  ;;  %v14988_v30 = vld [vmem:[#allocation3_spill] sm:$0xff] }
 0x394   : > { %14977 = vst [vmem:[#allocation15_spill] sm:$0xff] %v13147_v46  ;;  %14985 = vst [vmem:[#allocation19_spill] sm:$0xff] %v13163_v20  ;;  %v13166_v44 = vadd.f32 %v4887_v33, %v14986_v22  ;;  %v13169_v58 = vadd.f32 %v4888_v2, %v14988_v30  ;;  %v14990_v29 = vld [vmem:[#allocation4_spill] sm:$0xff]  ;;  %v14992_v59 = vld [vmem:[#allocation5_spill] sm:$0xff] }
 0x395   : > { %14979 = vst [vmem:[#allocation16_spill] sm:$0xff] %v13150_v49  ;;  %14981 = vst [vmem:[#allocation17_spill] sm:$0xff] %v13153_v48  ;;  %v13172_v27 = vadd.f32 %v4889_v36, %v14990_v29  ;;  %v6642_v39 = vld [vmem:[%s6757_s17 + $0xf5] sm:$0xff]  ;;  %v6644_v63 = vld [vmem:[%s6757_s17 + $0x10d] sm:$0xff]  ;;  %v13181_v33 = vadd.f32 %v4890_v15, %v14992_v59 }
 0x396   : > { %14983 = vst [vmem:[#allocation18_spill] sm:$0xff] %v13156_v11  ;;  %14987 = vst [vmem:[#allocation2_spill] sm:$0xff] %v13166_v44  ;;  %v6667_v25 = vld [vmem:[%s13465_s1 + $0x35] ss:$0 sm:$0xff]  ;;  %v14994_v57 = vld [vmem:[#allocation6_spill] sm:$0xff] }
 0x397   : > { %14989 = vst [vmem:[#allocation3_spill] sm:$0xff] %v13169_v58  ;;  %14991 = vst [vmem:[#allocation4_spill] sm:$0xff] %v13172_v27  ;;  %v13184_v37 = vadd.f32 %v4891_v19, %v14994_v57  ;;  %v14996_v16 = vld [vmem:[#allocation7_spill] sm:$0xff]  ;;  %v6645_v2 = vld [vmem:[%s6757_s17 + $0x115] sm:$0xff]  ;;  %v4967_v59 = vmul.f32 %v6667_v25, %v6634_v14  ;;  %v4968_v57 = vmul.f32 %v6667_v25, %v6635_v62 }
 0x398   : > { %14993 = vst [vmem:[#allocation5_spill] sm:$0xff] %v13181_v33  ;;  %v13187_v43 = vadd.f32 %v4892_v32, %v14996_v16  ;;  %14999 = vst [vmem:[#allocation8_spill] sm:$0xff] %v13190_v45  ;;  %v6646_v36 = vld [vmem:[%s6757_s17 + $0x125] sm:$0xff]  ;;  %v6647_v35 = vld [vmem:[%s6757_s17 + $0x12d] sm:$0xff]  ;;  %v4969_v16 = vmul.f32 %v6667_v25, %v6636_v40  ;;  %v4975_v14 = vmul.f32 %v6667_v25, %v6642_v39 }
 0x399   : > { %14995 = vst [vmem:[#allocation6_spill] sm:$0xff] %v13184_v37  ;;  %v15000_v17 = vld [vmem:[#allocation9_spill] sm:$0xff]  ;;  %v15002_v15 = vld [vmem:[#allocation10_spill] sm:$0xff]  ;;  %v15004_v19 = vld [vmem:[#allocation11_spill] sm:$0xff]  ;;  %v4976_v62 = vmul.f32 %v6667_v25, %v6643_v12  ;;  %v4977_v40 = vmul.f32 %v6667_v25, %v6644_v63  ;;  %v4979_v37 = vmul.f32 %v6667_v25, %v6646_v36  ;;  %v4980_v33 = vmul.f32 %v6667_v25, %v6647_v35 }
 0x39a   : > { %14997 = vst [vmem:[#allocation7_spill] sm:$0xff] %v13187_v43  ;;  %v13196_v42 = vadd.f32 %v4894_v13, %v15000_v17  ;;  %v13199_v4 = vadd.f32 %v4895_v50, %v15002_v15  ;;  %v13202_v56 = vadd.f32 %v4896_v10, %v15004_v19  ;;  %v15006_v32 = vld [vmem:[#allocation12_spill] sm:$0xff]  ;;  %v6648_v38 = vld [vmem:[%s6757_s17 + $0x13d] sm:$0xff]  ;;  %v6649_v31 = vld [vmem:[%s6757_s17 + $0x145] sm:$0xff]  ;;  %v4970_v50 = vmul.f32 %v6667_v25, %v6637_v23 }
 0x39b   : > { %v13205_v34 = vadd.f32 %v4897_v3, %v15006_v32  ;;  %v6650_v22 = vld [vmem:[%s6757_s17 + $0x155] sm:$0xff]  ;;  %v6651_v30 = vld [vmem:[%s6757_s17 + $0x15d] sm:$0xff]  ;;  %v6652_v29 = vld [vmem:[%s6757_s17 + $0x16d] sm:$0xff]  ;;  %v4971_v17 = vmul.f32 %v6667_v25, %v6638_v28  ;;  %v4972_v15 = vmul.f32 %v6667_v25, %v6639_v5  ;;  %v4973_v19 = vmul.f32 %v6667_v25, %v6640_v52 }
 0x39c   : > { %15001 = vst [vmem:[#allocation9_spill] sm:$0xff] %v13196_v42  ;;  %15003 = vst [vmem:[#allocation10_spill] sm:$0xff] %v13199_v4  ;;  %v6653_v13 = vld [vmem:[%s6757_s17 + $0x175] sm:$0xff]  ;;  %v6654_v10 = vld [vmem:[%s6757_s17 + $0x185] sm:$0xff]  ;;  %v4974_v32 = vmul.f32 %v6667_v25, %v6641_v18  ;;  %v4978_v42 = vmul.f32 %v6667_v25, %v6645_v2  ;;  %v4981_v27 = vmul.f32 %v6667_v25, %v6648_v38 }
 0x39d   : > { %15005 = vst [vmem:[#allocation11_spill] sm:$0xff] %v13202_v56  ;;  %15007 = vst [vmem:[#allocation12_spill] sm:$0xff] %v13205_v34  ;;  %v6655_v51 = vld [vmem:[%s6757_s17 + $0x18d] sm:$0xff]  ;;  %v6656_v3 = vld [vmem:[%s6757_s17 + $0x19d] sm:$0xff]  ;;  %v4982_v28 = vmul.f32 %v6667_v25, %v6649_v31  ;;  %v4983_v18 = vmul.f32 %v6667_v25, %v6650_v22  ;;  %v4984_v44 = vmul.f32 %v6667_v25, %v6651_v30 }
 0x39e   : > { %v6657_v34 = vld [vmem:[%s6757_s17 + $0x1a5] sm:$0xff]  ;;  %v6658_v56 = vld [vmem:[%s6757_s17 + $0x1b5] sm:$0xff]  ;;  %v6659_v4 = vld [vmem:[%s6757_s17 + $0x1bd] sm:$0xff]  ;;  %v4985_v20 = vmul.f32 %v6667_v25, %v6652_v29  ;;  %v4986_v11 = vmul.f32 %v6667_v25, %v6653_v13  ;;  %v4987_v48 = vmul.f32 %v6667_v25, %v6654_v10  ;;  %v4988_v49 = vmul.f32 %v6667_v25, %v6655_v51 }
 0x39f   : > { %v6660_v23 = vld [vmem:[%s6757_s17 + $0x1cd] sm:$0xff]  ;;  %v6661_v45 = vld [vmem:[%s6757_s17 + $0x1d5] sm:$0xff]  ;;  %v6662_v43 = vld [vmem:[%s6757_s17 + $0x1e5] sm:$0xff]  ;;  %v4989_v39 = vmul.f32 %v6667_v25, %v6656_v3  ;;  %v4990_v12 = vmul.f32 %v6667_v25, %v6657_v34  ;;  %v4991_v63 = vmul.f32 %v6667_v25, %v6658_v56  ;;  %v4992_v2 = vmul.f32 %v6667_v25, %v6659_v4 }
 0x3a0   : > { %v6663_v5 = vld [vmem:[%s6757_s17 + $0x1ed] sm:$0xff]  ;;  %v6664_v52 = vld [vmem:[%s6757_s17 + $0x1fd] sm:$0xff]  ;;  %v6665_v58 = vld [vmem:[%s6757_s17 + $0x205] sm:$0xff]  ;;  %v4993_v46 = vmul.f32 %v6667_v25, %v6660_v23  ;;  %v4994_v54 = vmul.f32 %v6667_v25, %v6661_v45  ;;  %v4995_v47 = vmul.f32 %v6667_v25, %v6662_v43  ;;  %v13226_v31 = vadd.f32 %v4967_v59, %v13095_v24 }
 0x3a1   : > { %v4996_v36 = vmul.f32 %v6667_v25, %v6663_v5  ;;  %v4997_v35 = vmul.f32 %v6667_v25, %v6664_v52  ;;  %v4998_v38 = vmul.f32 %v6667_v25, %v6665_v58  ;;  %v13229_v22 = vadd.f32 %v4968_v57, %v13098_v55  ;;  %v6668_v56 = vld [vmem:[%s6757_s17 + $0x96] sm:$0xff]  ;;  %v6670_v34 = vld [vmem:[%s6757_s17 + $0xae] sm:$0xff]  ;;  %v6672_v59 = vld [vmem:[%s6757_s17 + $0xc6] sm:$0xff] }
 0x3a2   : > { %v13232_v30 = vadd.f32 %v4969_v16, %v13101_v60  ;;  %v13235_v4 = vadd.f32 %v4970_v50, %v13104_v8  ;;  %v13238_v43 = vadd.f32 %v4971_v17, %v13107_v0  ;;  %v13241_v58 = vadd.f32 %v4972_v15, %v13110_v6  ;;  %v6673_v57 = vld [vmem:[%s6757_s17 + $0xce] sm:$0xff]  ;;  %v6674_v16 = vld [vmem:[%s6757_s17 + $0xde] sm:$0xff]  ;;  %v6675_v50 = vld [vmem:[%s6757_s17 + $0xe6] sm:$0xff] }
 0x3a3   : > { %v13244_v24 = vadd.f32 %v4973_v19, %v13113_v7  ;;  %v13247_v55 = vadd.f32 %v4974_v32, %v13116_v9  ;;  %v13250_v60 = vadd.f32 %v4975_v14, %v13119_v21  ;;  %v13253_v8 = vadd.f32 %v4976_v62, %v13122_v41  ;;  %v15009_v21 = vld [vmem:[#allocation13_spill] sm:$0xff]  ;;  %v15011_v41 = vld [vmem:[#allocation14_spill] sm:$0xff]  ;;  %v15021_v10 = vld [vmem:[#allocation19_spill] sm:$0xff] }
 0x3a4   : > { %v13256_v0 = vadd.f32 %v4977_v40, %v13125_v53  ;;  %v13259_v6 = vadd.f32 %v4978_v42, %v13128_v1  ;;  %v13262_v7 = vadd.f32 %v4979_v37, %v13131_v26  ;;  %v13265_v9 = vadd.f32 %v4980_v33, %v13134_v61  ;;  %v6669_v53 = vld [vmem:[%s6757_s17 + $0x9e] sm:$0xff]  ;;  %v6671_v1 = vld [vmem:[%s6757_s17 + $0xb6] sm:$0xff]  ;;  %v15013_v42 = vld [vmem:[#allocation15_spill] sm:$0xff] }
 0x3a5   : > { %v13268_v25 = vadd.f32 %v4981_v27, %v15009_v21  ;;  %v13271_v45 = vadd.f32 %v4982_v28, %v15011_v41  ;;  %v13278_v29 = vadd.f32 %v4983_v18, %v15013_v42  ;;  %v15015_v26 = vld [vmem:[#allocation16_spill] sm:$0xff]  ;;  %v15017_v61 = vld [vmem:[#allocation17_spill] sm:$0xff]  ;;  %v15019_v27 = vld [vmem:[#allocation18_spill] sm:$0xff]  ;;  %v13294_v51 = vadd.f32 %v4987_v48, %v15021_v10 }
 0x3a6   : > { %15008 = vst [vmem:[#allocation20_spill] sm:$0xff] %v13265_v9  ;;  %v13281_v37 = vadd.f32 %v4984_v44, %v15015_v26  ;;  %v13284_v33 = vadd.f32 %v4985_v20, %v15017_v61  ;;  %v13287_v13 = vadd.f32 %v4986_v11, %v15019_v27  ;;  %v15023_v3 = vld [vmem:[#allocation2_spill] sm:$0xff]  ;;  %v15025_v44 = vld [vmem:[#allocation3_spill] sm:$0xff]  ;;  %v15027_v20 = vld [vmem:[#allocation4_spill] sm:$0xff] }
 0x3a7   : > { %15010 = vst [vmem:[#allocation13_spill] sm:$0xff] %v13268_v25  ;;  %15012 = vst [vmem:[#allocation14_spill] sm:$0xff] %v13271_v45  ;;  %v13297_v17 = vadd.f32 %v4988_v49, %v15023_v3  ;;  %v13300_v15 = vadd.f32 %v4989_v39, %v15025_v44  ;;  %v13303_v19 = vadd.f32 %v4990_v12, %v15027_v20  ;;  %v6676_v11 = vld [vmem:[%s6757_s17 + $0xf6] sm:$0xff]  ;;  %v6677_v32 = vld [vmem:[%s6757_s17 + $0xfe] sm:$0xff] }
 0x3a8   : > { %15014 = vst [vmem:[#allocation15_spill] sm:$0xff] %v13278_v29  ;;  %15016 = vst [vmem:[#allocation16_spill] sm:$0xff] %v13281_v37  ;;  %v6678_v14 = vld [vmem:[%s6757_s17 + $0x10e] sm:$0xff]  ;;  %v6701_v48 = vld [vmem:[%s13465_s1 + $0x36] ss:$0 sm:$0xff] }
 0x3a9   : > { %15018 = vst [vmem:[#allocation17_spill] sm:$0xff] %v13284_v33  ;;  %15020 = vst [vmem:[#allocation18_spill] sm:$0xff] %v13287_v13  ;;  %v15029_v62 = vld [vmem:[#allocation5_spill] sm:$0xff]  ;;  %v15031_v40 = vld [vmem:[#allocation6_spill] sm:$0xff] }
 0x3aa   : > { %15022 = vst [vmem:[#allocation19_spill] sm:$0xff] %v13294_v51  ;;  %15024 = vst [vmem:[#allocation2_spill] sm:$0xff] %v13297_v17  ;;  %v13312_v49 = vadd.f32 %v4991_v63, %v15029_v62  ;;  %v13315_v23 = vadd.f32 %v4992_v2, %v15031_v40  ;;  %v15033_v28 = vld [vmem:[#allocation7_spill] sm:$0xff]  ;;  %v15035_v52 = vld [vmem:[#allocation8_spill] sm:$0xff]  ;;  %v5068_v62 = vmul.f32 %v6701_v48, %v6668_v56 }
 0x3ab   : > { %15026 = vst [vmem:[#allocation3_spill] sm:$0xff] %v13300_v15  ;;  %15028 = vst [vmem:[#allocation4_spill] sm:$0xff] %v13303_v19  ;;  %v13318_v5 = vadd.f32 %v4993_v46, %v15033_v28  ;;  %v13321_v18 = vadd.f32 %v4994_v54, %v15035_v52  ;;  %v6679_v39 = vld [vmem:[%s6757_s17 + $0x116] sm:$0xff]  ;;  %v6680_v12 = vld [vmem:[%s6757_s17 + $0x126] sm:$0xff]  ;;  %v5069_v40 = vmul.f32 %v6701_v48, %v6669_v53 }
 0x3ac   : > { %15030 = vst [vmem:[#allocation5_spill] sm:$0xff] %v13312_v49  ;;  %15032 = vst [vmem:[#allocation6_spill] sm:$0xff] %v13315_v23  ;;  %v6681_v21 = vld [vmem:[%s6757_s17 + $0x12e] sm:$0xff]  ;;  %v15037_v41 = vld [vmem:[#allocation9_spill] sm:$0xff]  ;;  %v5070_v28 = vmul.f32 %v6701_v48, %v6670_v34  ;;  %v5076_v56 = vmul.f32 %v6701_v48, %v6676_v11  ;;  %v5077_v53 = vmul.f32 %v6701_v48, %v6677_v32 }
 0x3ad   : > { %15034 = vst [vmem:[#allocation7_spill] sm:$0xff] %v13318_v5  ;;  %15036 = vst [vmem:[#allocation8_spill] sm:$0xff] %v13321_v18  ;;  %v13327_v42 = vadd.f32 %v4995_v47, %v15037_v41  ;;  %v15039_v63 = vld [vmem:[#allocation10_spill] sm:$0xff]  ;;  %v15041_v2 = vld [vmem:[#allocation11_spill] sm:$0xff]  ;;  %v5072_v41 = vmul.f32 %v6701_v48, %v6672_v59  ;;  %v5078_v34 = vmul.f32 %v6701_v48, %v6678_v14 }
 0x3ae   : > { %v13330_v26 = vadd.f32 %v4996_v36, %v15039_v63  ;;  %v13333_v61 = vadd.f32 %v4997_v35, %v15041_v2  ;;  %v15043_v46 = vld [vmem:[#allocation12_spill] sm:$0xff]  ;;  %v6682_v54 = vld [vmem:[%s6757_s17 + $0x13e] sm:$0xff]  ;;  %v6683_v10 = vld [vmem:[%s6757_s17 + $0x146] sm:$0xff]  ;;  %v5071_v36 = vmul.f32 %v6701_v48, %v6671_v1  ;;  %v5073_v63 = vmul.f32 %v6701_v48, %v6673_v57 }
 0x3af   : > { %15038 = vst [vmem:[#allocation9_spill] sm:$0xff] %v13327_v42  ;;  %v13336_v27 = vadd.f32 %v4998_v38, %v15043_v46  ;;  %v6684_v3 = vld [vmem:[%s6757_s17 + $0x156] sm:$0xff]  ;;  %v6685_v44 = vld [vmem:[%s6757_s17 + $0x15e] sm:$0xff]  ;;  %v6686_v20 = vld [vmem:[%s6757_s17 + $0x16e] sm:$0xff]  ;;  %v5074_v2 = vmul.f32 %v6701_v48, %v6674_v16  ;;  %v5075_v46 = vmul.f32 %v6701_v48, %v6675_v50  ;;  %v5079_v42 = vmul.f32 %v6701_v48, %v6679_v39 }
 0x3b0   : > { %15040 = vst [vmem:[#allocation10_spill] sm:$0xff] %v13330_v26  ;;  %15042 = vst [vmem:[#allocation11_spill] sm:$0xff] %v13333_v61  ;;  %v6687_v47 = vld [vmem:[%s6757_s17 + $0x176] sm:$0xff]  ;;  %v6688_v35 = vld [vmem:[%s6757_s17 + $0x186] sm:$0xff]  ;;  %v5080_v23 = vmul.f32 %v6701_v48, %v6680_v12  ;;  %v5081_v49 = vmul.f32 %v6701_v48, %v6681_v21  ;;  %v5082_v19 = vmul.f32 %v6701_v48, %v6682_v54 }
 0x3b1   : > { %15044 = vst [vmem:[#allocation12_spill] sm:$0xff] %v13336_v27  ;;  %v6689_v52 = vld [vmem:[%s6757_s17 + $0x18e] sm:$0xff]  ;;  %v6690_v38 = vld [vmem:[%s6757_s17 + $0x19e] sm:$0xff]  ;;  %v6691_v27 = vld [vmem:[%s6757_s17 + $0x1a6] sm:$0xff]  ;;  %v5083_v59 = vmul.f32 %v6701_v48, %v6683_v10  ;;  %v5084_v50 = vmul.f32 %v6701_v48, %v6684_v3  ;;  %v5085_v17 = vmul.f32 %v6701_v48, %v6685_v44  ;;  %v5086_v51 = vmul.f32 %v6701_v48, %v6686_v20 }
 0x3b2   : > { %v6692_v61 = vld [vmem:[%s6757_s17 + $0x1b6] sm:$0xff]  ;;  %v6693_v26 = vld [vmem:[%s6757_s17 + $0x1be] sm:$0xff]  ;;  %v6694_v1 = vld [vmem:[%s6757_s17 + $0x1ce] sm:$0xff]  ;;  %v5087_v13 = vmul.f32 %v6701_v48, %v6687_v47  ;;  %v5088_v33 = vmul.f32 %v6701_v48, %v6688_v35  ;;  %v5089_v37 = vmul.f32 %v6701_v48, %v6689_v52  ;;  %v5090_v11 = vmul.f32 %v6701_v48, %v6690_v38 }
 0x3b3   : > { %v6695_v18 = vld [vmem:[%s6757_s17 + $0x1d6] sm:$0xff]  ;;  %v6696_v5 = vld [vmem:[%s6757_s17 + $0x1e6] sm:$0xff]  ;;  %v6697_v57 = vld [vmem:[%s6757_s17 + $0x1ee] sm:$0xff]  ;;  %v5091_v32 = vmul.f32 %v6701_v48, %v6691_v27  ;;  %v5092_v14 = vmul.f32 %v6701_v48, %v6692_v61  ;;  %v5093_v39 = vmul.f32 %v6701_v48, %v6693_v26  ;;  %v5094_v29 = vmul.f32 %v6701_v48, %v6694_v1 }
 0x3b4   : > { %v6698_v16 = vld [vmem:[%s6757_s17 + $0x1fe] sm:$0xff]  ;;  %v6699_v15 = vld [vmem:[%s6757_s17 + $0x206] sm:$0xff]  ;;  %v5095_v45 = vmul.f32 %v6701_v48, %v6695_v18  ;;  %v5096_v25 = vmul.f32 %v6701_v48, %v6696_v5  ;;  %v5097_v12 = vmul.f32 %v6701_v48, %v6697_v57  ;;  %v5100_v10 = vadd.f32 %v5068_v62, %v13226_v31 }
 0x3b5   : > { %v5098_v21 = vmul.f32 %v6701_v48, %v6698_v16  ;;  %v5099_v54 = vmul.f32 %v6701_v48, %v6699_v15  ;;  %v5101_v9 = vadd.f32 %v5069_v40, %v13229_v22  ;;  %v5102_v3 = vadd.f32 %v5070_v28, %v13232_v30  ;;  %v15045_v48 = vld [vmem:[#allocation20_spill] sm:$0xff]  ;;  %v15046_v61 = vld [vmem:[#allocation13_spill] sm:$0xff]  ;;  %v15047_v47 = vld [vmem:[#allocation14_spill] sm:$0xff] }
 0x3b6   : > { %v5103_v44 = vadd.f32 %v5071_v36, %v13235_v4  ;;  %v5104_v20 = vadd.f32 %v5072_v41, %v13238_v43  ;;  %v5105_v27 = vadd.f32 %v5073_v63, %v13241_v58  ;;  %v5106_v26 = vadd.f32 %v5074_v2, %v13244_v24  ;;  %v15048_v62 = vld [vmem:[#allocation15_spill] sm:$0xff]  ;;  %v15049_v40 = vld [vmem:[#allocation16_spill] sm:$0xff]  ;;  %v15050_v28 = vld [vmem:[#allocation17_spill] sm:$0xff] }
 0x3b7   : > { %v5107_v18 = vadd.f32 %v5075_v46, %v13247_v55  ;;  %v5108_v5 = vadd.f32 %v5076_v56, %v13250_v60  ;;  %v5109_v15 = vadd.f32 %v5077_v53, %v13253_v8  ;;  %v5110_v31 = vadd.f32 %v5078_v34, %v13256_v0  ;;  %v15051_v36 = vld [vmem:[#allocation18_spill] sm:$0xff]  ;;  %v15052_v35 = vld [vmem:[#allocation19_spill] sm:$0xff]  ;;  %v15056_v38 = vld [vmem:[#allocation5_spill] sm:$0xff] }
 0x3b8   : > { %v5111_v22 = vadd.f32 %v5079_v42, %v13259_v6  ;;  %v5112_v30 = vadd.f32 %v5080_v23, %v13262_v7  ;;  %v5113_v4 = vadd.f32 %v5081_v49, %v15045_v48  ;;  %v5114_v43 = vadd.f32 %v5082_v19, %v15046_v61  ;;  %v15053_v52 = vld [vmem:[#allocation2_spill] sm:$0xff]  ;;  %v15054_v42 = vld [vmem:[#allocation3_spill] sm:$0xff]  ;;  %v15055_v23 = vld [vmem:[#allocation4_spill] sm:$0xff] }
 0x3b9   : > { %v5115_v58 = vadd.f32 %v5083_v59, %v15047_v47  ;;  %v5116_v24 = vadd.f32 %v5084_v50, %v15048_v62  ;;  %v5117_v55 = vadd.f32 %v5085_v17, %v15049_v40  ;;  %v5118_v60 = vadd.f32 %v5086_v51, %v15050_v28  ;;  %v6702_v19 = vld [vmem:[%s13466_s2] ss:$0 sm:$0xff]  ;;  %v15058_v2 = vld [vmem:[#allocation7_spill] sm:$0xff]  ;;  %v15059_v46 = vld [vmem:[#allocation8_spill] sm:$0xff] }
 0x3ba   : > { %v5119_v8 = vadd.f32 %v5087_v13, %v15051_v36  ;;  %v5120_v0 = vadd.f32 %v5088_v33, %v15052_v35  ;;  %v5121_v6 = vadd.f32 %v5089_v37, %v15053_v52  ;;  %v5122_v7 = vadd.f32 %v5090_v11, %v15054_v42  ;;  %v15057_v63 = vld [vmem:[#allocation6_spill] sm:$0xff]  ;;  %v15060_v56 = vld [vmem:[#allocation9_spill] sm:$0xff]  ;;  %v15062_v34 = vld [vmem:[#allocation11_spill] sm:$0xff] }
 0x3bb   : > { %v5123_v49 = vadd.f32 %v5091_v32, %v15055_v23  ;;  %v5124_v41 = vadd.f32 %v5092_v14, %v15056_v38  ;;  %v5125_v17 = vadd.f32 %v5093_v39, %v15057_v63  ;;  %v5126_v51 = vadd.f32 %v5094_v29, %v15058_v2  ;;  %v15061_v53 = vld [vmem:[#allocation10_spill] sm:$0xff]  ;;  %v15063_v59 = vld [vmem:[#allocation12_spill] sm:$0xff] }
 0x3bc   : > { %v5127_v13 = vadd.f32 %v5095_v45, %v15059_v46  ;;  %v5128_v33 = vadd.f32 %v5096_v25, %v15060_v56  ;;  %v5129_v37 = vadd.f32 %v5097_v12, %v15061_v53  ;;  %v5130_v1 = vadd.f32 %v5098_v21, %v15062_v34 }
 0x3bd   : > { %v5131_v57 = vadd.f32 %v5099_v54, %v15063_v59  ;;  %v5139_v16 = vadd.f32 %v6702_v19, %v5100_v10  ;;  %v5140_v50 = vadd.f32 %v6702_v19, %v5101_v9  ;;  %v5141_v11 = vadd.f32 %v6702_v19, %v5102_v3 }
 0x3be   : > { %v5142_v32 = vadd.f32 %v6702_v19, %v5103_v44  ;;  %v5143_v14 = vadd.f32 %v6702_v19, %v5104_v20  ;;  %v5144_v48 = vadd.f32 %v6702_v19, %v5105_v27  ;;  %v5145_v39 = vadd.f32 %v6702_v19, %v5106_v26 }
 0x3bf   : > { %v5146_v61 = vadd.f32 %v6702_v19, %v5107_v18  ;;  %v5147_v29 = vadd.f32 %v6702_v19, %v5108_v5  ;;  %v5148_v47 = vadd.f32 %v6702_v19, %v5109_v15  ;;  %v5149_v45 = vadd.f32 %v6702_v19, %v5110_v31  ;;  %5172 = vst.msk [vmem:[%s13395_s24] sm:$0xff] %vm5171_vm0, %v5139_v16 }
 0x3c0   : > { %v5150_v62 = vadd.f32 %v6702_v19, %v5111_v22  ;;  %v5151_v25 = vadd.f32 %v6702_v19, %v5112_v30  ;;  %v5152_v40 = vadd.f32 %v6702_v19, %v5113_v4  ;;  %v5153_v12 = vadd.f32 %v6702_v19, %v5114_v43  ;;  %5173 = vst.msk [vmem:[%s13395_s24 + $0x8] sm:$0xff] %vm5171_vm0, %v5140_v50 }
 0x3c1   : > { %v5154_v28 = vadd.f32 %v6702_v19, %v5115_v58  ;;  %v5155_v21 = vadd.f32 %v6702_v19, %v5116_v24  ;;  %v5156_v36 = vadd.f32 %v6702_v19, %v5117_v55  ;;  %v5157_v54 = vadd.f32 %v6702_v19, %v5118_v60  ;;  %5174 = vst.msk [vmem:[%s13395_s24 + $0x10] sm:$0xff] %vm5171_vm0, %v5141_v11 }
 0x3c2   : > { %v5158_v10 = vadd.f32 %v6702_v19, %v5119_v8  ;;  %v5159_v9 = vadd.f32 %v6702_v19, %v5120_v0  ;;  %v5160_v3 = vadd.f32 %v6702_v19, %v5121_v6  ;;  %v5161_v44 = vadd.f32 %v6702_v19, %v5122_v7  ;;  %5175 = vst.msk [vmem:[%s13395_s24 + $0x18] sm:$0xff] %vm5171_vm0, %v5142_v32 }
 0x3c3   : > { %v5162_v20 = vadd.f32 %v6702_v19, %v5123_v49  ;;  %v5163_v27 = vadd.f32 %v6702_v19, %v5124_v41  ;;  %v5164_v26 = vadd.f32 %v6702_v19, %v5125_v17  ;;  %v5165_v18 = vadd.f32 %v6702_v19, %v5126_v51  ;;  %5176 = vst.msk [vmem:[%s13395_s24 + $0x20] sm:$0xff] %vm5171_vm0, %v5143_v14 }
 0x3c4   : > { %v5166_v5 = vadd.f32 %v6702_v19, %v5127_v13  ;;  %v5167_v15 = vadd.f32 %v6702_v19, %v5128_v33  ;;  %v5168_v31 = vadd.f32 %v6702_v19, %v5129_v37  ;;  %v5169_v22 = vadd.f32 %v6702_v19, %v5130_v1  ;;  %5177 = vst.msk [vmem:[%s13395_s24 + $0x28] sm:$0xff] %vm5171_vm0, %v5144_v48 }
 0x3c5   : > { %v5170_v30 = vadd.f32 %v6702_v19, %v5131_v57  ;;  %5178 = vst.msk [vmem:[%s13395_s24 + $0x30] sm:$0xff] %vm5171_vm0, %v5145_v39  ;;  %5179 = vst.msk [vmem:[%s13395_s24 + $0x38] sm:$0xff] %vm5171_vm0, %v5146_v61 }
 0x3c6   : > { %5180 = vst.msk [vmem:[%s13395_s24 + $0x40] sm:$0xff] %vm5171_vm0, %v5147_v29  ;;  %5181 = vst.msk [vmem:[%s13395_s24 + $0x48] sm:$0xff] %vm5171_vm0, %v5148_v47 }
 0x3c7   : > { %5182 = vst.msk [vmem:[%s13395_s24 + $0x50] sm:$0xff] %vm5171_vm0, %v5149_v45  ;;  %5183 = vst.msk [vmem:[%s13395_s24 + $0x58] sm:$0xff] %vm5171_vm0, %v5150_v62 }
 0x3c8   : > { %5184 = vst.msk [vmem:[%s13395_s24 + $0x60] sm:$0xff] %vm5171_vm0, %v5151_v25  ;;  %5185 = vst.msk [vmem:[%s13395_s24 + $0x68] sm:$0xff] %vm5171_vm0, %v5152_v40 }
 0x3c9   : > { %5186 = vst.msk [vmem:[%s13395_s24 + $0x70] sm:$0xff] %vm5171_vm0, %v5153_v12  ;;  %5187 = vst.msk [vmem:[%s13395_s24 + $0x78] sm:$0xff] %vm5171_vm0, %v5154_v28 }
 0x3ca   : > { %5188 = vst.msk [vmem:[%s13395_s24 + $0x80] sm:$0xff] %vm5171_vm0, %v5155_v21  ;;  %5189 = vst.msk [vmem:[%s13395_s24 + $0x88] sm:$0xff] %vm5171_vm0, %v5156_v36 }
 0x3cb   : > { %5190 = vst.msk [vmem:[%s13395_s24 + $0x90] sm:$0xff] %vm5171_vm0, %v5157_v54  ;;  %5191 = vst.msk [vmem:[%s13395_s24 + $0x98] sm:$0xff] %vm5171_vm0, %v5158_v10 }
 0x3cc   : > { %5192 = vst.msk [vmem:[%s13395_s24 + $0xa0] sm:$0xff] %vm5171_vm0, %v5159_v9  ;;  %5193 = vst.msk [vmem:[%s13395_s24 + $0xa8] sm:$0xff] %vm5171_vm0, %v5160_v3 }
 0x3cd   : > { %5194 = vst.msk [vmem:[%s13395_s24 + $0xb0] sm:$0xff] %vm5171_vm0, %v5161_v44  ;;  %5195 = vst.msk [vmem:[%s13395_s24 + $0xb8] sm:$0xff] %vm5171_vm0, %v5162_v20 }
 0x3ce   : > { %5196 = vst.msk [vmem:[%s13395_s24 + $0xc0] sm:$0xff] %vm5171_vm0, %v5163_v27  ;;  %5197 = vst.msk [vmem:[%s13395_s24 + $0xc8] sm:$0xff] %vm5171_vm0, %v5164_v26 }
 0x3cf   : > { %5198 = vst.msk [vmem:[%s13395_s24 + $0xd0] sm:$0xff] %vm5171_vm0, %v5165_v18  ;;  %5199 = vst.msk [vmem:[%s13395_s24 + $0xd8] sm:$0xff] %vm5171_vm0, %v5166_v5 }
 0x3d0   : > { %5200 = vst.msk [vmem:[%s13395_s24 + $0xe0] sm:$0xff] %vm5171_vm0, %v5167_v15  ;;  %5201 = vst.msk [vmem:[%s13395_s24 + $0xe8] sm:$0xff] %vm5171_vm0, %v5168_v31 }
 0x3d1   : > { %5202 = vst.msk [vmem:[%s13395_s24 + $0xf0] sm:$0xff] %vm5171_vm0, %v5169_v22  ;;  %5203 = vst.msk [vmem:[%s13395_s24 + $0xf8] sm:$0xff] %vm5171_vm0, %v5170_v30 }
 0x3d2 PF: > { %s13_s12 = sadd.s32 1, %s6721_s12  }
 0x3d3   : > { %p10_p4 = scmp.ge.s32.totalorder %s13_s12, 4  }
 0x3d5   :  { %12 = sbr.rel (!%p10_p4) target bundleno = 1 (0x1), region = 74 }

</bundles_post_ra>
